<compile_context>
chip_gen: v7x
topology: tpu7x:2x2x1
jax: 0.10.0
libtpu: 0.0.40
codegen_flags: <defaults>
</compile_context>

<pallas_src>
import functools

import jax
import jax.numpy as jnp
from jax.experimental import pallas as pl
from jax.experimental.pallas import tpu as pltpu

BN_EPS = 1e-5
LANE = 128
MXU_DTYPE = jnp.bfloat16                # MXU operand dtype (accumulation stays f32)
VMEM_LIMIT_BYTES = 32 * 1024 * 1024     # explicit scoped-VMEM budget (plenty at demo shapes)


def round_up(x, m):
    return (x + m - 1) // m * m


# ----------------------------------------------------------------------------
# Kernel 1: fused [BN(prev layer) + ReLU] -> 3x3 conv (single K=9*Cin matmul)
#           + per-grid-step partial BatchNorm statistics.
# ----------------------------------------------------------------------------
def _conv3x3_kernel(scale_ref, bias_ref, x_ref, w_ref,
                    out_ref, psum_ref, psq_ref, xpad_ref, *, apply_bn_relu):
    # x_ref     : (1, H, W, CinP)   lane-padded input (raw or previous conv pre-BN output)
    # scale/bias: (1, CinP)         previous layer's folded BN scale/bias
    # w_ref     : (9*Cin, CoutP)    im2col-ordered weights, REAL Cin rows, bf16
    # out_ref   : (1, H, W, CoutP)  this conv's pre-BN output (f32)
    # psum/psq  : (1, 1, CoutP)     partial sum / sum-of-squares for this batch element
    # xpad_ref  : VMEM scratch (H+2, round_up(W+2,8), Cin) bf16, 1-wide zero halo
    _, H, W, _ = x_ref.shape
    kdim = w_ref.shape[0]
    cin = kdim // 9                                        # real input channels (static)
    coutp = out_ref.shape[-1]

    # Load only the REAL input channels (padded lanes are zero / ignored).
    x = x_ref[0, :, :, :cin]                               # (H, W, Cin) f32
    if apply_bn_relu:
        # fused BN + ReLU epilogue of the previous conv, applied while resident in VMEM.
        x = jnp.maximum(x * scale_ref[:, :cin] + bias_ref[:, :cin], 0.0)
    x = x.astype(MXU_DTYPE)                                # bf16 before halo / patch build

    # Zero only the 1-wide halo border; the interior is overwritten every step.
    zrow = jnp.zeros((1,) + xpad_ref.shape[1:], MXU_DTYPE)
    xpad_ref[0:1, :, :] = zrow
    xpad_ref[H + 1:H + 2, :, :] = zrow
    zcol = jnp.zeros((H, 1, cin), MXU_DTYPE)
    xpad_ref[1:H + 1, 0:1, :] = zcol
    xpad_ref[1:H + 1, W + 1:W + 2, :] = zcol
    xpad_ref[1:H + 1, 1:W + 1, :] = x

    # im2col with real-Cin taps: 3 sublane-shifted slab loads (dx = 0,1,2) + cheap
    # leading-axis slices for dy, concatenated ONCE on the lane axis -> a single matmul
    # with contraction K = 9*Cin.
    xw = [xpad_ref[:, dx:dx + W, :] for dx in range(3)]    # each (H+2, W, Cin) bf16
    cols = [xw[dx][dy:dy + H] for dy in range(3) for dx in range(3)]
    patches = jnp.concatenate(cols, axis=-1).reshape(H * W, kdim)   # (H*W, 9*Cin) bf16

    acc = jnp.dot(patches, w_ref[...],
                  preferred_element_type=jnp.float32)      # (H*W, CoutP) f32

    # Conv bias is intentionally omitted: under training-mode BatchNorm it cancels exactly.
    out_ref[...] = acc.reshape(1, H, W, coutp)

    # Per-grid-step partial BN statistics (reduced in the wrapper).  No resident
    # accumulator -> the batch grid axis stays 'parallel' (megacore friendly).
    psum_ref[...] = jnp.sum(acc, axis=0, keepdims=True)[None]
    psq_ref[...] = jnp.sum(acc * acc, axis=0, keepdims=True)[None]


def conv3x3(x, w2d, scale, bias, *, apply_bn_relu):
    N, H, W, cinp = x.shape
    kdim, coutp = w2d.shape
    cin = kdim // 9
    kern = functools.partial(_conv3x3_kernel, apply_bn_relu=apply_bn_relu)
    flops = 2 * N * H * W * kdim * coutp
    bytes_accessed = (x.size * 4 + w2d.size * 2 + N * H * W * coutp * 4
                      + 2 * N * coutp * 4)
    wpad = round_up(W + 2, 8)
    return pl.pallas_call(
        kern,
        out_shape=(jax.ShapeDtypeStruct((N, H, W, coutp), jnp.float32),
                   jax.ShapeDtypeStruct((N, 1, coutp), jnp.float32),
                   jax.ShapeDtypeStruct((N, 1, coutp), jnp.float32)),
        grid=(N,),
        in_specs=[
            pl.BlockSpec((1, cinp), lambda i: (0, 0)),             # BN scale (prev layer)
            pl.BlockSpec((1, cinp), lambda i: (0, 0)),             # BN bias  (prev layer)
            pl.BlockSpec((1, H, W, cinp), lambda i: (i, 0, 0, 0)),
            pl.BlockSpec((kdim, coutp), lambda i: (0, 0)),
        ],
        out_specs=(
            pl.BlockSpec((1, H, W, coutp), lambda i: (i, 0, 0, 0)),
            pl.BlockSpec((1, 1, coutp), lambda i: (i, 0, 0)),
            pl.BlockSpec((1, 1, coutp), lambda i: (i, 0, 0)),
        ),
        scratch_shapes=[pltpu.VMEM((H + 2, wpad, cin), MXU_DTYPE)],
        compiler_params=pltpu.CompilerParams(
            dimension_semantics=("parallel",),
            vmem_limit_bytes=VMEM_LIMIT_BYTES),
        cost_estimate=pl.CostEstimate(flops=flops, transcendentals=0,
                                      bytes_accessed=bytes_accessed),
    )(scale, bias, x, w2d)


# ----------------------------------------------------------------------------
# Kernel 2: fused BatchNorm (folded scale/bias) + ReLU + MaxPool 2x2/2
# ----------------------------------------------------------------------------
def _bn_relu_pool_kernel(scale_ref, bias_ref, x_ref, o_ref):
    _, H, W, C = x_ref.shape
    v = jnp.maximum(x_ref[...] * scale_ref[...] + bias_ref[...], 0.0)   # (1,H,W,C)
    # H-pair max first: splitting the LEADING axis is a free relayout.
    v = v.reshape(H // 2, 2, W, C)
    v = jnp.max(v, axis=1)                                              # (H/2, W, C)
    # W-pair max on the already-halved tensor (sublane split only on half the data).
    v = v.reshape(H // 2, W // 2, 2, C)
    o_ref[...] = jnp.max(v, axis=2)[None]                               # (1,H/2,W/2,C)


def bn_relu_maxpool(x, scale, bias):
    N, H, W, C = x.shape
    return pl.pallas_call(
        _bn_relu_pool_kernel,
        out_shape=jax.ShapeDtypeStruct((N, H // 2, W // 2, C), jnp.float32),
        grid=(N,),
        in_specs=[
            pl.BlockSpec((1, C), lambda i: (0, 0)),
            pl.BlockSpec((1, C), lambda i: (0, 0)),
            pl.BlockSpec((1, H, W, C), lambda i: (i, 0, 0, 0)),
        ],
        out_specs=pl.BlockSpec((1, H // 2, W // 2, C), lambda i: (i, 0, 0, 0)),
        compiler_params=pltpu.CompilerParams(
            dimension_semantics=("parallel",),
            vmem_limit_bytes=VMEM_LIMIT_BYTES),
    )(scale, bias, x)


# ----------------------------------------------------------------------------
# Kernel 3: classifier MLP.  fc1's K axis is streamed through the grid with an
# f32 accumulator (weight-streaming structure for production fc1); fc2/fc3 +
# ReLUs are fused into the finalize step.  Dropout = identity (inference).
# ----------------------------------------------------------------------------
def _mlp_kernel(x_ref, w1_ref, b1_ref, w2_ref, b2_ref, w3_ref, b3_ref,
                o_ref, acc_ref):
    k = pl.program_id(0)

    @pl.when(k == 0)
    def _():
        acc_ref[...] = jnp.zeros_like(acc_ref)

    acc_ref[...] += jnp.dot(x_ref[...].astype(w1_ref.dtype), w1_ref[...],
                            preferred_element_type=jnp.float32)

    @pl.when(k == pl.num_programs(0) - 1)
    def _():
        h = jnp.maximum(acc_ref[...] + b1_ref[...], 0.0)
        h = jnp.maximum(jnp.dot(h.astype(w2_ref.dtype), w2_ref[...],
                                preferred_element_type=jnp.float32) + b2_ref[...],
                        0.0)
        o_ref[...] = jnp.dot(h.astype(w3_ref.dtype), w3_ref[...],
                             preferred_element_type=jnp.float32) + b3_ref[...]


def mlp(x, fc_params):
    (w1, b1), (w2, b2), (w3, b3) = fc_params
    N, K1 = x.shape
    H1 = w1.shape[1]
    H2 = w2.shape[1]
    OUTP = w3.shape[1]
    if K1 % 512 == 0:
        TK = 512
    elif K1 % 256 == 0:
        TK = 256
    elif K1 % 128 == 0:
        TK = 128
    else:
        TK = K1
    nk = K1 // TK
    return pl.pallas_call(
        _mlp_kernel,
        out_shape=jax.ShapeDtypeStruct((N, OUTP), jnp.float32),
        grid=(nk,),
        in_specs=[
            pl.BlockSpec((N, TK), lambda k: (0, k)),
            pl.BlockSpec((TK, H1), lambda k: (k, 0)),
            pl.BlockSpec((1, H1), lambda k: (0, 0)),
            pl.BlockSpec((H1, H2), lambda k: (0, 0)),
            pl.BlockSpec((1, H2), lambda k: (0, 0)),
            pl.BlockSpec((H2, OUTP), lambda k: (0, 0)),
            pl.BlockSpec((1, OUTP), lambda k: (0, 0)),
        ],
        out_specs=pl.BlockSpec((N, OUTP), lambda k: (0, 0)),
        scratch_shapes=[pltpu.VMEM((N, H1), jnp.float32)],
        compiler_params=pltpu.CompilerParams(
            dimension_semantics=("arbitrary",),
            vmem_limit_bytes=VMEM_LIMIT_BYTES),
    )(x, w1, b1, w2, b2, w3, b3)


# ----------------------------------------------------------------------------
# Parameter init (mirrors the PyTorch module) + kernel-side packing
# ----------------------------------------------------------------------------
def init_vgg_params(key, in_channels, conv_arch, num_classes, hidden, feat_hw):
    blocks = []
    cin = in_channels
    for conv_num, cout in conv_arch:
        layers = []
        for _ in range(conv_num):
            key, k1, k2 = jax.random.split(key, 3)
            fan_in, fan_out = 9 * cin, 9 * cout
            bound = (6.0 / (fan_in + fan_out)) ** 0.5        # xavier_uniform_
            w = jax.random.uniform(k1, (3, 3, cin, cout), jnp.float32, -bound, bound)
            bb = 1.0 / (fan_in ** 0.5)
            b = jax.random.uniform(k2, (cout,), jnp.float32, -bb, bb)
            gamma = jnp.ones((cout,), jnp.float32)           # PyTorch BN defaults
            beta = jnp.zeros((cout,), jnp.float32)
            layers.append((w, b, gamma, beta))
            cin = cout
        blocks.append(layers)

    feats = cin * feat_hw * feat_hw
    dims = [feats, hidden, hidden, num_classes]
    fc = []
    for i in range(3):
        key, k1, k2 = jax.random.split(key, 3)
        fin, fout = dims[i], dims[i + 1]
        bound = (6.0 / (fin + fout)) ** 0.5                  # xavier_uniform_
        w = jax.random.uniform(k1, (fin, fout), jnp.float32, -bound, bound)
        bb = 1.0 / (fin ** 0.5)
        b = jax.random.uniform(k2, (fout,), jnp.float32, -bb, bb)
        fc.append((w, b))
    return {"blocks": blocks, "fc": fc}


def prepare_kernel_params(params, feat_hw, last_channels):
    kblocks = []
    for layers in params["blocks"]:
        klayers = []
        for (w, _b, gamma, beta) in layers:                  # conv bias dropped (cancels)
            _, _, cin, cout = w.shape
            coutp = round_up(cout, LANE)
            # K = 9*Cin_real rows in (ky, kx, cin) order; only Cout is lane-padded.
            w2d = jnp.zeros((9 * cin, coutp), jnp.float32)
            w2d = w2d.at[:, :cout].set(w.reshape(9 * cin, cout)).astype(MXU_DTYPE)
            g = jnp.zeros((1, coutp), jnp.float32).at[0, :cout].set(gamma)
            bt = jnp.zeros((1, coutp), jnp.float32).at[0, :cout].set(beta)
            klayers.append((w2d, g, bt))
        kblocks.append(klayers)

    # fc1: permute rows from PyTorch NCHW-flatten order (c,h,w) to the kernel's
    # NHWC channel-padded flatten order (h,w,c_pad), so the runtime flatten is a free view.
    (w1, b1), (w2, b2), (w3, b3) = params["fc"]
    C, Cpad = last_channels, round_up(last_channels, LANE)
    fh = fw = feat_hw
    h1, h1p = w1.shape[1], round_up(w1.shape[1], LANE)
    w1_nhwc = jnp.transpose(w1.reshape(C, fh, fw, h1), (1, 2, 0, 3))      # (fh,fw,C,h1)
    w1p = jnp.zeros((fh, fw, Cpad, h1p), jnp.float32).at[:, :, :C, :h1].set(w1_nhwc)
    w1p = w1p.reshape(fh * fw * Cpad, h1p).astype(MXU_DTYPE)
    b1p = jnp.zeros((1, h1p), jnp.float32).at[0, :h1].set(b1)

    h2, h2p = w2.shape[1], round_up(w2.shape[1], LANE)
    w2p = jnp.zeros((h1p, h2p), jnp.float32).at[:h1, :h2].set(w2).astype(MXU_DTYPE)
    b2p = jnp.zeros((1, h2p), jnp.float32).at[0, :h2].set(b2)

    nout, noutp = w3.shape[1], round_up(w3.shape[1], LANE)
    w3p = jnp.zeros((h2p, noutp), jnp.float32).at[:h2, :nout].set(w3).astype(MXU_DTYPE)
    b3p = jnp.zeros((1, noutp), jnp.float32).at[0, :nout].set(b3)

    return {"blocks": kblocks, "fc": [(w1p, b1p), (w2p, b2p), (w3p, b3p)]}


# ----------------------------------------------------------------------------
# Full VGG forward (Pallas)
# ----------------------------------------------------------------------------
@functools.partial(jax.jit, static_argnames=("num_classes",))
def vgg_forward(x_nchw, kparams, *, num_classes):
    x = jnp.transpose(x_nchw, (0, 2, 3, 1)).astype(jnp.float32)   # NCHW -> NHWC
    N, H, W, cin0 = x.shape
    cinp = round_up(cin0, LANE)
    if cinp != cin0:                                              # lane-dense channel storage
        x = jnp.pad(x, ((0, 0), (0, 0), (0, 0), (0, cinp - cin0)))

    for layers in kparams["blocks"]:
        scale = jnp.ones((1, x.shape[-1]), jnp.float32)           # unused for layer 0
        bias = jnp.zeros((1, x.shape[-1]), jnp.float32)
        for li, (w2d, gamma, beta) in enumerate(layers):
            conv, s, sq = conv3x3(x, w2d, scale, bias, apply_bn_relu=(li > 0))
            cnt = float(N * H * W)
            # NOTE: single-pass E[x^2]-E[x]^2 in f32; acceptable at these magnitudes.
            mean = jnp.sum(s, axis=0) / cnt                       # (1, CoutP)
            var = jnp.maximum(jnp.sum(sq, axis=0) / cnt - mean * mean, 0.0)
            scale = gamma * jax.lax.rsqrt(var + BN_EPS)           # folded BN scale/bias
            bias = beta - mean * scale
            x = conv                                              # pre-BN output
        x = bn_relu_maxpool(x, scale, bias)                       # fused block epilogue
        H, W = H // 2, W // 2

    # Flatten is a free view (fc1 rows were permuted to NHWC channel-padded order).
    feats = x.reshape(N, -1)
    logits_p = mlp(feats, kparams["fc"])
    return logits_p[:, :num_classes]


# ----------------------------------------------------------------------------
# Pure-JAX reference (PyTorch semantics) for the correctness check.
# ----------------------------------------------------------------------------
def reference(x_nchw, params, operand_dtype=jnp.float32):
    f32 = jnp.float32
    q = lambda a: a.astype(operand_dtype).astype(f32)
    x = jnp.transpose(x_nchw, (0, 2, 3, 1)).astype(f32)
    for layers in params["blocks"]:
        for (w, b, gamma, beta) in layers:
            y = jax.lax.conv_general_dilated(
                q(x), q(w), window_strides=(1, 1), padding="SAME",
                dimension_numbers=("NHWC", "HWIO", "NHWC")) + b
            mean = jnp.mean(y, axis=(0, 1, 2))
            var = jnp.mean((y - mean) ** 2, axis=(0, 1, 2))       # biased (train-mode BN)
            x = jnp.maximum((y - mean) * jax.lax.rsqrt(var + BN_EPS) * gamma + beta, 0.0)
        n, h, w_, c = x.shape
        x = x.reshape(n, h // 2, 2, w_ // 2, 2, c).max(axis=(2, 4))
    feats = jnp.transpose(x, (0, 3, 1, 2)).reshape(x.shape[0], -1)
    (w1, b1), (w2, b2), (w3, b3) = params["fc"]
    h1 = jnp.maximum(jnp.dot(q(feats), q(w1)) + b1, 0.0)
    h2 = jnp.maximum(jnp.dot(q(h1), q(w2)) + b2, 0.0)
    return jnp.dot(q(h2), q(w3)) + b3


if __name__ == "__main__":
    key = jax.random.PRNGKey(0)
    k_x, k_p = jax.random.split(key)

    # scaled-down VGG: 2 blocks of 2 convs each, then the 3-layer classifier
    N, IN_C, HW = 2, 4, 16
    CONV_ARCH = ((2, 8), (2, 16))
    HIDDEN, NUM_CLASSES = 32, 10
    FEAT_HW = HW // (2 ** len(CONV_ARCH))

    params = init_vgg_params(k_p, IN_C, CONV_ARCH, NUM_CLASSES, HIDDEN, FEAT_HW)
    kparams = prepare_kernel_params(params, FEAT_HW, CONV_ARCH[-1][1])

    x = jax.random.normal(k_x, (N, IN_C, HW, HW), jnp.float32)    # NCHW, like PyTorch

    out = vgg_forward(x, kparams, num_classes=NUM_CLASSES)
    out = jax.block_until_ready(out)
    assert out.shape == (N, NUM_CLASSES), out.shape

    # Tight check: same math with bf16 MXU operands (isolates kernel/structure bugs).
    ref_bf16 = reference(x, params, operand_dtype=MXU_DTYPE)
    err_tight = float(jnp.max(jnp.abs(out - ref_bf16)))
    assert jnp.allclose(out, ref_bf16, atol=2e-3, rtol=2e-3), err_tight

    # Loose check: pure f32 PyTorch-semantics reference (bounds bf16 operand rounding).
    ref_f32 = reference(x, params, operand_dtype=jnp.float32)
    rel = float(jnp.linalg.norm(out - ref_f32) / (jnp.linalg.norm(ref_f32) + 1e-12))
    assert rel < 3e-2, rel

    print("KERNEL_OK")
</pallas_src>

<mosaic_0001>
module attributes {stable_mosaic.version = 11 : i64} {
  func.func @_conv3x3_kernel(%arg0: i32, %arg1: memref<1x128xf32, #tpu.memory_space<vmem>>, %arg2: memref<1x128xf32, #tpu.memory_space<vmem>>, %arg3: memref<1x16x16x128xf32, #tpu.memory_space<vmem>>, %arg4: memref<36x128xbf16, #tpu.memory_space<vmem>>, %arg5: memref<1x16x16x128xf32, #tpu.memory_space<vmem>>, %arg6: memref<1x1x128xf32, #tpu.memory_space<vmem>>, %arg7: memref<1x1x128xf32, #tpu.memory_space<vmem>>, %arg8: memref<18x24x4xbf16, #tpu.memory_space<vmem>>) attributes {dimension_semantics = [#tpu.dimension_semantics<parallel>], iteration_bounds = array<i64: 2>, scalar_prefetch = 0 : i64, scratch_operands = 1 : i64, tpu.core_type = #tpu.core_type<tc>, window_params = [{pipeline_mode = #tpu.pipeline_mode<synchronous>, transform_indices = @transform_0, window_bounds = array<i64: 1, 128>}, {pipeline_mode = #tpu.pipeline_mode<synchronous>, transform_indices = @transform_1, window_bounds = array<i64: 1, 128>}, {transform_indices = @transform_2, window_bounds = array<i64: 1, 16, 16, 128>}, {pipeline_mode = #tpu.pipeline_mode<synchronous>, transform_indices = @transform_3, window_bounds = array<i64: 36, 128>}, {transform_indices = @transform_4, window_bounds = array<i64: 1, 16, 16, 128>}, {transform_indices = @transform_5, window_bounds = array<i64: 1, 1, 128>}, {transform_indices = @transform_6, window_bounds = array<i64: 1, 1, 128>}]} {
    %c0 = arith.constant 0 : index
    %c0_0 = arith.constant 0 : index
    %c0_1 = arith.constant 0 : index
    %c0_2 = arith.constant 0 : index
    %0 = vector.load %arg3[%c0, %c0_0, %c0_1, %c0_2] : memref<1x16x16x128xf32, #tpu.memory_space<vmem>>, vector<1x16x16x4xf32>
    %1 = vector.shape_cast %0 : vector<1x16x16x4xf32> to vector<16x16x4xf32>
    %2 = arith.truncf %1 : vector<16x16x4xf32> to vector<16x16x4xbf16>
    %cst = arith.constant 0.000000e+00 : bf16
    %3 = vector.broadcast %cst : bf16 to vector<1x24x4xbf16>
    %c0_3 = arith.constant 0 : index
    %c0_4 = arith.constant 0 : index
    %c0_5 = arith.constant 0 : index
    %4 = vector.load %arg8[%c0_3, %c0_4, %c0_5] : memref<18x24x4xbf16, #tpu.memory_space<vmem>>, vector<1x24x4xbf16>
    tpu.vector_store %arg8[%c0_3, %c0_4, %c0_5], %3 {strides = array<i32>} : memref<18x24x4xbf16, #tpu.memory_space<vmem>>, vector<1x24x4xbf16>,
    %c17 = arith.constant 17 : index
    %c0_6 = arith.constant 0 : index
    %c0_7 = arith.constant 0 : index
    %5 = vector.load %arg8[%c17, %c0_6, %c0_7] : memref<18x24x4xbf16, #tpu.memory_space<vmem>>, vector<1x24x4xbf16>
    tpu.vector_store %arg8[%c17, %c0_6, %c0_7], %3 {strides = array<i32>} : memref<18x24x4xbf16, #tpu.memory_space<vmem>>, vector<1x24x4xbf16>,
    %cst_8 = arith.constant 0.000000e+00 : bf16
    %6 = vector.broadcast %cst_8 : bf16 to vector<16x1x4xbf16>
    %c1 = arith.constant 1 : index
    %c0_9 = arith.constant 0 : index
    %c0_10 = arith.constant 0 : index
    %7 = vector.load %arg8[%c1, %c0_9, %c0_10] : memref<18x24x4xbf16, #tpu.memory_space<vmem>>, vector<16x1x4xbf16>
    tpu.vector_store %arg8[%c1, %c0_9, %c0_10], %6 {strides = array<i32>} : memref<18x24x4xbf16, #tpu.memory_space<vmem>>, vector<16x1x4xbf16>,
    %c1_11 = arith.constant 1 : index
    %c17_12 = arith.constant 17 : index
    %c0_13 = arith.constant 0 : index
    %8 = vector.load %arg8[%c1_11, %c17_12, %c0_13] : memref<18x24x4xbf16, #tpu.memory_space<vmem>>, vector<16x1x4xbf16>
    tpu.vector_store %arg8[%c1_11, %c17_12, %c0_13], %6 {strides = array<i32>} : memref<18x24x4xbf16, #tpu.memory_space<vmem>>, vector<16x1x4xbf16>,
    %c1_14 = arith.constant 1 : index
    %c1_15 = arith.constant 1 : index
    %c0_16 = arith.constant 0 : index
    %9 = vector.load %arg8[%c1_14, %c1_15, %c0_16] : memref<18x24x4xbf16, #tpu.memory_space<vmem>>, vector<16x16x4xbf16>
    tpu.vector_store %arg8[%c1_14, %c1_15, %c0_16], %2 {strides = array<i32>} : memref<18x24x4xbf16, #tpu.memory_space<vmem>>, vector<16x16x4xbf16>,
    %c0_17 = arith.constant 0 : index
    %c0_18 = arith.constant 0 : index
    %c0_19 = arith.constant 0 : index
    %10 = vector.load %arg8[%c0_17, %c0_18, %c0_19] : memref<18x24x4xbf16, #tpu.memory_space<vmem>>, vector<18x16x4xbf16>
    %c0_20 = arith.constant 0 : index
    %c1_21 = arith.constant 1 : index
    %c0_22 = arith.constant 0 : index
    %11 = vector.load %arg8[%c0_20, %c1_21, %c0_22] : memref<18x24x4xbf16, #tpu.memory_space<vmem>>, vector<18x16x4xbf16>
    %c0_23 = arith.constant 0 : index
    %c2 = arith.constant 2 : index
    %c0_24 = arith.constant 0 : index
    %12 = vector.load %arg8[%c0_23, %c2, %c0_24] : memref<18x24x4xbf16, #tpu.memory_space<vmem>>, vector<18x16x4xbf16>
    %13 = vector.extract_strided_slice %10 {offsets = [0, 0, 0], sizes = [16, 16, 4], strides = [1, 1, 1]} : vector<18x16x4xbf16> to vector<16x16x4xbf16>
    %14 = vector.extract_strided_slice %11 {offsets = [0, 0, 0], sizes = [16, 16, 4], strides = [1, 1, 1]} : vector<18x16x4xbf16> to vector<16x16x4xbf16>
    %15 = vector.extract_strided_slice %12 {offsets = [0, 0, 0], sizes = [16, 16, 4], strides = [1, 1, 1]} : vector<18x16x4xbf16> to vector<16x16x4xbf16>
    %16 = vector.extract_strided_slice %10 {offsets = [1, 0, 0], sizes = [16, 16, 4], strides = [1, 1, 1]} : vector<18x16x4xbf16> to vector<16x16x4xbf16>
    %17 = vector.extract_strided_slice %11 {offsets = [1, 0, 0], sizes = [16, 16, 4], strides = [1, 1, 1]} : vector<18x16x4xbf16> to vector<16x16x4xbf16>
    %18 = vector.extract_strided_slice %12 {offsets = [1, 0, 0], sizes = [16, 16, 4], strides = [1, 1, 1]} : vector<18x16x4xbf16> to vector<16x16x4xbf16>
    %19 = vector.extract_strided_slice %10 {offsets = [2, 0, 0], sizes = [16, 16, 4], strides = [1, 1, 1]} : vector<18x16x4xbf16> to vector<16x16x4xbf16>
    %20 = vector.extract_strided_slice %11 {offsets = [2, 0, 0], sizes = [16, 16, 4], strides = [1, 1, 1]} : vector<18x16x4xbf16> to vector<16x16x4xbf16>
    %21 = vector.extract_strided_slice %12 {offsets = [2, 0, 0], sizes = [16, 16, 4], strides = [1, 1, 1]} : vector<18x16x4xbf16> to vector<16x16x4xbf16>
    %22 = tpu.concatenate %13, %14, %15, %16, %17, %18, %19, %20, %21 in 2 : vector<16x16x4xbf16>, vector<16x16x4xbf16>, vector<16x16x4xbf16>, vector<16x16x4xbf16>, vector<16x16x4xbf16>, vector<16x16x4xbf16>, vector<16x16x4xbf16>, vector<16x16x4xbf16>, vector<16x16x4xbf16> -> vector<16x16x36xbf16>
    %23 = vector.shape_cast %22 : vector<16x16x36xbf16> to vector<256x36xbf16>
    %c0_25 = arith.constant 0 : index
    %c0_26 = arith.constant 0 : index
    %24 = vector.load %arg4[%c0_25, %c0_26] : memref<36x128xbf16, #tpu.memory_space<vmem>>, vector<36x128xbf16>
    %cst_27 = arith.constant dense<0.000000e+00> : vector<256x128xf32>
    %25 = tpu.matmul %23, %24, %cst_27 {dimension_numbers = #tpu.dot_dimension_numbers<[1], [0], [0], [1], [0, 0, 1, 1], [], []>} : vector<256x36xbf16>, vector<36x128xbf16>, vector<256x128xf32> -> vector<256x128xf32>
    %26 = vector.shape_cast %25 : vector<256x128xf32> to vector<1x16x16x128xf32>
    %c0_28 = arith.constant 0 : index
    %c0_29 = arith.constant 0 : index
    %c0_30 = arith.constant 0 : index
    %c0_31 = arith.constant 0 : index
    %27 = vector.load %arg5[%c0_28, %c0_29, %c0_30, %c0_31] : memref<1x16x16x128xf32, #tpu.memory_space<vmem>>, vector<1x16x16x128xf32>
    tpu.vector_store %arg5[%c0_28, %c0_29, %c0_30, %c0_31], %26 {strides = array<i32>} : memref<1x16x16x128xf32, #tpu.memory_space<vmem>>, vector<1x16x16x128xf32>,
    %cst_32 = arith.constant dense<0.000000e+00> : vector<128xf32>
    %28 = vector.multi_reduction <add>, %25, %cst_32 [0] : vector<256x128xf32> to vector<128xf32>
    %29 = vector.shape_cast %28 : vector<128xf32> to vector<1x128xf32>
    %30 = vector.shape_cast %29 : vector<1x128xf32> to vector<1x1x128xf32>
    %c0_33 = arith.constant 0 : index
    %c0_34 = arith.constant 0 : index
    %c0_35 = arith.constant 0 : index
    %31 = vector.load %arg6[%c0_33, %c0_34, %c0_35] : memref<1x1x128xf32, #tpu.memory_space<vmem>>, vector<1x1x128xf32>
    tpu.vector_store %arg6[%c0_33, %c0_34, %c0_35], %30 {strides = array<i32>} : memref<1x1x128xf32, #tpu.memory_space<vmem>>, vector<1x1x128xf32>,
    %32 = arith.mulf %25, %25 : vector<256x128xf32>
    %cst_36 = arith.constant dense<0.000000e+00> : vector<128xf32>
    %33 = vector.multi_reduction <add>, %32, %cst_36 [0] : vector<256x128xf32> to vector<128xf32>
    %34 = vector.shape_cast %33 : vector<128xf32> to vector<1x128xf32>
    %35 = vector.shape_cast %34 : vector<1x128xf32> to vector<1x1x128xf32>
    %c0_37 = arith.constant 0 : index
    %c0_38 = arith.constant 0 : index
    %c0_39 = arith.constant 0 : index
    %36 = vector.load %arg7[%c0_37, %c0_38, %c0_39] : memref<1x1x128xf32, #tpu.memory_space<vmem>>, vector<1x1x128xf32>
    tpu.vector_store %arg7[%c0_37, %c0_38, %c0_39], %35 {strides = array<i32>} : memref<1x1x128xf32, #tpu.memory_space<vmem>>, vector<1x1x128xf32>,
    return
  }
  func.func @transform_0(%arg0: i32) -> (i32, i32) {
    %c0_i32 = arith.constant 0 : i32
    %c0_i32_0 = arith.constant 0 : i32
    %c0_i32_1 = arith.constant 0 : i32
    return %c0_i32, %c0_i32_0 : i32, i32
  }
  func.func @transform_1(%arg0: i32) -> (i32, i32) {
    %c0_i32 = arith.constant 0 : i32
    %c0_i32_0 = arith.constant 0 : i32
    %c0_i32_1 = arith.constant 0 : i32
    return %c0_i32, %c0_i32_0 : i32, i32
  }
  func.func @transform_2(%arg0: i32) -> (i32, i32, i32, i32) {
    %c0_i32 = arith.constant 0 : i32
    %c0_i32_0 = arith.constant 0 : i32
    %c0_i32_1 = arith.constant 0 : i32
    %c0_i32_2 = arith.constant 0 : i32
    return %arg0, %c0_i32, %c0_i32_0, %c0_i32_1 : i32, i32, i32, i32
  }
  func.func @transform_3(%arg0: i32) -> (i32, i32) {
    %c0_i32 = arith.constant 0 : i32
    %c0_i32_0 = arith.constant 0 : i32
    %c0_i32_1 = arith.constant 0 : i32
    return %c0_i32, %c0_i32_0 : i32, i32
  }
  func.func @transform_4(%arg0: i32) -> (i32, i32, i32, i32) {
    %c0_i32 = arith.constant 0 : i32
    %c0_i32_0 = arith.constant 0 : i32
    %c0_i32_1 = arith.constant 0 : i32
    %c0_i32_2 = arith.constant 0 : i32
    return %arg0, %c0_i32, %c0_i32_0, %c0_i32_1 : i32, i32, i32, i32
  }
  func.func @transform_5(%arg0: i32) -> (i32, i32, i32) {
    %c0_i32 = arith.constant 0 : i32
    %c0_i32_0 = arith.constant 0 : i32
    %c0_i32_1 = arith.constant 0 : i32
    return %arg0, %c0_i32, %c0_i32_0 : i32, i32, i32
  }
  func.func @transform_6(%arg0: i32) -> (i32, i32, i32) {
    %c0_i32 = arith.constant 0 : i32
    %c0_i32_0 = arith.constant 0 : i32
    %c0_i32_1 = arith.constant 0 : i32
    return %arg0, %c0_i32, %c0_i32_0 : i32, i32, i32
  }
}

module attributes {stable_mosaic.version = 11 : i64} {
  func.func @_conv3x3_kernel(%arg0: i32, %arg1: memref<1x128xf32, #tpu.memory_space<vmem>>, %arg2: memref<1x128xf32, #tpu.memory_space<vmem>>, %arg3: memref<1x16x16x128xf32, #tpu.memory_space<vmem>>, %arg4: memref<72x128xbf16, #tpu.memory_space<vmem>>, %arg5: memref<1x16x16x128xf32, #tpu.memory_space<vmem>>, %arg6: memref<1x1x128xf32, #tpu.memory_space<vmem>>, %arg7: memref<1x1x128xf32, #tpu.memory_space<vmem>>, %arg8: memref<18x24x8xbf16, #tpu.memory_space<vmem>>) attributes {dimension_semantics = [#tpu.dimension_semantics<parallel>], iteration_bounds = array<i64: 2>, scalar_prefetch = 0 : i64, scratch_operands = 1 : i64, tpu.core_type = #tpu.core_type<tc>, window_params = [{pipeline_mode = #tpu.pipeline_mode<synchronous>, transform_indices = @transform_0, window_bounds = array<i64: 1, 128>}, {pipeline_mode = #tpu.pipeline_mode<synchronous>, transform_indices = @transform_1, window_bounds = array<i64: 1, 128>}, {transform_indices = @transform_2, window_bounds = array<i64: 1, 16, 16, 128>}, {pipeline_mode = #tpu.pipeline_mode<synchronous>, transform_indices = @transform_3, window_bounds = array<i64: 72, 128>}, {transform_indices = @transform_4, window_bounds = array<i64: 1, 16, 16, 128>}, {transform_indices = @transform_5, window_bounds = array<i64: 1, 1, 128>}, {transform_indices = @transform_6, window_bounds = array<i64: 1, 1, 128>}]} {
    %c0 = arith.constant 0 : index
    %c0_0 = arith.constant 0 : index
    %c0_1 = arith.constant 0 : index
    %c0_2 = arith.constant 0 : index
    %0 = vector.load %arg3[%c0, %c0_0, %c0_1, %c0_2] : memref<1x16x16x128xf32, #tpu.memory_space<vmem>>, vector<1x16x16x8xf32>
    %1 = vector.shape_cast %0 : vector<1x16x16x8xf32> to vector<16x16x8xf32>
    %c0_3 = arith.constant 0 : index
    %c0_4 = arith.constant 0 : index
    %2 = vector.load %arg1[%c0_3, %c0_4] : memref<1x128xf32, #tpu.memory_space<vmem>>, vector<1x8xf32>
    %3 = vector.shape_cast %2 : vector<1x8xf32> to vector<1x1x8xf32>
    %4 = vector.broadcast %3 : vector<1x1x8xf32> to vector<16x16x8xf32>
    %5 = arith.mulf %1, %4 : vector<16x16x8xf32>
    %c0_5 = arith.constant 0 : index
    %c0_6 = arith.constant 0 : index
    %6 = vector.load %arg2[%c0_5, %c0_6] : memref<1x128xf32, #tpu.memory_space<vmem>>, vector<1x8xf32>
    %7 = vector.shape_cast %6 : vector<1x8xf32> to vector<1x1x8xf32>
    %8 = vector.broadcast %7 : vector<1x1x8xf32> to vector<16x16x8xf32>
    %9 = arith.addf %5, %8 : vector<16x16x8xf32>
    %cst = arith.constant 0.000000e+00 : f32
    %10 = vector.broadcast %cst : f32 to vector<16x16x8xf32>
    %11 = arith.maximumf %9, %10 : vector<16x16x8xf32>
    %12 = arith.truncf %11 : vector<16x16x8xf32> to vector<16x16x8xbf16>
    %cst_7 = arith.constant 0.000000e+00 : bf16
    %13 = vector.broadcast %cst_7 : bf16 to vector<1x24x8xbf16>
    %c0_8 = arith.constant 0 : index
    %c0_9 = arith.constant 0 : index
    %c0_10 = arith.constant 0 : index
    %14 = vector.load %arg8[%c0_8, %c0_9, %c0_10] : memref<18x24x8xbf16, #tpu.memory_space<vmem>>, vector<1x24x8xbf16>
    tpu.vector_store %arg8[%c0_8, %c0_9, %c0_10], %13 {strides = array<i32>} : memref<18x24x8xbf16, #tpu.memory_space<vmem>>, vector<1x24x8xbf16>,
    %c17 = arith.constant 17 : index
    %c0_11 = arith.constant 0 : index
    %c0_12 = arith.constant 0 : index
    %15 = vector.load %arg8[%c17, %c0_11, %c0_12] : memref<18x24x8xbf16, #tpu.memory_space<vmem>>, vector<1x24x8xbf16>
    tpu.vector_store %arg8[%c17, %c0_11, %c0_12], %13 {strides = array<i32>} : memref<18x24x8xbf16, #tpu.memory_space<vmem>>, vector<1x24x8xbf16>,
    %cst_13 = arith.constant 0.000000e+00 : bf16
    %16 = vector.broadcast %cst_13 : bf16 to vector<16x1x8xbf16>
    %c1 = arith.constant 1 : index
    %c0_14 = arith.constant 0 : index
    %c0_15 = arith.constant 0 : index
    %17 = vector.load %arg8[%c1, %c0_14, %c0_15] : memref<18x24x8xbf16, #tpu.memory_space<vmem>>, vector<16x1x8xbf16>
    tpu.vector_store %arg8[%c1, %c0_14, %c0_15], %16 {strides = array<i32>} : memref<18x24x8xbf16, #tpu.memory_space<vmem>>, vector<16x1x8xbf16>,
    %c1_16 = arith.constant 1 : index
    %c17_17 = arith.constant 17 : index
    %c0_18 = arith.constant 0 : index
    %18 = vector.load %arg8[%c1_16, %c17_17, %c0_18] : memref<18x24x8xbf16, #tpu.memory_space<vmem>>, vector<16x1x8xbf16>
    tpu.vector_store %arg8[%c1_16, %c17_17, %c0_18], %16 {strides = array<i32>} : memref<18x24x8xbf16, #tpu.memory_space<vmem>>, vector<16x1x8xbf16>,
    %c1_19 = arith.constant 1 : index
    %c1_20 = arith.constant 1 : index
    %c0_21 = arith.constant 0 : index
    %19 = vector.load %arg8[%c1_19, %c1_20, %c0_21] : memref<18x24x8xbf16, #tpu.memory_space<vmem>>, vector<16x16x8xbf16>
    tpu.vector_store %arg8[%c1_19, %c1_20, %c0_21], %12 {strides = array<i32>} : memref<18x24x8xbf16, #tpu.memory_space<vmem>>, vector<16x16x8xbf16>,
    %c0_22 = arith.constant 0 : index
    %c0_23 = arith.constant 0 : index
    %c0_24 = arith.constant 0 : index
    %20 = vector.load %arg8[%c0_22, %c0_23, %c0_24] : memref<18x24x8xbf16, #tpu.memory_space<vmem>>, vector<18x16x8xbf16>
    %c0_25 = arith.constant 0 : index
    %c1_26 = arith.constant 1 : index
    %c0_27 = arith.constant 0 : index
    %21 = vector.load %arg8[%c0_25, %c1_26, %c0_27] : memref<18x24x8xbf16, #tpu.memory_space<vmem>>, vector<18x16x8xbf16>
    %c0_28 = arith.constant 0 : index
    %c2 = arith.constant 2 : index
    %c0_29 = arith.constant 0 : index
    %22 = vector.load %arg8[%c0_28, %c2, %c0_29] : memref<18x24x8xbf16, #tpu.memory_space<vmem>>, vector<18x16x8xbf16>
    %23 = vector.extract_strided_slice %20 {offsets = [0, 0, 0], sizes = [16, 16, 8], strides = [1, 1, 1]} : vector<18x16x8xbf16> to vector<16x16x8xbf16>
    %24 = vector.extract_strided_slice %21 {offsets = [0, 0, 0], sizes = [16, 16, 8], strides = [1, 1, 1]} : vector<18x16x8xbf16> to vector<16x16x8xbf16>
    %25 = vector.extract_strided_slice %22 {offsets = [0, 0, 0], sizes = [16, 16, 8], strides = [1, 1, 1]} : vector<18x16x8xbf16> to vector<16x16x8xbf16>
    %26 = vector.extract_strided_slice %20 {offsets = [1, 0, 0], sizes = [16, 16, 8], strides = [1, 1, 1]} : vector<18x16x8xbf16> to vector<16x16x8xbf16>
    %27 = vector.extract_strided_slice %21 {offsets = [1, 0, 0], sizes = [16, 16, 8], strides = [1, 1, 1]} : vector<18x16x8xbf16> to vector<16x16x8xbf16>
    %28 = vector.extract_strided_slice %22 {offsets = [1, 0, 0], sizes = [16, 16, 8], strides = [1, 1, 1]} : vector<18x16x8xbf16> to vector<16x16x8xbf16>
    %29 = vector.extract_strided_slice %20 {offsets = [2, 0, 0], sizes = [16, 16, 8], strides = [1, 1, 1]} : vector<18x16x8xbf16> to vector<16x16x8xbf16>
    %30 = vector.extract_strided_slice %21 {offsets = [2, 0, 0], sizes = [16, 16, 8], strides = [1, 1, 1]} : vector<18x16x8xbf16> to vector<16x16x8xbf16>
    %31 = vector.extract_strided_slice %22 {offsets = [2, 0, 0], sizes = [16, 16, 8], strides = [1, 1, 1]} : vector<18x16x8xbf16> to vector<16x16x8xbf16>
    %32 = tpu.concatenate %23, %24, %25, %26, %27, %28, %29, %30, %31 in 2 : vector<16x16x8xbf16>, vector<16x16x8xbf16>, vector<16x16x8xbf16>, vector<16x16x8xbf16>, vector<16x16x8xbf16>, vector<16x16x8xbf16>, vector<16x16x8xbf16>, vector<16x16x8xbf16>, vector<16x16x8xbf16> -> vector<16x16x72xbf16>
    %33 = vector.shape_cast %32 : vector<16x16x72xbf16> to vector<256x72xbf16>
    %c0_30 = arith.constant 0 : index
    %c0_31 = arith.constant 0 : index
    %34 = vector.load %arg4[%c0_30, %c0_31] : memref<72x128xbf16, #tpu.memory_space<vmem>>, vector<72x128xbf16>
    %cst_32 = arith.constant dense<0.000000e+00> : vector<256x128xf32>
    %35 = tpu.matmul %33, %34, %cst_32 {dimension_numbers = #tpu.dot_dimension_numbers<[1], [0], [0], [1], [0, 0, 1, 1], [], []>} : vector<256x72xbf16>, vector<72x128xbf16>, vector<256x128xf32> -> vector<256x128xf32>
    %36 = vector.shape_cast %35 : vector<256x128xf32> to vector<1x16x16x128xf32>
    %c0_33 = arith.constant 0 : index
    %c0_34 = arith.constant 0 : index
    %c0_35 = arith.constant 0 : index
    %c0_36 = arith.constant 0 : index
    %37 = vector.load %arg5[%c0_33, %c0_34, %c0_35, %c0_36] : memref<1x16x16x128xf32, #tpu.memory_space<vmem>>, vector<1x16x16x128xf32>
    tpu.vector_store %arg5[%c0_33, %c0_34, %c0_35, %c0_36], %36 {strides = array<i32>} : memref<1x16x16x128xf32, #tpu.memory_space<vmem>>, vector<1x16x16x128xf32>,
    %cst_37 = arith.constant dense<0.000000e+00> : vector<128xf32>
    %38 = vector.multi_reduction <add>, %35, %cst_37 [0] : vector<256x128xf32> to vector<128xf32>
    %39 = vector.shape_cast %38 : vector<128xf32> to vector<1x128xf32>
    %40 = vector.shape_cast %39 : vector<1x128xf32> to vector<1x1x128xf32>
    %c0_38 = arith.constant 0 : index
    %c0_39 = arith.constant 0 : index
    %c0_40 = arith.constant 0 : index
    %41 = vector.load %arg6[%c0_38, %c0_39, %c0_40] : memref<1x1x128xf32, #tpu.memory_space<vmem>>, vector<1x1x128xf32>
    tpu.vector_store %arg6[%c0_38, %c0_39, %c0_40], %40 {strides = array<i32>} : memref<1x1x128xf32, #tpu.memory_space<vmem>>, vector<1x1x128xf32>,
    %42 = arith.mulf %35, %35 : vector<256x128xf32>
    %cst_41 = arith.constant dense<0.000000e+00> : vector<128xf32>
    %43 = vector.multi_reduction <add>, %42, %cst_41 [0] : vector<256x128xf32> to vector<128xf32>
    %44 = vector.shape_cast %43 : vector<128xf32> to vector<1x128xf32>
    %45 = vector.shape_cast %44 : vector<1x128xf32> to vector<1x1x128xf32>
    %c0_42 = arith.constant 0 : index
    %c0_43 = arith.constant 0 : index
    %c0_44 = arith.constant 0 : index
    %46 = vector.load %arg7[%c0_42, %c0_43, %c0_44] : memref<1x1x128xf32, #tpu.memory_space<vmem>>, vector<1x1x128xf32>
    tpu.vector_store %arg7[%c0_42, %c0_43, %c0_44], %45 {strides = array<i32>} : memref<1x1x128xf32, #tpu.memory_space<vmem>>, vector<1x1x128xf32>,
    return
  }
  func.func @transform_0(%arg0: i32) -> (i32, i32) {
    %c0_i32 = arith.constant 0 : i32
    %c0_i32_0 = arith.constant 0 : i32
    %c0_i32_1 = arith.constant 0 : i32
    return %c0_i32, %c0_i32_0 : i32, i32
  }
  func.func @transform_1(%arg0: i32) -> (i32, i32) {
    %c0_i32 = arith.constant 0 : i32
    %c0_i32_0 = arith.constant 0 : i32
    %c0_i32_1 = arith.constant 0 : i32
    return %c0_i32, %c0_i32_0 : i32, i32
  }
  func.func @transform_2(%arg0: i32) -> (i32, i32, i32, i32) {
    %c0_i32 = arith.constant 0 : i32
    %c0_i32_0 = arith.constant 0 : i32
    %c0_i32_1 = arith.constant 0 : i32
    %c0_i32_2 = arith.constant 0 : i32
    return %arg0, %c0_i32, %c0_i32_0, %c0_i32_1 : i32, i32, i32, i32
  }
  func.func @transform_3(%arg0: i32) -> (i32, i32) {
    %c0_i32 = arith.constant 0 : i32
    %c0_i32_0 = arith.constant 0 : i32
    %c0_i32_1 = arith.constant 0 : i32
    return %c0_i32, %c0_i32_0 : i32, i32
  }
  func.func @transform_4(%arg0: i32) -> (i32, i32, i32, i32) {
    %c0_i32 = arith.constant 0 : i32
    %c0_i32_0 = arith.constant 0 : i32
    %c0_i32_1 = arith.constant 0 : i32
    %c0_i32_2 = arith.constant 0 : i32
    return %arg0, %c0_i32, %c0_i32_0, %c0_i32_1 : i32, i32, i32, i32
  }
  func.func @transform_5(%arg0: i32) -> (i32, i32, i32) {
    %c0_i32 = arith.constant 0 : i32
    %c0_i32_0 = arith.constant 0 : i32
    %c0_i32_1 = arith.constant 0 : i32
    return %arg0, %c0_i32, %c0_i32_0 : i32, i32, i32
  }
  func.func @transform_6(%arg0: i32) -> (i32, i32, i32) {
    %c0_i32 = arith.constant 0 : i32
    %c0_i32_0 = arith.constant 0 : i32
    %c0_i32_1 = arith.constant 0 : i32
    return %arg0, %c0_i32, %c0_i32_0 : i32, i32, i32
  }
}

module attributes {stable_mosaic.version = 11 : i64} {
  func.func @_bn_relu_pool_kernel(%arg0: i32, %arg1: memref<1x128xf32, #tpu.memory_space<vmem>>, %arg2: memref<1x128xf32, #tpu.memory_space<vmem>>, %arg3: memref<1x16x16x128xf32, #tpu.memory_space<vmem>>, %arg4: memref<1x8x8x128xf32, #tpu.memory_space<vmem>>) attributes {dimension_semantics = [#tpu.dimension_semantics<parallel>], iteration_bounds = array<i64: 2>, scalar_prefetch = 0 : i64, scratch_operands = 0 : i64, tpu.core_type = #tpu.core_type<tc>, window_params = [{pipeline_mode = #tpu.pipeline_mode<synchronous>, transform_indices = @transform_0, window_bounds = array<i64: 1, 128>}, {pipeline_mode = #tpu.pipeline_mode<synchronous>, transform_indices = @transform_1, window_bounds = array<i64: 1, 128>}, {transform_indices = @transform_2, window_bounds = array<i64: 1, 16, 16, 128>}, {transform_indices = @transform_3, window_bounds = array<i64: 1, 8, 8, 128>}]} {
    %c0 = arith.constant 0 : index
    %c0_0 = arith.constant 0 : index
    %c0_1 = arith.constant 0 : index
    %c0_2 = arith.constant 0 : index
    %0 = vector.load %arg3[%c0, %c0_0, %c0_1, %c0_2] : memref<1x16x16x128xf32, #tpu.memory_space<vmem>>, vector<1x16x16x128xf32>
    %c0_3 = arith.constant 0 : index
    %c0_4 = arith.constant 0 : index
    %1 = vector.load %arg1[%c0_3, %c0_4] : memref<1x128xf32, #tpu.memory_space<vmem>>, vector<1x128xf32>
    %2 = vector.shape_cast %1 : vector<1x128xf32> to vector<1x1x1x128xf32>
    %3 = vector.broadcast %2 : vector<1x1x1x128xf32> to vector<1x16x16x128xf32>
    %4 = arith.mulf %0, %3 : vector<1x16x16x128xf32>
    %c0_5 = arith.constant 0 : index
    %c0_6 = arith.constant 0 : index
    %5 = vector.load %arg2[%c0_5, %c0_6] : memref<1x128xf32, #tpu.memory_space<vmem>>, vector<1x128xf32>
    %6 = vector.shape_cast %5 : vector<1x128xf32> to vector<1x1x1x128xf32>
    %7 = vector.broadcast %6 : vector<1x1x1x128xf32> to vector<1x16x16x128xf32>
    %8 = arith.addf %4, %7 : vector<1x16x16x128xf32>
    %cst = arith.constant 0.000000e+00 : f32
    %9 = vector.broadcast %cst : f32 to vector<1x16x16x128xf32>
    %10 = arith.maximumf %8, %9 : vector<1x16x16x128xf32>
    %11 = vector.shape_cast %10 : vector<1x16x16x128xf32> to vector<8x2x16x128xf32>
    %cst_7 = arith.constant dense<0xFF800000> : vector<8x16x128xf32>
    %12 = vector.multi_reduction <maximumf>, %11, %cst_7 [1] : vector<8x2x16x128xf32> to vector<8x16x128xf32>
    %13 = vector.shape_cast %12 : vector<8x16x128xf32> to vector<8x8x2x128xf32>
    %cst_8 = arith.constant dense<0xFF800000> : vector<8x8x128xf32>
    %14 = vector.multi_reduction <maximumf>, %13, %cst_8 [2] : vector<8x8x2x128xf32> to vector<8x8x128xf32>
    %15 = vector.shape_cast %14 : vector<8x8x128xf32> to vector<1x8x8x128xf32>
    %c0_9 = arith.constant 0 : index
    %c0_10 = arith.constant 0 : index
    %c0_11 = arith.constant 0 : index
    %c0_12 = arith.constant 0 : index
    %16 = vector.load %arg4[%c0_9, %c0_10, %c0_11, %c0_12] : memref<1x8x8x128xf32, #tpu.memory_space<vmem>>, vector<1x8x8x128xf32>
    tpu.vector_store %arg4[%c0_9, %c0_10, %c0_11, %c0_12], %15 {strides = array<i32>} : memref<1x8x8x128xf32, #tpu.memory_space<vmem>>, vector<1x8x8x128xf32>,
    return
  }
  func.func @transform_0(%arg0: i32) -> (i32, i32) {
    %c0_i32 = arith.constant 0 : i32
    %c0_i32_0 = arith.constant 0 : i32
    %c0_i32_1 = arith.constant 0 : i32
    return %c0_i32, %c0_i32_0 : i32, i32
  }
  func.func @transform_1(%arg0: i32) -> (i32, i32) {
    %c0_i32 = arith.constant 0 : i32
    %c0_i32_0 = arith.constant 0 : i32
    %c0_i32_1 = arith.constant 0 : i32
    return %c0_i32, %c0_i32_0 : i32, i32
  }
  func.func @transform_2(%arg0: i32) -> (i32, i32, i32, i32) {
    %c0_i32 = arith.constant 0 : i32
    %c0_i32_0 = arith.constant 0 : i32
    %c0_i32_1 = arith.constant 0 : i32
    %c0_i32_2 = arith.constant 0 : i32
    return %arg0, %c0_i32, %c0_i32_0, %c0_i32_1 : i32, i32, i32, i32
  }
  func.func @transform_3(%arg0: i32) -> (i32, i32, i32, i32) {
    %c0_i32 = arith.constant 0 : i32
    %c0_i32_0 = arith.constant 0 : i32
    %c0_i32_1 = arith.constant 0 : i32
    %c0_i32_2 = arith.constant 0 : i32
    return %arg0, %c0_i32, %c0_i32_0, %c0_i32_1 : i32, i32, i32, i32
  }
}

module attributes {stable_mosaic.version = 11 : i64} {
  func.func @_conv3x3_kernel(%arg0: i32, %arg1: memref<1x128xf32, #tpu.memory_space<vmem>>, %arg2: memref<1x128xf32, #tpu.memory_space<vmem>>, %arg3: memref<1x8x8x128xf32, #tpu.memory_space<vmem>>, %arg4: memref<72x128xbf16, #tpu.memory_space<vmem>>, %arg5: memref<1x8x8x128xf32, #tpu.memory_space<vmem>>, %arg6: memref<1x1x128xf32, #tpu.memory_space<vmem>>, %arg7: memref<1x1x128xf32, #tpu.memory_space<vmem>>, %arg8: memref<10x16x8xbf16, #tpu.memory_space<vmem>>) attributes {dimension_semantics = [#tpu.dimension_semantics<parallel>], iteration_bounds = array<i64: 2>, scalar_prefetch = 0 : i64, scratch_operands = 1 : i64, tpu.core_type = #tpu.core_type<tc>, window_params = [{pipeline_mode = #tpu.pipeline_mode<synchronous>, transform_indices = @transform_0, window_bounds = array<i64: 1, 128>}, {pipeline_mode = #tpu.pipeline_mode<synchronous>, transform_indices = @transform_1, window_bounds = array<i64: 1, 128>}, {transform_indices = @transform_2, window_bounds = array<i64: 1, 8, 8, 128>}, {pipeline_mode = #tpu.pipeline_mode<synchronous>, transform_indices = @transform_3, window_bounds = array<i64: 72, 128>}, {transform_indices = @transform_4, window_bounds = array<i64: 1, 8, 8, 128>}, {transform_indices = @transform_5, window_bounds = array<i64: 1, 1, 128>}, {transform_indices = @transform_6, window_bounds = array<i64: 1, 1, 128>}]} {
    %c0 = arith.constant 0 : index
    %c0_0 = arith.constant 0 : index
    %c0_1 = arith.constant 0 : index
    %c0_2 = arith.constant 0 : index
    %0 = vector.load %arg3[%c0, %c0_0, %c0_1, %c0_2] : memref<1x8x8x128xf32, #tpu.memory_space<vmem>>, vector<1x8x8x8xf32>
    %1 = vector.shape_cast %0 : vector<1x8x8x8xf32> to vector<8x8x8xf32>
    %2 = arith.truncf %1 : vector<8x8x8xf32> to vector<8x8x8xbf16>
    %cst = arith.constant 0.000000e+00 : bf16
    %3 = vector.broadcast %cst : bf16 to vector<1x16x8xbf16>
    %c0_3 = arith.constant 0 : index
    %c0_4 = arith.constant 0 : index
    %c0_5 = arith.constant 0 : index
    %4 = vector.load %arg8[%c0_3, %c0_4, %c0_5] : memref<10x16x8xbf16, #tpu.memory_space<vmem>>, vector<1x16x8xbf16>
    tpu.vector_store %arg8[%c0_3, %c0_4, %c0_5], %3 {strides = array<i32>} : memref<10x16x8xbf16, #tpu.memory_space<vmem>>, vector<1x16x8xbf16>,
    %c9 = arith.constant 9 : index
    %c0_6 = arith.constant 0 : index
    %c0_7 = arith.constant 0 : index
    %5 = vector.load %arg8[%c9, %c0_6, %c0_7] : memref<10x16x8xbf16, #tpu.memory_space<vmem>>, vector<1x16x8xbf16>
    tpu.vector_store %arg8[%c9, %c0_6, %c0_7], %3 {strides = array<i32>} : memref<10x16x8xbf16, #tpu.memory_space<vmem>>, vector<1x16x8xbf16>,
    %cst_8 = arith.constant 0.000000e+00 : bf16
    %6 = vector.broadcast %cst_8 : bf16 to vector<8x1x8xbf16>
    %c1 = arith.constant 1 : index
    %c0_9 = arith.constant 0 : index
    %c0_10 = arith.constant 0 : index
    %7 = vector.load %arg8[%c1, %c0_9, %c0_10] : memref<10x16x8xbf16, #tpu.memory_space<vmem>>, vector<8x1x8xbf16>
    tpu.vector_store %arg8[%c1, %c0_9, %c0_10], %6 {strides = array<i32>} : memref<10x16x8xbf16, #tpu.memory_space<vmem>>, vector<8x1x8xbf16>,
    %c1_11 = arith.constant 1 : index
    %c9_12 = arith.constant 9 : index
    %c0_13 = arith.constant 0 : index
    %8 = vector.load %arg8[%c1_11, %c9_12, %c0_13] : memref<10x16x8xbf16, #tpu.memory_space<vmem>>, vector<8x1x8xbf16>
    tpu.vector_store %arg8[%c1_11, %c9_12, %c0_13], %6 {strides = array<i32>} : memref<10x16x8xbf16, #tpu.memory_space<vmem>>, vector<8x1x8xbf16>,
    %c1_14 = arith.constant 1 : index
    %c1_15 = arith.constant 1 : index
    %c0_16 = arith.constant 0 : index
    %9 = vector.load %arg8[%c1_14, %c1_15, %c0_16] : memref<10x16x8xbf16, #tpu.memory_space<vmem>>, vector<8x8x8xbf16>
    tpu.vector_store %arg8[%c1_14, %c1_15, %c0_16], %2 {strides = array<i32>} : memref<10x16x8xbf16, #tpu.memory_space<vmem>>, vector<8x8x8xbf16>,
    %c0_17 = arith.constant 0 : index
    %c0_18 = arith.constant 0 : index
    %c0_19 = arith.constant 0 : index
    %10 = vector.load %arg8[%c0_17, %c0_18, %c0_19] : memref<10x16x8xbf16, #tpu.memory_space<vmem>>, vector<10x8x8xbf16>
    %c0_20 = arith.constant 0 : index
    %c1_21 = arith.constant 1 : index
    %c0_22 = arith.constant 0 : index
    %11 = vector.load %arg8[%c0_20, %c1_21, %c0_22] : memref<10x16x8xbf16, #tpu.memory_space<vmem>>, vector<10x8x8xbf16>
    %c0_23 = arith.constant 0 : index
    %c2 = arith.constant 2 : index
    %c0_24 = arith.constant 0 : index
    %12 = vector.load %arg8[%c0_23, %c2, %c0_24] : memref<10x16x8xbf16, #tpu.memory_space<vmem>>, vector<10x8x8xbf16>
    %13 = vector.extract_strided_slice %10 {offsets = [0, 0, 0], sizes = [8, 8, 8], strides = [1, 1, 1]} : vector<10x8x8xbf16> to vector<8x8x8xbf16>
    %14 = vector.extract_strided_slice %11 {offsets = [0, 0, 0], sizes = [8, 8, 8], strides = [1, 1, 1]} : vector<10x8x8xbf16> to vector<8x8x8xbf16>
    %15 = vector.extract_strided_slice %12 {offsets = [0, 0, 0], sizes = [8, 8, 8], strides = [1, 1, 1]} : vector<10x8x8xbf16> to vector<8x8x8xbf16>
    %16 = vector.extract_strided_slice %10 {offsets = [1, 0, 0], sizes = [8, 8, 8], strides = [1, 1, 1]} : vector<10x8x8xbf16> to vector<8x8x8xbf16>
    %17 = vector.extract_strided_slice %11 {offsets = [1, 0, 0], sizes = [8, 8, 8], strides = [1, 1, 1]} : vector<10x8x8xbf16> to vector<8x8x8xbf16>
    %18 = vector.extract_strided_slice %12 {offsets = [1, 0, 0], sizes = [8, 8, 8], strides = [1, 1, 1]} : vector<10x8x8xbf16> to vector<8x8x8xbf16>
    %19 = vector.extract_strided_slice %10 {offsets = [2, 0, 0], sizes = [8, 8, 8], strides = [1, 1, 1]} : vector<10x8x8xbf16> to vector<8x8x8xbf16>
    %20 = vector.extract_strided_slice %11 {offsets = [2, 0, 0], sizes = [8, 8, 8], strides = [1, 1, 1]} : vector<10x8x8xbf16> to vector<8x8x8xbf16>
    %21 = vector.extract_strided_slice %12 {offsets = [2, 0, 0], sizes = [8, 8, 8], strides = [1, 1, 1]} : vector<10x8x8xbf16> to vector<8x8x8xbf16>
    %22 = tpu.concatenate %13, %14, %15, %16, %17, %18, %19, %20, %21 in 2 : vector<8x8x8xbf16>, vector<8x8x8xbf16>, vector<8x8x8xbf16>, vector<8x8x8xbf16>, vector<8x8x8xbf16>, vector<8x8x8xbf16>, vector<8x8x8xbf16>, vector<8x8x8xbf16>, vector<8x8x8xbf16> -> vector<8x8x72xbf16>
    %23 = vector.shape_cast %22 : vector<8x8x72xbf16> to vector<64x72xbf16>
    %c0_25 = arith.constant 0 : index
    %c0_26 = arith.constant 0 : index
    %24 = vector.load %arg4[%c0_25, %c0_26] : memref<72x128xbf16, #tpu.memory_space<vmem>>, vector<72x128xbf16>
    %cst_27 = arith.constant dense<0.000000e+00> : vector<64x128xf32>
    %25 = tpu.matmul %23, %24, %cst_27 {dimension_numbers = #tpu.dot_dimension_numbers<[1], [0], [0], [1], [0, 0, 1, 1], [], []>} : vector<64x72xbf16>, vector<72x128xbf16>, vector<64x128xf32> -> vector<64x128xf32>
    %26 = vector.shape_cast %25 : vector<64x128xf32> to vector<1x8x8x128xf32>
    %c0_28 = arith.constant 0 : index
    %c0_29 = arith.constant 0 : index
    %c0_30 = arith.constant 0 : index
    %c0_31 = arith.constant 0 : index
    %27 = vector.load %arg5[%c0_28, %c0_29, %c0_30, %c0_31] : memref<1x8x8x128xf32, #tpu.memory_space<vmem>>, vector<1x8x8x128xf32>
    tpu.vector_store %arg5[%c0_28, %c0_29, %c0_30, %c0_31], %26 {strides = array<i32>} : memref<1x8x8x128xf32, #tpu.memory_space<vmem>>, vector<1x8x8x128xf32>,
    %cst_32 = arith.constant dense<0.000000e+00> : vector<128xf32>
    %28 = vector.multi_reduction <add>, %25, %cst_32 [0] : vector<64x128xf32> to vector<128xf32>
    %29 = vector.shape_cast %28 : vector<128xf32> to vector<1x128xf32>
    %30 = vector.shape_cast %29 : vector<1x128xf32> to vector<1x1x128xf32>
    %c0_33 = arith.constant 0 : index
    %c0_34 = arith.constant 0 : index
    %c0_35 = arith.constant 0 : index
    %31 = vector.load %arg6[%c0_33, %c0_34, %c0_35] : memref<1x1x128xf32, #tpu.memory_space<vmem>>, vector<1x1x128xf32>
    tpu.vector_store %arg6[%c0_33, %c0_34, %c0_35], %30 {strides = array<i32>} : memref<1x1x128xf32, #tpu.memory_space<vmem>>, vector<1x1x128xf32>,
    %32 = arith.mulf %25, %25 : vector<64x128xf32>
    %cst_36 = arith.constant dense<0.000000e+00> : vector<128xf32>
    %33 = vector.multi_reduction <add>, %32, %cst_36 [0] : vector<64x128xf32> to vector<128xf32>
    %34 = vector.shape_cast %33 : vector<128xf32> to vector<1x128xf32>
    %35 = vector.shape_cast %34 : vector<1x128xf32> to vector<1x1x128xf32>
    %c0_37 = arith.constant 0 : index
    %c0_38 = arith.constant 0 : index
    %c0_39 = arith.constant 0 : index
    %36 = vector.load %arg7[%c0_37, %c0_38, %c0_39] : memref<1x1x128xf32, #tpu.memory_space<vmem>>, vector<1x1x128xf32>
    tpu.vector_store %arg7[%c0_37, %c0_38, %c0_39], %35 {strides = array<i32>} : memref<1x1x128xf32, #tpu.memory_space<vmem>>, vector<1x1x128xf32>,
    return
  }
  func.func @transform_0(%arg0: i32) -> (i32, i32) {
    %c0_i32 = arith.constant 0 : i32
    %c0_i32_0 = arith.constant 0 : i32
    %c0_i32_1 = arith.constant 0 : i32
    return %c0_i32, %c0_i32_0 : i32, i32
  }
  func.func @transform_1(%arg0: i32) -> (i32, i32) {
    %c0_i32 = arith.constant 0 : i32
    %c0_i32_0 = arith.constant 0 : i32
    %c0_i32_1 = arith.constant 0 : i32
    return %c0_i32, %c0_i32_0 : i32, i32
  }
  func.func @transform_2(%arg0: i32) -> (i32, i32, i32, i32) {
    %c0_i32 = arith.constant 0 : i32
    %c0_i32_0 = arith.constant 0 : i32
    %c0_i32_1 = arith.constant 0 : i32
    %c0_i32_2 = arith.constant 0 : i32
    return %arg0, %c0_i32, %c0_i32_0, %c0_i32_1 : i32, i32, i32, i32
  }
  func.func @transform_3(%arg0: i32) -> (i32, i32) {
    %c0_i32 = arith.constant 0 : i32
    %c0_i32_0 = arith.constant 0 : i32
    %c0_i32_1 = arith.constant 0 : i32
    return %c0_i32, %c0_i32_0 : i32, i32
  }
  func.func @transform_4(%arg0: i32) -> (i32, i32, i32, i32) {
    %c0_i32 = arith.constant 0 : i32
    %c0_i32_0 = arith.constant 0 : i32
    %c0_i32_1 = arith.constant 0 : i32
    %c0_i32_2 = arith.constant 0 : i32
    return %arg0, %c0_i32, %c0_i32_0, %c0_i32_1 : i32, i32, i32, i32
  }
  func.func @transform_5(%arg0: i32) -> (i32, i32, i32) {
    %c0_i32 = arith.constant 0 : i32
    %c0_i32_0 = arith.constant 0 : i32
    %c0_i32_1 = arith.constant 0 : i32
    return %arg0, %c0_i32, %c0_i32_0 : i32, i32, i32
  }
  func.func @transform_6(%arg0: i32) -> (i32, i32, i32) {
    %c0_i32 = arith.constant 0 : i32
    %c0_i32_0 = arith.constant 0 : i32
    %c0_i32_1 = arith.constant 0 : i32
    return %arg0, %c0_i32, %c0_i32_0 : i32, i32, i32
  }
}

module attributes {stable_mosaic.version = 11 : i64} {
  func.func @_bn_relu_pool_kernel(%arg0: i32, %arg1: memref<1x128xf32, #tpu.memory_space<vmem>>, %arg2: memref<1x128xf32, #tpu.memory_space<vmem>>, %arg3: memref<1x8x8x128xf32, #tpu.memory_space<vmem>>, %arg4: memref<1x4x4x128xf32, #tpu.memory_space<vmem>>) attributes {dimension_semantics = [#tpu.dimension_semantics<parallel>], iteration_bounds = array<i64: 2>, scalar_prefetch = 0 : i64, scratch_operands = 0 : i64, tpu.core_type = #tpu.core_type<tc>, window_params = [{pipeline_mode = #tpu.pipeline_mode<synchronous>, transform_indices = @transform_0, window_bounds = array<i64: 1, 128>}, {pipeline_mode = #tpu.pipeline_mode<synchronous>, transform_indices = @transform_1, window_bounds = array<i64: 1, 128>}, {transform_indices = @transform_2, window_bounds = array<i64: 1, 8, 8, 128>}, {transform_indices = @transform_3, window_bounds = array<i64: 1, 4, 4, 128>}]} {
    %c0 = arith.constant 0 : index
    %c0_0 = arith.constant 0 : index
    %c0_1 = arith.constant 0 : index
    %c0_2 = arith.constant 0 : index
    %0 = vector.load %arg3[%c0, %c0_0, %c0_1, %c0_2] : memref<1x8x8x128xf32, #tpu.memory_space<vmem>>, vector<1x8x8x128xf32>
    %c0_3 = arith.constant 0 : index
    %c0_4 = arith.constant 0 : index
    %1 = vector.load %arg1[%c0_3, %c0_4] : memref<1x128xf32, #tpu.memory_space<vmem>>, vector<1x128xf32>
    %2 = vector.shape_cast %1 : vector<1x128xf32> to vector<1x1x1x128xf32>
    %3 = vector.broadcast %2 : vector<1x1x1x128xf32> to vector<1x8x8x128xf32>
    %4 = arith.mulf %0, %3 : vector<1x8x8x128xf32>
    %c0_5 = arith.constant 0 : index
    %c0_6 = arith.constant 0 : index
    %5 = vector.load %arg2[%c0_5, %c0_6] : memref<1x128xf32, #tpu.memory_space<vmem>>, vector<1x128xf32>
    %6 = vector.shape_cast %5 : vector<1x128xf32> to vector<1x1x1x128xf32>
    %7 = vector.broadcast %6 : vector<1x1x1x128xf32> to vector<1x8x8x128xf32>
    %8 = arith.addf %4, %7 : vector<1x8x8x128xf32>
    %cst = arith.constant 0.000000e+00 : f32
    %9 = vector.broadcast %cst : f32 to vector<1x8x8x128xf32>
    %10 = arith.maximumf %8, %9 : vector<1x8x8x128xf32>
    %11 = vector.shape_cast %10 : vector<1x8x8x128xf32> to vector<4x2x8x128xf32>
    %cst_7 = arith.constant dense<0xFF800000> : vector<4x8x128xf32>
    %12 = vector.multi_reduction <maximumf>, %11, %cst_7 [1] : vector<4x2x8x128xf32> to vector<4x8x128xf32>
    %13 = vector.shape_cast %12 : vector<4x8x128xf32> to vector<4x4x2x128xf32>
    %cst_8 = arith.constant dense<0xFF800000> : vector<4x4x128xf32>
    %14 = vector.multi_reduction <maximumf>, %13, %cst_8 [2] : vector<4x4x2x128xf32> to vector<4x4x128xf32>
    %15 = vector.shape_cast %14 : vector<4x4x128xf32> to vector<1x4x4x128xf32>
    %c0_9 = arith.constant 0 : index
    %c0_10 = arith.constant 0 : index
    %c0_11 = arith.constant 0 : index
    %c0_12 = arith.constant 0 : index
    %16 = vector.load %arg4[%c0_9, %c0_10, %c0_11, %c0_12] : memref<1x4x4x128xf32, #tpu.memory_space<vmem>>, vector<1x4x4x128xf32>
    tpu.vector_store %arg4[%c0_9, %c0_10, %c0_11, %c0_12], %15 {strides = array<i32>} : memref<1x4x4x128xf32, #tpu.memory_space<vmem>>, vector<1x4x4x128xf32>,
    return
  }
  func.func @transform_0(%arg0: i32) -> (i32, i32) {
    %c0_i32 = arith.constant 0 : i32
    %c0_i32_0 = arith.constant 0 : i32
    %c0_i32_1 = arith.constant 0 : i32
    return %c0_i32, %c0_i32_0 : i32, i32
  }
  func.func @transform_1(%arg0: i32) -> (i32, i32) {
    %c0_i32 = arith.constant 0 : i32
    %c0_i32_0 = arith.constant 0 : i32
    %c0_i32_1 = arith.constant 0 : i32
    return %c0_i32, %c0_i32_0 : i32, i32
  }
  func.func @transform_2(%arg0: i32) -> (i32, i32, i32, i32) {
    %c0_i32 = arith.constant 0 : i32
    %c0_i32_0 = arith.constant 0 : i32
    %c0_i32_1 = arith.constant 0 : i32
    %c0_i32_2 = arith.constant 0 : i32
    return %arg0, %c0_i32, %c0_i32_0, %c0_i32_1 : i32, i32, i32, i32
  }
  func.func @transform_3(%arg0: i32) -> (i32, i32, i32, i32) {
    %c0_i32 = arith.constant 0 : i32
    %c0_i32_0 = arith.constant 0 : i32
    %c0_i32_1 = arith.constant 0 : i32
    %c0_i32_2 = arith.constant 0 : i32
    return %arg0, %c0_i32, %c0_i32_0, %c0_i32_1 : i32, i32, i32, i32
  }
}

module attributes {stable_mosaic.version = 11 : i64} {
  func.func @_conv3x3_kernel(%arg0: i32, %arg1: memref<1x128xf32, #tpu.memory_space<vmem>>, %arg2: memref<1x128xf32, #tpu.memory_space<vmem>>, %arg3: memref<1x8x8x128xf32, #tpu.memory_space<vmem>>, %arg4: memref<144x128xbf16, #tpu.memory_space<vmem>>, %arg5: memref<1x8x8x128xf32, #tpu.memory_space<vmem>>, %arg6: memref<1x1x128xf32, #tpu.memory_space<vmem>>, %arg7: memref<1x1x128xf32, #tpu.memory_space<vmem>>, %arg8: memref<10x16x16xbf16, #tpu.memory_space<vmem>>) attributes {dimension_semantics = [#tpu.dimension_semantics<parallel>], iteration_bounds = array<i64: 2>, scalar_prefetch = 0 : i64, scratch_operands = 1 : i64, tpu.core_type = #tpu.core_type<tc>, window_params = [{pipeline_mode = #tpu.pipeline_mode<synchronous>, transform_indices = @transform_0, window_bounds = array<i64: 1, 128>}, {pipeline_mode = #tpu.pipeline_mode<synchronous>, transform_indices = @transform_1, window_bounds = array<i64: 1, 128>}, {transform_indices = @transform_2, window_bounds = array<i64: 1, 8, 8, 128>}, {pipeline_mode = #tpu.pipeline_mode<synchronous>, transform_indices = @transform_3, window_bounds = array<i64: 144, 128>}, {transform_indices = @transform_4, window_bounds = array<i64: 1, 8, 8, 128>}, {transform_indices = @transform_5, window_bounds = array<i64: 1, 1, 128>}, {transform_indices = @transform_6, window_bounds = array<i64: 1, 1, 128>}]} {
    %c0 = arith.constant 0 : index
    %c0_0 = arith.constant 0 : index
    %c0_1 = arith.constant 0 : index
    %c0_2 = arith.constant 0 : index
    %0 = vector.load %arg3[%c0, %c0_0, %c0_1, %c0_2] : memref<1x8x8x128xf32, #tpu.memory_space<vmem>>, vector<1x8x8x16xf32>
    %1 = vector.shape_cast %0 : vector<1x8x8x16xf32> to vector<8x8x16xf32>
    %c0_3 = arith.constant 0 : index
    %c0_4 = arith.constant 0 : index
    %2 = vector.load %arg1[%c0_3, %c0_4] : memref<1x128xf32, #tpu.memory_space<vmem>>, vector<1x16xf32>
    %3 = vector.shape_cast %2 : vector<1x16xf32> to vector<1x1x16xf32>
    %4 = vector.broadcast %3 : vector<1x1x16xf32> to vector<8x8x16xf32>
    %5 = arith.mulf %1, %4 : vector<8x8x16xf32>
    %c0_5 = arith.constant 0 : index
    %c0_6 = arith.constant 0 : index
    %6 = vector.load %arg2[%c0_5, %c0_6] : memref<1x128xf32, #tpu.memory_space<vmem>>, vector<1x16xf32>
    %7 = vector.shape_cast %6 : vector<1x16xf32> to vector<1x1x16xf32>
    %8 = vector.broadcast %7 : vector<1x1x16xf32> to vector<8x8x16xf32>
    %9 = arith.addf %5, %8 : vector<8x8x16xf32>
    %cst = arith.constant 0.000000e+00 : f32
    %10 = vector.broadcast %cst : f32 to vector<8x8x16xf32>
    %11 = arith.maximumf %9, %10 : vector<8x8x16xf32>
    %12 = arith.truncf %11 : vector<8x8x16xf32> to vector<8x8x16xbf16>
    %cst_7 = arith.constant 0.000000e+00 : bf16
    %13 = vector.broadcast %cst_7 : bf16 to vector<1x16x16xbf16>
    %c0_8 = arith.constant 0 : index
    %c0_9 = arith.constant 0 : index
    %c0_10 = arith.constant 0 : index
    %14 = vector.load %arg8[%c0_8, %c0_9, %c0_10] : memref<10x16x16xbf16, #tpu.memory_space<vmem>>, vector<1x16x16xbf16>
    tpu.vector_store %arg8[%c0_8, %c0_9, %c0_10], %13 {strides = array<i32>} : memref<10x16x16xbf16, #tpu.memory_space<vmem>>, vector<1x16x16xbf16>,
    %c9 = arith.constant 9 : index
    %c0_11 = arith.constant 0 : index
    %c0_12 = arith.constant 0 : index
    %15 = vector.load %arg8[%c9, %c0_11, %c0_12] : memref<10x16x16xbf16, #tpu.memory_space<vmem>>, vector<1x16x16xbf16>
    tpu.vector_store %arg8[%c9, %c0_11, %c0_12], %13 {strides = array<i32>} : memref<10x16x16xbf16, #tpu.memory_space<vmem>>, vector<1x16x16xbf16>,
    %cst_13 = arith.constant 0.000000e+00 : bf16
    %16 = vector.broadcast %cst_13 : bf16 to vector<8x1x16xbf16>
    %c1 = arith.constant 1 : index
    %c0_14 = arith.constant 0 : index
    %c0_15 = arith.constant 0 : index
    %17 = vector.load %arg8[%c1, %c0_14, %c0_15] : memref<10x16x16xbf16, #tpu.memory_space<vmem>>, vector<8x1x16xbf16>
    tpu.vector_store %arg8[%c1, %c0_14, %c0_15], %16 {strides = array<i32>} : memref<10x16x16xbf16, #tpu.memory_space<vmem>>, vector<8x1x16xbf16>,
    %c1_16 = arith.constant 1 : index
    %c9_17 = arith.constant 9 : index
    %c0_18 = arith.constant 0 : index
    %18 = vector.load %arg8[%c1_16, %c9_17, %c0_18] : memref<10x16x16xbf16, #tpu.memory_space<vmem>>, vector<8x1x16xbf16>
    tpu.vector_store %arg8[%c1_16, %c9_17, %c0_18], %16 {strides = array<i32>} : memref<10x16x16xbf16, #tpu.memory_space<vmem>>, vector<8x1x16xbf16>,
    %c1_19 = arith.constant 1 : index
    %c1_20 = arith.constant 1 : index
    %c0_21 = arith.constant 0 : index
    %19 = vector.load %arg8[%c1_19, %c1_20, %c0_21] : memref<10x16x16xbf16, #tpu.memory_space<vmem>>, vector<8x8x16xbf16>
    tpu.vector_store %arg8[%c1_19, %c1_20, %c0_21], %12 {strides = array<i32>} : memref<10x16x16xbf16, #tpu.memory_space<vmem>>, vector<8x8x16xbf16>,
    %c0_22 = arith.constant 0 : index
    %c0_23 = arith.constant 0 : index
    %c0_24 = arith.constant 0 : index
    %20 = vector.load %arg8[%c0_22, %c0_23, %c0_24] : memref<10x16x16xbf16, #tpu.memory_space<vmem>>, vector<10x8x16xbf16>
    %c0_25 = arith.constant 0 : index
    %c1_26 = arith.constant 1 : index
    %c0_27 = arith.constant 0 : index
    %21 = vector.load %arg8[%c0_25, %c1_26, %c0_27] : memref<10x16x16xbf16, #tpu.memory_space<vmem>>, vector<10x8x16xbf16>
    %c0_28 = arith.constant 0 : index
    %c2 = arith.constant 2 : index
    %c0_29 = arith.constant 0 : index
    %22 = vector.load %arg8[%c0_28, %c2, %c0_29] : memref<10x16x16xbf16, #tpu.memory_space<vmem>>, vector<10x8x16xbf16>
    %23 = vector.extract_strided_slice %20 {offsets = [0, 0, 0], sizes = [8, 8, 16], strides = [1, 1, 1]} : vector<10x8x16xbf16> to vector<8x8x16xbf16>
    %24 = vector.extract_strided_slice %21 {offsets = [0, 0, 0], sizes = [8, 8, 16], strides = [1, 1, 1]} : vector<10x8x16xbf16> to vector<8x8x16xbf16>
    %25 = vector.extract_strided_slice %22 {offsets = [0, 0, 0], sizes = [8, 8, 16], strides = [1, 1, 1]} : vector<10x8x16xbf16> to vector<8x8x16xbf16>
    %26 = vector.extract_strided_slice %20 {offsets = [1, 0, 0], sizes = [8, 8, 16], strides = [1, 1, 1]} : vector<10x8x16xbf16> to vector<8x8x16xbf16>
    %27 = vector.extract_strided_slice %21 {offsets = [1, 0, 0], sizes = [8, 8, 16], strides = [1, 1, 1]} : vector<10x8x16xbf16> to vector<8x8x16xbf16>
    %28 = vector.extract_strided_slice %22 {offsets = [1, 0, 0], sizes = [8, 8, 16], strides = [1, 1, 1]} : vector<10x8x16xbf16> to vector<8x8x16xbf16>
    %29 = vector.extract_strided_slice %20 {offsets = [2, 0, 0], sizes = [8, 8, 16], strides = [1, 1, 1]} : vector<10x8x16xbf16> to vector<8x8x16xbf16>
    %30 = vector.extract_strided_slice %21 {offsets = [2, 0, 0], sizes = [8, 8, 16], strides = [1, 1, 1]} : vector<10x8x16xbf16> to vector<8x8x16xbf16>
    %31 = vector.extract_strided_slice %22 {offsets = [2, 0, 0], sizes = [8, 8, 16], strides = [1, 1, 1]} : vector<10x8x16xbf16> to vector<8x8x16xbf16>
    %32 = tpu.concatenate %23, %24, %25, %26, %27, %28, %29, %30, %31 in 2 : vector<8x8x16xbf16>, vector<8x8x16xbf16>, vector<8x8x16xbf16>, vector<8x8x16xbf16>, vector<8x8x16xbf16>, vector<8x8x16xbf16>, vector<8x8x16xbf16>, vector<8x8x16xbf16>, vector<8x8x16xbf16> -> vector<8x8x144xbf16>
    %33 = vector.shape_cast %32 : vector<8x8x144xbf16> to vector<64x144xbf16>
    %c0_30 = arith.constant 0 : index
    %c0_31 = arith.constant 0 : index
    %34 = vector.load %arg4[%c0_30, %c0_31] : memref<144x128xbf16, #tpu.memory_space<vmem>>, vector<144x128xbf16>
    %cst_32 = arith.constant dense<0.000000e+00> : vector<64x128xf32>
    %35 = tpu.matmul %33, %34, %cst_32 {dimension_numbers = #tpu.dot_dimension_numbers<[1], [0], [0], [1], [0, 0, 1, 1], [], []>} : vector<64x144xbf16>, vector<144x128xbf16>, vector<64x128xf32> -> vector<64x128xf32>
    %36 = vector.shape_cast %35 : vector<64x128xf32> to vector<1x8x8x128xf32>
    %c0_33 = arith.constant 0 : index
    %c0_34 = arith.constant 0 : index
    %c0_35 = arith.constant 0 : index
    %c0_36 = arith.constant 0 : index
    %37 = vector.load %arg5[%c0_33, %c0_34, %c0_35, %c0_36] : memref<1x8x8x128xf32, #tpu.memory_space<vmem>>, vector<1x8x8x128xf32>
    tpu.vector_store %arg5[%c0_33, %c0_34, %c0_35, %c0_36], %36 {strides = array<i32>} : memref<1x8x8x128xf32, #tpu.memory_space<vmem>>, vector<1x8x8x128xf32>,
    %cst_37 = arith.constant dense<0.000000e+00> : vector<128xf32>
    %38 = vector.multi_reduction <add>, %35, %cst_37 [0] : vector<64x128xf32> to vector<128xf32>
    %39 = vector.shape_cast %38 : vector<128xf32> to vector<1x128xf32>
    %40 = vector.shape_cast %39 : vector<1x128xf32> to vector<1x1x128xf32>
    %c0_38 = arith.constant 0 : index
    %c0_39 = arith.constant 0 : index
    %c0_40 = arith.constant 0 : index
    %41 = vector.load %arg6[%c0_38, %c0_39, %c0_40] : memref<1x1x128xf32, #tpu.memory_space<vmem>>, vector<1x1x128xf32>
    tpu.vector_store %arg6[%c0_38, %c0_39, %c0_40], %40 {strides = array<i32>} : memref<1x1x128xf32, #tpu.memory_space<vmem>>, vector<1x1x128xf32>,
    %42 = arith.mulf %35, %35 : vector<64x128xf32>
    %cst_41 = arith.constant dense<0.000000e+00> : vector<128xf32>
    %43 = vector.multi_reduction <add>, %42, %cst_41 [0] : vector<64x128xf32> to vector<128xf32>
    %44 = vector.shape_cast %43 : vector<128xf32> to vector<1x128xf32>
    %45 = vector.shape_cast %44 : vector<1x128xf32> to vector<1x1x128xf32>
    %c0_42 = arith.constant 0 : index
    %c0_43 = arith.constant 0 : index
    %c0_44 = arith.constant 0 : index
    %46 = vector.load %arg7[%c0_42, %c0_43, %c0_44] : memref<1x1x128xf32, #tpu.memory_space<vmem>>, vector<1x1x128xf32>
    tpu.vector_store %arg7[%c0_42, %c0_43, %c0_44], %45 {strides = array<i32>} : memref<1x1x128xf32, #tpu.memory_space<vmem>>, vector<1x1x128xf32>,
    return
  }
  func.func @transform_0(%arg0: i32) -> (i32, i32) {
    %c0_i32 = arith.constant 0 : i32
    %c0_i32_0 = arith.constant 0 : i32
    %c0_i32_1 = arith.constant 0 : i32
    return %c0_i32, %c0_i32_0 : i32, i32
  }
  func.func @transform_1(%arg0: i32) -> (i32, i32) {
    %c0_i32 = arith.constant 0 : i32
    %c0_i32_0 = arith.constant 0 : i32
    %c0_i32_1 = arith.constant 0 : i32
    return %c0_i32, %c0_i32_0 : i32, i32
  }
  func.func @transform_2(%arg0: i32) -> (i32, i32, i32, i32) {
    %c0_i32 = arith.constant 0 : i32
    %c0_i32_0 = arith.constant 0 : i32
    %c0_i32_1 = arith.constant 0 : i32
    %c0_i32_2 = arith.constant 0 : i32
    return %arg0, %c0_i32, %c0_i32_0, %c0_i32_1 : i32, i32, i32, i32
  }
  func.func @transform_3(%arg0: i32) -> (i32, i32) {
    %c0_i32 = arith.constant 0 : i32
    %c0_i32_0 = arith.constant 0 : i32
    %c0_i32_1 = arith.constant 0 : i32
    return %c0_i32, %c0_i32_0 : i32, i32
  }
  func.func @transform_4(%arg0: i32) -> (i32, i32, i32, i32) {
    %c0_i32 = arith.constant 0 : i32
    %c0_i32_0 = arith.constant 0 : i32
    %c0_i32_1 = arith.constant 0 : i32
    %c0_i32_2 = arith.constant 0 : i32
    return %arg0, %c0_i32, %c0_i32_0, %c0_i32_1 : i32, i32, i32, i32
  }
  func.func @transform_5(%arg0: i32) -> (i32, i32, i32) {
    %c0_i32 = arith.constant 0 : i32
    %c0_i32_0 = arith.constant 0 : i32
    %c0_i32_1 = arith.constant 0 : i32
    return %arg0, %c0_i32, %c0_i32_0 : i32, i32, i32
  }
  func.func @transform_6(%arg0: i32) -> (i32, i32, i32) {
    %c0_i32 = arith.constant 0 : i32
    %c0_i32_0 = arith.constant 0 : i32
    %c0_i32_1 = arith.constant 0 : i32
    return %arg0, %c0_i32, %c0_i32_0 : i32, i32, i32
  }
}

module attributes {stable_mosaic.version = 11 : i64} {
  func.func @_mlp_kernel(%arg0: i32, %arg1: memref<2x512xf32, #tpu.memory_space<vmem>>, %arg2: memref<512x128xbf16, #tpu.memory_space<vmem>>, %arg3: memref<1x128xf32, #tpu.memory_space<vmem>>, %arg4: memref<128x128xbf16, #tpu.memory_space<vmem>>, %arg5: memref<1x128xf32, #tpu.memory_space<vmem>>, %arg6: memref<128x128xbf16, #tpu.memory_space<vmem>>, %arg7: memref<1x128xf32, #tpu.memory_space<vmem>>, %arg8: memref<2x128xf32, #tpu.memory_space<vmem>>, %arg9: memref<2x128xf32, #tpu.memory_space<vmem>>) attributes {dimension_semantics = [#tpu.dimension_semantics<arbitrary>], iteration_bounds = array<i64: 4>, scalar_prefetch = 0 : i64, scratch_operands = 1 : i64, tpu.core_type = #tpu.core_type<tc>, window_params = [{transform_indices = @transform_0, window_bounds = array<i64: 2, 512>}, {transform_indices = @transform_1, window_bounds = array<i64: 512, 128>}, {pipeline_mode = #tpu.pipeline_mode<synchronous>, transform_indices = @transform_2, window_bounds = array<i64: 1, 128>}, {pipeline_mode = #tpu.pipeline_mode<synchronous>, transform_indices = @transform_3, window_bounds = array<i64: 128, 128>}, {pipeline_mode = #tpu.pipeline_mode<synchronous>, transform_indices = @transform_4, window_bounds = array<i64: 1, 128>}, {pipeline_mode = #tpu.pipeline_mode<synchronous>, transform_indices = @transform_5, window_bounds = array<i64: 128, 128>}, {pipeline_mode = #tpu.pipeline_mode<synchronous>, transform_indices = @transform_6, window_bounds = array<i64: 1, 128>}, {pipeline_mode = #tpu.pipeline_mode<synchronous>, transform_indices = @transform_7, window_bounds = array<i64: 2, 128>}]} {
    %c0_i32 = arith.constant 0 : i32
    %0 = arith.cmpi eq, %arg0, %c0_i32 : i32
    %1 = arith.extui %0 : i1 to i32
    %c0_i32_0 = arith.constant 0 : i32
    %2 = arith.cmpi ne, %1, %c0_i32_0 : i32
    scf.if %2 {
      %cst_9 = arith.constant 0.000000e+00 : f32
      %13 = vector.broadcast %cst_9 : f32 to vector<2x128xf32>
      %c0_10 = arith.constant 0 : index
      %c0_11 = arith.constant 0 : index
      %14 = vector.load %arg9[%c0_10, %c0_11] : memref<2x128xf32, #tpu.memory_space<vmem>>, vector<2x128xf32>
      tpu.vector_store %arg9[%c0_10, %c0_11], %13 {strides = array<i32>} : memref<2x128xf32, #tpu.memory_space<vmem>>, vector<2x128xf32>,
    } else {
    }
    %c0 = arith.constant 0 : index
    %c0_1 = arith.constant 0 : index
    %3 = vector.load %arg9[%c0, %c0_1] : memref<2x128xf32, #tpu.memory_space<vmem>>, vector<2x128xf32>
    %c0_2 = arith.constant 0 : index
    %c0_3 = arith.constant 0 : index
    %4 = vector.load %arg1[%c0_2, %c0_3] : memref<2x512xf32, #tpu.memory_space<vmem>>, vector<2x512xf32>
    %5 = arith.truncf %4 : vector<2x512xf32> to vector<2x512xbf16>
    %c0_4 = arith.constant 0 : index
    %c0_5 = arith.constant 0 : index
    %6 = vector.load %arg2[%c0_4, %c0_5] : memref<512x128xbf16, #tpu.memory_space<vmem>>, vector<512x128xbf16>
    %cst = arith.constant dense<0.000000e+00> : vector<2x128xf32>
    %7 = tpu.matmul %5, %6, %cst {dimension_numbers = #tpu.dot_dimension_numbers<[1], [0], [0], [1], [0, 0, 1, 1], [], []>} : vector<2x512xbf16>, vector<512x128xbf16>, vector<2x128xf32> -> vector<2x128xf32>
    %8 = arith.addf %3, %7 : vector<2x128xf32>
    %c0_6 = arith.constant 0 : index
    %c0_7 = arith.constant 0 : index
    %9 = vector.load %arg9[%c0_6, %c0_7] : memref<2x128xf32, #tpu.memory_space<vmem>>, vector<2x128xf32>
    tpu.vector_store %arg9[%c0_6, %c0_7], %8 {strides = array<i32>} : memref<2x128xf32, #tpu.memory_space<vmem>>, vector<2x128xf32>,
    %c3_i32 = arith.constant 3 : i32
    %10 = arith.cmpi eq, %arg0, %c3_i32 : i32
    %11 = arith.extui %10 : i1 to i32
    %c0_i32_8 = arith.constant 0 : i32
    %12 = arith.cmpi ne, %11, %c0_i32_8 : i32
    scf.if %12 {
      %c0_9 = arith.constant 0 : index
      %c0_10 = arith.constant 0 : index
      %13 = vector.load %arg9[%c0_9, %c0_10] : memref<2x128xf32, #tpu.memory_space<vmem>>, vector<2x128xf32>
      %c0_11 = arith.constant 0 : index
      %c0_12 = arith.constant 0 : index
      %14 = vector.load %arg3[%c0_11, %c0_12] : memref<1x128xf32, #tpu.memory_space<vmem>>, vector<1x128xf32>
      %15 = vector.broadcast %14 : vector<1x128xf32> to vector<2x128xf32>
      %16 = arith.addf %13, %15 : vector<2x128xf32>
      %cst_13 = arith.constant 0.000000e+00 : f32
      %17 = vector.broadcast %cst_13 : f32 to vector<2x128xf32>
      %18 = arith.maximumf %16, %17 : vector<2x128xf32>
      %19 = arith.truncf %18 : vector<2x128xf32> to vector<2x128xbf16>
      %c0_14 = arith.constant 0 : index
      %c0_15 = arith.constant 0 : index
      %20 = vector.load %arg4[%c0_14, %c0_15] : memref<128x128xbf16, #tpu.memory_space<vmem>>, vector<128x128xbf16>
      %cst_16 = arith.constant dense<0.000000e+00> : vector<2x128xf32>
      %21 = tpu.matmul %19, %20, %cst_16 {dimension_numbers = #tpu.dot_dimension_numbers<[1], [0], [0], [1], [0, 0, 1, 1], [], []>} : vector<2x128xbf16>, vector<128x128xbf16>, vector<2x128xf32> -> vector<2x128xf32>
      %c0_17 = arith.constant 0 : index
      %c0_18 = arith.constant 0 : index
      %22 = vector.load %arg5[%c0_17, %c0_18] : memref<1x128xf32, #tpu.memory_space<vmem>>, vector<1x128xf32>
      %23 = vector.broadcast %22 : vector<1x128xf32> to vector<2x128xf32>
      %24 = arith.addf %21, %23 : vector<2x128xf32>
      %cst_19 = arith.constant 0.000000e+00 : f32
      %25 = vector.broadcast %cst_19 : f32 to vector<2x128xf32>
      %26 = arith.maximumf %24, %25 : vector<2x128xf32>
      %27 = arith.truncf %26 : vector<2x128xf32> to vector<2x128xbf16>
      %c0_20 = arith.constant 0 : index
      %c0_21 = arith.constant 0 : index
      %28 = vector.load %arg6[%c0_20, %c0_21] : memref<128x128xbf16, #tpu.memory_space<vmem>>, vector<128x128xbf16>
      %cst_22 = arith.constant dense<0.000000e+00> : vector<2x128xf32>
      %29 = tpu.matmul %27, %28, %cst_22 {dimension_numbers = #tpu.dot_dimension_numbers<[1], [0], [0], [1], [0, 0, 1, 1], [], []>} : vector<2x128xbf16>, vector<128x128xbf16>, vector<2x128xf32> -> vector<2x128xf32>
      %c0_23 = arith.constant 0 : index
      %c0_24 = arith.constant 0 : index
      %30 = vector.load %arg7[%c0_23, %c0_24] : memref<1x128xf32, #tpu.memory_space<vmem>>, vector<1x128xf32>
      %31 = vector.broadcast %30 : vector<1x128xf32> to vector<2x128xf32>
      %32 = arith.addf %29, %31 : vector<2x128xf32>
      %c0_25 = arith.constant 0 : index
      %c0_26 = arith.constant 0 : index
      %33 = vector.load %arg8[%c0_25, %c0_26] : memref<2x128xf32, #tpu.memory_space<vmem>>, vector<2x128xf32>
      tpu.vector_store %arg8[%c0_25, %c0_26], %32 {strides = array<i32>} : memref<2x128xf32, #tpu.memory_space<vmem>>, vector<2x128xf32>,
    } else {
    }
    return
  }
  func.func @transform_0(%arg0: i32) -> (i32, i32) {
    %c0_i32 = arith.constant 0 : i32
    %c0_i32_0 = arith.constant 0 : i32
    return %c0_i32, %arg0 : i32, i32
  }
  func.func @transform_1(%arg0: i32) -> (i32, i32) {
    %c0_i32 = arith.constant 0 : i32
    %c0_i32_0 = arith.constant 0 : i32
    return %arg0, %c0_i32 : i32, i32
  }
  func.func @transform_2(%arg0: i32) -> (i32, i32) {
    %c0_i32 = arith.constant 0 : i32
    %c0_i32_0 = arith.constant 0 : i32
    %c0_i32_1 = arith.constant 0 : i32
    return %c0_i32, %c0_i32_0 : i32, i32
  }
  func.func @transform_3(%arg0: i32) -> (i32, i32) {
    %c0_i32 = arith.constant 0 : i32
    %c0_i32_0 = arith.constant 0 : i32
    %c0_i32_1 = arith.constant 0 : i32
    return %c0_i32, %c0_i32_0 : i32, i32
  }
  func.func @transform_4(%arg0: i32) -> (i32, i32) {
    %c0_i32 = arith.constant 0 : i32
    %c0_i32_0 = arith.constant 0 : i32
    %c0_i32_1 = arith.constant 0 : i32
    return %c0_i32, %c0_i32_0 : i32, i32
  }
  func.func @transform_5(%arg0: i32) -> (i32, i32) {
    %c0_i32 = arith.constant 0 : i32
    %c0_i32_0 = arith.constant 0 : i32
    %c0_i32_1 = arith.constant 0 : i32
    return %c0_i32, %c0_i32_0 : i32, i32
  }
  func.func @transform_6(%arg0: i32) -> (i32, i32) {
    %c0_i32 = arith.constant 0 : i32
    %c0_i32_0 = arith.constant 0 : i32
    %c0_i32_1 = arith.constant 0 : i32
    return %c0_i32, %c0_i32_0 : i32, i32
  }
  func.func @transform_7(%arg0: i32) -> (i32, i32) {
    %c0_i32 = arith.constant 0 : i32
    %c0_i32_0 = arith.constant 0 : i32
    %c0_i32_1 = arith.constant 0 : i32
    return %c0_i32, %c0_i32_0 : i32, i32
  }
}

</mosaic_0001>

<bundles_post_ra>
// kernel: vgg_forward.9
= control target key start
LH: loop header
LB: loop body
LE: loop exit
PB: predicated region body
PF: predicated region fallthrough
CT: control target
= control target key end

     0   :  { %s1381_s12 = smov 0   ;;  %s2148_s0 = inlined_call_operand.vmem [shape: f32[1,128], index: 0, kind: input, shape index: {}]   ;;  %s2149_s1 = inlined_call_operand.vmem [shape: f32[1,128], index: 1, kind: input, shape index: {}]   ;;  %s2150_s2 = inlined_call_operand.vmem [shape: f32[2,16,16,128], index: 2, kind: input, shape index: {}]   ;;  %s2151_s3 = inlined_call_operand.vmem [shape: f32[2,8,8,128], index: 3, kind: output, shape index: {}]  }
   0x1 LB: > { %s1328_s13 = sadd.s32 4294967295, %s1358_s12   ;;  %p1332_p0 = scmp.ge.s32.totalorder %s1358_s12, 1  ;;  %s1358_s12 = sphi %s1381_s12, %s13_s12  }
   0x2   : > { %p137_p1 = scmp.lt.s32.totalorder %s1358_s12, 3 }
   0x4   : > { %p138_p2 = pnand %p1332_p0, %p137_p1 }
   0x6   : > { %141 = sbr.rel (%p138_p2) target bundleno = 196 (0xc4), region = 32 }
   0xd   : > { %p161_p3 = scmp.lt.s32.totalorder %s1328_s13, 1  ;;  %v349_v0 = vlaneseq  ;;  %v1360_v1 = vmov 1983009808   ;;  %v1395_v3 = vld [vmem:[%s2148_s0] ss:$0 sm:$0xff]  ;;  %vm681_vm0 = vcmask 1041408  }
   0xe   : > { %v347_v2 = vunpack.c.l.s4 %v1360_v1  ;;  %v1405_v6 = vld [vmem:[%s2149_s1] ss:$0 sm:$0xff]  ;;  %vm1194_vm1 = vcmask 1041409   ;;  %vm1196_vm2 = vcmask 1042434   ;;  %vm1198_vm3 = vcmask 1043459  }
   0xf   : > { %s2217_s13 = smov (!%p161_p3, %s1328_s13), 1  ;;  %v350_v5 = vshrl.u32 %v349_v0, 7  ;;  %vm1200_vm4 = vcmask 1044484   ;;  %vm1202_vm5 = vcmask 1045509   ;;  %vm1204_vm6 = vcmask 1046534  }
  0x10   : > { %s1341_s14 = sshll.u32 %s2217_s13, 8  ;;  %v348_v4 = vunpack.c.0.s8 %v347_v2  ;;  %s1342_s22 = sshll.u32 %s2217_s13, 6  ;;  %vm1206_vm7 = vcmask 1047559  }
  0x11   : > { %s1400_s19 = scalar_lea.vmem %s2150_s2, %s1341_s14  ;;  %s2029_s25 = scalar_lea.vmem %s2151_s3, %s1342_s22 }
  0x12   : > { %v171_v7 = vld [vmem:[%s1400_s19] sm:$0xff]  ;;  %v172_v8 = vld [vmem:[%s1400_s19 + $0x8] sm:$0xff]  ;;  %v173_v9 = vld [vmem:[%s1400_s19 + $0x10] sm:$0xff]  ;;  %v1421_v21 = vsub.s32 %v348_v4, %v350_v5 }
  0x13   : > { %v174_v10 = vld [vmem:[%s1400_s19 + $0x18] sm:$0xff]  ;;  %v175_v11 = vld [vmem:[%s1400_s19 + $0x20] sm:$0xff]  ;;  %v176_v12 = vld [vmem:[%s1400_s19 + $0x28] sm:$0xff]  ;;  %v210_v13 = vmul.f32 %v1395_v3, %v171_v7  ;;  %v211_v14 = vmul.f32 %v1395_v3, %v172_v8  ;;  %v212_v18 = vmul.f32 %v1395_v3, %v173_v9 }
  0x14   : > { %v177_v15 = vld [vmem:[%s1400_s19 + $0x30] sm:$0xff]  ;;  %v178_v16 = vld [vmem:[%s1400_s19 + $0x38] sm:$0xff]  ;;  %v179_v17 = vld [vmem:[%s1400_s19 + $0x40] sm:$0xff]  ;;  %v213_v19 = vmul.f32 %v1395_v3, %v174_v10  ;;  %v214_v20 = vmul.f32 %v1395_v3, %v175_v11  ;;  %v215_v25 = vmul.f32 %v1395_v3, %v176_v12 }
  0x15   : > { %v180_v22 = vld [vmem:[%s1400_s19 + $0x48] sm:$0xff]  ;;  %v181_v23 = vld [vmem:[%s1400_s19 + $0x50] sm:$0xff]  ;;  %v182_v24 = vld [vmem:[%s1400_s19 + $0x58] sm:$0xff]  ;;  %v216_v26 = vmul.f32 %v1395_v3, %v177_v15  ;;  %v217_v27 = vmul.f32 %v1395_v3, %v178_v16  ;;  %v218_v28 = vmul.f32 %v1395_v3, %v179_v17  ;;  %v1437_v35 = vadd.f32 %v1405_v6, %v210_v13 }
  0x16   : > { %v183_v29 = vld [vmem:[%s1400_s19 + $0x60] sm:$0xff]  ;;  %v184_v30 = vld [vmem:[%s1400_s19 + $0x68] sm:$0xff]  ;;  %v185_v31 = vld [vmem:[%s1400_s19 + $0x70] sm:$0xff]  ;;  %v219_v32 = vmul.f32 %v1395_v3, %v180_v22  ;;  %v220_v33 = vmul.f32 %v1395_v3, %v181_v23  ;;  %v221_v34 = vmul.f32 %v1395_v3, %v182_v24  ;;  %v1446_v42 = vadd.f32 %v1405_v6, %v211_v14 }
  0x17   : > { %v186_v36 = vld [vmem:[%s1400_s19 + $0x78] sm:$0xff]  ;;  %v187_v37 = vld [vmem:[%s1400_s19 + $0x80] sm:$0xff]  ;;  %v188_v38 = vld [vmem:[%s1400_s19 + $0x88] sm:$0xff]  ;;  %v222_v39 = vmul.f32 %v1395_v3, %v183_v29  ;;  %v223_v40 = vmul.f32 %v1395_v3, %v184_v30  ;;  %v224_v41 = vmul.f32 %v1395_v3, %v185_v31  ;;  %v1455_v49 = vadd.f32 %v1405_v6, %v212_v18 }
  0x18   : > { %v189_v43 = vld [vmem:[%s1400_s19 + $0x90] sm:$0xff]  ;;  %v190_v44 = vld [vmem:[%s1400_s19 + $0x98] sm:$0xff]  ;;  %v191_v45 = vld [vmem:[%s1400_s19 + $0xa0] sm:$0xff]  ;;  %v225_v46 = vmul.f32 %v1395_v3, %v186_v36  ;;  %v226_v47 = vmul.f32 %v1395_v3, %v187_v37  ;;  %v227_v48 = vmul.f32 %v1395_v3, %v188_v38  ;;  %v1464_v56 = vadd.f32 %v1405_v6, %v213_v19 }
  0x19   : > { %v192_v50 = vld [vmem:[%s1400_s19 + $0xa8] sm:$0xff]  ;;  %v193_v51 = vld [vmem:[%s1400_s19 + $0xb0] sm:$0xff]  ;;  %v194_v52 = vld [vmem:[%s1400_s19 + $0xb8] sm:$0xff]  ;;  %v228_v53 = vmul.f32 %v1395_v3, %v189_v43  ;;  %v229_v54 = vmul.f32 %v1395_v3, %v190_v44  ;;  %v230_v55 = vmul.f32 %v1395_v3, %v191_v45  ;;  %v1473_v63 = vadd.f32 %v1405_v6, %v214_v20 }
  0x1a   : > { %v195_v57 = vld [vmem:[%s1400_s19 + $0xc0] sm:$0xff]  ;;  %v196_v58 = vld [vmem:[%s1400_s19 + $0xc8] sm:$0xff]  ;;  %v197_v59 = vld [vmem:[%s1400_s19 + $0xd0] sm:$0xff]  ;;  %v231_v60 = vmul.f32 %v1395_v3, %v192_v50  ;;  %v232_v61 = vmul.f32 %v1395_v3, %v193_v51  ;;  %v233_v62 = vmul.f32 %v1395_v3, %v194_v52  ;;  %v1482_v8 = vadd.f32 %v1405_v6, %v215_v25 }
  0x1b   : > { %v198_v0 = vld [vmem:[%s1400_s19 + $0xd8] sm:$0xff]  ;;  %v199_v1 = vld [vmem:[%s1400_s19 + $0xe0] sm:$0xff]  ;;  %v200_v2 = vld [vmem:[%s1400_s19 + $0xe8] sm:$0xff]  ;;  %v234_v4 = vmul.f32 %v1395_v3, %v195_v57  ;;  %v235_v5 = vmul.f32 %v1395_v3, %v196_v58  ;;  %v236_v7 = vmul.f32 %v1395_v3, %v197_v59  ;;  %v1490_v14 = vadd.f32 %v1405_v6, %v216_v26 }
  0x1c   : > { %v201_v9 = vld [vmem:[%s1400_s19 + $0xf0] sm:$0xff]  ;;  %v202_v10 = vld [vmem:[%s1400_s19 + $0xf8] sm:$0xff]  ;;  %v237_v11 = vmul.f32 %v1395_v3, %v198_v0  ;;  %v238_v12 = vmul.f32 %v1395_v3, %v199_v1  ;;  %v239_v13 = vmul.f32 %v1395_v3, %v200_v2  ;;  %v256_v17 = vadd.f32 %v1405_v6, %v217_v27 }
  0x1d   : > { %v240_v15 = vmul.f32 %v1395_v3, %v201_v9  ;;  %v241_v16 = vmul.f32 %v1395_v3, %v202_v10  ;;  %v257_v18 = vadd.f32 %v1405_v6, %v218_v28  ;;  %v258_v19 = vadd.f32 %v1405_v6, %v219_v32 }
  0x1e   : > { %v259_v20 = vadd.f32 %v1405_v6, %v220_v33  ;;  %v260_v22 = vadd.f32 %v1405_v6, %v221_v34  ;;  %v261_v23 = vadd.f32 %v1405_v6, %v222_v39  ;;  %v262_v24 = vadd.f32 %v1405_v6, %v223_v40 }
  0x1f   : > { %v263_v25 = vadd.f32 %v1405_v6, %v224_v41  ;;  %v264_v26 = vadd.f32 %v1405_v6, %v225_v46  ;;  %v265_v3 = vadd.f32 %v1405_v6, %v226_v47  ;;  %v266_v27 = vadd.f32 %v1405_v6, %v227_v48 }
  0x20   : > { %v267_v28 = vadd.f32 %v1405_v6, %v228_v53  ;;  %v268_v29 = vadd.f32 %v1405_v6, %v229_v54  ;;  %v269_v30 = vadd.f32 %v1405_v6, %v230_v55  ;;  %v270_v31 = vadd.f32 %v1405_v6, %v231_v60 }
  0x21   : > { %v271_v32 = vadd.f32 %v1405_v6, %v232_v61  ;;  %v272_v33 = vadd.f32 %v1405_v6, %v233_v62  ;;  %v273_v34 = vadd.f32 %v1405_v6, %v234_v4  ;;  %v274_v36 = vadd.f32 %v1405_v6, %v235_v5 }
  0x22   : > { %v275_v37 = vadd.f32 %v1405_v6, %v236_v7  ;;  %v276_v38 = vadd.f32 %v1405_v6, %v237_v11  ;;  %v277_v39 = vadd.f32 %v1405_v6, %v238_v12  ;;  %v278_v40 = vadd.f32 %v1405_v6, %v239_v13 }
  0x23   : > { %v279_v41 = vadd.f32 %v1405_v6, %v240_v15  ;;  %v280_v43 = vadd.f32 %v1405_v6, %v241_v16  ;;  %v281_v44 = vmax.f32 %v1437_v35, 0.0  ;;  %v282_v45 = vmax.f32 %v1446_v42, 0.0 }
  0x24   : > { %v283_v46 = vmax.f32 %v1455_v49, 0.0  ;;  %v284_v47 = vmax.f32 %v1464_v56, 0.0  ;;  %v285_v48 = vmax.f32 %v1473_v63, 0.0  ;;  %v286_v50 = vmax.f32 %v1482_v8, 0.0 }
  0x25   : > { %v287_v51 = vmax.f32 %v1490_v14, 0.0  ;;  %v288_v52 = vmax.f32 %v256_v17, 0.0  ;;  %v289_v53 = vmax.f32 %v257_v18, 0.0  ;;  %v290_v54 = vmax.f32 %v258_v19, 0.0 }
  0x26   : > { %v291_v55 = vmax.f32 %v259_v20, 0.0  ;;  %v292_v57 = vmax.f32 %v260_v22, 0.0  ;;  %v293_v6 = vmax.f32 %v261_v23, 0.0  ;;  %v294_v58 = vmax.f32 %v262_v24, 0.0 }
  0x27   : > { %v295_v35 = vmax.f32 %v263_v25, 0.0  ;;  %v296_v59 = vmax.f32 %v264_v26, 0.0  ;;  %v297_v42 = vmax.f32 %v265_v3, 0.0  ;;  %v298_v60 = vmax.f32 %v266_v27, 0.0 }
  0x28   : > { %v299_v49 = vmax.f32 %v267_v28, 0.0  ;;  %v300_v61 = vmax.f32 %v268_v29, 0.0  ;;  %v301_v56 = vmax.f32 %v269_v30, 0.0  ;;  %v302_v62 = vmax.f32 %v270_v31, 0.0 }
  0x29   : > { %v303_v63 = vmax.f32 %v271_v32, 0.0  ;;  %v304_v0 = vmax.f32 %v272_v33, 0.0  ;;  %v305_v1 = vmax.f32 %v273_v34, 0.0  ;;  %v306_v2 = vmax.f32 %v274_v36, 0.0 }
  0x2a   : > { %v307_v4 = vmax.f32 %v275_v37, 0.0  ;;  %v308_v5 = vmax.f32 %v276_v38, 0.0  ;;  %v309_v7 = vmax.f32 %v277_v39, 0.0  ;;  %v310_v8 = vmax.f32 %v278_v40, 0.0 }
  0x2b   : > { %v311_v9 = vmax.f32 %v279_v41, 0.0  ;;  %v312_v10 = vmax.f32 %v280_v43, 0.0  ;;  %v313_v11 = vmax.f32 %v281_v44, %v283_v46  ;;  %v314_v12 = vmax.f32 %v282_v45, %v284_v47 }
  0x2c   : > { %v315_v13 = vmax.f32 %v285_v48, %v287_v51  ;;  %v316_v14 = vmax.f32 %v286_v50, %v288_v52  ;;  %v317_v15 = vmax.f32 %v289_v53, %v291_v55  ;;  %v318_v16 = vmax.f32 %v290_v54, %v292_v57 }
  0x2d   : > { %v319_v17 = vmax.f32 %v293_v6, %v295_v35  ;;  %v320_v18 = vmax.f32 %v294_v58, %v296_v59  ;;  %v321_v19 = vmax.f32 %v297_v42, %v299_v49  ;;  %v322_v20 = vmax.f32 %v298_v60, %v300_v61 }
  0x2e   : > { %v323_v22 = vmax.f32 %v301_v56, %v303_v63  ;;  %v324_v23 = vmax.f32 %v302_v62, %v304_v0  ;;  %v1526_v24 = vmax.f32 %v305_v1, %v307_v4  ;;  %v1528_v25 = vmax.f32 %v306_v2, %v308_v5 }
  0x2f   : > { %v1530_v26 = vmax.f32 %v309_v7, %v311_v9  ;;  %v345_v3 = vcombine.high %v313_v11, %v313_v11  ;;  %v1533_v27 = vrot.slane %v313_v11, %v1421_v21  ;;  %v362_v28 = vcombine.high %v314_v12, %v314_v12 }
  0x30   : > { %v1536_v29 = vrot.slane %v314_v12, %v1421_v21  ;;  %v379_v30 = vcombine.high %v315_v13, %v315_v13  ;;  %v1539_v31 = vrot.slane %v315_v13, %v1421_v21  ;;  %v1541_v32 = vmax.f32 %v310_v8, %v312_v10 }
  0x31   : > { %v1544_v33 = vrot.slane %v345_v3, %v1421_v21  ;;  %v396_v34 = vcombine.high %v316_v14, %v316_v14  ;;  %v1547_v36 = vrot.slane %v316_v14, %v1421_v21  ;;  %v360_v37 = vcombine.high %v1533_v27, %v1533_v27 }
  0x32   : > { %v1552_v38 = vrot.slane %v362_v28, %v1421_v21  ;;  %v377_v39 = vcombine.high %v1536_v29, %v1536_v29  ;;  %v1557_v40 = vrot.slane %v379_v30, %v1421_v21  ;;  %v394_v43 = vcombine.high %v1539_v31, %v1539_v31 }
  0x33   : > { %v361_v41 = vcombine.high %v1544_v33, %v1544_v33  ;;  %v1564_v44 = vrot.slane %v396_v34, %v1421_v21  ;;  %v413_v45 = vcombine.high %v317_v15, %v317_v15  ;;  %v411_v47 = vcombine.high %v1547_v36, %v1547_v36 }
  0x34   : > { %v378_v46 = vcombine.high %v1552_v38, %v1552_v38  ;;  %v1571_v48 = vrot.slane %v317_v15, %v1421_v21  ;;  %v430_v50 = vcombine.high %v318_v16, %v318_v16  ;;  %v395_v51 = vcombine.high %v1557_v40, %v1557_v40 }
  0x35   : > { %v1576_v52 = vrot.slane %v413_v45, %v1421_v21  ;;  %v1579_v53 = vrot.slane %v318_v16, %v1421_v21  ;;  %v447_v54 = vcombine.high %v319_v17, %v319_v17  ;;  %v412_v55 = vcombine.high %v1564_v44, %v1564_v44 }
  0x36   : > { %v1584_v57 = vrot.slane %v430_v50, %v1421_v21  ;;  %v1587_v6 = vrot.slane %v319_v17, %v1421_v21  ;;  %v464_v58 = vcombine.high %v320_v18, %v320_v18  ;;  %v1597_v60 = vrot.slane %v320_v18, %v1421_v21 }
  0x37   : > { %v1594_v42 = vrot.slane %v447_v54, %v1421_v21  ;;  %v481_v62 = vcombine.high %v321_v19, %v321_v19  ;;  %v1611_v1 = vrot.slane %v321_v19, %v1421_v21  ;;  %v498_v2 = vcombine.high %v322_v20, %v322_v20 }
  0x38   : > { %v1604_v56 = vrot.slane %v464_v58, %v1421_v21  ;;  %v1619_v7 = vrot.slane %v322_v20, %v1421_v21  ;;  %v515_v8 = vcombine.high %v323_v22, %v323_v22  ;;  %v1627_v11 = vrot.slane %v323_v22, %v1421_v21 }
  0x39   : > { %v1616_v5 = vrot.slane %v481_v62, %v1421_v21  ;;  %v1624_v10 = vrot.slane %v498_v2, %v1421_v21  ;;  %v532_v12 = vcombine.high %v324_v23, %v324_v23  ;;  %v1637_v16 = vrot.slane %v324_v23, %v1421_v21 }
  0x3a   : > { %v1634_v15 = vrot.slane %v515_v8, %v1421_v21  ;;  %v549_v20 = vcombine.high %v1526_v24, %v1526_v24  ;;  %v1654_v23 = vrot.slane %v1526_v24, %v1421_v21  ;;  %v566_v28 = vcombine.high %v1528_v25, %v1528_v25 }
  0x3b   : > { %v1644_v19 = vrot.slane %v532_v12, %v1421_v21  ;;  %v1665_v45 = vrot.slane %v1528_v25, %v1421_v21  ;;  %v583_v50 = vcombine.high %v1530_v26, %v1530_v26  ;;  %v1676_v58 = vrot.slane %v1530_v26, %v1421_v21 }
  0x3c   : > { %v1661_v34 = vrot.slane %v549_v20, %v1421_v21  ;;  %v1672_v54 = vrot.slane %v566_v28, %v1421_v21  ;;  %v600_v62 = vcombine.high %v1541_v32, %v1541_v32  ;;  %v1689_v12 = vrot.slane %v1541_v32, %v1421_v21 }
  0x3d   : > { %v1685_v8 = vrot.slane %v583_v50, %v1421_v21  ;;  %v682_v25 = vsel %vm681_vm0, %v1533_v27, -inf  ;;  %v689_v26 = vsel %vm681_vm0, %v360_v37, -inf  ;;  %v696_v28 = vsel %vm681_vm0, %v1544_v33, -inf }
  0x3e   : > { %v1702_v2 = vrot.slane %v600_v62, %v1421_v21  ;;  %v683_v32 = vrot.slane %v682_v25, 4  ;;  %v690_v24 = vrot.slane %v689_v26, 4  ;;  %v703_v50 = vsel %vm681_vm0, %v361_v41, -inf }
  0x3f   : > { %v697_v62 = vrot.slane %v696_v28, 4  ;;  %v704_v30 = vrot.slane %v703_v50, 4  ;;  %v710_v27 = vsel %vm681_vm0, %v1536_v29, -inf  ;;  %v717_v20 = vsel %vm681_vm0, %v377_v39, -inf }
  0x40   : > { %v684_v21 = vmax.f32 %v682_v25, %v683_v32  ;;  %v691_v3 = vmax.f32 %v689_v26, %v690_v24  ;;  %v711_v37 = vrot.slane %v710_v27, 4  ;;  %v724_v22 = vsel %vm681_vm0, %v1552_v38, -inf }
  0x41   : > { %v698_v33 = vmax.f32 %v696_v28, %v697_v62  ;;  %v705_v17 = vmax.f32 %v703_v50, %v704_v30  ;;  %v718_v41 = vrot.slane %v717_v20, 4  ;;  %v725_v14 = vrot.slane %v724_v22, 4 }
  0x42   : > { %v685_v18 = vrot.slane %v684_v21, 2  ;;  %v692_v25 = vrot.slane %v691_v3, 2  ;;  %v712_v32 = vmax.f32 %v710_v27, %v711_v37  ;;  %v731_v24 = vsel %vm681_vm0, %v378_v46, -inf }
  0x43   : > { %v699_v13 = vrot.slane %v698_v33, 2  ;;  %v706_v29 = vrot.slane %v705_v17, 2  ;;  %v719_v9 = vmax.f32 %v717_v20, %v718_v41  ;;  %v726_v0 = vmax.f32 %v724_v22, %v725_v14 }
  0x44   : > { %v686_v26 = vmax.f32 %v684_v21, %v685_v18  ;;  %v693_v39 = vmax.f32 %v691_v3, %v692_v25  ;;  %v713_v4 = vrot.slane %v712_v32, 2  ;;  %v732_v63 = vrot.slane %v731_v24, 4 }
  0x45   : > { %v700_v28 = vmax.f32 %v698_v33, %v699_v13  ;;  %v707_v30 = vmax.f32 %v705_v17, %v706_v29  ;;  %v720_v50 = vrot.slane %v719_v9, 2  ;;  %v727_v37 = vrot.slane %v726_v0, 2 }
  0x46   : > { %v687_v61 = vrot.slane %v686_v26, 1  ;;  %v694_v62 = vrot.slane %v693_v39, 1  ;;  %v714_v27 = vmax.f32 %v712_v32, %v713_v4  ;;  %v733_v49 = vmax.f32 %v731_v24, %v732_v63 }
  0x47   : > { %v701_v46 = vrot.slane %v700_v28, 1  ;;  %v708_v18 = vrot.slane %v707_v30, 1  ;;  %v721_v21 = vmax.f32 %v719_v9, %v720_v50  ;;  %v728_v20 = vmax.f32 %v726_v0, %v727_v37 }
  0x48   : > { %v1730_v59 = vmax.f32 %v686_v26, %v687_v61  ;;  %v715_v3 = vrot.slane %v714_v27, 1  ;;  %v734_v14 = vrot.slane %v733_v49, 2  ;;  %v1732_v22 = vmax.f32 %v693_v39, %v694_v62 }
  0x49   : > { %v1734_v13 = vmax.f32 %v700_v28, %v701_v46  ;;  %v722_v17 = vrot.slane %v721_v21, 1  ;;  %v738_v4 = vsel %vm681_vm0, %v1539_v31, -inf  ;;  %v1738_v63 = vmax.f32 %v707_v30, %v708_v18 }
  0x4a   : > { %v729_v33 = vrot.slane %v728_v20, 1  ;;  %v735_v41 = vmax.f32 %v733_v49, %v734_v14  ;;  %v739_v25 = vrot.slane %v738_v4, 4  ;;  %v1740_v32 = vmax.f32 %v714_v27, %v715_v3 }
  0x4b   : > { %v745_v61 = vsel %vm681_vm0, %v394_v43, -inf  ;;  %v752_v0 = vsel %vm681_vm0, %v1557_v40, -inf  ;;  %v759_v9 = vsel %vm681_vm0, %v395_v51, -inf  ;;  %v1752_v24 = vmax.f32 %v721_v21, %v722_v17 }
  0x4c   : > { %v1754_v26 = vmax.f32 %v728_v20, %v729_v33  ;;  %v740_v49 = vmax.f32 %v738_v4, %v739_v25  ;;  %v746_v29 = vrot.slane %v745_v61, 4  ;;  %v753_v39 = vrot.slane %v752_v0, 4 }
  0x4d   : > { %v760_v28 = vrot.slane %v759_v9, 4  ;;  %v766_v31 = vsel %vm681_vm0, %v1547_v36, -inf  ;;  %v773_v43 = vsel %vm681_vm0, %v411_v47, -inf  ;;  %v736_v30 = vrot.slane %v735_v41, 1 }
  0x4e   : > { %v741_v40 = vrot.slane %v740_v49, 2  ;;  %v747_v50 = vmax.f32 %v745_v61, %v746_v29  ;;  %v767_v51 = vrot.slane %v766_v31, 4  ;;  %v754_v62 = vmax.f32 %v752_v0, %v753_v39 }
  0x4f   : > { %v761_v27 = vmax.f32 %v759_v9, %v760_v28  ;;  %v774_v37 = vrot.slane %v773_v43, 4  ;;  %v780_v46 = vsel %vm681_vm0, %v1564_v44, -inf  ;;  %v787_v36 = vsel %vm681_vm0, %v412_v55, -inf }
  0x50   : > { %v742_v18 = vmax.f32 %v740_v49, %v741_v40  ;;  %v748_v21 = vrot.slane %v747_v50, 2  ;;  %v768_v3 = vmax.f32 %v766_v31, %v767_v51  ;;  %v781_v20 = vrot.slane %v780_v46, 4 }
  0x51   : > { %v755_v14 = vrot.slane %v754_v62, 2  ;;  %v762_v17 = vrot.slane %v761_v27, 2  ;;  %v775_v4 = vmax.f32 %v773_v43, %v774_v37  ;;  %v788_v39 = vrot.slane %v787_v36, 4 }
  0x52   : > { %v743_v47 = vrot.slane %v742_v18, 1  ;;  %v749_v33 = vmax.f32 %v747_v50, %v748_v21  ;;  %v769_v25 = vrot.slane %v768_v3, 2  ;;  %v782_v61 = vmax.f32 %v780_v46, %v781_v20 }
  0x53   : > { %v756_v0 = vmax.f32 %v754_v62, %v755_v14  ;;  %v763_v9 = vmax.f32 %v761_v27, %v762_v17  ;;  %v776_v29 = vrot.slane %v775_v4, 2  ;;  %v1768_v49 = vmax.f32 %v735_v41, %v736_v30 }
  0x54   : > { %v750_v28 = vrot.slane %v749_v33, 1  ;;  %v770_v31 = vmax.f32 %v768_v3, %v769_v25  ;;  %v783_v40 = vrot.slane %v782_v61, 2  ;;  %v789_v38 = vmax.f32 %v787_v36, %v788_v39 }
  0x55   : > { %v757_v51 = vrot.slane %v756_v0, 1  ;;  %v764_v43 = vrot.slane %v763_v9, 1  ;;  %v777_v37 = vmax.f32 %v775_v4, %v776_v29  ;;  %v1770_v44 = vmax.f32 %v742_v18, %v743_v47 }
  0x56   : > { %v771_v55 = vrot.slane %v770_v31, 1  ;;  %v784_v35 = vmax.f32 %v782_v61, %v783_v40  ;;  %v794_v50 = vsel %vm681_vm0, %v1571_v48, -inf  ;;  %v1774_v62 = vmax.f32 %v749_v33, %v750_v28 }
  0x57   : > { %v1776_v27 = vmax.f32 %v756_v0, %v757_v51  ;;  %v778_v41 = vrot.slane %v777_v37, 1  ;;  %v790_v30 = vrot.slane %v789_v38, 2  ;;  %v1778_v46 = vmax.f32 %v763_v9, %v764_v43 }
  0x58   : > { %v785_v21 = vrot.slane %v784_v35, 1  ;;  %v795_v3 = vrot.slane %v794_v50, 4  ;;  %v2152_v20 = vcombine.high %v1571_v48, %v1571_v48  ;;  %v1784_v14 = vmax.f32 %v770_v31, %v771_v55 }
  0x59   : > { %v791_v17 = vmax.f32 %v789_v38, %v790_v30  ;;  %v808_v36 = vsel %vm681_vm0, %v1576_v52, -inf  ;;  %v1788_v47 = vmax.f32 %v777_v37, %v778_v41  ;;  %v2153_v61 = vcombine.high %v1576_v52, %v1576_v52 }
  0x5a   : > { %v801_v18 = vsel %vm681_vm0, %v2152_v20, -inf  ;;  %v796_v33 = vmax.f32 %v794_v50, %v795_v3  ;;  %v809_v25 = vrot.slane %v808_v36, 4  ;;  %v1794_v9 = vmax.f32 %v784_v35, %v785_v21 }
  0x5b   : > { %v802_v4 = vrot.slane %v801_v18, 4  ;;  %v815_v0 = vsel %vm681_vm0, %v2153_v61, -inf  ;;  %v822_v38 = vsel %vm681_vm0, %v1579_v53, -inf  ;;  %v2155_v40 = vcombine.high %v1579_v53, %v1579_v53 }
  0x5c   : > { %2154 = vst [vmem:[#allocation2_spill] sm:$0xff] %v1794_v9  ;;  %v816_v29 = vrot.slane %v815_v0, 4  ;;  %v797_v39 = vrot.slane %v796_v33, 2  ;;  %v810_v28 = vmax.f32 %v808_v36, %v809_v25  ;;  %v823_v31 = vrot.slane %v822_v38, 4 }
  0x5d   : > { %v803_v48 = vmax.f32 %v801_v18, %v802_v4  ;;  %v829_v51 = vsel %vm681_vm0, %v2155_v40, -inf  ;;  %v792_v43 = vrot.slane %v791_v17, 1  ;;  %v836_v30 = vsel %vm681_vm0, %v1584_v57, -inf }
  0x5e   : > { %v817_v52 = vmax.f32 %v815_v0, %v816_v29  ;;  %v830_v55 = vrot.slane %v829_v51, 4  ;;  %v798_v50 = vmax.f32 %v796_v33, %v797_v39  ;;  %v811_v35 = vrot.slane %v810_v28, 2 }
  0x5f   : > { %v804_v37 = vrot.slane %v803_v48, 2  ;;  %v824_v41 = vmax.f32 %v822_v38, %v823_v31  ;;  %v837_v18 = vrot.slane %v836_v30, 4  ;;  %v2156_v53 = vcombine.high %v1584_v57, %v1584_v57 }
  0x60   : > { %v818_v3 = vrot.slane %v817_v52, 2  ;;  %v831_v20 = vmax.f32 %v829_v51, %v830_v55  ;;  %v799_v4 = vrot.slane %v798_v50, 1  ;;  %v812_v36 = vmax.f32 %v810_v28, %v811_v35 }
  0x61   : > { %v805_v21 = vmax.f32 %v803_v48, %v804_v37  ;;  %v825_v25 = vrot.slane %v824_v41, 2  ;;  %v843_v61 = vsel %vm681_vm0, %v2156_v53, -inf  ;;  %v838_v39 = vmax.f32 %v836_v30, %v837_v18 }
  0x62   : > { %v819_v29 = vmax.f32 %v817_v52, %v818_v3  ;;  %v832_v33 = vrot.slane %v831_v20, 2  ;;  %v1808_v38 = vmax.f32 %v791_v17, %v792_v43  ;;  %v813_v31 = vrot.slane %v812_v36, 1 }
  0x63   : > { %v806_v0 = vrot.slane %v805_v21, 1  ;;  %v826_v40 = vmax.f32 %v824_v41, %v825_v25  ;;  %v844_v48 = vrot.slane %v843_v61, 4  ;;  %v1810_v37 = vmax.f32 %v798_v50, %v799_v4 }
  0x64   : > { %2157 = vst [vmem:[#allocation3_spill] sm:$0xff] %v1808_v38  ;;  %v820_v51 = vrot.slane %v819_v29, 1  ;;  %v833_v55 = vmax.f32 %v831_v20, %v832_v33  ;;  %v839_v28 = vrot.slane %v838_v39, 2  ;;  %v850_v53 = vsel %vm681_vm0, %v1587_v6, -inf }
  0x65   : > { %v1812_v35 = vmax.f32 %v805_v21, %v806_v0  ;;  %v827_v9 = vrot.slane %v826_v40, 1  ;;  %v845_v57 = vmax.f32 %v843_v61, %v844_v48  ;;  %v1816_v52 = vmax.f32 %v812_v36, %v813_v31 }
  0x66   : > { %v834_v30 = vrot.slane %v833_v55, 1  ;;  %v840_v17 = vmax.f32 %v838_v39, %v839_v28  ;;  %v851_v43 = vrot.slane %v850_v53, 4  ;;  %v1818_v3 = vmax.f32 %v819_v29, %v820_v51 }
  0x67   : > { %v846_v41 = vrot.slane %v845_v57, 2  ;;  %v2158_v50 = vcombine.high %v1587_v6, %v1587_v6  ;;  %v864_v21 = vsel %vm681_vm0, %v1594_v42, -inf  ;;  %v1826_v18 = vmax.f32 %v826_v40, %v827_v9 }
  0x68   : > { %v841_v4 = vrot.slane %v840_v17, 1  ;;  %v852_v25 = vmax.f32 %v850_v53, %v851_v43  ;;  %v865_v0 = vrot.slane %v864_v21, 4  ;;  %v2160_v29 = vcombine.high %v1594_v42, %v1594_v42 }
  0x69   : > { %v857_v20 = vsel %vm681_vm0, %v2158_v50, -inf  ;;  %2159 = vst [vmem:[#allocation4_spill] sm:$0xff] %v1826_v18  ;;  %v847_v61 = vmax.f32 %v845_v57, %v846_v41  ;;  %v878_v6 = vsel %vm681_vm0, %v1597_v60, -inf  ;;  %v1834_v39 = vmax.f32 %v833_v55, %v834_v30 }
  0x6a   : > { %v858_v36 = vrot.slane %v857_v20, 4  ;;  %v871_v33 = vsel %vm681_vm0, %v2160_v29, -inf  ;;  %v853_v31 = vrot.slane %v852_v25, 2  ;;  %v866_v40 = vmax.f32 %v864_v21, %v865_v0 }
  0x6b   : > { %2161 = vst [vmem:[#allocation5_spill] sm:$0xff] %v1834_v39  ;;  %v872_v51 = vrot.slane %v871_v33, 4  ;;  %v848_v9 = vrot.slane %v847_v61, 1  ;;  %v879_v28 = vrot.slane %v878_v6, 4  ;;  %v2162_v57 = vcombine.high %v1597_v60, %v1597_v60 }
  0x6c   : > { %v859_v48 = vmax.f32 %v857_v20, %v858_v36  ;;  %v854_v43 = vmax.f32 %v852_v25, %v853_v31  ;;  %v1840_v29 = vmax.f32 %v840_v17, %v841_v4  ;;  %v867_v38 = vrot.slane %v866_v40, 2 }
  0x6d   : > { %v885_v53 = vsel %vm681_vm0, %v2162_v57, -inf  ;;  %v873_v41 = vmax.f32 %v871_v33, %v872_v51  ;;  %v880_v55 = vmax.f32 %v878_v6, %v879_v28  ;;  %v892_v30 = vsel %vm681_vm0, %v1604_v56, -inf }
  0x6e   : > { %v860_v42 = vrot.slane %v859_v48, 2  ;;  %v886_v50 = vrot.slane %v885_v53, 4  ;;  %2163 = vst [vmem:[#allocation6_spill] sm:$0xff] %v1840_v29  ;;  %v855_v20 = vrot.slane %v854_v43, 1  ;;  %v868_v39 = vmax.f32 %v866_v40, %v867_v38 }
  0x6f   : > { %v874_v21 = vrot.slane %v873_v41, 2  ;;  %v881_v18 = vrot.slane %v880_v55, 2  ;;  %v893_v60 = vrot.slane %v892_v30, 4  ;;  %v2164_v25 = vcombine.high %v1604_v56, %v1604_v56 }
  0x70   : > { %v861_v36 = vmax.f32 %v859_v48, %v860_v42  ;;  %v887_v0 = vmax.f32 %v885_v53, %v886_v50  ;;  %v1848_v31 = vmax.f32 %v847_v61, %v848_v9  ;;  %v869_v51 = vrot.slane %v868_v39, 1 }
  0x71   : > { %v899_v33 = vsel %vm681_vm0, %v2164_v25, -inf  ;;  %v875_v4 = vmax.f32 %v873_v41, %v874_v21  ;;  %v882_v28 = vmax.f32 %v880_v55, %v881_v18  ;;  %v894_v57 = vmax.f32 %v892_v30, %v893_v60 }
  0x72   : > { %2165 = vst [vmem:[#allocation7_spill] sm:$0xff] %v1848_v31  ;;  %v862_v17 = vrot.slane %v861_v36, 1  ;;  %v888_v6 = vrot.slane %v887_v0, 2  ;;  %v900_v29 = vrot.slane %v899_v33, 4  ;;  %v1850_v48 = vmax.f32 %v854_v43, %v855_v20 }
  0x73   : > { %v876_v53 = vrot.slane %v875_v4, 1  ;;  %v906_v40 = vsel %vm681_vm0, %v1611_v1, -inf  ;;  %v883_v56 = vrot.slane %v882_v28, 1  ;;  %v895_v50 = vrot.slane %v894_v57, 2 }
  0x74   : > { %v889_v38 = vmax.f32 %v887_v0, %v888_v6  ;;  %v1854_v42 = vmax.f32 %v861_v36, %v862_v17  ;;  %v901_v61 = vmax.f32 %v899_v33, %v900_v29  ;;  %v1856_v9 = vmax.f32 %v868_v39, %v869_v51 }
  0x75   : > { %v1858_v41 = vmax.f32 %v875_v4, %v876_v53  ;;  %v907_v21 = vrot.slane %v906_v40, 4  ;;  %v2167_v18 = vcombine.high %v1611_v1, %v1611_v1  ;;  %v896_v30 = vmax.f32 %v894_v57, %v895_v50 }
  0x76   : > { %v890_v55 = vrot.slane %v889_v38, 1  ;;  %v902_v20 = vrot.slane %v901_v61, 2  ;;  %v1864_v60 = vmax.f32 %v882_v28, %v883_v56  ;;  %v920_v29 = vsel %vm681_vm0, %v1616_v5, -inf }
  0x77   : > { %2166 = vst [vmem:[#allocation8_spill] sm:$0xff] %v1858_v41  ;;  %v913_v43 = vsel %vm681_vm0, %v2167_v18, -inf  ;;  %v908_v36 = vmax.f32 %v906_v40, %v907_v21  ;;  %v2169_v39 = vcombine.high %v1616_v5, %v1616_v5  ;;  %v897_v33 = vrot.slane %v896_v30, 1 }
  0x78   : > { %v914_v0 = vrot.slane %v913_v43, 4  ;;  %2168 = vst [vmem:[#allocation9_spill] sm:$0xff] %v1864_v60  ;;  %v903_v17 = vmax.f32 %v901_v61, %v902_v20  ;;  %v921_v4 = vrot.slane %v920_v29, 4  ;;  %v934_v57 = vsel %vm681_vm0, %v1619_v7, -inf }
  0x79   : > { %v927_v25 = vsel %vm681_vm0, %v2169_v39, -inf  ;;  %v909_v6 = vrot.slane %v908_v36, 2  ;;  %v2170_v28 = vcombine.high %v1619_v7, %v1619_v7  ;;  %v1878_v40 = vmax.f32 %v889_v38, %v890_v55 }
  0x7a   : > { %v915_v1 = vmax.f32 %v913_v43, %v914_v0  ;;  %v928_v51 = vrot.slane %v927_v25, 4  ;;  %v904_v56 = vrot.slane %v903_v17, 1  ;;  %v922_v50 = vmax.f32 %v920_v29, %v921_v4 }
  0x7b   : > { %v941_v53 = vsel %vm681_vm0, %v2170_v28, -inf  ;;  %2171 = vst [vmem:[#allocation10_spill] sm:$0xff] %v1878_v40  ;;  %v910_v21 = vmax.f32 %v908_v36, %v909_v6  ;;  %v935_v61 = vrot.slane %v934_v57, 4  ;;  %v1880_v20 = vmax.f32 %v896_v30, %v897_v33 }
  0x7c   : > { %v916_v5 = vrot.slane %v915_v1, 2  ;;  %v929_v18 = vmax.f32 %v927_v25, %v928_v51  ;;  %v942_v43 = vrot.slane %v941_v53, 4  ;;  %v923_v39 = vrot.slane %v922_v50, 2 }
  0x7d   : > { %2172 = vst [vmem:[#allocation11_spill] sm:$0xff] %v1880_v20  ;;  %v948_v31 = vsel %vm681_vm0, %v1624_v10, -inf  ;;  %v911_v60 = vrot.slane %v910_v21, 1  ;;  %v936_v41 = vmax.f32 %v934_v57, %v935_v61  ;;  %v2173_v36 = vcombine.high %v1624_v10, %v1624_v10 }
  0x7e   : > { %v917_v0 = vmax.f32 %v915_v1, %v916_v5  ;;  %v930_v7 = vrot.slane %v929_v18, 2  ;;  %v943_v28 = vmax.f32 %v941_v53, %v942_v43  ;;  %v924_v55 = vmax.f32 %v922_v50, %v923_v39 }
  0x7f   : > { %v949_v40 = vrot.slane %v948_v31, 4  ;;  %v955_v29 = vsel %vm681_vm0, %v2173_v36, -inf  ;;  %v1888_v25 = vmax.f32 %v903_v17, %v904_v56  ;;  %v937_v33 = vrot.slane %v936_v41, 2 }
  0x80   : > { %v918_v38 = vrot.slane %v917_v0, 1  ;;  %v931_v30 = vmax.f32 %v929_v18, %v930_v7  ;;  %v944_v1 = vrot.slane %v943_v28, 2  ;;  %v1890_v4 = vmax.f32 %v910_v21, %v911_v60 }
  0x81   : > { %2174 = vst [vmem:[#allocation12_spill] sm:$0xff] %v1888_v25  ;;  %v925_v6 = vrot.slane %v924_v55, 1  ;;  %v950_v51 = vmax.f32 %v948_v31, %v949_v40  ;;  %v956_v5 = vrot.slane %v955_v29, 4  ;;  %v938_v53 = vmax.f32 %v936_v41, %v937_v33 }
  0x82   : > { %v932_v57 = vrot.slane %v931_v30, 1  ;;  %v945_v61 = vmax.f32 %v943_v28, %v944_v1  ;;  %v962_v50 = vsel %vm681_vm0, %v1627_v11, -inf  ;;  %v1894_v43 = vmax.f32 %v917_v0, %v918_v38 }
  0x83   : > { %v951_v10 = vrot.slane %v950_v51, 2  ;;  %v957_v39 = vmax.f32 %v955_v29, %v956_v5  ;;  %v963_v17 = vrot.slane %v962_v50, 4  ;;  %v1896_v56 = vmax.f32 %v924_v55, %v925_v6 }
  0x84   : > { %v939_v18 = vrot.slane %v938_v53, 1  ;;  %v946_v7 = vrot.slane %v945_v61, 1  ;;  %v2175_v60 = vcombine.high %v1627_v11, %v1627_v11  ;;  %v1902_v36 = vmax.f32 %v931_v30, %v932_v57 }
  0x85   : > { %v952_v40 = vmax.f32 %v950_v51, %v951_v10  ;;  %v958_v41 = vrot.slane %v957_v39, 2  ;;  %v964_v21 = vmax.f32 %v962_v50, %v963_v17  ;;  %v976_v38 = vsel %vm681_vm0, %v1634_v15, -inf }
  0x86   : > { %v969_v31 = vsel %vm681_vm0, %v2175_v60, -inf  ;;  %v1904_v0 = vmax.f32 %v938_v53, %v939_v18  ;;  %v2177_v55 = vcombine.high %v1634_v15, %v1634_v15  ;;  %v977_v51 = vrot.slane %v976_v38, 4 }
  0x87   : > { %v970_v28 = vrot.slane %v969_v31, 4  ;;  %v953_v33 = vrot.slane %v952_v40, 1  ;;  %v959_v11 = vmax.f32 %v957_v39, %v958_v41  ;;  %v965_v1 = vrot.slane %v964_v21, 2 }
  0x88   : > { %2176 = vst [vmem:[#allocation13_spill] sm:$0xff] %v1904_v0  ;;  %v983_v29 = vsel %vm681_vm0, %v2177_v55, -inf  ;;  %v990_v30 = vsel %vm681_vm0, %v1637_v16, -inf  ;;  %v2178_v57 = vcombine.high %v1637_v16, %v1637_v16  ;;  %v1918_v50 = vmax.f32 %v945_v61, %v946_v7 }
  0x89   : > { %v971_v6 = vmax.f32 %v969_v31, %v970_v28  ;;  %v984_v5 = vrot.slane %v983_v29, 4  ;;  %v960_v10 = vrot.slane %v959_v11, 1  ;;  %v966_v15 = vmax.f32 %v964_v21, %v965_v1 }
  0x8a   : > { %v997_v53 = vsel %vm681_vm0, %v2178_v57, -inf  ;;  %v978_v18 = vmax.f32 %v976_v38, %v977_v51  ;;  %v991_v39 = vrot.slane %v990_v30, 4  ;;  %v1920_v31 = vmax.f32 %v952_v40, %v953_v33 }
  0x8b   : > { %v972_v17 = vrot.slane %v971_v6, 2  ;;  %v985_v60 = vmax.f32 %v983_v29, %v984_v5  ;;  %v998_v41 = vrot.slane %v997_v53, 4  ;;  %v967_v28 = vrot.slane %v966_v15, 1 }
  0x8c   : > { %2179 = vst [vmem:[#allocation14_spill] sm:$0xff] %v1920_v31  ;;  %v1004_v25 = vsel %vm681_vm0, %v1644_v19, -inf  ;;  %v979_v0 = vrot.slane %v978_v18, 2  ;;  %v992_v20 = vmax.f32 %v990_v30, %v991_v39  ;;  %v1924_v61 = vmax.f32 %v959_v11, %v960_v10 }
  0x8d   : > { %v973_v55 = vmax.f32 %v971_v6, %v972_v17  ;;  %v986_v16 = vrot.slane %v985_v60, 2  ;;  %v999_v57 = vmax.f32 %v997_v53, %v998_v41  ;;  %v1005_v21 = vrot.slane %v1004_v25, 4 }
  0x8e   : > { %2180 = vst [vmem:[#allocation15_spill] sm:$0xff] %v1924_v61  ;;  %v2181_v38 = vcombine.high %v1644_v19, %v1644_v19  ;;  %v980_v40 = vmax.f32 %v978_v18, %v979_v0  ;;  %v993_v1 = vrot.slane %v992_v20, 2  ;;  %v1930_v51 = vmax.f32 %v966_v15, %v967_v28 }
  0x8f   : > { %v974_v7 = vrot.slane %v973_v55, 1  ;;  %v987_v33 = vmax.f32 %v985_v60, %v986_v16  ;;  %v1000_v6 = vrot.slane %v999_v57, 2  ;;  %v1006_v5 = vmax.f32 %v1004_v25, %v1005_v21 }
  0x90   : > { %v1011_v29 = vsel %vm681_vm0, %v2181_v38, -inf  ;;  %v1018_v30 = vsel %vm681_vm0, %v1654_v23, -inf  ;;  %v981_v11 = vrot.slane %v980_v40, 1  ;;  %v994_v10 = vmax.f32 %v992_v20, %v993_v1 }
  0x91   : > { %v1012_v17 = vrot.slane %v1011_v29, 4  ;;  %v988_v53 = vrot.slane %v987_v33, 1  ;;  %v1001_v39 = vmax.f32 %v999_v57, %v1000_v6  ;;  %v1007_v41 = vrot.slane %v1006_v5, 2 }
  0x92   : > { %v1019_v19 = vrot.slane %v1018_v30, 4  ;;  %v2182_v0 = vcombine.high %v1654_v23, %v1654_v23  ;;  %v1938_v60 = vmax.f32 %v973_v55, %v974_v7  ;;  %v1940_v15 = vmax.f32 %v980_v40, %v981_v11 }
  0x93   : > { %v1013_v61 = vmax.f32 %v1011_v29, %v1012_v17  ;;  %v995_v25 = vrot.slane %v994_v10, 1  ;;  %v1002_v28 = vrot.slane %v1001_v39, 1  ;;  %v1008_v16 = vmax.f32 %v1006_v5, %v1007_v41 }
  0x94   : > { %v1025_v18 = vsel %vm681_vm0, %v2182_v0, -inf  ;;  %v1020_v38 = vmax.f32 %v1018_v30, %v1019_v19  ;;  %v1942_v20 = vmax.f32 %v987_v33, %v988_v53  ;;  %v1032_v29 = vsel %vm681_vm0, %v1661_v34, -inf }
  0x95   : > { %v1014_v21 = vrot.slane %v1013_v61, 2  ;;  %v1026_v31 = vrot.slane %v1025_v18, 4  ;;  %v1944_v57 = vmax.f32 %v994_v10, %v995_v25  ;;  %v2185_v23 = vcombine.high %v1661_v34, %v1661_v34 }
  0x96   : > { %2183 = vst [vmem:[#allocation16_spill] sm:$0xff] %v1942_v20  ;;  %v1009_v7 = vrot.slane %v1008_v16, 1  ;;  %v1021_v1 = vrot.slane %v1020_v38, 2  ;;  %v1033_v5 = vrot.slane %v1032_v29, 4  ;;  %v1046_v33 = vsel %vm681_vm0, %v1665_v45, -inf }
  0x97   : > { %2184 = vst [vmem:[#allocation17_spill] sm:$0xff] %v1944_v57  ;;  %v1039_v55 = vsel %vm681_vm0, %v2185_v23, -inf  ;;  %v1015_v40 = vmax.f32 %v1013_v61, %v1014_v21  ;;  %v1027_v6 = vmax.f32 %v1025_v18, %v1026_v31  ;;  %v2186_v30 = vcombine.high %v1665_v45, %v1665_v45 }
  0x98   : > { %v1040_v17 = vrot.slane %v1039_v55, 4  ;;  %v1958_v53 = vmax.f32 %v1001_v39, %v1002_v28  ;;  %v1022_v34 = vmax.f32 %v1020_v38, %v1021_v1  ;;  %v1034_v19 = vmax.f32 %v1032_v29, %v1033_v5 }
  0x99   : > { %v1053_v11 = vsel %vm681_vm0, %v2186_v30, -inf  ;;  %v1016_v10 = vrot.slane %v1015_v40, 1  ;;  %v1028_v41 = vrot.slane %v1027_v6, 2  ;;  %v1047_v61 = vrot.slane %v1046_v33, 4 }
  0x9a   : > { %v1041_v0 = vmax.f32 %v1039_v55, %v1040_v17  ;;  %v1054_v25 = vrot.slane %v1053_v11, 4  ;;  %v1960_v31 = vmax.f32 %v1008_v16, %v1009_v7  ;;  %v1023_v18 = vrot.slane %v1022_v34, 1 }
  0x9b   : > { %v1029_v21 = vmax.f32 %v1027_v6, %v1028_v41  ;;  %v1060_v23 = vsel %vm681_vm0, %v1672_v54, -inf  ;;  %v1035_v57 = vrot.slane %v1034_v19, 2  ;;  %v1048_v20 = vmax.f32 %v1046_v33, %v1047_v61 }
  0x9c   : > { %2187 = vst [vmem:[#allocation18_spill] sm:$0xff] %v1960_v31  ;;  %v1042_v45 = vrot.slane %v1041_v0, 2  ;;  %v1055_v30 = vmax.f32 %v1053_v11, %v1054_v25  ;;  %v1964_v39 = vmax.f32 %v1015_v40, %v1016_v10  ;;  %v1061_v38 = vrot.slane %v1060_v23, 4 }
  0x9d   : > { %v1030_v28 = vrot.slane %v1029_v21, 1  ;;  %v2189_v29 = vcombine.high %v1672_v54, %v1672_v54  ;;  %v1036_v16 = vmax.f32 %v1034_v19, %v1035_v57  ;;  %v1049_v1 = vrot.slane %v1048_v20, 2 }
  0x9e   : > { %2188 = vst [vmem:[#allocation19_spill] sm:$0xff] %v1964_v39  ;;  %v1043_v7 = vmax.f32 %v1041_v0, %v1042_v45  ;;  %v1056_v6 = vrot.slane %v1055_v30, 2  ;;  %v1970_v5 = vmax.f32 %v1022_v34, %v1023_v18  ;;  %v1062_v17 = vmax.f32 %v1060_v23, %v1061_v38 }
  0x9f   : > { %v1067_v55 = vsel %vm681_vm0, %v2189_v29, -inf  ;;  %v1074_v33 = vsel %vm681_vm0, %v1676_v58, -inf  ;;  %v1037_v40 = vrot.slane %v1036_v16, 1  ;;  %v1050_v10 = vmax.f32 %v1048_v20, %v1049_v1 }
  0xa0   : > { %v1068_v41 = vrot.slane %v1067_v55, 4  ;;  %v1044_v11 = vrot.slane %v1043_v7, 1  ;;  %v1057_v61 = vmax.f32 %v1055_v30, %v1056_v6  ;;  %v1063_v25 = vrot.slane %v1062_v17, 2 }
  0xa1   : > { %v1075_v54 = vrot.slane %v1074_v33, 4  ;;  %v2190_v57 = vcombine.high %v1676_v58, %v1676_v58  ;;  %v1978_v0 = vmax.f32 %v1029_v21, %v1030_v28  ;;  %v1980_v34 = vmax.f32 %v1036_v16, %v1037_v40 }
  0xa2   : > { %v1069_v39 = vmax.f32 %v1067_v55, %v1068_v41  ;;  %v1051_v18 = vrot.slane %v1050_v10, 1  ;;  %v1058_v23 = vrot.slane %v1057_v61, 1  ;;  %v1064_v45 = vmax.f32 %v1062_v17, %v1063_v25 }
  0xa3   : > { %v1081_v19 = vsel %vm681_vm0, %v2190_v57, -inf  ;;  %v1076_v29 = vmax.f32 %v1074_v33, %v1075_v54  ;;  %v1982_v20 = vmax.f32 %v1043_v7, %v1044_v11  ;;  %v1088_v55 = vsel %vm681_vm0, %v1685_v8, -inf }
  0xa4   : > { %v1070_v38 = vrot.slane %v1069_v39, 2  ;;  %v1082_v31 = vrot.slane %v1081_v19, 4  ;;  %v1984_v30 = vmax.f32 %v1050_v10, %v1051_v18  ;;  %v2193_v58 = vcombine.high %v1685_v8, %v1685_v8 }
  0xa5   : > { %2191 = vst [vmem:[#allocation20_spill] sm:$0xff] %v1982_v20  ;;  %v1065_v28 = vrot.slane %v1064_v45, 1  ;;  %v1077_v1 = vrot.slane %v1076_v29, 2  ;;  %v1089_v17 = vrot.slane %v1088_v55, 4  ;;  %v1102_v7 = vsel %vm681_vm0, %v1689_v12, -inf }
  0xa6   : > { %2192 = vst [vmem:[#allocation21_spill] sm:$0xff] %v1984_v30  ;;  %v1095_v21 = vsel %vm681_vm0, %v2193_v58, -inf  ;;  %v1071_v16 = vmax.f32 %v1069_v39, %v1070_v38  ;;  %v1083_v6 = vmax.f32 %v1081_v19, %v1082_v31  ;;  %v2194_v33 = vcombine.high %v1689_v12, %v1689_v12 }
  0xa7   : > { %v1096_v41 = vrot.slane %v1095_v21, 4  ;;  %v1998_v11 = vmax.f32 %v1057_v61, %v1058_v23  ;;  %v1078_v8 = vmax.f32 %v1076_v29, %v1077_v1  ;;  %v1090_v54 = vmax.f32 %v1088_v55, %v1089_v17 }
  0xa8   : > { %v1109_v40 = vsel %vm681_vm0, %v2194_v33, -inf  ;;  %v1072_v10 = vrot.slane %v1071_v16, 1  ;;  %v1084_v25 = vrot.slane %v1083_v6, 2  ;;  %v1103_v39 = vrot.slane %v1102_v7, 4 }
  0xa9   : > { %v1097_v57 = vmax.f32 %v1095_v21, %v1096_v41  ;;  %v1110_v18 = vrot.slane %v1109_v40, 4  ;;  %v2000_v31 = vmax.f32 %v1064_v45, %v1065_v28  ;;  %v1079_v19 = vrot.slane %v1078_v8, 1 }
  0xaa   : > { %v1085_v38 = vmax.f32 %v1083_v6, %v1084_v25  ;;  %v1116_v58 = vsel %vm681_vm0, %v1702_v2, -inf  ;;  %v1091_v30 = vrot.slane %v1090_v54, 2  ;;  %v1104_v20 = vmax.f32 %v1102_v7, %v1103_v39 }
  0xab   : > { %v1098_v12 = vrot.slane %v1097_v57, 2  ;;  %v1111_v33 = vmax.f32 %v1109_v40, %v1110_v18  ;;  %v2004_v61 = vmax.f32 %v1071_v16, %v1072_v10  ;;  %v1117_v29 = vrot.slane %v1116_v58, 4 }
  0xac   : > { %v1086_v23 = vrot.slane %v1085_v38, 1  ;;  %v2195_v55 = vcombine.high %v1702_v2, %v1702_v2  ;;  %v1092_v45 = vmax.f32 %v1090_v54, %v1091_v30  ;;  %v1105_v1 = vrot.slane %v1104_v20, 2 }
  0xad   : > { %v1099_v28 = vmax.f32 %v1097_v57, %v1098_v12  ;;  %v1112_v6 = vrot.slane %v1111_v33, 2  ;;  %v2010_v17 = vmax.f32 %v1078_v8, %v1079_v19  ;;  %v1118_v41 = vmax.f32 %v1116_v58, %v1117_v29 }
  0xae   : > { %v1123_v21 = vsel %vm681_vm0, %v2195_v55, -inf  ;;  %v1093_v7 = vrot.slane %v1092_v45, 1  ;;  %v1106_v40 = vmax.f32 %v1104_v20, %v1105_v1  ;;  %v1195_v2 = vsel %vm1194_vm1, %v1732_v22, %v1730_v59  ;;  %v2198_v1 = vld [vmem:[#allocation4_spill] sm:$0xff] }
  0xaf   : > { %v1124_v25 = vrot.slane %v1123_v21, 4  ;;  %v1100_v16 = vrot.slane %v1099_v28, 1  ;;  %v1113_v10 = vmax.f32 %v1111_v33, %v1112_v6  ;;  %v1119_v39 = vrot.slane %v1118_v41, 2  ;;  %v2199_v6 = vld [vmem:[#allocation9_spill] sm:$0xff] }
  0xb0   : > { %v1087_v30 = vmax.f32 %v1085_v38, %v1086_v23  ;;  %v2015_v54 = vmax.f32 %v1092_v45, %v1093_v7  ;;  %v1107_v8 = vrot.slane %v1106_v40, 1  ;;  %v1197_v12 = vsel %vm1196_vm2, %v1734_v13, %v1195_v2  ;;  %v2201_v7 = vld [vmem:[#allocation5_spill] sm:$0xff] }
  0xb1   : > { %v1125_v18 = vmax.f32 %v1123_v21, %v1124_v25  ;;  %v1114_v57 = vrot.slane %v1113_v10, 1  ;;  %v1120_v19 = vmax.f32 %v1118_v41, %v1119_v39  ;;  %v1101_v20 = vmax.f32 %v1099_v28, %v1100_v16  ;;  %v2205_v2 = vld [vmem:[#allocation13_spill] sm:$0xff] }
  0xb2   : > { %v2020_v33 = vmax.f32 %v1106_v40, %v1107_v8  ;;  %v1199_v29 = vsel %vm1198_vm3, %v1738_v63, %v1197_v12  ;;  %v1208_v63 = vsel %vm1194_vm1, %v1774_v62, %v1770_v44  ;;  %v1215_v28 = vsel %vm1194_vm1, %v1812_v35, %v1810_v37  ;;  %v2196_v35 = vld [vmem:[#allocation8_spill] sm:$0xff]  ;;  %v2202_v40 = vld [vmem:[#allocation10_spill] sm:$0xff] }
  0xb3   : > { %v1126_v58 = vrot.slane %v1125_v18, 2  ;;  %v1121_v59 = vrot.slane %v1120_v19, 1  ;;  %v1201_v38 = vsel %vm1200_vm4, %v1740_v32, %v1199_v29  ;;  %v1115_v23 = vmax.f32 %v1113_v10, %v1114_v57  ;;  %v2203_v10 = vld [vmem:[#allocation6_spill] sm:$0xff]  ;;  %v2207_v12 = vld [vmem:[#allocation12_spill] sm:$0xff] }
  0xb4   : > { %v1203_v13 = vsel %vm1202_vm5, %v1752_v24, %v1201_v38  ;;  %v1209_v21 = vsel %vm1196_vm2, %v1776_v27, %v1208_v63  ;;  %v1222_v44 = vsel %vm1194_vm1, %v1854_v42, %v1850_v48  ;;  %v1216_v27 = vsel %vm1196_vm2, %v1816_v52, %v1215_v28  ;;  %v2197_v42 = vld [vmem:[#allocation2_spill] sm:$0xff]  ;;  %v2209_v63 = vld [vmem:[#allocation16_spill] sm:$0xff] }
  0xb5   : > { %v1127_v22 = vmax.f32 %v1125_v18, %v1126_v58  ;;  %v1122_v55 = vmax.f32 %v1120_v19, %v1121_v59  ;;  %v1205_v32 = vsel %vm1204_vm6, %v1754_v26, %v1203_v13  ;;  %v1210_v24 = vsel %vm1198_vm3, %v1778_v46, %v1209_v21  ;;  %v2204_v18 = vld [vmem:[#allocation11_spill] sm:$0xff]  ;;  %v2208_v38 = vld [vmem:[#allocation14_spill] sm:$0xff] }
  0xb6   : > { %v1207_v45 = vsel %vm1206_vm7, %v1768_v49, %v1205_v32  ;;  %v1211_v26 = vsel %vm1200_vm4, %v1784_v14, %v1210_v24  ;;  %v1223_v49 = vsel %vm1196_vm2, %v1856_v9, %v1222_v44  ;;  %v1217_v37 = vsel %vm1198_vm3, %v1818_v3, %v1216_v27  ;;  %v2200_v3 = vld [vmem:[#allocation3_spill] sm:$0xff] }
  0xb7   : > { %v1128_v62 = vrot.slane %v1127_v22, 1  ;;  %1265 = vst [vmem:[%s2029_s25] sm:$0xff] %v1207_v45  ;;  %v1212_v46 = vsel %vm1202_vm5, %v1788_v47, %v1211_v26  ;;  %v1224_v48 = vsel %vm1198_vm3, %v2196_v35, %v1223_v49  ;;  %v1229_v14 = vsel %vm1194_vm1, %v1894_v43, %v1890_v4  ;;  %v2206_v19 = vld [vmem:[#allocation7_spill] sm:$0xff]  ;;  %v2211_v45 = vld [vmem:[#allocation17_spill] sm:$0xff]  ;;  %v2213_v26 = vld [vmem:[#allocation18_spill] sm:$0xff] }
  0xb8   : > { %v1213_v52 = vsel %vm1204_vm6, %v2197_v42, %v1212_v46  ;;  %v1218_v9 = vsel %vm1200_vm4, %v2198_v1, %v1217_v37  ;;  %v1225_v47 = vsel %vm1200_vm4, %v2199_v6, %v1224_v48  ;;  %v1230_v41 = vsel %vm1196_vm2, %v1896_v56, %v1229_v14  ;;  %v2214_v49 = vld [vmem:[#allocation21_spill] sm:$0xff] }
  0xb9   : > { %v1214_v25 = vsel %vm1206_vm7, %v2200_v3, %v1213_v52  ;;  %v1219_v16 = vsel %vm1202_vm5, %v2201_v7, %v1218_v9  ;;  %v1226_v4 = vsel %vm1202_vm5, %v2202_v40, %v1225_v47  ;;  %v1231_v43 = vsel %vm1198_vm3, %v1902_v36, %v1230_v41 }
  0xba   : > { %v1220_v39 = vsel %vm1204_vm6, %v2203_v10, %v1219_v16  ;;  %v1227_v56 = vsel %vm1204_vm6, %v2204_v18, %v1226_v4  ;;  %v1232_v8 = vsel %vm1200_vm4, %v2205_v2, %v1231_v43  ;;  %v1236_v57 = vsel %vm1194_vm1, %v1938_v60, %v1930_v51  ;;  %1266 = vst [vmem:[%s2029_s25 + $0x8] sm:$0xff] %v1214_v25 }
  0xbb   : > { %v1221_v58 = vsel %vm1206_vm7, %v2206_v19, %v1220_v39  ;;  %v1228_v36 = vsel %vm1206_vm7, %v2207_v12, %v1227_v56  ;;  %v1233_v29 = vsel %vm1202_vm5, %v1918_v50, %v1232_v8  ;;  %v1237_v59 = vsel %vm1196_vm2, %v1940_v15, %v1236_v57  ;;  %v2210_v50 = vld [vmem:[#allocation15_spill] sm:$0xff] }
  0xbc   : > { %v1234_v13 = vsel %vm1204_vm6, %v2208_v38, %v1233_v29  ;;  %v1238_v51 = vsel %vm1198_vm3, %v2209_v63, %v1237_v59  ;;  %v1243_v60 = vsel %vm1194_vm1, %v1978_v0, %v1970_v5  ;;  %v1250_v32 = vsel %vm1194_vm1, %v1087_v30, %v2010_v17  ;;  %1267 = vst [vmem:[%s2029_s25 + $0x10] sm:$0xff] %v1221_v58  ;;  %v2212_v0 = vld [vmem:[#allocation20_spill] sm:$0xff] }
  0xbd   : > { %1268 = vst [vmem:[%s2029_s25 + $0x18] sm:$0xff] %v1228_v36  ;;  %v1235_v21 = vsel %vm1206_vm7, %v2210_v50, %v1234_v13  ;;  %v1239_v15 = vsel %vm1200_vm4, %v2211_v45, %v1238_v51  ;;  %v1244_v24 = vsel %vm1196_vm2, %v1980_v34, %v1243_v60  ;;  %v1251_v28 = vsel %vm1196_vm2, %v2015_v54, %v1250_v32 }
  0xbe   : > { %v1129_v44 = vmax.f32 %v1127_v22, %v1128_v62  ;;  %v1240_v5 = vsel %vm1202_vm5, %v1958_v53, %v1239_v15  ;;  %v1245_v17 = vsel %vm1198_vm3, %v2212_v0, %v1244_v24  ;;  %v1252_v30 = vsel %vm1198_vm3, %v1101_v20, %v1251_v28  ;;  %1269 = vst [vmem:[%s2029_s25 + $0x20] sm:$0xff] %v1235_v21  ;;  %v2215_v22 = vld [vmem:[#allocation19_spill] sm:$0xff] }
  0xbf   : > { %v1241_v27 = vsel %vm1204_vm6, %v2213_v26, %v1240_v5  ;;  %v1246_v34 = vsel %vm1200_vm4, %v2214_v49, %v1245_v17  ;;  %v1253_v54 = vsel %vm1200_vm4, %v2020_v33, %v1252_v30 }
  0xc0   : > { %v1242_v62 = vsel %vm1206_vm7, %v2215_v22, %v1241_v27  ;;  %v1247_v53 = vsel %vm1202_vm5, %v1998_v11, %v1246_v34  ;;  %v1254_v46 = vsel %vm1202_vm5, %v1115_v23, %v1253_v54 }
  0xc1   : > { %v1248_v20 = vsel %vm1204_vm6, %v2000_v31, %v1247_v53  ;;  %v1255_v37 = vsel %vm1204_vm6, %v1122_v55, %v1254_v46  ;;  %1270 = vst [vmem:[%s2029_s25 + $0x28] sm:$0xff] %v1242_v62 }
  0xc2   : > { %v1249_v35 = vsel %vm1206_vm7, %v2004_v61, %v1248_v20  ;;  %v1256_v48 = vsel %vm1206_vm7, %v1129_v44, %v1255_v37 }
  0xc3   : > { %1271 = vst [vmem:[%s2029_s25 + $0x30] sm:$0xff] %v1249_v35  ;;  %1272 = vst [vmem:[%s2029_s25 + $0x38] sm:$0xff] %v1256_v48 }
  0xc4 PF: > { %s13_s12 = sadd.s32 1, %s1358_s12  }
  0xc5   : > { %p10_p4 = scmp.ge.s32.totalorder %s13_s12, 4  }
  0xc7   :  { %12 = sbr.rel (!%p10_p4) target bundleno = 1 (0x1), region = 62 }

// kernel: vgg_forward.10
= control target key start
LH: loop header
LB: loop body
LE: loop exit
PB: predicated region body
PF: predicated region fallthrough
CT: control target
= control target key end

     0   :  { %s1262_s21 = smov 0   ;;  %s1569_s0 = inlined_call_operand.vmem [shape: f32[1,128], index: 0, kind: input, shape index: {}]   ;;  %s1570_s1 = inlined_call_operand.vmem [shape: f32[1,128], index: 1, kind: input, shape index: {}]   ;;  %s1571_s2 = inlined_call_operand.vmem [shape: f32[2,8,8,128], index: 2, kind: input, shape index: {}]   ;;  %s1572_s3 = inlined_call_operand.vmem [shape: bf16[72,128], index: 3, kind: input, shape index: {}]   ;;  %s1573_s4 = inlined_call_operand.vmem [shape: f32[2,8,8,128], index: 4, kind: output, shape index: {0}]   ;;  %s1574_s5 = inlined_call_operand.vmem [shape: f32[2,1,128], index: 5, kind: output, shape index: {1}]   ;;  %s1575_s6 = inlined_call_operand.vmem [shape: f32[2,1,128], index: 6, kind: output, shape index: {2}]  }
   0x1 LB: > { %s1123_s0 = sadd.s32 4294967295, %s1216_s21   ;;  %p1127_p0 = scmp.ge.s32.totalorder %s1216_s21, 1  ;;  %s1216_s21 = sphi %s1262_s21, %s17_s21  }
   0x2   : > { %p217_p1 = scmp.lt.s32.totalorder %s1216_s21, 3 }
   0x4   : > { %p218_p2 = pnand %p1127_p0, %p217_p1 }
   0x5   : > { %vm286_vm0 = vcmask (!%p218_p2), 64512   ;;  %vm291_vm1 = vcmask (!%p218_p2), 57344   ;;  %vm318_vm2 = vcmask (!%p218_p2), 61444   ;;  %v1218_v0 = vmov (!%p218_p2), 0   ;;  %p253_p3 = scmp.lt.s32.totalorder (!%p218_p2), %s1123_s0, 1  ;;  %s1219_s25 = smov (!%p218_p2), 16  }
   0x6   : > { %221 = sbr.rel (%p218_p2) target bundleno = 512 (0x200), region = 36  ;;  %287 = vst.msk [vmem:[#allocation2] sm:$0xff] (!%p218_p2), %vm286_vm0, %v1218_v0  ;;  %289 = vst.msk [vmem:[#allocation2 + $0x48] sm:$0xff] (!%p218_p2), %vm286_vm0, %v1218_v0  ;;  %vm292_vm3 = vsmask.f32 (!%p218_p2), 256  ;;  %vm409_vm8 = vcmask (!%p218_p2), 61440  }
   0x7   : > { %v297_v1 = vld [vmem:[#allocation2 + $0x10] sm:$0x1] (!%p218_p2)  ;;  %vm1272_vm4 = vmand (!%p218_p2), %vm291_vm1, %vm292_vm3  ;;  %vm319_vm5 = vsmask.f32 (!%p218_p2), 7954  ;;  %v324_v3 = vld [vmem:[#allocation2 + $0x10] sm:$0x10] (!%p218_p2) }
   0x8   : > { %v298_v4 = vsel (!%p218_p2), %vm1272_vm4, 0, %v297_v1  ;;  %vm1280_vm6 = vmand (!%p218_p2), %vm318_vm2, %vm319_vm5  ;;  %v294_v6 = vld [vmem:[#allocation2 + $0x8] sm:$0x1] (!%p218_p2)  ;;  %v321_v7 = vld [vmem:[#allocation2 + $0x8] sm:$0x10] (!%p218_p2)  ;;  %s1220_s26 = smov (!%p218_p2), 8  }
   0x9   : > { %299 = vst [vmem:[#allocation2 + $0x10] sm:$0x1] (!%p218_p2), %v298_v4  ;;  %v325_v8 = vsel (!%p218_p2), %vm1280_vm6, 0, %v324_v3  ;;  %v295_v9 = vsel (!%p218_p2), %vm1272_vm4, 0, %v294_v6  ;;  %v322_v10 = vsel (!%p218_p2), %vm1280_vm6, 0, %v321_v7  ;;  %s1221_s27 = smov (!%p218_p2), 24  }
   0xa   : > { %v303_v11 = vld [vmem:[#allocation2 + $0x20] sm:$0x1] (!%p218_p2)  ;;  %326 = vst [vmem:[#allocation2 + $0x10] sm:$0x10] (!%p218_p2), %v325_v8  ;;  %296 = vst [vmem:[#allocation2 + $0x8] sm:$0x1] (!%p218_p2), %v295_v9 }
   0xb   : > { %323 = vst [vmem:[#allocation2 + $0x8] sm:$0x10] (!%p218_p2), %v322_v10  ;;  %v304_v12 = vsel (!%p218_p2), %vm1272_vm4, 0, %v303_v11  ;;  %v330_v13 = vld [vmem:[#allocation2 + $0x20] sm:$0x10] (!%p218_p2)  ;;  %s1222_s28 = smov (!%p218_p2), 32  }
   0xc   : > { %v300_v14 = vld [vmem:[#allocation2 + $0x18] sm:$0x1] (!%p218_p2)  ;;  %305 = vst [vmem:[#allocation2 + $0x20] sm:$0x1] (!%p218_p2), %v304_v12  ;;  %v331_v15 = vsel (!%p218_p2), %vm1280_vm6, 0, %v330_v13  ;;  %s1223_s29 = smov (!%p218_p2), 40  }
   0xd   : > { %s1583_s0 = smov (!%p253_p3, %s1123_s0), 1  ;;  %v301_v16 = vsel %vm1272_vm4, 0, %v300_v14  ;;  %v327_v17 = vld [vmem:[#allocation2 + $0x18] sm:$0x10]  ;;  %vm410_vm7 = vsmask.f32 4354 }
   0xe   : > { %s1147_s1 = sshll.u32 %s1583_s0, 6  ;;  %332 = vst [vmem:[#allocation2 + $0x20] sm:$0x10] %v331_v15  ;;  %302 = vst [vmem:[#allocation2 + $0x18] sm:$0x1] %v301_v16  ;;  %v328_v21 = vsel %vm1280_vm6, 0, %v327_v17 }
   0xf   : > { %s1298_s24 = scalar_lea.vmem %s1571_s2, %s1147_s1  ;;  %v456_v22 = vld [vmem:[#allocation2] sm:$0x1e]  ;;  %329 = vst [vmem:[#allocation2 + $0x18] sm:$0x10] %v328_v21  ;;  %v306_v33 = vld [vmem:[#allocation2 + $0x28] sm:$0x1]  ;;  %vm1317_vm9 = vmand %vm409_vm8, %vm410_vm7  ;;  %s262_s22 = scalar_lea.vmem %s1573_s4, %s1147_s1 }
  0x10   : > { %v271_v18 = vld [vmem:[%s1298_s24 + $0x8] sm:$0xff]  ;;  %v270_v19 = vld [vmem:[%s1298_s24] sm:$0xff]  ;;  %v273_v20 = vld [vmem:[%s1298_s24 + $0x18] sm:$0xff]  ;;  %v546_v28 = vrot.slane %v456_v22, 1  ;;  %v307_v60 = vsel %vm1272_vm4, 0, %v306_v33  ;;  %s1224_s8 = smov 48  }
  0x11   : > { %v446_v23 = vld [vmem:[#allocation2] sm:$0x1f]  ;;  %v279_v24 = vpack.c.bf16 %v271_v18, %v271_v18  ;;  %v278_v25 = vpack.c.bf16 %v270_v19, %v270_v19  ;;  %v281_v26 = vpack.c.bf16 %v273_v20, %v273_v20  ;;  %v272_v27 = vld [vmem:[%s1298_s24 + $0x10] sm:$0xff]  ;;  %v333_v38 = vld [vmem:[#allocation2 + $0x28] sm:$0x10]  ;;  %s1225_s13 = smov 56  }
  0x12   : > { %v467_v29 = vshrl.u32 %v446_v23, 16  ;;  %v469_v30 = vshll.u32 %v446_v23, 16  ;;  %v280_v31 = vpack.c.bf16 %v272_v27, %v272_v27  ;;  %v274_v32 = vld [vmem:[%s1298_s24 + $0x20] sm:$0xff]  ;;  %554 = vrot.lane.b32.xlu0 %v546_v28, %s1219_s25  ;;  %v275_v43 = vld [vmem:[%s1298_s24 + $0x28] sm:$0xff]  ;;  %v415_v45 = vld [vmem:[#allocation2 + $0x10] sm:$0x1f] }
  0x13   : > { %v353_v34 = vshrl.u32 %v279_v24, 16  ;;  %v356_v35 = vshll.u32 %v279_v24, 16  ;;  %v346_v36 = vshrl.u32 %v278_v25, 16  ;;  %v349_v37 = vshll.u32 %v278_v25, 16  ;;  %v412_v47 = vld [vmem:[#allocation2 + $0x8] sm:$0x1f] }
  0x14   : > { %v471_v39 = vrot.slane %v469_v30, 1  ;;  %v367_v40 = vshrl.u32 %v281_v26, 16  ;;  %v370_v41 = vshll.u32 %v281_v26, 16  ;;  %v360_v42 = vshrl.u32 %v280_v31, 16  ;;  %v309_v55 = vld [vmem:[#allocation2 + $0x30] sm:$0x1] }
  0x15   : > { %v355_v44 = vrot.slane %v353_v34, 7  ;;  %v348_v46 = vrot.slane %v346_v36, 7  ;;  %v282_v48 = vpack.c.bf16 %v274_v32, %v274_v32  ;;  %v1313_v49 = vpack.c.bf16 %v275_v43, %v275_v43  ;;  %v276_v56 = vld [vmem:[%s1298_s24 + $0x30] sm:$0xff]  ;;  %v421_v59 = vld [vmem:[#allocation2 + $0x20] sm:$0x1f]  ;;  %v277_v12 = vld [vmem:[%s1298_s24 + $0x38] sm:$0xff]  ;;  %s265_s24 = scalar_lea.vmem %s1574_s5, %s1583_s0 }
  0x16   : > { %v472_v50 = vor.u32 %v471_v39, %v467_v29  ;;  %v369_v52 = vrot.slane %v367_v40, 7  ;;  %v362_v53 = vrot.slane %v360_v42, 7  ;;  %v363_v54 = vshll.u32 %v280_v31, 16  ;;  %v336_v62 = vld [vmem:[#allocation2 + $0x30] sm:$0x10]  ;;  %s1226_s18 = smov 64  }
  0x17   : > { %v358_v57 = vor.u32 %v356_v35, %v355_v44  ;;  %v351_v58 = vor.u32 %v349_v37, %v348_v46  ;;  %v334_v61 = vsel %vm1280_vm6, 0, %v333_v38  ;;  %v418_v1 = vld [vmem:[#allocation2 + $0x18] sm:$0x1f]  ;;  %308 = vst [vmem:[#allocation2 + $0x28] sm:$0x1] %v307_v60  ;;  %v374_v3 = vshrl.u32 %v282_v48, 16 }
  0x18   : > { %522 = vrot.lane.b32.xlu0 %v472_v50, %s1220_s26  ;;  %v372_v63 = vor.u32 %v370_v41, %v369_v52  ;;  %v365_v0 = vor.u32 %v363_v54, %v362_v53  ;;  %335 = vst [vmem:[#allocation2 + $0x28] sm:$0x10] %v334_v61  ;;  %v377_v4 = vshll.u32 %v282_v48, 16  ;;  %v312_v6 = vld [vmem:[#allocation2 + $0x38] sm:$0x1]  ;;  %v310_v9 = vsel %vm1272_vm4, 0, %v309_v55 }
  0x19   : > { %v416_v7 = vsel %vm1317_vm9, %v358_v57, %v415_v45  ;;  %v413_v8 = vsel %vm1317_vm9, %v351_v58, %v412_v47  ;;  %v337_v10 = vsel %vm1280_vm6, 0, %v336_v62  ;;  %v339_v11 = vld [vmem:[#allocation2 + $0x38] sm:$0x10]  ;;  %v376_v15 = vrot.slane %v374_v3, 7  ;;  %311 = vst [vmem:[#allocation2 + $0x30] sm:$0x1] %v310_v9 }
  0x1a   : > { %417 = vst [vmem:[#allocation2 + $0x10] sm:$0x1f] %v416_v7  ;;  %414 = vst [vmem:[#allocation2 + $0x8] sm:$0x1f] %v413_v8  ;;  %v422_v13 = vsel %vm1317_vm9, %v372_v63, %v421_v59  ;;  %v419_v14 = vsel %vm1317_vm9, %v365_v0, %v418_v1  ;;  %v315_v16 = vld [vmem:[#allocation2 + $0x40] sm:$0x1]  ;;  %v284_v18 = vpack.c.bf16 %v276_v56, %v276_v56 }
  0x1b   : > { %338 = vst [vmem:[#allocation2 + $0x30] sm:$0x10] %v337_v10  ;;  %v342_v17 = vld [vmem:[#allocation2 + $0x40] sm:$0x10]  ;;  %423 = vst [vmem:[#allocation2 + $0x20] sm:$0x1f] %v422_v13  ;;  %v379_v21 = vor.u32 %v377_v4, %v376_v15  ;;  %v285_v23 = vpack.c.bf16 %v277_v12, %v277_v12 }
  0x1c   : > { %420 = vst [vmem:[#allocation2 + $0x18] sm:$0x1f] %v419_v14  ;;  %v313_v19 = vsel %vm1272_vm4, 0, %v312_v6  ;;  %v340_v20 = vsel %vm1280_vm6, 0, %v339_v11  ;;  %v381_v22 = vshrl.u32 %v1313_v49, 16  ;;  %v316_v24 = vsel %vm1272_vm4, 0, %v315_v16 }
  0x1d   : > { %314 = vst [vmem:[#allocation2 + $0x38] sm:$0x1] %v313_v19  ;;  %341 = vst [vmem:[#allocation2 + $0x38] sm:$0x10] %v340_v20  ;;  %v343_v25 = vsel %vm1280_vm6, 0, %v342_v17  ;;  %v388_v26 = vshrl.u32 %v284_v18, 16 }
  0x1e   : > { %317 = vst [vmem:[#allocation2 + $0x40] sm:$0x1] %v316_v24  ;;  %344 = vst [vmem:[#allocation2 + $0x40] sm:$0x10] %v343_v25  ;;  %v395_v27 = vshrl.u32 %v285_v23, 16  ;;  %v383_v30 = vrot.slane %v381_v22, 7 }
  0x1f   : > { %v424_v28 = vld [vmem:[#allocation2 + $0x28] sm:$0x1f]  ;;  %v384_v31 = vshll.u32 %v1313_v49, 16  ;;  %v391_v2 = vshll.u32 %v284_v18, 16  ;;  %v398_v34 = vshll.u32 %v285_v23, 16  ;;  %v390_v36 = vrot.slane %v388_v26, 7 }
  0x20   : > { %v425_v29 = vsel %vm1317_vm9, %v379_v21, %v424_v28  ;;  %v397_v37 = vrot.slane %v395_v27, 7  ;;  %v1205_v12 = vld [vmem:[%s1572_s3] sm:$0xff]   ;;  %v1206_v14 = vld [vmem:[%s1572_s3 + $0x8] sm:$0xff]   ;;  %v1207_v16 = vld [vmem:[%s1572_s3 + $0x10] sm:$0xff]   ;;  %vm905_vm10 = vcmask 1043456   ;;  %vm717_vm11 = vcmask 130048  }
  0x21   : > { %v1352_v32 = vld [vmem:[#allocation2 + $0x10] sm:$0xf]  ;;  %v1354_v33 = vld [vmem:[#allocation2 + $0x8] sm:$0xf]  ;;  %426 = vst [vmem:[#allocation2 + $0x28] sm:$0x1f] %v425_v29  ;;  %v386_v43 = vor.u32 %v384_v31, %v383_v30  ;;  %v393_v53 = vor.u32 %v391_v2, %v390_v36  ;;  %1158 = vmatprep.subr.bf16.mxu0 %v1205_v12  ;;  %1176 = vmatprep.subr.bf16.mxu1 %v1205_v12 }
  0x22   : > { %580 = vrot.lane.b32.xlu1 %v1352_v32, %s1221_s27  ;;  %578 = vrot.lane.b32.xlu0 %v1354_v33, %s1221_s27  ;;  %v1360_v5 = vld [vmem:[#allocation2 + $0x20] sm:$0xf]  ;;  %v457_v35 = vld [vmem:[#allocation2 + $0x8] sm:$0x1e]  ;;  %v458_v39 = vld [vmem:[#allocation2 + $0x10] sm:$0x1e]  ;;  %v400_v54 = vor.u32 %v398_v34, %v397_v37 }
  0x23   : > { %v1362_v38 = vld [vmem:[#allocation2 + $0x18] sm:$0xf]  ;;  %v447_v40 = vld [vmem:[#allocation2 + $0x8] sm:$0x1f]  ;;  %v448_v42 = vld [vmem:[#allocation2 + $0x10] sm:$0x1f]  ;;  %1159 = vmatpush3.bf16.msra.mxu0 %v1205_v12  ;;  %1181 = vmatpush3.bf16.msra.mxu1 %v1205_v12 }
  0x24   : > { %v476_v41 = vshll.u32 %v447_v40, 16  ;;  %v547_v44 = vrot.slane %v457_v35, 1  ;;  %v1368_v45 = vrot.slane %v458_v39, 1  ;;  %v459_v46 = vld [vmem:[#allocation2 + $0x18] sm:$0x1e]  ;;  %v474_v47 = vshrl.u32 %v447_v40, 16  ;;  %1160 = vmatprep.subr.bf16.mxu0 %v1206_v14  ;;  %1177 = vmatprep.subr.bf16.mxu1 %v1206_v14 }
  0x25   : > { %v483_v49 = vshll.u32 %v448_v42, 16  ;;  %v449_v50 = vld [vmem:[#allocation2 + $0x18] sm:$0x1f]  ;;  %v427_v52 = vld [vmem:[#allocation2 + $0x30] sm:$0x1f]  ;;  %v1372_v56 = vrot.slane %v459_v46, 1 }
  0x26   : > { %584 = vrot.lane.b32.xlu1 %v1360_v5, %s1221_s27  ;;  %582 = vrot.lane.b32.xlu0 %v1362_v38, %s1221_s27  ;;  %v478_v48 = vrot.slane %v476_v41, 1  ;;  %v428_v55 = vsel %vm1317_vm9, %v386_v43, %v427_v52  ;;  %v481_v57 = vshrl.u32 %v448_v42, 16  ;;  %v490_v60 = vshll.u32 %v449_v50, 16  ;;  %v430_v61 = vld [vmem:[#allocation2 + $0x38] sm:$0x1f] }
  0x27   : > { %429 = vst [vmem:[#allocation2 + $0x30] sm:$0x1f] %v428_v55  ;;  %v485_v59 = vrot.slane %v483_v49, 1  ;;  %v433_v62 = vld [vmem:[#allocation2 + $0x40] sm:$0x1f]  ;;  %v431_v63 = vsel %vm1317_vm9, %v393_v53, %v430_v61  ;;  %v488_v3 = vshrl.u32 %v449_v50, 16  ;;  %1161 = vmatpush3.bf16.msra.mxu0 %v1206_v14  ;;  %1182 = vmatpush3.bf16.msra.mxu1 %v1206_v14 }
  0x28   : > { %v479_v58 = vor.u32 %v478_v48, %v474_v47  ;;  %v434_v0 = vsel %vm1317_vm9, %v400_v54, %v433_v62  ;;  %432 = vst [vmem:[#allocation2 + $0x38] sm:$0x1f] %v431_v63  ;;  %v492_v4 = vrot.slane %v490_v60, 1  ;;  %v450_v6 = vld [vmem:[#allocation2 + $0x20] sm:$0x1f]  ;;  %1162 = vmatprep.subr.bf16.mxu0 %v1207_v16  ;;  %1178 = vmatprep.subr.bf16.mxu1 %v1207_v16  ;;  %v1208_v19 = vld [vmem:[%s1572_s3 + $0x18] sm:$0xff]  }
  0x29   : > { %435 = vst [vmem:[#allocation2 + $0x40] sm:$0x1f] %v434_v0  ;;  %v486_v1 = vor.u32 %v485_v59, %v481_v57  ;;  %v497_v8 = vshll.u32 %v450_v6, 16  ;;  %v495_v51 = vshrl.u32 %v450_v6, 16  ;;  %v460_v11 = vld [vmem:[#allocation2 + $0x20] sm:$0x1e] }
  0x2a   : > { %556 = vrot.lane.b32.xlu1 %v547_v44, %s1219_s25  ;;  %558 = vrot.lane.b32.xlu0 %v1368_v45, %s1219_s25  ;;  %v493_v7 = vor.u32 %v492_v4, %v488_v3  ;;  %v550_v13 = vrot.slane %v460_v11, 1  ;;  %v451_v15 = vld [vmem:[#allocation2 + $0x28] sm:$0x1f]  ;;  %v1209_v23 = vld [vmem:[%s1572_s3 + $0x20] ss:$0 sps:$4 sm:$0xff]   ;;  %vm734_vm12 = vcmask 195584  }
  0x2b   : > { %v499_v9 = vrot.slane %v497_v8, 1  ;;  %v504_v17 = vshll.u32 %v451_v15, 16  ;;  %v1412_v18 = vld [vmem:[#allocation2 + $0x28] sm:$0xf]  ;;  %1163 = vmatpush3.bf16.msra.mxu0 %v1207_v16  ;;  %1183 = vmatpush3.bf16.msra.mxu1 %v1207_v16  ;;  %v502_v20 = vshrl.u32 %v451_v15, 16  ;;  %v907_v26 = vsel %vm905_vm10, %v1209_v23, 0 }
  0x2c   : > { %1164 = vmatprep.subr.bf16.mxu0 %v1208_v19  ;;  %1179 = vmatprep.subr.bf16.mxu1 %v1208_v19  ;;  %v461_v2 = vld [vmem:[#allocation2 + $0x28] sm:$0x1e]  ;;  %vm751_vm13 = vcmask 261120   ;;  %vm768_vm14 = vcmask 326656   ;;  %vm785_vm15 = vcmask 392192   ;;  %vm802_vm1 = vcmask 457728  }
  0x2d   : > { %v500_v10 = vor.u32 %v499_v9, %v495_v51  ;;  %v506_v21 = vrot.slane %v504_v17, 1  ;;  %v551_v34 = vrot.slane %v461_v2, 1  ;;  %v455_v54 = vld [vmem:[#allocation2 + $0x48] sm:$0x1f]  ;;  %vm819_vm2 = vcmask 523264  }
  0x2e   : > { %560 = vrot.lane.b32.xlu1 %v1372_v56, %s1219_s25  ;;  %524 = vrot.lane.b32.xlu0 %v479_v58, %s1220_s26  ;;  %v452_v22 = vld [vmem:[#allocation2 + $0x30] sm:$0x1f]  ;;  %v445_v57 = vld [vmem:[#allocation2 + $0x48] sm:$0xf]  ;;  %v653_v59 = vshrl.u32 %v455_v54, 16  ;;  %vm892_vm3 = vcmask 588800  }
  0x2f   : > { %1165 = vmatpush3.bf16.msra.mxu0 %v1208_v19  ;;  %1184 = vmatpush3.bf16.msra.mxu1 %v1208_v19  ;;  %v507_v24 = vor.u32 %v506_v21, %v502_v20  ;;  %v511_v25 = vshll.u32 %v452_v22, 16  ;;  %v509_v27 = vshrl.u32 %v452_v22, 16  ;;  %v453_v29 = vld [vmem:[#allocation2 + $0x38] sm:$0x1f]  ;;  %v462_v37 = vld [vmem:[#allocation2 + $0x30] sm:$0x1e] }
  0x30   : > { %1186 = vmatprep.subr.msk.bf16.mxu0 %vm905_vm10, %v1209_v23  ;;  %1187 = vmatprep.subr.msk.bf16.mxu1 %vm905_vm10, %v1209_v23  ;;  %v518_v31 = vshll.u32 %v453_v29, 16  ;;  %v516_v35 = vshrl.u32 %v453_v29, 16  ;;  %v552_v40 = vrot.slane %v462_v37, 1  ;;  %v463_v41 = vld [vmem:[#allocation2 + $0x38] sm:$0x1e] }
  0x31   : > { %v513_v28 = vrot.slane %v511_v25, 1  ;;  %v553_v42 = vrot.slane %v463_v41, 1  ;;  %v1440_v43 = vld [vmem:[#allocation2 + $0x38] sm:$0xf]  ;;  %v444_v47 = vld [vmem:[#allocation2 + $0x40] sm:$0xf] }
  0x32   : > { %526 = vrot.lane.b32.xlu1 %v486_v1, %s1220_s26  ;;  %601 = vrot.lane.b32.xlu0 %v479_v58, %s1222_s28  ;;  %v520_v36 = vrot.slane %v518_v31, 1  ;;  %v464_v52 = vld [vmem:[#allocation2 + $0x40] sm:$0x1e]  ;;  %v465_v0 = vld [vmem:[#allocation2 + $0x48] sm:$0x1e] }
  0x33   : > { %1167 = vmatpush3.bf16.msra.mxu0 %v907_v26  ;;  %1185 = vmatpush3.bf16.msra.mxu1 %v907_v26  ;;  %v514_v30 = vor.u32 %v513_v28, %v509_v27  ;;  %v618_v53 = vrot.slane %v464_v52, 1  ;;  %v676_v4 = vrot.slane %v465_v0, 1 }
  0x34   : > { %v521_v39 = vor.u32 %v520_v36, %v516_v35 }
  0x36   : > { %528 = vrot.lane.b32.xlu1 %v493_v7, %s1220_s26  ;;  %605 = vrot.lane.b32.xlu0 %v493_v7, %s1222_s28 }
  0x3a   : > { %603 = vrot.lane.b32.xlu1 %v486_v1, %s1222_s28  ;;  %619 = vrot.lane.b32.xlu0 %v547_v44, %s1223_s29  ;;  %v1445_v44 = vld [vmem:[#allocation2 + $0x30] sm:$0xf] }
  0x3e   : > { %607 = vrot.lane.b32.xlu1 %v500_v10, %s1222_s28  ;;  %623 = vrot.lane.b32.xlu0 %v1372_v56, %s1223_s29 }
  0x42   : > { %621 = vrot.lane.b32.xlu1 %v1368_v45, %s1223_s29  ;;  %636 = vrot.lane.b32.xlu0 %v1352_v32, %s1224_s8 }
  0x46   : > { %625 = vrot.lane.b32.xlu1 %v550_v13, %s1223_s29  ;;  %640 = vrot.lane.b32.xlu0 %v1360_v5, %s1224_s8 }
  0x4a   : > { %638 = vrot.lane.b32.xlu1 %v1362_v38, %s1224_s8  ;;  %659 = vrot.lane.b32.xlu0 %v486_v1, %s1225_s13 }
  0x4e   : > { %642 = vrot.lane.b32.xlu1 %v1412_v18, %s1224_s8  ;;  %663 = vrot.lane.b32.xlu0 %v500_v10, %s1225_s13 }
  0x52   : > { %661 = vrot.lane.b32.xlu1 %v493_v7, %s1225_s13  ;;  %677 = vrot.lane.b32.xlu0 %v1368_v45, %s1226_s18  ;;  %v454_v45 = vld [vmem:[#allocation2 + $0x40] sm:$0x1f] }
  0x53   : > { %v597_v46 = vshll.u32 %v454_v45, 16  ;;  %v595_v48 = vshrl.u32 %v454_v45, 16 }
  0x55   : > { %v599_v49 = vrot.slane %v597_v46, 1 }
  0x56   : > { %665 = vrot.lane.b32.xlu1 %v507_v24, %s1225_s13  ;;  %530 = vrot.lane.b32.xlu0 %v500_v10, %s1220_s26 }
  0x57   : > { %v600_v50 = vor.u32 %v599_v49, %v595_v48 }
  0x5a   : > { %679 = vrot.lane.b32.xlu1 %v1372_v56, %s1226_s18  ;;  %681 = vrot.lane.b32.xlu0 %v550_v13, %s1226_s18  ;;  %v655_v56 = vshll.u32 %v455_v54, 16 }
  0x5c   : > { %v657_v60 = vrot.slane %v655_v56, 1 }
  0x5e   : > { %532 = vrot.lane.b32.xlu1 %v507_v24, %s1220_s26  ;;  %534 = vrot.lane.b32.xlu0 %v514_v30, %s1220_s26  ;;  %v658_v61 = vor.u32 %v657_v60, %v653_v59 }
  0x62   : > { %683 = vrot.lane.b32.xlu1 %v551_v34, %s1226_s18  ;;  %562 = vrot.lane.b32.xlu0 %v550_v13, %s1219_s25 }
  0x66   : > { %536 = vrot.lane.b32.xlu1 %v521_v39, %s1220_s26  ;;  %566 = vrot.lane.b32.xlu0 %v552_v40, %s1219_s25 }
  0x6a   : > { %564 = vrot.lane.b32.xlu1 %v551_v34, %s1219_s25  ;;  %586 = vrot.lane.b32.xlu0 %v1412_v18, %s1221_s27 }
  0x6e   : > { %568 = vrot.lane.b32.xlu1 %v553_v42, %s1219_s25  ;;  %590 = vrot.lane.b32.xlu0 %v1440_v43, %s1221_s27 }
  0x72   : > { %588 = vrot.lane.b32.xlu1 %v1445_v44, %s1221_s27  ;;  %609 = vrot.lane.b32.xlu0 %v507_v24, %s1222_s28  ;;  %v436_v24 = vld [vmem:[#allocation2] sm:$0xf] }
  0x76   : > { %592 = vrot.lane.b32.xlu1 %v444_v47, %s1221_s27  ;;  %613 = vrot.lane.b32.xlu0 %v521_v39, %s1222_s28  ;;  %s268_s27 = scalar_lea.vmem %s1575_s6, %s1583_s0 }
  0x7a   : > { %611 = vrot.lane.b32.xlu1 %v514_v30, %s1222_s28  ;;  %627 = vrot.lane.b32.xlu0 %v551_v34, %s1223_s29 }
  0x7e   : > { %615 = vrot.lane.b32.xlu1 %v600_v50, %s1222_s28  ;;  %631 = vrot.lane.b32.xlu0 %v553_v42, %s1223_s29 }
  0x82   : > { %629 = vrot.lane.b32.xlu1 %v552_v40, %s1223_s29  ;;  %644 = vrot.lane.b32.xlu0 %v1445_v44, %s1224_s8 }
  0x84   : > { %v555_v55 = vpop.permute.xlu0 %554 }
  0x86   : > { %633 = vrot.lane.b32.xlu1 %v618_v53, %s1223_s29  ;;  %648 = vrot.lane.b32.xlu0 %v444_v47, %s1224_s8 }
  0x8a   : > { %646 = vrot.lane.b32.xlu1 %v1440_v43, %s1224_s8  ;;  %667 = vrot.lane.b32.xlu0 %v514_v30, %s1225_s13  ;;  %v523_v58 = vpop.permute.xlu0 %522 }
  0x8b   : > { %v695_v27 = vsel %vm286_vm0, %v436_v24, %v523_v58 }
  0x8c   : > { %v719_v31 = vsel %vm717_vm11, %v695_v27, %v555_v55 }
  0x8e   : > { %650 = vrot.lane.b32.xlu1 %v445_v57, %s1224_s8  ;;  %671 = vrot.lane.b32.xlu0 %v600_v50, %s1225_s13 }
  0x92   : > { %669 = vrot.lane.b32.xlu1 %v521_v39, %s1225_s13  ;;  %685 = vrot.lane.b32.xlu0 %v552_v40, %s1226_s18 }
  0x94   : > { %v581_v62 = vpop.permute.xlu1 %580  ;;  %v579_v63 = vpop.permute.xlu0 %578 }
  0x95   : > { %v736_v34 = vsel %vm734_vm12, %v719_v31, %v579_v63 }
  0x96   : > { %673 = vrot.lane.b32.xlu1 %v658_v61, %s1225_s13  ;;  %689 = vrot.lane.b32.xlu0 %v618_v53, %s1226_s18 }
  0x98   : > { %v1470_v1 = vpop.permute.xlu1 %584  ;;  %v583_v3 = vpop.permute.xlu0 %582 }
  0x9a   : > { %687 = vrot.lane.b32.xlu1 %v553_v42, %s1226_s18 }
  0x9c   : > { %v557_v6 = vpop.permute.xlu1 %556  ;;  %v559_v7 = vpop.permute.xlu0 %558 }
  0x9e   : > { %691 = vrot.lane.b32.xlu1 %v676_v4, %s1226_s18 }
  0xa0   : > { %v561_v8 = vpop.permute.xlu1 %560  ;;  %v525_v51 = vpop.permute.xlu0 %524 }
  0xa1   : > { %v698_v28 = vsel %vm286_vm0, %v1354_v33, %v525_v51 }
  0xa2   : > { %v721_v2 = vsel %vm717_vm11, %v698_v28, %v557_v6 }
  0xa3   : > { %v738_v36 = vsel %vm734_vm12, %v721_v2, %v581_v62 }
  0xa4   : > { %v527_v9 = vpop.permute.xlu1 %526  ;;  %v602_v10 = vpop.permute.xlu0 %601 }
  0xa5   : > { %v701_v35 = vsel %vm286_vm0, %v1352_v32, %v527_v9  ;;  %v753_v33 = vsel %vm751_vm13, %v736_v34, %v602_v10 }
  0xa6   : > { %v723_v32 = vsel %vm717_vm11, %v701_v35, %v559_v7 }
  0xa7   : > { %v740_v55 = vsel %vm734_vm12, %v723_v32, %v583_v3 }
  0xa8   : > { %v529_v11 = vpop.permute.xlu1 %528  ;;  %v606_v12 = vpop.permute.xlu0 %605 }
  0xa9   : > { %v704_v41 = vsel %vm286_vm0, %v1362_v38, %v529_v11  ;;  %v757_v60 = vsel %vm751_vm13, %v740_v55, %v606_v12 }
  0xaa   : > { %v725_v53 = vsel %vm717_vm11, %v704_v41, %v561_v8 }
  0xab   : > { %v742_v57 = vsel %vm734_vm12, %v725_v53, %v1470_v1 }
  0xac   : > { %v604_v13 = vpop.permute.xlu1 %603  ;;  %v620_v14 = vpop.permute.xlu0 %619 }
  0xad   : > { %v755_v40 = vsel %vm751_vm13, %v738_v36, %v604_v13  ;;  %v770_v42 = vsel %vm768_vm14, %v753_v33, %v620_v14 }
  0xb0   : > { %v608_v15 = vpop.permute.xlu1 %607  ;;  %v624_v16 = vpop.permute.xlu0 %623 }
  0xb1   : > { %v759_v61 = vsel %vm751_vm13, %v742_v57, %v608_v15  ;;  %v774_v62 = vsel %vm768_vm14, %v757_v60, %v624_v16 }
  0xb4   : > { %v622_v17 = vpop.permute.xlu1 %621  ;;  %v637_v19 = vpop.permute.xlu0 %636 }
  0xb5   : > { %v772_v45 = vsel %vm768_vm14, %v755_v40, %v622_v17  ;;  %v787_v46 = vsel %vm785_vm15, %v770_v42, %v637_v19 }
  0xb8   : > { %v626_v20 = vpop.permute.xlu1 %625  ;;  %v641_v21 = vpop.permute.xlu0 %640 }
  0xb9   : > { %v776_v63 = vsel %vm768_vm14, %v759_v61, %v626_v20  ;;  %v791_v0 = vsel %vm785_vm15, %v774_v62, %v641_v21 }
  0xbc   : > { %v639_v22 = vpop.permute.xlu1 %638  ;;  %v660_v23 = vpop.permute.xlu0 %659 }
  0xbd   : > { %v789_v47 = vsel %vm785_vm15, %v772_v45, %v639_v22  ;;  %v804_v48 = vsel %vm802_vm1, %v787_v46, %v660_v23 }
  0xc0   : > { %v643_v25 = vpop.permute.xlu1 %642  ;;  %v664_v26 = vpop.permute.xlu0 %663 }
  0xc1   : > { %v793_v3 = vsel %vm785_vm15, %v776_v63, %v643_v25  ;;  %v808_v4 = vsel %vm802_vm1, %v791_v0, %v664_v26 }
  0xc4   : > { %v662_v29 = vpop.permute.xlu1 %661  ;;  %v678_v30 = vpop.permute.xlu0 %677 }
  0xc5   : > { %v806_v49 = vsel %vm802_vm1, %v789_v47, %v662_v29  ;;  %v821_v38 = vsel %vm819_vm2, %v804_v48, %v678_v30 }
  0xc8   : > { %v666_v37 = vpop.permute.xlu1 %665  ;;  %v1483_v39 = vpop.permute.xlu0 %530 }
  0xc9   : > { %v810_v1 = vsel %vm802_vm1, %v793_v3, %v666_v37  ;;  %v707_v35 = vsel %vm286_vm0, %v1360_v5, %v1483_v39 }
  0xcc   : > { %v680_v50 = vpop.permute.xlu1 %679  ;;  %v682_v52 = vpop.permute.xlu0 %681 }
  0xcd   : > { %v823_v54 = vsel %vm819_vm2, %v806_v49, %v680_v50  ;;  %v825_v8 = vsel %vm819_vm2, %v808_v4, %v682_v52 }
  0xce   : > { %v1132_v56 = vcombine.low %v821_v38, %v823_v54 }
  0xd0   : > { %v533_v58 = vpop.permute.xlu1 %532  ;;  %1168 = vmatprep.mubr.msk.bf16.mxu0 %vm892_vm3, %v1132_v56  ;;  %v535_v59 = vpop.permute.xlu0 %534 }
  0xd1   : > { %v710_v36 = vsel %vm286_vm0, %v1412_v18, %v533_v58  ;;  %v713_v40 = vsel %vm286_vm0, %v1445_v44, %v535_v59 }
  0xd4   : > { %v684_v6 = vpop.permute.xlu1 %683  ;;  %v563_v7 = vpop.permute.xlu0 %562 }
  0xd5   : > { %v827_v51 = vsel %vm819_vm2, %v810_v1, %v684_v6  ;;  %v727_v37 = vsel %vm717_vm11, %v707_v35, %v563_v7 }
  0xd6   : > { %v1133_v9 = vcombine.low %v825_v8, %v827_v51 }
  0xd8   : > { %v537_v10 = vpop.permute.xlu1 %536  ;;  %1169 = vmatmul.mubr.msk.bf16.vlgmr.msra.gmra.mrb[0].mxu0 %vm892_vm3, %v1133_v9  ;;  %v567_v11 = vpop.permute.xlu0 %566 }
  0xd9   : > { %v716_v18 = vsel %vm286_vm0, %v1440_v43, %v537_v10  ;;  %v731_v48 = vsel %vm717_vm11, %v713_v40, %v567_v11 }
  0xdc   : > { %v565_v12 = vpop.permute.xlu1 %564  ;;  %v587_v13 = vpop.permute.xlu0 %586 }
  0xdd   : > { %v729_v33 = vsel %vm717_vm11, %v710_v36, %v565_v12  ;;  %v744_v41 = vsel %vm734_vm12, %v727_v37, %v587_v13 }
  0xe0   : > { %v569_v14 = vpop.permute.xlu1 %568  ;;  %v591_v15 = vpop.permute.xlu0 %590 }
  0xe1   : > { %v733_v44 = vsel %vm717_vm11, %v716_v18, %v569_v14  ;;  %v748_v52 = vsel %vm734_vm12, %v731_v48, %v591_v15 }
  0xe4   : > { %v589_v16 = vpop.permute.xlu1 %588  ;;  %v610_v17 = vpop.permute.xlu0 %609 }
  0xe5   : > { %v746_v42 = vsel %vm734_vm12, %v729_v33, %v589_v16  ;;  %v761_v46 = vsel %vm751_vm13, %v744_v41, %v610_v17 }
  0xe8   : > { %v593_v19 = vpop.permute.xlu1 %592  ;;  %v614_v20 = vpop.permute.xlu0 %613 }
  0xe9   : > { %v750_v53 = vsel %vm734_vm12, %v733_v44, %v593_v19  ;;  %v765_v55 = vsel %vm751_vm13, %v748_v52, %v614_v20 }
  0xec   : > { %v612_v21 = vpop.permute.xlu1 %611  ;;  %v628_v22 = vpop.permute.xlu0 %627 }
  0xed   : > { %v763_v5 = vsel %vm751_vm13, %v746_v42, %v612_v21  ;;  %v778_v39 = vsel %vm768_vm14, %v761_v46, %v628_v22 }
  0xf0   : > { %v616_v23 = vpop.permute.xlu1 %615  ;;  %v632_v24 = vpop.permute.xlu0 %631 }
  0xf1   : > { %v767_v56 = vsel %vm751_vm13, %v750_v53, %v616_v23  ;;  %v782_v59 = vsel %vm768_vm14, %v765_v55, %v632_v24 }
  0xf4   : > { %v630_v25 = vpop.permute.xlu1 %629  ;;  %v645_v26 = vpop.permute.xlu0 %644 }
  0xf5   : > { %v780_v47 = vsel %vm768_vm14, %v763_v5, %v630_v25  ;;  %v795_v49 = vsel %vm785_vm15, %v778_v39, %v645_v26 }
  0xf8   : > { %v634_v27 = vpop.permute.xlu1 %633  ;;  %v649_v28 = vpop.permute.xlu0 %648 }
  0xf9   : > { %v784_v60 = vsel %vm768_vm14, %v767_v56, %v634_v27  ;;  %v799_v63 = vsel %vm785_vm15, %v782_v59, %v649_v28 }
  0xfc   : > { %v647_v29 = vpop.permute.xlu1 %646  ;;  %v668_v30 = vpop.permute.xlu0 %667 }
  0xfd   : > { %v797_v50 = vsel %vm785_vm15, %v780_v47, %v647_v29  ;;  %v812_v38 = vsel %vm802_vm1, %v795_v49, %v668_v30 }
 0x100   : > { %v651_v31 = vpop.permute.xlu1 %650  ;;  %v672_v2 = vpop.permute.xlu0 %671 }
 0x101   : > { %v801_v0 = vsel %vm785_vm15, %v784_v60, %v651_v31  ;;  %v816_v3 = vsel %vm802_vm1, %v799_v63, %v672_v2 }
 0x104   : > { %v670_v34 = vpop.permute.xlu1 %669  ;;  %v686_v45 = vpop.permute.xlu0 %685 }
 0x105   : > { %v814_v43 = vsel %vm802_vm1, %v797_v50, %v670_v34  ;;  %v829_v57 = vsel %vm819_vm2, %v812_v38, %v686_v45 }
 0x108   : > { %v674_v32 = vpop.permute.xlu1 %673  ;;  %v690_v61 = vpop.permute.xlu0 %689 }
 0x109   : > { %v818_v4 = vsel %vm802_vm1, %v801_v0, %v674_v32  ;;  %v833_v6 = vsel %vm819_vm2, %v816_v3, %v690_v61 }
 0x10c   : > { %v688_v54 = vpop.permute.xlu1 %687 }
 0x10d   : > { %v831_v58 = vsel %vm819_vm2, %v814_v43, %v688_v54 }
 0x10e   : > { %v1134_v62 = vcombine.low %v829_v57, %v831_v58 }
 0x110   : > { %v692_v1 = vpop.permute.xlu1 %691  ;;  %1172 = vmatprep.mubr.msk.bf16.mxu1 %vm892_vm3, %v1134_v62 }
 0x111   : > { %v835_v7 = vsel %vm819_vm2, %v818_v4, %v692_v1 }
 0x112   : > { %v1135_v8 = vcombine.low %v833_v6, %v835_v7 }
 0x114   : > { %1173 = vmatmul.mubr.msk.bf16.vlgmr.msra.gmra.mrb[0].mxu1 %vm892_vm3, %v1135_v8 }
 0x1ab   : > { %v1170_v51 = vpop.f32.mrb[0].mxu0 }
 0x1ac   : > { %976 = vst [vmem:[%s262_s22 + $0x10] sm:$0xff] %v1170_v51  ;;  %v943_v9 = vpop.f32.mrb[1].mxu0  ;;  %v998_v15 = vmul.f32 %v1170_v51, %v1170_v51 }
 0x1ad   : > { %974 = vst [vmem:[%s262_s22] sm:$0xff] %v943_v9  ;;  %v1171_v10 = vpop.f32.mrb[2].mxu0  ;;  %v996_v12 = vmul.f32 %v943_v9, %v943_v9 }
 0x1ae   : > { %977 = vst [vmem:[%s262_s22 + $0x18] sm:$0xff] %v1171_v10  ;;  %v946_v11 = vpop.f32.mrb[3].mxu0  ;;  %v999_v19 = vmul.f32 %v1171_v10, %v1171_v10 }
 0x1af   : > { %975 = vst [vmem:[%s262_s22 + $0x8] sm:$0xff] %v946_v11  ;;  %v982_v13 = vadd.f32 %v946_v11, %v943_v9  ;;  %v997_v14 = vmul.f32 %v946_v11, %v946_v11 }
 0x1b1   : > { %v983_v16 = vadd.f32 %v1170_v51, %v982_v13  ;;  %v1004_v17 = vadd.f32 %v997_v14, %v996_v12 }
 0x1b3   : > { %v1005_v20 = vadd.f32 %v1004_v17, %v998_v15  ;;  %v984_v21 = vadd.f32 %v1171_v10, %v983_v16 }
 0x1b5   : > { %v1006_v22 = vadd.f32 %v1005_v20, %v999_v19 }
 0x1e7   : > { %v1174_v23 = vpop.f32.mrb[0].mxu1 }
 0x1e8   : > { %980 = vst [vmem:[%s262_s22 + $0x30] sm:$0xff] %v1174_v23  ;;  %v959_v24 = vpop.f32.mrb[1].mxu1  ;;  %v1002_v2 = vmul.f32 %v1174_v23, %v1174_v23 }
 0x1e9   : > { %978 = vst [vmem:[%s262_s22 + $0x20] sm:$0xff] %v959_v24  ;;  %v985_v25 = vadd.f32 %v984_v21, %v959_v24  ;;  %v1000_v26 = vmul.f32 %v959_v24, %v959_v24  ;;  %v1175_v27 = vpop.f32.mrb[2].mxu1 }
 0x1ea   : > { %981 = vst [vmem:[%s262_s22 + $0x38] sm:$0xff] %v1175_v27  ;;  %v962_v28 = vpop.f32.mrb[3].mxu1  ;;  %v1003_v36 = vmul.f32 %v1175_v27, %v1175_v27 }
 0x1eb   : > { %v1007_v29 = vadd.f32 %v1006_v22, %v1000_v26  ;;  %979 = vst [vmem:[%s262_s22 + $0x28] sm:$0xff] %v962_v28  ;;  %v986_v30 = vadd.f32 %v985_v25, %v962_v28  ;;  %v1001_v31 = vmul.f32 %v962_v28, %v962_v28 }
 0x1ed   : > { %v987_v34 = vadd.f32 %v1174_v23, %v986_v30  ;;  %v1008_v35 = vadd.f32 %v1007_v29, %v1001_v31 }
 0x1ef   : > { %v988_v37 = vadd.f32 %v1175_v27, %v987_v34  ;;  %v1009_v33 = vadd.f32 %v1008_v35, %v1002_v2 }
 0x1f1   : > { %v989_v40 = vrot.slane %v988_v37, 4  ;;  %v1010_v41 = vadd.f32 %v1009_v33, %v1003_v36 }
 0x1f3   : > { %v990_v42 = vadd.f32 %v989_v40, %v988_v37  ;;  %v1011_v45 = vrot.slane %v1010_v41, 4 }
 0x1f5   : > { %v991_v32 = vrot.slane %v990_v42, 2  ;;  %v1012_v46 = vadd.f32 %v1011_v45, %v1010_v41 }
 0x1f7   : > { %v992_v5 = vadd.f32 %v991_v32, %v990_v42  ;;  %v1013_v18 = vrot.slane %v1012_v46, 2 }
 0x1f9   : > { %v993_v39 = vrot.slane %v992_v5, 1  ;;  %v1014_v47 = vadd.f32 %v1013_v18, %v1012_v46 }
 0x1fb   : > { %v994_v48 = vadd.f32 %v993_v39, %v992_v5  ;;  %v1015_v44 = vrot.slane %v1014_v47, 1 }
 0x1fd   : > { %995 = vst [vmem:[%s265_s24] sm:$0x1] %v994_v48  ;;  %v1016_v49 = vadd.f32 %v1015_v44, %v1014_v47 }
 0x1ff   : > { %1017 = vst [vmem:[%s268_s27] sm:$0x1] %v1016_v49 }
 0x200 PF: > { %s17_s21 = sadd.s32 1, %s1216_s21  }
 0x201   : > { %p14_p4 = scmp.ge.s32.totalorder %s17_s21, 4  }
 0x203   :  { %16 = sbr.rel (!%p14_p4) target bundleno = 1 (0x1), region = 92 }

// kernel: vgg_forward.7
= control target key start
LH: loop header
LB: loop body
LE: loop exit
PB: predicated region body
PF: predicated region fallthrough
CT: control target
= control target key end

     0   :  { %s2801_s21 = smov 0   ;;  %s3705_s0 = inlined_call_operand.vmem [shape: f32[1,128], index: 0, kind: input, shape index: {}]   ;;  %s3706_s1 = inlined_call_operand.vmem [shape: f32[1,128], index: 1, kind: input, shape index: {}]   ;;  %s3707_s2 = inlined_call_operand.vmem [shape: f32[2,16,16,128], index: 2, kind: input, shape index: {}]   ;;  %s3708_s3 = inlined_call_operand.vmem [shape: bf16[36,128], index: 3, kind: input, shape index: {}]   ;;  %s3709_s4 = inlined_call_operand.vmem [shape: f32[2,16,16,128], index: 4, kind: output, shape index: {0}]   ;;  %s3710_s5 = inlined_call_operand.vmem [shape: f32[2,1,128], index: 5, kind: output, shape index: {1}]   ;;  %s3711_s6 = inlined_call_operand.vmem [shape: f32[2,1,128], index: 6, kind: output, shape index: {2}]  }
   0x1 LB: > { %s2469_s0 = sadd.s32 4294967295, %s2755_s21   ;;  %p2473_p0 = scmp.ge.s32.totalorder %s2755_s21, 1  ;;  %s2755_s21 = sphi %s2801_s21, %s17_s21  }
   0x2   : > { %p217_p1 = scmp.lt.s32.totalorder %s2755_s21, 3 }
   0x4   : > { %p218_p2 = pnand %p2473_p0, %p217_p1 }
   0x5   : > { %vm318_vm0 = vcmask (!%p218_p2), 27648   ;;  %v2757_v0 = vmov (!%p218_p2), 0   ;;  %p253_p3 = scmp.lt.s32.totalorder (!%p218_p2), %s2469_s0, 1  ;;  %vm327_vm1 = vcmask (!%p218_p2), 24576   ;;  %vm328_vm2 = vsmask.f32 (!%p218_p2), 256 }
   0x6   : > { %221 = sbr.rel (%p218_p2) target bundleno = 642 (0x282), region = 36  ;;  %319 = vst.msk [vmem:[#allocation2] sm:$0xf] (!%p218_p2), %vm318_vm0, %v2757_v0  ;;  %320 = vst.msk [vmem:[#allocation2 + $0x4] sm:$0xf] (!%p218_p2), %vm318_vm0, %v2757_v0  ;;  %vm1417_vm8 = vcmask (!%p218_p2), 1046528  }
   0x7   : > { %321 = vst.msk [vmem:[#allocation2 + $0x8] sm:$0xf] (!%p218_p2), %vm318_vm0, %v2757_v0  ;;  %323 = vst.msk [vmem:[#allocation2 + $0xcc] sm:$0xf] (!%p218_p2), %vm318_vm0, %v2757_v0  ;;  %v333_v2 = vld [vmem:[#allocation2 + $0x18] sm:$0x1] (!%p218_p2) }
   0x8   : > { %324 = vst.msk [vmem:[#allocation2 + $0xd0] sm:$0xf] (!%p218_p2), %vm318_vm0, %v2757_v0  ;;  %325 = vst.msk [vmem:[#allocation2 + $0xd4] sm:$0xf] (!%p218_p2), %vm318_vm0, %v2757_v0  ;;  %vm378_vm4 = vsmask.f32 (!%p218_p2), 7938 }
   0x9   : > { %vm2817_vm3 = vmand (!%p218_p2), %vm327_vm1, %vm328_vm2  ;;  %v330_v4 = vld [vmem:[#allocation2 + $0xc] sm:$0x1] (!%p218_p2)  ;;  %v336_v5 = vld [vmem:[#allocation2 + $0x24] sm:$0x1] (!%p218_p2)  ;;  %vm1144_vm6 = vsmask.f32 (!%p218_p2), 7424 }
   0xa   : > { %v334_v3 = vsel (!%p218_p2), %vm2817_vm3, 0, %v333_v2  ;;  %v331_v6 = vsel (!%p218_p2), %vm2817_vm3, 0, %v330_v4  ;;  %v337_v7 = vsel (!%p218_p2), %vm2817_vm3, 0, %v336_v5  ;;  %v380_v8 = vld [vmem:[#allocation2 + $0x14] sm:$0x1] (!%p218_p2)  ;;  %vm2832_vm5 = vmand (!%p218_p2), %vm327_vm1, %vm378_vm4  ;;  %s2758_s25 = smov (!%p218_p2), 8  }
   0xb   : > { %335 = vst [vmem:[#allocation2 + $0x18] sm:$0x1] (!%p218_p2), %v334_v3  ;;  %332 = vst [vmem:[#allocation2 + $0xc] sm:$0x1] (!%p218_p2), %v331_v6  ;;  %v383_v10 = vld [vmem:[#allocation2 + $0x20] sm:$0x1] (!%p218_p2) }
   0xc   : > { %338 = vst [vmem:[#allocation2 + $0x24] sm:$0x1] (!%p218_p2), %v337_v7  ;;  %v386_v11 = vld [vmem:[#allocation2 + $0x2c] sm:$0x1] (!%p218_p2)  ;;  %v381_v12 = vsel (!%p218_p2), %vm2832_vm5, 0, %v380_v8  ;;  %v384_v13 = vsel (!%p218_p2), %vm2832_vm5, 0, %v383_v10  ;;  %vm2868_vm10 = vmand (!%p218_p2), %vm318_vm0, %vm378_vm4 }
   0xd   : > { %s3721_s0 = smov (!%p253_p3, %s2469_s0), 1  ;;  %v387_v14 = vsel %vm2832_vm5, 0, %v386_v11  ;;  %v339_v15 = vld [vmem:[#allocation2 + $0x30] sm:$0x1]  ;;  %vm508_vm7 = vsmask.f32 4368 }
   0xe   : > { %s2585_s1 = sshll.u32 %s3721_s0, 8  ;;  %382 = vst [vmem:[#allocation2 + $0x14] sm:$0x1] %v381_v12  ;;  %385 = vst [vmem:[#allocation2 + $0x20] sm:$0x1] %v384_v13  ;;  %v340_v19 = vsel %vm2817_vm3, 0, %v339_v15  ;;  %s265_s20 = scalar_lea.vmem %s3710_s5, %s3721_s0 }
   0xf   : > { %s2841_s24 = scalar_lea.vmem %s3707_s2, %s2585_s1  ;;  %388 = vst [vmem:[#allocation2 + $0x2c] sm:$0x1] %v387_v14  ;;  %v945_v20 = vld [vmem:[#allocation2 + $0x4] sm:$0xf]  ;;  %v998_v21 = vld [vmem:[#allocation2] sm:$0xe]  ;;  %vm2861_vm9 = vmor %vm328_vm2, %vm508_vm7  ;;  %s3640_s17 = scalar_lea.vmem %s3709_s4, %s2585_s1 }
  0x10   : > { %v272_v16 = vld [vmem:[%s2841_s24 + $0x10] sm:$0xff]  ;;  %v273_v17 = vld [vmem:[%s2841_s24 + $0x18] sm:$0xff]  ;;  %v270_v18 = vld [vmem:[%s2841_s24] sm:$0xff]  ;;  %341 = vst [vmem:[#allocation2 + $0x30] sm:$0x1] %v340_v19  ;;  %v2542_v25 = vcombine.low %v998_v21, %v945_v20  ;;  %s2759_s26 = smov 4   ;;  %s268_s23 = scalar_lea.vmem %s3711_s6, %s3721_s0 }
  0x11   : > { %v2589_v22 = vpack.c.bf16 %v272_v16, %v272_v16  ;;  %v2590_v23 = vpack.c.bf16 %v273_v17, %v273_v17  ;;  %v2701_v24 = vld [vmem:[#allocation2 + $0x8] ss:$0 sps:$4 sm:$0x11]   ;;  %v944_v26 = vld [vmem:[#allocation2] sm:$0xf]  ;;  %v2587_v27 = vpack.c.bf16 %v270_v18, %v270_v18  ;;  %v276_v5 = vld [vmem:[%s2841_s24 + $0x30] sm:$0xff] }
  0x12   : > { %v2854_v28 = vcombine.low %v944_v26, %v945_v20  ;;  %v271_v32 = vld [vmem:[%s2841_s24 + $0x8] sm:$0xff]  ;;  %v1418_v33 = vrot.slane %v2542_v25, 1  ;;  %v1419_v34 = vrot.slane %v2701_v24, 1  ;;  %v1153_v35 = vshll.u32 %v2701_v24, 16  ;;  %v839_v45 = vld [vmem:[#allocation2 + $0x18] sm:$0xf] }
  0x13   : > { %v528_v29 = vshrl.u32 %v2589_v22, 16  ;;  %v531_v30 = vshll.u32 %v2589_v22, 16  ;;  %v536_v31 = vshrl.u32 %v2590_v23, 16  ;;  %v539_v36 = vshll.u32 %v2590_v23, 16  ;;  %v274_v48 = vld [vmem:[%s2841_s24 + $0x20] sm:$0xff]  ;;  %v275_v53 = vld [vmem:[%s2841_s24 + $0x28] sm:$0xff] }
  0x14   : > { %v1146_v37 = vshrl.u32 %v2854_v28, 16  ;;  %v1148_v38 = vshll.u32 %v2854_v28, 16  ;;  %v1420_v42 = vsel %vm1417_vm8, %v1418_v33, %v1419_v34  ;;  %v1155_v43 = vrot.slane %v1153_v35, 1  ;;  %v832_v61 = vld [vmem:[#allocation2 + $0xc] sm:$0xf]  ;;  %v277_v11 = vld [vmem:[%s2841_s24 + $0x38] sm:$0xff] }
  0x15   : > { %v530_v40 = vrot.slane %v528_v29, 7  ;;  %v538_v41 = vrot.slane %v536_v31, 7  ;;  %v2588_v46 = vpack.c.bf16 %v271_v32, %v271_v32  ;;  %v511_v47 = vshrl.u32 %v2587_v27, 16  ;;  %1466 = vrot.lane.b32.xlu1 %v1420_v42, %s2758_s25  ;;  %v843_v4 = vld [vmem:[#allocation2 + $0x20] sm:$0x1]  ;;  %s2760_s27 = smov 12  }
  0x16   : > { %v1150_v49 = vrot.slane %v1148_v38, 1  ;;  %v514_v55 = vshll.u32 %v2587_v27, 16  ;;  %v2591_v62 = vpack.c.bf16 %v274_v48, %v274_v48  ;;  %v2592_v3 = vpack.c.bf16 %v275_v53, %v275_v53  ;;  %v389_v12 = vld [vmem:[#allocation2 + $0x38] sm:$0x1]  ;;  %v836_v17 = vld [vmem:[#allocation2 + $0x14] sm:$0x1] }
  0x17   : > { %v533_v50 = vor.u32 %v531_v30, %v530_v40  ;;  %v534_v51 = vrot.slane %v530_v40, 4  ;;  %v541_v52 = vor.u32 %v539_v36, %v538_v41  ;;  %v513_v54 = vrot.slane %v511_v47, 7  ;;  %v846_v24 = vld [vmem:[#allocation2 + $0x24] sm:$0xf]  ;;  %v850_v31 = vld [vmem:[#allocation2 + $0x2c] sm:$0x1] }
  0x18   : > { %v519_v56 = vshrl.u32 %v2588_v46, 16  ;;  %v522_v57 = vshll.u32 %v2588_v46, 16  ;;  %v1151_v58 = vor.u32 %v1150_v49, %v1146_v37  ;;  %v545_v7 = vshrl.u32 %v2591_v62, 16  ;;  %v342_v37 = vld [vmem:[#allocation2 + $0x3c] sm:$0x1]  ;;  %s2761_s28 = smov 24  }
  0x19   : > { %v542_v59 = vsel %vm2861_vm9, %v534_v51, %v541_v52  ;;  %v840_v60 = vsel %vm2868_vm10, %v533_v50, %v839_v45  ;;  %v516_v63 = vor.u32 %v514_v55, %v513_v54  ;;  %v517_v0 = vrot.slane %v513_v54, 4  ;;  %v278_v50 = vld [vmem:[%s2841_s24 + $0x40] sm:$0xff]  ;;  %v853_v55 = vld [vmem:[#allocation2 + $0x30] sm:$0xf]  ;;  %s2762_s7 = smov 20   ;;  %s2763_s10 = smov 32  }
  0x1a   : > { %841 = vst [vmem:[#allocation2 + $0x18] sm:$0xf] %v840_v60  ;;  %842 = vst.msk [vmem:[#allocation2 + $0x1c] sm:$0xf] %vm318_vm0, %v542_v59  ;;  %v521_v2 = vrot.slane %v519_v56, 7  ;;  %v1156_v6 = vsel %vm1144_vm6, %v1151_v58, %v1155_v43  ;;  %v548_v8 = vshll.u32 %v2591_v62, 16  ;;  %v2593_v21 = vpack.c.bf16 %v276_v5, %v276_v5 }
  0x1b   : > { %v543_v10 = vrot.slane %v538_v41, 4  ;;  %1337 = vrot.lane.b32.xlu0 %v1156_v6, %s2759_s26  ;;  %v833_v14 = vsel %vm2868_vm10, %v516_v63, %v832_v61  ;;  %v553_v15 = vshrl.u32 %v2592_v3, 16  ;;  %v556_v16 = vshll.u32 %v2592_v3, 16  ;;  %v279_v5 = vld [vmem:[%s2841_s24 + $0x48] sm:$0xff]  ;;  %s2764_s11 = smov 16   ;;  %s2765_s12 = smov 28  }
  0x1c   : > { %v524_v13 = vor.u32 %v522_v57, %v521_v2  ;;  %834 = vst [vmem:[#allocation2 + $0xc] sm:$0xf] %v833_v14  ;;  %v547_v18 = vrot.slane %v545_v7, 7  ;;  %v526_v19 = vrot.slane %v521_v2, 4  ;;  %v2594_v25 = vpack.c.bf16 %v277_v11, %v277_v11 }
  0x1d   : > { %v844_v20 = vsel %vm2817_vm3, %v543_v10, %v843_v4  ;;  %v555_v23 = vrot.slane %v553_v15, 7  ;;  %v390_v26 = vsel %vm2832_vm5, 0, %v389_v12  ;;  %v562_v32 = vshrl.u32 %v2593_v21, 16  ;;  %v280_v12 = vld [vmem:[%s2841_s24 + $0x50] sm:$0xff] }
  0x1e   : > { %v525_v22 = vsel %vm2861_vm9, %v517_v0, %v524_v13  ;;  %845 = vst [vmem:[#allocation2 + $0x20] sm:$0x1] %v844_v20  ;;  %v550_v27 = vor.u32 %v548_v8, %v547_v18  ;;  %v551_v29 = vrot.slane %v547_v18, 4  ;;  %v837_v30 = vsel %vm2817_vm3, %v526_v19, %v836_v17  ;;  %391 = vst [vmem:[#allocation2 + $0x38] sm:$0x1] %v390_v26  ;;  %v281_v13 = vld [vmem:[%s2841_s24 + $0x58] sm:$0xff] }
  0x1f   : > { %835 = vst.msk [vmem:[#allocation2 + $0x10] sm:$0xf] %vm318_vm0, %v525_v22  ;;  %v558_v33 = vor.u32 %v556_v16, %v555_v23  ;;  %838 = vst [vmem:[#allocation2 + $0x14] sm:$0x1] %v837_v30  ;;  %v560_v34 = vrot.slane %v555_v23, 4  ;;  %v565_v35 = vshll.u32 %v2593_v21, 16  ;;  %v2595_v6 = vpack.c.bf16 %v278_v50, %v278_v50 }
  0x20   : > { %v570_v36 = vshrl.u32 %v2594_v25, 16  ;;  %v847_v41 = vsel %vm2868_vm10, %v550_v27, %v846_v24  ;;  %v564_v47 = vrot.slane %v562_v32, 7  ;;  %v573_v49 = vshll.u32 %v2594_v25, 16 }
  0x21   : > { %v948_v38 = vld [vmem:[#allocation2 + $0x18] sm:$0xf]  ;;  %v949_v40 = vld [vmem:[#allocation2 + $0x1c] sm:$0xf]  ;;  %v559_v45 = vsel %vm2861_vm9, %v551_v29, %v558_v33  ;;  %848 = vst [vmem:[#allocation2 + $0x24] sm:$0xf] %v847_v41  ;;  %v851_v46 = vsel %vm2817_vm3, %v560_v34, %v850_v31  ;;  %v2596_v23 = vpack.c.bf16 %v279_v5, %v279_v5  ;;  %v2936_v31 = vpack.c.bf16 %v280_v12, %v280_v12 }
  0x22   : > { %v1000_v42 = vld [vmem:[#allocation2 + $0x18] sm:$0xe]  ;;  %v2897_v43 = vcombine.low %v948_v38, %v949_v40  ;;  %849 = vst.msk [vmem:[#allocation2 + $0x28] sm:$0xf] %vm318_vm0, %v559_v45  ;;  %852 = vst [vmem:[#allocation2 + $0x2c] sm:$0x1] %v851_v46  ;;  %v567_v58 = vor.u32 %v565_v35, %v564_v47  ;;  %v2938_v32 = vpack.c.bf16 %v281_v13, %v281_v13 }
  0x23   : > { %v572_v48 = vrot.slane %v570_v36, 7  ;;  %v343_v51 = vsel %vm2817_vm3, 0, %v342_v37  ;;  %v946_v52 = vld [vmem:[#allocation2 + $0xc] sm:$0xf]  ;;  %v2544_v54 = vcombine.low %v1000_v42, %v949_v40  ;;  %v568_v61 = vrot.slane %v564_v47, 4  ;;  %v2726_v33 = vld [vmem:[%s3708_s3] sm:$0xff]  }
  0x24   : > { %1505 = vrot.lane.b32.xlu1 %v2897_v43, %s2760_s27  ;;  %v999_v53 = vld [vmem:[#allocation2 + $0xc] sm:$0xe]  ;;  %344 = vst [vmem:[#allocation2 + $0x3c] sm:$0x1] %v343_v51  ;;  %v1172_v57 = vshll.u32 %v2897_v43, 16  ;;  %v854_v4 = vsel %vm2868_vm10, %v567_v58, %v853_v55  ;;  %v1170_v8 = vshrl.u32 %v2897_v43, 16  ;;  %2638 = vmatprep.subr.bf16.mxu0 %v2726_v33 }
  0x25   : > { %v2708_v56 = vld [vmem:[#allocation2 + $0x20] ss:$0 sps:$4 sm:$0x11]   ;;  %v575_v59 = vor.u32 %v573_v49, %v572_v48  ;;  %v577_v62 = vrot.slane %v572_v48, 4  ;;  %v857_v63 = vld [vmem:[#allocation2 + $0x38] sm:$0x1]  ;;  %2676 = vmatprep.subr.bf16.mxu1 %v2726_v33  ;;  %2639 = vmatpush3.bf16.msra.mxu0 %v2726_v33 }
  0x26   : > { %v947_v60 = vld [vmem:[#allocation2 + $0x10] sm:$0xf]  ;;  %v2912_v2 = vld [vmem:[#allocation2 + $0x14] ss:$0 sps:$4 sm:$0x11]   ;;  %v1424_v7 = vrot.slane %v2544_v54, 1  ;;  %2679 = vmatpush3.bf16.msra.mxu1 %v2726_v33 }
  0x27   : > { %v2910_v0 = vcombine.low %v946_v52, %v947_v60  ;;  %v2543_v3 = vcombine.low %v999_v53, %v947_v60  ;;  %v576_v10 = vsel %vm2861_vm9, %v568_v61, %v575_v59  ;;  %855 = vst [vmem:[#allocation2 + $0x30] sm:$0xf] %v854_v4  ;;  %v858_v11 = vsel %vm2817_vm3, %v577_v62, %v857_v63  ;;  %v392_v38 = vld [vmem:[#allocation2 + $0x44] sm:$0x1]  ;;  %v345_v52 = vld [vmem:[#allocation2 + $0x48] sm:$0x1] }
  0x28   : > { %v950_v14 = vld [vmem:[#allocation2 + $0x24] sm:$0xf]  ;;  %v1425_v15 = vrot.slane %v2708_v56, 1  ;;  %v1174_v16 = vrot.slane %v1172_v57, 1  ;;  %856 = vst.msk [vmem:[#allocation2 + $0x34] sm:$0xf] %vm318_vm0, %v576_v10 }
  0x29   : > { %1503 = vrot.lane.b32.xlu0 %v2910_v0, %s2760_s27  ;;  %v1001_v17 = vld [vmem:[#allocation2 + $0x24] sm:$0xe]  ;;  %859 = vst [vmem:[#allocation2 + $0x38] sm:$0x1] %v858_v11  ;;  %v951_v18 = vld [vmem:[#allocation2 + $0x28] sm:$0xf] }
  0x2a   : > { %v1421_v19 = vrot.slane %v2543_v3, 1  ;;  %v1422_v20 = vrot.slane %v2912_v2, 1  ;;  %v2928_v21 = vcombine.low %v950_v14, %v951_v18  ;;  %v1177_v22 = vshll.u32 %v2708_v56, 16  ;;  %v2709_v24 = vld [vmem:[#allocation2 + $0x2c] ss:$0 sps:$4 sm:$0x11]  }
  0x2b   : > { %v2545_v25 = vcombine.low %v1001_v17, %v951_v18  ;;  %v579_v26 = vshrl.u32 %v2595_v6, 16  ;;  %v582_v27 = vshll.u32 %v2595_v6, 16  ;;  %v1160_v30 = vshll.u32 %v2910_v0, 16  ;;  %v282_v40 = vld [vmem:[%s2841_s24 + $0x60] sm:$0xff]  ;;  %v860_v47 = vld [vmem:[#allocation2 + $0x3c] sm:$0xf] }
  0x2c   : > { %1627 = vrot.lane.b32.xlu1 %v2928_v21, %s2761_s28  ;;  %v1184_v29 = vshll.u32 %v2928_v21, 16  ;;  %v1423_v34 = vsel %vm1417_vm8, %v1421_v19, %v1422_v20  ;;  %v2945_v35 = vsel %vm1417_vm8, %v1424_v7, %v1425_v15  ;;  %v1175_v36 = vor.u32 %v1174_v16, %v1170_v8  ;;  %v283_v53 = vld [vmem:[%s2841_s24 + $0x68] sm:$0xff]  ;;  %v395_v7 = vld [vmem:[#allocation2 + $0x50] sm:$0x1]  ;;  %v348_v13 = vld [vmem:[#allocation2 + $0x54] sm:$0x1] }
  0x2d   : > { %1625 = vrot.lane.b32.xlu0 %v2897_v43, %s2761_s28  ;;  %v581_v37 = vrot.slane %v579_v26, 7  ;;  %v1179_v41 = vrot.slane %v1177_v22, 1  ;;  %v1158_v42 = vshrl.u32 %v2910_v0, 16  ;;  %v1165_v45 = vshll.u32 %v2912_v2, 16  ;;  %v2728_v62 = vld [vmem:[%s3708_s3 + $0x8] sm:$0xff]   ;;  %v284_v14 = vld [vmem:[%s2841_s24 + $0x70] sm:$0xff] }
  0x2e   : > { %v587_v46 = vshrl.u32 %v2596_v23, 16  ;;  %v1427_v48 = vrot.slane %v2545_v25, 1  ;;  %v1428_v49 = vrot.slane %v2709_v24, 1  ;;  %v1182_v50 = vshrl.u32 %v2928_v21, 16  ;;  %2640 = vmatprep.subr.bf16.mxu0 %v2728_v62  ;;  %2677 = vmatprep.subr.bf16.mxu1 %v2728_v62  ;;  %v285_v19 = vld [vmem:[%s2841_s24 + $0x78] sm:$0xff] }
  0x2f   : > { %v584_v51 = vor.u32 %v582_v27, %v581_v37  ;;  %v1186_v54 = vrot.slane %v1184_v29, 1  ;;  %v1189_v55 = vshll.u32 %v2709_v24, 16  ;;  %v1162_v56 = vrot.slane %v1160_v30, 1  ;;  %2641 = vmatpush3.bf16.msra.mxu0 %v2728_v62  ;;  %2680 = vmatpush3.bf16.msra.mxu1 %v2728_v62  ;;  %v398_v29 = vld [vmem:[#allocation2 + $0x5c] sm:$0x1] }
  0x30   : > { %1468 = vrot.lane.b32.xlu1 %v1423_v34, %s2758_s25  ;;  %v2954_v57 = vrot.slane %v587_v46, 7  ;;  %v585_v58 = vrot.slane %v581_v37, 4  ;;  %v590_v59 = vshll.u32 %v2596_v23, 16  ;;  %v393_v61 = vsel %vm2832_vm5, 0, %v392_v38 }
  0x31   : > { %1588 = vrot.lane.b32.xlu0 %v1423_v34, %s2762_s7  ;;  %v861_v60 = vsel %vm2868_vm10, %v584_v51, %v860_v47  ;;  %394 = vst [vmem:[#allocation2 + $0x44] sm:$0x1] %v393_v61  ;;  %v2963_v63 = vpack.c.bf16 %v282_v40, %v282_v40  ;;  %v2965_v2 = vpack.c.bf16 %v283_v53, %v283_v53  ;;  %v1167_v5 = vrot.slane %v1165_v45, 1  ;;  %v351_v34 = vld [vmem:[#allocation2 + $0x60] sm:$0x1] }
  0x32   : > { %862 = vst [vmem:[#allocation2 + $0x3c] sm:$0xf] %v861_v60  ;;  %v2968_v3 = vsel %vm1144_vm6, %v1175_v36, %v1179_v41  ;;  %v2971_v4 = vsel %vm1417_vm8, %v1427_v48, %v1428_v49  ;;  %v592_v6 = vor.u32 %v590_v59, %v2954_v57  ;;  %v1191_v8 = vrot.slane %v1189_v55, 1  ;;  %v952_v40 = vld [vmem:[#allocation2 + $0x30] sm:$0xf] }
  0x33   : > { %v1163_v10 = vor.u32 %v1162_v56, %v1158_v42  ;;  %v346_v11 = vsel %vm2817_vm3, 0, %v345_v52  ;;  %v596_v12 = vshrl.u32 %v2936_v31, 16  ;;  %v1187_v15 = vor.u32 %v1186_v54, %v1182_v50  ;;  %v3007_v41 = vld [vmem:[#allocation2 + $0x34] sm:$0xf]  ;;  %v401_v60 = vld [vmem:[#allocation2 + $0x68] sm:$0x1] }
  0x34   : > { %1590 = vrot.lane.b32.xlu1 %v2945_v35, %s2762_s7  ;;  %v593_v16 = vsel %vm2861_vm9, %v585_v58, %v592_v6  ;;  %347 = vst [vmem:[#allocation2 + $0x48] sm:$0x1] %v346_v11  ;;  %v599_v17 = vshll.u32 %v2936_v31, 16  ;;  %v604_v18 = vshrl.u32 %v2938_v32, 16  ;;  %v594_v20 = vrot.slane %v2954_v57, 4 }
  0x35   : > { %1710 = vrot.lane.b32.xlu0 %v2945_v35, %s2763_s10  ;;  %863 = vst.msk [vmem:[#allocation2 + $0x40] sm:$0xf] %vm318_vm0, %v593_v16  ;;  %v598_v22 = vrot.slane %v596_v12, 7  ;;  %v607_v23 = vshll.u32 %v2938_v32, 16  ;;  %v396_v24 = vsel %vm2832_vm5, 0, %v395_v7  ;;  %v349_v26 = vsel %vm2817_vm3, 0, %v348_v13 }
  0x36   : > { %v606_v25 = vrot.slane %v604_v18, 7  ;;  %397 = vst [vmem:[#allocation2 + $0x50] sm:$0x1] %v396_v24  ;;  %v613_v27 = vshrl.u32 %v2963_v63, 16  ;;  %v2995_v30 = vpack.c.bf16 %v284_v14, %v284_v14  ;;  %350 = vst [vmem:[#allocation2 + $0x54] sm:$0x1] %v349_v26  ;;  %v2602_v36 = vpack.c.bf16 %v285_v19, %v285_v19 }
  0x37   : > { %v602_v31 = vrot.slane %v598_v22, 4  ;;  %v616_v32 = vshll.u32 %v2963_v63, 16  ;;  %v621_v33 = vshrl.u32 %v2965_v2, 16  ;;  %v3004_v37 = vsel %vm1144_vm6, %v1187_v15, %v1191_v8  ;;  %v3038_v14 = vld [vmem:[#allocation2 + $0x38] ss:$0 sps:$4 sm:$0x11]  }
  0x38   : > { %1552 = vrot.lane.b32.xlu1 %v2968_v3, %s2764_s11  ;;  %v1168_v38 = vsel %vm1144_vm6, %v1163_v10, %v1167_v5  ;;  %v864_v42 = vld [vmem:[#allocation2 + $0x44] sm:$0x1]  ;;  %v601_v45 = vor.u32 %v599_v17, %v598_v22  ;;  %v609_v46 = vor.u32 %v607_v23, %v606_v25  ;;  %v611_v48 = vrot.slane %v606_v25, 4  ;;  %v354_v23 = vld [vmem:[#allocation2 + $0x6c] sm:$0x1] }
  0x39   : > { %1712 = vrot.lane.b32.xlu0 %v2971_v4, %s2763_s10  ;;  %v865_v47 = vsel %vm2817_vm3, %v594_v20, %v864_v42  ;;  %v615_v49 = vrot.slane %v613_v27, 7  ;;  %v623_v50 = vrot.slane %v621_v33, 7  ;;  %v624_v52 = vshll.u32 %v2965_v2, 16  ;;  %v286_v17 = vld [vmem:[%s2841_s24 + $0x80] sm:$0xff] }
  0x3a   : > { %866 = vst [vmem:[#allocation2 + $0x44] sm:$0x1] %v865_v47  ;;  %v610_v51 = vsel %vm2861_vm9, %v602_v31, %v609_v46  ;;  %v399_v53 = vsel %vm2832_vm5, 0, %v398_v29  ;;  %v352_v54 = vsel %vm2817_vm3, 0, %v351_v34  ;;  %v3022_v55 = vcombine.low %v952_v40, %v3007_v41  ;;  %v1002_v31 = vld [vmem:[#allocation2 + $0x30] sm:$0xe] }
  0x3b   : > { %v867_v56 = vld [vmem:[#allocation2 + $0x48] sm:$0xf]  ;;  %870 = vst.msk [vmem:[#allocation2 + $0x4c] sm:$0xf] %vm318_vm0, %v610_v51  ;;  %v618_v57 = vor.u32 %v616_v32, %v615_v49  ;;  %v619_v58 = vrot.slane %v615_v49, 4  ;;  %v630_v59 = vshrl.u32 %v2995_v30, 16  ;;  %v626_v62 = vor.u32 %v624_v52, %v623_v50 }
  0x3c   : > { %1674 = vrot.lane.b32.xlu1 %v3004_v37, %s2765_s12  ;;  %400 = vst [vmem:[#allocation2 + $0x5c] sm:$0x1] %v399_v53  ;;  %353 = vst [vmem:[#allocation2 + $0x60] sm:$0x1] %v352_v54  ;;  %v868_v61 = vsel %vm2868_vm10, %v601_v45, %v867_v56  ;;  %v633_v63 = vshll.u32 %v2995_v30, 16  ;;  %v638_v2 = vshrl.u32 %v2602_v36, 16  ;;  %v2603_v27 = vpack.c.bf16 %v286_v17, %v286_v17 }
  0x3d   : > { %1339 = vrot.lane.b32.xlu0 %v1168_v38, %s2759_s26  ;;  %869 = vst [vmem:[#allocation2 + $0x48] sm:$0xf] %v868_v61  ;;  %v871_v5 = vld [vmem:[#allocation2 + $0x50] sm:$0x1]  ;;  %v632_v6 = vrot.slane %v630_v59, 7  ;;  %v641_v7 = vshll.u32 %v2602_v36, 16  ;;  %v627_v10 = vsel %vm2861_vm9, %v619_v58, %v626_v62  ;;  %v2546_v45 = vcombine.low %v1002_v31, %v3007_v41 }
  0x3e   : > { %v872_v8 = vsel %vm2817_vm3, %v611_v48, %v871_v5  ;;  %v874_v11 = vld [vmem:[#allocation2 + $0x54] sm:$0xf]  ;;  %v640_v12 = vrot.slane %v638_v2, 7  ;;  %v402_v13 = vsel %vm2832_vm5, 0, %v401_v60  ;;  %877 = vst.msk [vmem:[#allocation2 + $0x58] sm:$0xf] %vm318_vm0, %v627_v10 }
  0x3f   : > { %873 = vst [vmem:[#allocation2 + $0x50] sm:$0x1] %v872_v8  ;;  %v875_v15 = vsel %vm2868_vm10, %v618_v57, %v874_v11  ;;  %v628_v16 = vrot.slane %v623_v50, 4  ;;  %403 = vst [vmem:[#allocation2 + $0x68] sm:$0x1] %v402_v13  ;;  %v1196_v18 = vshll.u32 %v3022_v55, 16  ;;  %v635_v19 = vor.u32 %v633_v63, %v632_v6 }
  0x40   : > { %1341 = vrot.lane.b32.xlu1 %v2968_v3, %s2759_s26  ;;  %876 = vst [vmem:[#allocation2 + $0x54] sm:$0xf] %v875_v15  ;;  %v636_v20 = vrot.slane %v632_v6, 4  ;;  %v643_v22 = vor.u32 %v641_v7, %v640_v12  ;;  %v1194_v29 = vshrl.u32 %v3022_v55, 16  ;;  %v1201_v30 = vshll.u32 %v3038_v14, 16  ;;  %v287_v47 = vld [vmem:[%s2841_s24 + $0x88] sm:$0xff] }
  0x41   : > { %1550 = vrot.lane.b32.xlu0 %v1168_v38, %s2764_s11  ;;  %v1198_v33 = vrot.slane %v1196_v18, 1  ;;  %v954_v34 = vld [vmem:[#allocation2 + $0x3c] sm:$0xf]  ;;  %v3056_v36 = vld [vmem:[#allocation2 + $0x40] sm:$0xf]  ;;  %v645_v40 = vrot.slane %v640_v12, 4  ;;  %v2604_v53 = vpack.c.bf16 %v287_v47, %v287_v47 }
  0x42   : > { %v644_v25 = vsel %vm2861_vm9, %v636_v20, %v643_v22  ;;  %v647_v42 = vshrl.u32 %v2603_v27, 16  ;;  %v3068_v46 = vcombine.low %v954_v34, %v3056_v36  ;;  %v1203_v49 = vrot.slane %v1201_v30, 1  ;;  %v3082_v58 = vld [vmem:[#allocation2 + $0x44] ss:$0 sps:$4 sm:$0x11]   ;;  %v288_v59 = vld [vmem:[%s2841_s24 + $0x90] sm:$0xff] }
  0x43   : > { %v878_v24 = vld [vmem:[#allocation2 + $0x5c] sm:$0x1]  ;;  %v881_v26 = vld [vmem:[#allocation2 + $0x60] sm:$0xf]  ;;  %884 = vst.msk [vmem:[#allocation2 + $0x64] sm:$0xf] %vm318_vm0, %v644_v25  ;;  %v1199_v48 = vor.u32 %v1198_v33, %v1194_v29  ;;  %v2605_v10 = vpack.c.bf16 %v288_v59, %v288_v59 }
  0x44   : > { %1343 = vrot.lane.b32.xlu1 %v3004_v37, %s2759_s26  ;;  %v879_v32 = vsel %vm2817_vm3, %v628_v16, %v878_v24  ;;  %v882_v38 = vsel %vm2868_vm10, %v635_v19, %v881_v26  ;;  %v649_v51 = vrot.slane %v647_v42, 7  ;;  %v650_v54 = vshll.u32 %v2603_v27, 16  ;;  %v289_v63 = vld [vmem:[%s2841_s24 + $0x98] sm:$0xff]  ;;  %v404_v8 = vld [vmem:[#allocation2 + $0x74] sm:$0x1]  ;;  %v290_v24 = vld [vmem:[%s2841_s24 + $0xa0] sm:$0xff] }
  0x45   : > { %1672 = vrot.lane.b32.xlu0 %v2968_v3, %s2765_s12  ;;  %880 = vst [vmem:[#allocation2 + $0x5c] sm:$0x1] %v879_v32  ;;  %v355_v3 = vsel %vm2817_vm3, 0, %v354_v23  ;;  %883 = vst [vmem:[#allocation2 + $0x60] sm:$0xf] %v882_v38  ;;  %v1431_v41 = vrot.slane %v3038_v14, 1  ;;  %v3080_v57 = vsel %vm1144_vm6, %v1199_v48, %v1203_v49  ;;  %v2606_v16 = vpack.c.bf16 %v289_v63, %v289_v63 }
  0x46   : > { %356 = vst [vmem:[#allocation2 + $0x6c] sm:$0x1] %v355_v3  ;;  %v885_v50 = vld [vmem:[#allocation2 + $0x68] sm:$0x1]  ;;  %v1208_v56 = vshll.u32 %v3068_v46, 16  ;;  %v652_v60 = vor.u32 %v650_v54, %v649_v51  ;;  %v655_v61 = vshrl.u32 %v2604_v53, 16 }
  0x47   : > { %v886_v52 = vsel %vm2817_vm3, %v645_v40, %v885_v50  ;;  %v1206_v5 = vshrl.u32 %v3068_v46, 16  ;;  %v1003_v7 = vld [vmem:[#allocation2 + $0x3c] sm:$0xe]  ;;  %v1213_v11 = vshll.u32 %v3082_v58, 16  ;;  %v653_v12 = vrot.slane %v649_v51, 4  ;;  %v291_v25 = vld [vmem:[%s2841_s24 + $0xa8] sm:$0xff] }
  0x48   : > { %1472 = vrot.lane.b32.xlu1 %v2971_v4, %s2758_s25  ;;  %887 = vst [vmem:[#allocation2 + $0x68] sm:$0x1] %v886_v52  ;;  %v1210_v6 = vrot.slane %v1208_v56, 1  ;;  %v3095_v13 = vrot.slane %v655_v61, 7  ;;  %v658_v14 = vshll.u32 %v2604_v53, 16  ;;  %v2547_v17 = vcombine.low %v1003_v7, %v3056_v36  ;;  %v292_v34 = vld [vmem:[%s2841_s24 + $0xb0] sm:$0xff] }
  0x49   : > { %1470 = vrot.lane.b32.xlu0 %v2945_v35, %s2758_s25  ;;  %v1430_v35 = vrot.slane %v2546_v45, 1  ;;  %v357_v15 = vld [vmem:[#allocation2 + $0x78] sm:$0x1]  ;;  %v405_v19 = vsel %vm2832_vm5, 0, %v404_v8  ;;  %v664_v22 = vshrl.u32 %v2605_v10, 16  ;;  %v1215_v27 = vrot.slane %v1213_v11, 1 }
  0x4a   : > { %v660_v18 = vor.u32 %v658_v14, %v3095_v13  ;;  %406 = vst [vmem:[#allocation2 + $0x74] sm:$0x1] %v405_v19  ;;  %v358_v20 = vsel %vm2817_vm3, 0, %v357_v15  ;;  %v407_v23 = vld [vmem:[#allocation2 + $0x80] sm:$0x1]  ;;  %v1211_v26 = vor.u32 %v1210_v6, %v1206_v5  ;;  %v667_v30 = vshll.u32 %v2605_v10, 16 }
  0x4b   : > { %v3091_v2 = vsel %vm1417_vm8, %v1430_v35, %v1431_v41  ;;  %359 = vst [vmem:[#allocation2 + $0x78] sm:$0x1] %v358_v20  ;;  %v666_v31 = vrot.slane %v664_v22, 7  ;;  %v672_v32 = vshrl.u32 %v2606_v16, 16  ;;  %v675_v33 = vshll.u32 %v2606_v16, 16  ;;  %v293_v45 = vld [vmem:[%s2841_s24 + $0xb8] sm:$0xff] }
  0x4c   : > { %1509 = vrot.lane.b32.xlu1 %v3022_v55, %s2760_s27  ;;  %v661_v29 = vsel %vm2861_vm9, %v653_v12, %v660_v18  ;;  %v3118_v36 = vrot.slane %v2547_v17, 1  ;;  %v408_v38 = vsel %vm2832_vm5, 0, %v407_v23  ;;  %v360_v3 = vld [vmem:[#allocation2 + $0x84] sm:$0x1]  ;;  %v2607_v40 = vpack.c.bf16 %v290_v24, %v290_v24  ;;  %v956_v51 = vld [vmem:[#allocation2 + $0x48] sm:$0xf] }
  0x4d   : > { %1507 = vrot.lane.b32.xlu0 %v2928_v21, %s2760_s27  ;;  %v888_v62 = vld [vmem:[#allocation2 + $0x6c] sm:$0xf]  ;;  %891 = vst.msk [vmem:[#allocation2 + $0x70] sm:$0xf] %vm318_vm0, %v661_v29  ;;  %v2608_v42 = vpack.c.bf16 %v291_v25, %v291_v25  ;;  %v662_v47 = vrot.slane %v3095_v13, 4  ;;  %v670_v48 = vrot.slane %v666_v31, 4  ;;  %v3129_v50 = vsel %vm1144_vm6, %v1211_v26, %v1215_v27 }
  0x4e   : > { %v674_v49 = vrot.slane %v672_v32, 7  ;;  %409 = vst [vmem:[#allocation2 + $0x80] sm:$0x1] %v408_v38  ;;  %vm2059_vm11 = vcmask 1041408   ;;  %v3131_v52 = vld [vmem:[#allocation2 + $0x4c] sm:$0xf]  ;;  %v669_v53 = vor.u32 %v667_v30, %v666_v31  ;;  %v3133_v35 = vpack.c.bf16 %v292_v34, %v292_v34 }
  0x4f   : > { %v1434_v41 = vrot.slane %v3082_v58, 1  ;;  %v361_v59 = vsel %vm2817_vm3, 0, %v360_v3  ;;  %v363_v61 = vld [vmem:[#allocation2 + $0x90] sm:$0x1]  ;;  %v681_v5 = vshrl.u32 %v2607_v40, 16  ;;  %v684_v6 = vshll.u32 %v2607_v40, 16 }
  0x50   : > { %1556 = vrot.lane.b32.xlu1 %v3080_v57, %s2764_s11  ;;  %v677_v56 = vor.u32 %v675_v33, %v674_v49  ;;  %362 = vst [vmem:[#allocation2 + $0x84] sm:$0x1] %v361_v59  ;;  %v689_v7 = vshrl.u32 %v2608_v42, 16  ;;  %v692_v8 = vshll.u32 %v2608_v42, 16  ;;  %v3145_v58 = vcombine.low %v956_v51, %v3131_v52  ;;  %v294_v17 = vld [vmem:[%s2841_s24 + $0xc0] sm:$0xff] }
  0x51   : > { %1554 = vrot.lane.b32.xlu0 %v3004_v37, %s2764_s11  ;;  %v889_v37 = vsel %vm2868_vm10, %v652_v60, %v888_v62  ;;  %v410_v60 = vld [vmem:[#allocation2 + $0x8c] sm:$0x1]  ;;  %v3138_v62 = vpack.c.bf16 %v293_v45, %v293_v45  ;;  %v892_v63 = vld [vmem:[#allocation2 + $0x74] sm:$0x1]  ;;  %v679_v13 = vrot.slane %v674_v49, 4  ;;  %v683_v15 = vrot.slane %v681_v5, 7 }
  0x52   : > { %890 = vst [vmem:[#allocation2 + $0x6c] sm:$0xf] %v889_v37  ;;  %v893_v10 = vsel %vm2817_vm3, %v662_v47, %v892_v63  ;;  %v678_v11 = vsel %vm2861_vm9, %v670_v48, %v677_v56  ;;  %v895_v12 = vld [vmem:[#allocation2 + $0x78] sm:$0xf]  ;;  %v691_v37 = vrot.slane %v689_v7, 7  ;;  %v411_v16 = vsel %vm2832_vm5, 0, %v410_v60 }
  0x53   : > { %894 = vst [vmem:[#allocation2 + $0x74] sm:$0x1] %v893_v10  ;;  %v896_v14 = vsel %vm2868_vm10, %v669_v53, %v895_v12  ;;  %898 = vst.msk [vmem:[#allocation2 + $0x7c] sm:$0xf] %vm318_vm0, %v678_v11  ;;  %v364_v18 = vsel %vm2817_vm3, 0, %v363_v61  ;;  %v698_v19 = vshrl.u32 %v3133_v35, 16  ;;  %v686_v23 = vor.u32 %v684_v6, %v683_v15 }
  0x54   : > { %1594 = vrot.lane.b32.xlu1 %v3091_v2, %s2762_s7  ;;  %897 = vst [vmem:[#allocation2 + $0x78] sm:$0xf] %v896_v14  ;;  %412 = vst [vmem:[#allocation2 + $0x8c] sm:$0x1] %v411_v16  ;;  %v413_v20 = vld [vmem:[#allocation2 + $0x98] sm:$0x1]  ;;  %v694_v25 = vor.u32 %v692_v8, %v691_v37  ;;  %v3166_v27 = vsel %vm1417_vm8, %v3118_v36, %v1434_v41 }
  0x55   : > { %1592 = vrot.lane.b32.xlu0 %v2971_v4, %s2762_s7  ;;  %v2730_v4 = vld [vmem:[%s3708_s3 + $0x10] ss:$0 sps:$4 sm:$0x33]   ;;  %v899_v22 = vld [vmem:[#allocation2 + $0x80] sm:$0x1]  ;;  %v687_v24 = vrot.slane %v683_v15, 4 }
  0x56   : > { %2682 = vmatprep.subr.msk.bf16.mxu0 %vm2059_vm11, %v2730_v4  ;;  %v2061_v54 = vsel %vm2059_vm11, %v2730_v4, 0  ;;  %2683 = vmatprep.subr.msk.bf16.mxu1 %vm2059_vm11, %v2730_v4  ;;  %365 = vst [vmem:[#allocation2 + $0x90] sm:$0x1] %v364_v18  ;;  %v366_v26 = vld [vmem:[#allocation2 + $0x9c] sm:$0x1]  ;;  %v1220_v29 = vshll.u32 %v3145_v58, 16  ;;  %v900_v30 = vsel %vm2817_vm3, %v679_v13, %v899_v22  ;;  %v3171_v4 = vpack.c.bf16 %v294_v17, %v294_v17 }
  0x57   : > { %2643 = vmatpush3.bf16.msra.mxu0 %v2061_v54  ;;  %2681 = vmatpush3.bf16.msra.mxu1 %v2061_v54  ;;  %v3173_v31 = vld [vmem:[#allocation2 + $0x50] ss:$0 sps:$4 sm:$0x11]   ;;  %901 = vst [vmem:[#allocation2 + $0x80] sm:$0x1] %v900_v30  ;;  %v700_v32 = vrot.slane %v698_v19, 7 }
  0x58   : > { %1631 = vrot.lane.b32.xlu1 %v3068_v46, %s2761_s28  ;;  %v701_v33 = vshll.u32 %v3133_v35, 16  ;;  %v706_v34 = vshrl.u32 %v3138_v62, 16  ;;  %v902_v36 = vld [vmem:[#allocation2 + $0x84] sm:$0xf]  ;;  %v696_v38 = vrot.slane %v691_v37, 4  ;;  %v709_v3 = vshll.u32 %v3138_v62, 16 }
  0x59   : > { %1629 = vrot.lane.b32.xlu0 %v3022_v55, %s2761_s28  ;;  %v414_v40 = vsel %vm2832_vm5, 0, %v413_v20  ;;  %v367_v42 = vsel %vm2817_vm3, 0, %v366_v26  ;;  %v958_v45 = vld [vmem:[#allocation2 + $0x54] sm:$0xf]  ;;  %v3185_v47 = vld [vmem:[#allocation2 + $0x58] sm:$0xf]  ;;  %v903_v48 = vsel %vm2868_vm10, %v686_v23, %v902_v36 }
  0x5a   : > { %v703_v49 = vor.u32 %v701_v33, %v700_v32  ;;  %v704_v51 = vrot.slane %v700_v32, 4  ;;  %v708_v53 = vrot.slane %v706_v34, 7  ;;  %415 = vst [vmem:[#allocation2 + $0x98] sm:$0x1] %v414_v40  ;;  %368 = vst [vmem:[#allocation2 + $0x9c] sm:$0x1] %v367_v42  ;;  %v3197_v61 = vcombine.low %v958_v45, %v3185_v47 }
  0x5b   : > { %v1218_v54 = vshrl.u32 %v3145_v58, 16  ;;  %904 = vst [vmem:[#allocation2 + $0x84] sm:$0xf] %v903_v48  ;;  %v1222_v35 = vrot.slane %v1220_v29, 1  ;;  %v1225_v41 = vshll.u32 %v3173_v31, 16  ;;  %v715_v60 = vshrl.u32 %v3171_v4, 16 }
  0x5c   : > { %1678 = vrot.lane.b32.xlu1 %v3129_v50, %s2765_s12  ;;  %v1004_v56 = vld [vmem:[#allocation2 + $0x48] sm:$0xe]  ;;  %v711_v59 = vor.u32 %v709_v3, %v708_v53  ;;  %v906_v62 = vld [vmem:[#allocation2 + $0x8c] sm:$0x1]  ;;  %v713_v10 = vrot.slane %v708_v53, 4  ;;  %v718_v17 = vshll.u32 %v3171_v4, 16 }
  0x5d   : > { %1676 = vrot.lane.b32.xlu0 %v3080_v57, %s2765_s12  ;;  %v909_v63 = vld [vmem:[#allocation2 + $0x90] sm:$0xf]  ;;  %v295_v5 = vld [vmem:[%s2841_s24 + $0xc8] sm:$0xff]  ;;  %v907_v6 = vsel %vm2817_vm3, %v696_v38, %v906_v62  ;;  %v2548_v11 = vcombine.low %v1004_v56, %v3131_v52  ;;  %v1223_v12 = vor.u32 %v1222_v35, %v1218_v54  ;;  %v1227_v13 = vrot.slane %v1225_v41, 1  ;;  %v416_v19 = vld [vmem:[#allocation2 + $0xa4] sm:$0x1] }
  0x5e   : > { %v712_v7 = vsel %vm2861_vm9, %v704_v51, %v711_v59  ;;  %v910_v8 = vsel %vm2868_vm10, %v703_v49, %v909_v63  ;;  %908 = vst [vmem:[#allocation2 + $0x8c] sm:$0x1] %v907_v6  ;;  %v2612_v14 = vpack.c.bf16 %v295_v5, %v295_v5  ;;  %v717_v15 = vrot.slane %v715_v60, 7  ;;  %v3212_v37 = vld [vmem:[#allocation2 + $0x5c] ss:$0 sps:$4 sm:$0x11]  }
  0x5f   : > { %911 = vst [vmem:[#allocation2 + $0x90] sm:$0xf] %v910_v8  ;;  %912 = vst.msk [vmem:[#allocation2 + $0x94] sm:$0xf] %vm318_vm0, %v712_v7  ;;  %v1232_v18 = vshll.u32 %v3197_v61, 16  ;;  %v296_v52 = vld [vmem:[%s2841_s24 + $0xd0] sm:$0xff] }
  0x60   : > { %1345 = vrot.lane.b32.xlu1 %v3080_v57, %s2759_s26  ;;  %v695_v57 = vsel %vm2861_vm9, %v687_v24, %v694_v25  ;;  %v1436_v20 = vrot.slane %v2548_v11, 1  ;;  %v1437_v22 = vrot.slane %v3173_v31, 1  ;;  %v3225_v24 = vsel %vm1144_vm6, %v1223_v12, %v1227_v13  ;;  %v369_v30 = vld [vmem:[#allocation2 + $0xa8] sm:$0x1]  ;;  %v297_v3 = vld [vmem:[%s2841_s24 + $0xd8] sm:$0xff]  ;;  %v298_v51 = vld [vmem:[%s2841_s24 + $0xe0] sm:$0xff] }
  0x61   : > { %1714 = vrot.lane.b32.xlu0 %v3091_v2, %s2763_s10  ;;  %905 = vst.msk [vmem:[#allocation2 + $0x88] sm:$0xf] %vm318_vm0, %v695_v57  ;;  %v913_v16 = vld [vmem:[#allocation2 + $0x98] sm:$0x1]  ;;  %v916_v23 = vld [vmem:[#allocation2 + $0x9c] sm:$0xf]  ;;  %v720_v25 = vor.u32 %v718_v17, %v717_v15  ;;  %v2613_v33 = vpack.c.bf16 %v296_v52, %v296_v52  ;;  %v2614_v48 = vpack.c.bf16 %v297_v3, %v297_v3 }
  0x62   : > { %v723_v26 = vshrl.u32 %v2612_v14, 16  ;;  %v726_v29 = vshll.u32 %v2612_v14, 16  ;;  %v1230_v4 = vshrl.u32 %v3197_v61, 16  ;;  %v1237_v57 = vshll.u32 %v3212_v37, 16  ;;  %v299_v53 = vld [vmem:[%s2841_s24 + $0xe8] sm:$0xff] }
  0x63   : > { %v417_v32 = vsel %vm2832_vm5, 0, %v416_v19  ;;  %v1234_v31 = vrot.slane %v1232_v18, 1  ;;  %v721_v34 = vrot.slane %v717_v15, 4  ;;  %v917_v38 = vsel %vm2868_vm10, %v720_v25, %v916_v23  ;;  %v1005_v41 = vld [vmem:[#allocation2 + $0x54] sm:$0xe] }
  0x64   : > { %1347 = vrot.lane.b32.xlu1 %v3129_v50, %s2759_s26  ;;  %v725_v36 = vrot.slane %v723_v26, 7  ;;  %418 = vst [vmem:[#allocation2 + $0xa4] sm:$0x1] %v417_v32  ;;  %918 = vst [vmem:[#allocation2 + $0x9c] sm:$0xf] %v917_v38  ;;  %v370_v40 = vsel %vm2817_vm3, 0, %v369_v30  ;;  %v3241_v42 = vsel %vm1417_vm8, %v1436_v20, %v1437_v22  ;;  %v2615_v5 = vpack.c.bf16 %v298_v51, %v298_v51 }
  0x65   : > { %1716 = vrot.lane.b32.xlu0 %v3166_v27, %s2763_s10  ;;  %371 = vst [vmem:[#allocation2 + $0xa8] sm:$0x1] %v370_v40  ;;  %v732_v49 = vshrl.u32 %v2613_v33, 16  ;;  %v1235_v54 = vor.u32 %v1234_v31, %v1230_v4  ;;  %v1239_v35 = vrot.slane %v1237_v57, 1  ;;  %v735_v60 = vshll.u32 %v2613_v33, 16  ;;  %v300_v31 = vld [vmem:[%s2841_s24 + $0xf0] sm:$0xff] }
  0x66   : > { %v728_v45 = vor.u32 %v726_v29, %v725_v36  ;;  %v419_v62 = vld [vmem:[#allocation2 + $0xb0] sm:$0x1]  ;;  %v372_v63 = vld [vmem:[#allocation2 + $0xb4] sm:$0x1]  ;;  %v2616_v6 = vpack.c.bf16 %v299_v53, %v299_v53  ;;  %v2549_v7 = vcombine.low %v1005_v41, %v3185_v47  ;;  %v743_v11 = vshll.u32 %v2614_v48, 16  ;;  %v301_v40 = vld [vmem:[%s2841_s24 + $0xf8] sm:$0xff] }
  0x67   : > { %v734_v59 = vrot.slane %v732_v49, 7  ;;  %v3254_v12 = vsel %vm1144_vm6, %v1235_v54, %v1239_v35  ;;  %v960_v13 = vld [vmem:[#allocation2 + $0x60] sm:$0xf]  ;;  %v3256_v14 = vld [vmem:[#allocation2 + $0x64] sm:$0xf]  ;;  %v420_v19 = vsel %vm2832_vm5, 0, %v419_v62  ;;  %v2618_v35 = vpack.c.bf16 %v301_v40, %v301_v40 }
  0x68   : > { %1476 = vrot.lane.b32.xlu1 %v3166_v27, %s2758_s25  ;;  %v729_v56 = vsel %vm2861_vm9, %v721_v34, %v728_v45  ;;  %v375_v17 = vld [vmem:[#allocation2 + $0xc0] sm:$0x1]  ;;  %v373_v52 = vsel %vm2817_vm3, 0, %v372_v63  ;;  %421 = vst [vmem:[#allocation2 + $0xb0] sm:$0x1] %v420_v19  ;;  %v749_v22 = vshrl.u32 %v2615_v5, 16  ;;  %v3281_v38 = vcombine.low %v960_v13, %v3256_v14 }
  0x69   : > { %1474 = vrot.lane.b32.xlu0 %v3091_v2, %s2758_s25  ;;  %v914_v2 = vsel %vm2817_vm3, %v713_v10, %v913_v16  ;;  %919 = vst.msk [vmem:[#allocation2 + $0xa0] sm:$0xf] %vm318_vm0, %v729_v56  ;;  %v740_v10 = vshrl.u32 %v2614_v48, 16  ;;  %v737_v15 = vor.u32 %v735_v60, %v734_v59  ;;  %v422_v16 = vld [vmem:[#allocation2 + $0xbc] sm:$0x1]  ;;  %v738_v47 = vrot.slane %v734_v59, 4 }
  0x6a   : > { %915 = vst [vmem:[#allocation2 + $0x98] sm:$0x1] %v914_v2  ;;  %374 = vst [vmem:[#allocation2 + $0xb4] sm:$0x1] %v373_v52  ;;  %v752_v23 = vshll.u32 %v2615_v5, 16  ;;  %v757_v25 = vshrl.u32 %v2616_v6, 16 }
  0x6b   : > { %v920_v8 = vld [vmem:[#allocation2 + $0xa4] sm:$0x1]  ;;  %v742_v18 = vrot.slane %v740_v10, 7  ;;  %v425_v26 = vld [vmem:[#allocation2 + $0xc8] sm:$0x1]  ;;  %v1439_v29 = vrot.slane %v2549_v7, 1 }
  0x6c   : > { %1513 = vrot.lane.b32.xlu1 %v3145_v58, %s2760_s27  ;;  %v923_v2 = vld [vmem:[#allocation2 + $0xa8] sm:$0xf]  ;;  %v760_v4 = vshll.u32 %v2616_v6, 16  ;;  %v751_v57 = vrot.slane %v749_v22, 7  ;;  %v759_v32 = vrot.slane %v757_v25, 7  ;;  %v423_v33 = vsel %vm2832_vm5, 0, %v422_v16 }
  0x6d   : > { %1511 = vrot.lane.b32.xlu0 %v3068_v46, %s2760_s27  ;;  %v924_v20 = vsel %vm2868_vm10, %v737_v15, %v923_v2  ;;  %v745_v30 = vor.u32 %v743_v11, %v742_v18  ;;  %v376_v34 = vsel %vm2817_vm3, 0, %v375_v17  ;;  %424 = vst [vmem:[#allocation2 + $0xbc] sm:$0x1] %v423_v33  ;;  %v426_v45 = vsel %vm2832_vm5, 0, %v425_v26  ;;  %v1006_v13 = vld [vmem:[#allocation2 + $0x60] sm:$0xe] }
  0x6e   : > { %925 = vst [vmem:[#allocation2 + $0xa8] sm:$0xf] %v924_v20  ;;  %377 = vst [vmem:[#allocation2 + $0xc0] sm:$0x1] %v376_v34  ;;  %v747_v48 = vrot.slane %v742_v18, 4  ;;  %v754_v49 = vor.u32 %v752_v23, %v751_v57  ;;  %v755_v51 = vrot.slane %v751_v57, 4  ;;  %v762_v53 = vor.u32 %v760_v4, %v759_v32 }
  0x6f   : > { %v746_v3 = vsel %vm2861_vm9, %v738_v47, %v745_v30  ;;  %427 = vst [vmem:[#allocation2 + $0xc8] sm:$0x1] %v426_v45  ;;  %v927_v9 = vld [vmem:[#allocation2 + $0xb0] sm:$0x1]  ;;  %v764_v56 = vrot.slane %v759_v32, 4  ;;  %v1244_v62 = vshll.u32 %v3281_v38, 16  ;;  %v2550_v57 = vcombine.low %v1006_v13, %v3256_v14 }
  0x70   : > { %1560 = vrot.lane.b32.xlu1 %v3225_v24, %s2764_s11  ;;  %926 = vst.msk [vmem:[#allocation2 + $0xac] sm:$0xf] %vm318_vm0, %v746_v3  ;;  %v763_v54 = vsel %vm2861_vm9, %v755_v51, %v762_v53  ;;  %v2721_v60 = vld [vmem:[#allocation2 + $0x68] ss:$0 sps:$4 sm:$0x11]   ;;  %v928_v63 = vsel %vm2817_vm3, %v747_v48, %v927_v9  ;;  %v774_v7 = vshrl.u32 %v2618_v35, 16 }
  0x71   : > { %1558 = vrot.lane.b32.xlu0 %v3129_v50, %s2764_s11  ;;  %v730_v50 = vrot.slane %v725_v36, 4  ;;  %v1440_v36 = vrot.slane %v3212_v37, 1  ;;  %v2617_v37 = vpack.c.bf16 %v300_v31, %v300_v31  ;;  %v930_v41 = vld [vmem:[#allocation2 + $0xb4] sm:$0xf]  ;;  %933 = vst.msk [vmem:[#allocation2 + $0xb8] sm:$0xf] %vm318_vm0, %v763_v54 }
  0x72   : > { %929 = vst [vmem:[#allocation2 + $0xb0] sm:$0x1] %v928_v63  ;;  %v777_v10 = vshll.u32 %v2618_v35, 16  ;;  %v776_v17 = vrot.slane %v774_v7, 7  ;;  %v1242_v47 = vshrl.u32 %v3281_v38, 16  ;;  %v1246_v18 = vrot.slane %v1244_v62, 1 }
  0x73   : > { %v1441_v59 = vsel %vm1417_vm8, %v1439_v29, %v1440_v36  ;;  %v769_v6 = vshll.u32 %v2617_v37, 16  ;;  %v1249_v2 = vshll.u32 %v2721_v60, 16  ;;  %v962_v52 = vld [vmem:[#allocation2 + $0x6c] sm:$0xf]  ;;  %v963_v20 = vld [vmem:[#allocation2 + $0x70] sm:$0xf] }
  0x74   : > { %1598 = vrot.lane.b32.xlu1 %v3241_v42, %s2762_s7  ;;  %v779_v22 = vor.u32 %v777_v10, %v776_v17  ;;  %v781_v23 = vrot.slane %v776_v17, 4  ;;  %v1247_v30 = vor.u32 %v1246_v18, %v1242_v47  ;;  %v3318_v32 = vcombine.low %v962_v52, %v963_v20  ;;  %v964_v54 = vld [vmem:[#allocation2 + $0x78] sm:$0xf]  ;;  %v965_v35 = vld [vmem:[#allocation2 + $0x7c] sm:$0xf] }
  0x75   : > { %1596 = vrot.lane.b32.xlu0 %v3166_v27, %s2762_s7  ;;  %v921_v27 = vsel %vm2817_vm3, %v730_v50, %v920_v8  ;;  %v766_v50 = vshrl.u32 %v2617_v37, 16  ;;  %v934_v8 = vld [vmem:[#allocation2 + $0xbc] sm:$0x1]  ;;  %v937_v11 = vld [vmem:[#allocation2 + $0xc0] sm:$0xf]  ;;  %v1251_v4 = vrot.slane %v1249_v2, 1 }
  0x76   : > { %922 = vst [vmem:[#allocation2 + $0xa4] sm:$0x1] %v921_v27  ;;  %v935_v27 = vsel %vm2817_vm3, %v764_v56, %v934_v8  ;;  %v941_v19 = vld [vmem:[#allocation2 + $0xc8] sm:$0x1]  ;;  %v1442_v44 = vrot.slane %v2550_v57, 1  ;;  %v1443_v1 = vrot.slane %v2721_v60, 1  ;;  %v3343_v56 = vcombine.low %v964_v54, %v965_v35 }
  0x77   : > { %v768_v5 = vrot.slane %v766_v50, 7  ;;  %936 = vst [vmem:[#allocation2 + $0xbc] sm:$0x1] %v935_v27  ;;  %v942_v29 = vsel %vm2817_vm3, %v781_v23, %v941_v19  ;;  %v1252_v39 = vsel %vm1144_vm6, %v1247_v30, %v1251_v4  ;;  %v1256_v33 = vshll.u32 %v3318_v32, 16  ;;  %v1008_v10 = vld [vmem:[#allocation2 + $0x78] sm:$0xe] }
  0x78   : > { %1635 = vrot.lane.b32.xlu1 %v3197_v61, %s2761_s28  ;;  %943 = vst [vmem:[#allocation2 + $0xc8] sm:$0x1] %v942_v29  ;;  %v1444_v14 = vsel %vm1417_vm8, %v1442_v44, %v1443_v1  ;;  %v1254_v31 = vshrl.u32 %v3318_v32, 16  ;;  %v2727_v62 = vld [vmem:[#allocation2 + $0x80] ss:$0 sps:$4 sm:$0x11]  }
  0x79   : > { %1633 = vrot.lane.b32.xlu0 %v3145_v58, %s2761_s28  ;;  %v771_v15 = vor.u32 %v769_v6, %v768_v5  ;;  %v772_v16 = vrot.slane %v768_v5, 4  ;;  %v1258_v34 = vrot.slane %v1256_v33, 1  ;;  %v1268_v63 = vshll.u32 %v3343_v56, 16  ;;  %v966_v27 = vld [vmem:[#allocation2 + $0x84] sm:$0xf] }
  0x7a   : > { %v1266_v6 = vshrl.u32 %v3343_v56, 16  ;;  %v1273_v8 = vshll.u32 %v2727_v62, 16  ;;  %vm1742_vm12 = vcmask 31744   ;;  %v3368_v23 = vld [vmem:[#allocation2 + $0x8c] ss:$0 sps:$4 sm:$0x11]  }
  0x7b   : > { %v938_v25 = vsel %vm2868_vm10, %v771_v15, %v937_v11  ;;  %v780_v26 = vsel %vm2861_vm9, %v772_v16, %v779_v22  ;;  %v1259_v45 = vor.u32 %v1258_v34, %v1254_v31  ;;  %v1270_v7 = vrot.slane %v1268_v63, 1  ;;  %v3356_v15 = vld [vmem:[#allocation2 + $0x88] sm:$0xf]  ;;  %v1009_v54 = vld [vmem:[#allocation2 + $0x84] sm:$0xe] }
  0x7c   : > { %1682 = vrot.lane.b32.xlu1 %v3254_v12, %s2765_s12  ;;  %939 = vst [vmem:[#allocation2 + $0xc0] sm:$0xf] %v938_v25  ;;  %940 = vst.msk [vmem:[#allocation2 + $0xc4] sm:$0xf] %vm318_vm0, %v780_v26  ;;  %v2552_v16 = vcombine.low %v1008_v10, %v965_v35  ;;  %v1275_v47 = vrot.slane %v1273_v8, 1  ;;  %v3361_v18 = vcombine.low %v966_v27, %v3356_v15  ;;  %vm1775_vm13 = vcmask 64512  }
  0x7d   : > { %1680 = vrot.lane.b32.xlu0 %v3225_v24, %s2765_s12  ;;  %v1271_v17 = vor.u32 %v1270_v7, %v1266_v6  ;;  %vm1808_vm14 = vcmask 97280   ;;  %vm1841_vm15 = vcmask 130048   ;;  %vm1874_vm0 = vcmask 162816   ;;  %v968_v63 = vld [vmem:[#allocation2 + $0x90] sm:$0xf] }
  0x7e   : > { %v1448_v52 = vrot.slane %v2552_v16, 1  ;;  %v1280_v25 = vshll.u32 %v3361_v18, 16  ;;  %vm1907_vm1 = vcmask 195584   ;;  %vm1940_vm2 = vcmask 228352  }
  0x7f   : > { %v1276_v22 = vsel %vm1144_vm6, %v1271_v17, %v1275_v47  ;;  %vm1973_vm3 = vcmask 261120   ;;  %vm2026_vm4 = vcmask 293888   ;;  %v1452_v6 = vrot.slane %v3368_v23, 1 }
  0x80   : > { %1349 = vrot.lane.b32.xlu1 %v3225_v24, %s2759_s26  ;;  %v931_v24 = vsel %vm2868_vm10, %v754_v49, %v930_v41  ;;  %v1007_v49 = vld [vmem:[#allocation2 + $0x6c] sm:$0xe] }
  0x81   : > { %1718 = vrot.lane.b32.xlu0 %v3241_v42, %s2763_s10  ;;  %932 = vst [vmem:[#allocation2 + $0xb4] sm:$0xf] %v931_v24  ;;  %v2551_v53 = vcombine.low %v1007_v49, %v963_v20  ;;  %v1449_v20 = vrot.slane %v2727_v62, 1 }
  0x83   : > { %v1445_v9 = vrot.slane %v2551_v53, 1 }
  0x84   : > { %1351 = vrot.lane.b32.xlu1 %v3254_v12, %s2759_s26 }
  0x85   : > { %1720 = vrot.lane.b32.xlu0 %v1441_v59, %s2763_s10 }
  0x87   : > { %v3332_v3 = vpop.permute.xlu1 %1466 }
  0x88   : > { %1480 = vrot.lane.b32.xlu1 %v1441_v59, %s2758_s25 }
  0x89   : > { %1478 = vrot.lane.b32.xlu0 %v3241_v42, %s2758_s25  ;;  %v2724_v42 = vld [vmem:[#allocation2 + $0x74] ss:$0 sps:$4 sm:$0x11]  }
  0x8a   : > { %v1261_v36 = vshll.u32 %v2724_v42, 16  ;;  %v1446_v41 = vrot.slane %v2724_v42, 1  ;;  %v1282_v42 = vrot.slane %v1280_v25, 1 }
  0x8c   : > { %1517 = vrot.lane.b32.xlu1 %v3281_v38, %s2760_s27  ;;  %v1263_v48 = vrot.slane %v1261_v36, 1  ;;  %v1447_v60 = vsel %vm1417_vm8, %v1445_v9, %v1446_v41 }
  0x8d   : > { %1515 = vrot.lane.b32.xlu0 %v3197_v61, %s2760_s27  ;;  %v1338_v40 = vpop.permute.xlu0 %1337 }
  0x8e   : > { %v1264_v51 = vsel %vm1144_vm6, %v1259_v45, %v1263_v48  ;;  %v1744_v26 = vsel %vm1742_vm12, %v2854_v28, %v1338_v40  ;;  %v1278_v28 = vshrl.u32 %v3361_v18, 16 }
  0x8f   : > { %v1777_v44 = vsel %vm1775_vm13, %v1744_v26, %v3332_v3 }
  0x90   : > { %1564 = vrot.lane.b32.xlu1 %v1252_v39, %s2764_s11  ;;  %v1283_v49 = vor.u32 %v1282_v42, %v1278_v28 }
  0x91   : > { %1562 = vrot.lane.b32.xlu0 %v3254_v12, %s2764_s11 }
  0x94   : > { %1602 = vrot.lane.b32.xlu1 %v1444_v14, %s2762_s7 }
  0x95   : > { %1600 = vrot.lane.b32.xlu0 %v1441_v59, %s2762_s7 }
  0x96   : > { %v1506_v12 = vpop.permute.xlu1 %1505 }
  0x98   : > { %1639 = vrot.lane.b32.xlu1 %v3318_v32, %s2761_s28 }
  0x99   : > { %1637 = vrot.lane.b32.xlu0 %v3281_v38, %s2761_s28 }
  0x9b   : > { %v1504_v37 = vpop.permute.xlu0 %1503 }
  0x9c   : > { %1686 = vrot.lane.b32.xlu1 %v1264_v51, %s2765_s12  ;;  %v1810_v33 = vsel %vm1808_vm14, %v1777_v44, %v1504_v37 }
  0x9d   : > { %1684 = vrot.lane.b32.xlu0 %v1252_v39, %s2765_s12 }
  0x9e   : > { %v3345_v50 = vpop.permute.xlu1 %1627 }
  0x9f   : > { %v3347_v59 = vpop.permute.xlu0 %1625 }
  0xa0   : > { %1353 = vrot.lane.b32.xlu1 %v1252_v39, %s2759_s26  ;;  %v3379_v39 = vsel %vm1417_vm8, %v1448_v52, %v1449_v20 }
  0xa1   : > { %1722 = vrot.lane.b32.xlu0 %v1444_v14, %s2763_s10 }
  0xa2   : > { %v1469_v24 = vpop.permute.xlu1 %1468 }
  0xa3   : > { %v1589_v5 = vpop.permute.xlu0 %1588 }
  0xa4   : > { %1355 = vrot.lane.b32.xlu1 %v1264_v51, %s2759_s26 }
  0xa5   : > { %1724 = vrot.lane.b32.xlu0 %v1447_v60, %s2763_s10 }
  0xa6   : > { %v1591_v11 = vpop.permute.xlu1 %1590 }
  0xa7   : > { %v1711_v13 = vpop.permute.xlu0 %1710 }
  0xa8   : > { %1484 = vrot.lane.b32.xlu1 %v1447_v60, %s2758_s25 }
  0xa9   : > { %1482 = vrot.lane.b32.xlu0 %v1444_v14, %s2758_s25 }
  0xaa   : > { %v1553_v2 = vpop.permute.xlu1 %1552 }
  0xab   : > { %v1713_v19 = vpop.permute.xlu0 %1712 }
  0xac   : > { %1521 = vrot.lane.b32.xlu1 %v3343_v56, %s2760_s27 }
  0xad   : > { %1519 = vrot.lane.b32.xlu0 %v3318_v32, %s2760_s27 }
  0xae   : > { %v1675_v29 = vpop.permute.xlu1 %1674 }
  0xaf   : > { %v1340_v30 = vpop.permute.xlu0 %1339 }
  0xb0   : > { %v1746_v4 = vsel %vm1742_vm12, %v2910_v0, %v1340_v30  ;;  %1568 = vrot.lane.b32.xlu1 %v1276_v22, %s2764_s11  ;;  %v1285_v0 = vshll.u32 %v3368_v23, 16  ;;  %v971_v23 = vld [vmem:[#allocation2 + $0xa0] sm:$0xf] }
  0xb1   : > { %v1779_v57 = vsel %vm1775_vm13, %v1746_v4, %v1469_v24  ;;  %1566 = vrot.lane.b32.xlu0 %v1264_v51, %s2764_s11  ;;  %v969_v24 = vld [vmem:[#allocation2 + $0x94] sm:$0xf] }
  0xb2   : > { %v1812_v1 = vsel %vm1808_vm14, %v1779_v57, %v1506_v12  ;;  %v3388_v31 = vpop.permute.xlu1 %1341  ;;  %v1287_v12 = vrot.slane %v1285_v0, 1  ;;  %v3417_v7 = vcombine.low %v968_v63, %v969_v24  ;;  %v2737_v0 = vld [vmem:[#allocation2 + $0xa4] ss:$0 sps:$4 sm:$0x11]  }
  0xb3   : > { %v1845_v14 = vsel %vm1841_vm15, %v1812_v1, %v1553_v2  ;;  %v1551_v34 = vpop.permute.xlu0 %1550  ;;  %v1748_v28 = vsel %vm1742_vm12, %v2897_v43, %v3388_v31 }
  0xb4   : > { %v1843_v36 = vsel %vm1841_vm15, %v1810_v33, %v1551_v34  ;;  %v1878_v40 = vsel %vm1874_vm0, %v1845_v14, %v1591_v11  ;;  %1606 = vrot.lane.b32.xlu1 %v3379_v39, %s2762_s7  ;;  %v1292_v27 = vshll.u32 %v3417_v7, 16  ;;  %v1290_v17 = vshrl.u32 %v3417_v7, 16 }
  0xb5   : > { %v1876_v45 = vsel %vm1874_vm0, %v1843_v36, %v1589_v5  ;;  %1604 = vrot.lane.b32.xlu0 %v1447_v60, %s2762_s7  ;;  %v1911_v3 = vsel %vm1907_vm1, %v1878_v40, %v3345_v50  ;;  %v1288_v50 = vsel %vm1144_vm6, %v1283_v49, %v1287_v12 }
  0xb6   : > { %v1909_v48 = vsel %vm1907_vm1, %v1876_v45, %v3347_v59  ;;  %v3400_v51 = vpop.permute.xlu1 %1343  ;;  %v1944_v37 = vsel %vm1940_vm2, %v1911_v3, %v1675_v29  ;;  %v2553_v59 = vcombine.low %v1009_v54, %v3356_v15  ;;  %v1294_v47 = vrot.slane %v1292_v27, 1  ;;  %v972_v27 = vld [vmem:[#allocation2 + $0xa8] sm:$0xf] }
  0xb7   : > { %v1673_v53 = vpop.permute.xlu0 %1672  ;;  %v1977_v41 = vsel %vm1973_vm3, %v1944_v37, %v1713_v19  ;;  %v1010_v19 = vld [vmem:[#allocation2 + $0x90] sm:$0xe]  ;;  %v1750_v31 = vsel %vm1742_vm12, %v2928_v21, %v3400_v51 }
  0xb8   : > { %v1942_v35 = vsel %vm1940_vm2, %v1909_v48, %v1673_v53  ;;  %1643 = vrot.lane.b32.xlu1 %v3361_v18, %s2761_s28  ;;  %v1451_v5 = vrot.slane %v2553_v59, 1  ;;  %v2554_v25 = vcombine.low %v1010_v19, %v969_v24  ;;  %v1295_v26 = vor.u32 %v1294_v47, %v1290_v17 }
  0xb9   : > { %1641 = vrot.lane.b32.xlu0 %v3343_v56, %s2761_s28  ;;  %v1975_v9 = vsel %vm1973_vm3, %v1942_v35, %v1711_v13  ;;  %v2734_v13 = vld [vmem:[#allocation2 + $0x98] ss:$0 sps:$4 sm:$0x11]   ;;  %v1309_v53 = vshll.u32 %v2737_v0, 16  ;;  %v1458_v17 = vrot.slane %v2737_v0, 1 }
  0xba   : > { %2644 = vmatprep.mubr.msk.bf16.mxu0 %vm2026_vm4, %v1975_v9  ;;  %v1473_v60 = vpop.permute.xlu1 %1472  ;;  %v1453_v11 = vsel %vm1417_vm8, %v1451_v5, %v1452_v6  ;;  %v1297_v2 = vshll.u32 %v2734_v13, 16  ;;  %v1454_v44 = vrot.slane %v2554_v25, 1  ;;  %v1455_v1 = vrot.slane %v2734_v13, 1  ;;  %v1011_v5 = vld [vmem:[#allocation2 + $0x9c] sm:$0xe] }
  0xbb   : > { %2645 = vmatmul.mubr.msk.bf16.vlgmr.msra.gmra.mrb[0].mxu0 %vm2026_vm4, %v1977_v41  ;;  %v1471_v62 = vpop.permute.xlu0 %1470  ;;  %v1783_v48 = vsel %vm1775_vm13, %v1750_v31, %v1473_v60  ;;  %v1311_v60 = vrot.slane %v1309_v53, 1 }
  0xbc   : > { %1690 = vrot.lane.b32.xlu1 %v1288_v50, %s2765_s12  ;;  %v1299_v29 = vrot.slane %v1297_v2, 1  ;;  %v1456_v45 = vsel %vm1417_vm8, %v1454_v44, %v1455_v1  ;;  %v974_v1 = vld [vmem:[#allocation2 + $0xb4] sm:$0xf] }
  0xbd   : > { %1688 = vrot.lane.b32.xlu0 %v1276_v22, %s2765_s12 }
  0xbe   : > { %v1510_v8 = vpop.permute.xlu1 %1509  ;;  %v1300_v42 = vsel %vm1144_vm6, %v1295_v26, %v1299_v29 }
  0xbf   : > { %v1508_v10 = vpop.permute.xlu0 %1507  ;;  %v1816_v37 = vsel %vm1808_vm14, %v1783_v48, %v1510_v8  ;;  %v2742_v48 = vld [vmem:[#allocation2 + $0xbc] ss:$0 sps:$4 sm:$0x11]  }
  0xc0   : > { %1357 = vrot.lane.b32.xlu1 %v1276_v22, %s2759_s26  ;;  %v970_v22 = vld [vmem:[#allocation2 + $0x9c] sm:$0xf] }
  0xc1   : > { %1726 = vrot.lane.b32.xlu0 %v3379_v39, %s2763_s10  ;;  %v3430_v30 = vcombine.low %v970_v22, %v971_v23 }
  0xc2   : > { %v1557_v15 = vpop.permute.xlu1 %1556 }
  0xc3   : > { %v1555_v16 = vpop.permute.xlu0 %1554  ;;  %v1304_v33 = vshll.u32 %v3430_v30, 16  ;;  %v1302_v3 = vshrl.u32 %v3430_v30, 16  ;;  %v1849_v35 = vsel %vm1841_vm15, %v1816_v37, %v1557_v15  ;;  %v973_v15 = vld [vmem:[#allocation2 + $0xac] sm:$0xf] }
  0xc4   : > { %1359 = vrot.lane.b32.xlu1 %v1288_v50, %s2759_s26  ;;  %v3473_v47 = vcombine.low %v972_v27, %v973_v15 }
  0xc5   : > { %1728 = vrot.lane.b32.xlu0 %v1453_v11, %s2763_s10  ;;  %v1306_v12 = vrot.slane %v1304_v33, 1 }
  0xc6   : > { %v1595_v52 = vpop.permute.xlu1 %1594  ;;  %v1316_v22 = vshll.u32 %v3473_v47, 16  ;;  %v1314_v26 = vshrl.u32 %v3473_v47, 16 }
  0xc7   : > { %v1593_v20 = vpop.permute.xlu0 %1592  ;;  %v1882_v41 = vsel %vm1874_vm0, %v1849_v35, %v1595_v52  ;;  %v1307_v59 = vor.u32 %v1306_v12, %v1302_v3 }
  0xc8   : > { %1488 = vrot.lane.b32.xlu1 %v1453_v11, %s2758_s25  ;;  %v1318_v29 = vrot.slane %v1316_v22, 1  ;;  %v976_v22 = vld [vmem:[#allocation2 + $0xc0] sm:$0xf] }
  0xc9   : > { %1486 = vrot.lane.b32.xlu0 %v3379_v39, %s2758_s25  ;;  %v1781_v39 = vsel %vm1775_vm13, %v1748_v28, %v1471_v62  ;;  %v1312_v8 = vsel %vm1144_vm6, %v1307_v59, %v1311_v60  ;;  %v1333_v59 = vshll.u32 %v2742_v48, 16 }
  0xca   : > { %v1632_v4 = vpop.permute.xlu1 %1631  ;;  %v1814_v14 = vsel %vm1808_vm14, %v1781_v39, %v1508_v10  ;;  %v2555_v10 = vcombine.low %v1011_v5, %v971_v23  ;;  %v975_v39 = vld [vmem:[#allocation2 + $0xb8] sm:$0xf]  ;;  %v1319_v0 = vor.u32 %v1318_v29, %v1314_v26  ;;  %v1464_v26 = vrot.slane %v2742_v48, 1 }
  0xcb   : > { %v1630_v57 = vpop.permute.xlu0 %1629  ;;  %v1847_v43 = vsel %vm1841_vm15, %v1814_v14, %v1555_v16  ;;  %v3484_v14 = vcombine.low %v974_v1, %v975_v39 }
  0xcc   : > { %1525 = vrot.lane.b32.xlu1 %v3417_v7, %s2760_s27  ;;  %v1880_v40 = vsel %vm1874_vm0, %v1847_v43, %v1593_v20  ;;  %v1457_v16 = vrot.slane %v2555_v10, 1  ;;  %v2739_v20 = vld [vmem:[#allocation2 + $0xb0] ss:$0 sps:$4 sm:$0x11]  }
  0xcd   : > { %1523 = vrot.lane.b32.xlu0 %v3361_v18, %s2760_s27  ;;  %v1913_v49 = vsel %vm1907_vm1, %v1880_v40, %v1630_v57  ;;  %v1012_v57 = vld [vmem:[#allocation2 + $0xa8] sm:$0xe]  ;;  %v1461_v40 = vrot.slane %v2739_v20, 1  ;;  %v1326_v35 = vshrl.u32 %v3484_v14, 16 }
  0xce   : > { %v1679_v34 = vpop.permute.xlu1 %1678  ;;  %v1459_v52 = vsel %vm1417_vm8, %v1457_v16, %v1458_v17  ;;  %v1013_v16 = vld [vmem:[#allocation2 + $0xb4] sm:$0xe] }
  0xcf   : > { %v1677_v36 = vpop.permute.xlu0 %1676 }
  0xd0   : > { %1572 = vrot.lane.b32.xlu1 %v1300_v42, %s2764_s11  ;;  %v1946_v21 = vsel %vm1940_vm2, %v1913_v49, %v1677_v36  ;;  %v1328_v49 = vshll.u32 %v3484_v14, 16 }
  0xd1   : > { %1570 = vrot.lane.b32.xlu0 %v1288_v50, %s2764_s11  ;;  %v1915_v50 = vsel %vm1907_vm1, %v1882_v41, %v1632_v4  ;;  %v1321_v4 = vshll.u32 %v2739_v20, 16 }
  0xd2   : > { %v1346_v51 = vpop.permute.xlu1 %1345  ;;  %v1948_v62 = vsel %vm1940_vm2, %v1915_v50, %v1679_v34  ;;  %v1330_v50 = vrot.slane %v1328_v49, 1 }
  0xd3   : > { %v1715_v54 = vpop.permute.xlu0 %1714  ;;  %v1323_v33 = vrot.slane %v1321_v4, 1  ;;  %v1752_v43 = vsel %vm1742_vm12, %v3022_v55, %v1346_v51 }
  0xd4   : > { %v1979_v9 = vsel %vm1973_vm3, %v1946_v21, %v1715_v54  ;;  %1610 = vrot.lane.b32.xlu1 %v1456_v45, %s2762_s7  ;;  %v1331_v10 = vor.u32 %v1330_v50, %v1326_v35 }
  0xd5   : > { %1608 = vrot.lane.b32.xlu0 %v1453_v11, %s2762_s7  ;;  %2648 = vmatprep.mubr.msk.bf16.mxu0 %vm2026_vm4, %v1979_v9  ;;  %v1324_v3 = vsel %vm1144_vm6, %v1319_v0, %v1323_v33 }
  0xd6   : > { %v1348_v63 = vpop.permute.xlu1 %1347 }
  0xd7   : > { %v1717_v24 = vpop.permute.xlu0 %1716  ;;  %v1754_v21 = vsel %vm1742_vm12, %v3068_v46, %v1348_v63 }
  0xd8   : > { %v1981_v6 = vsel %vm1973_vm3, %v1948_v62, %v1717_v24  ;;  %1647 = vrot.lane.b32.xlu1 %v3430_v30, %s2761_s28 }
  0xd9   : > { %1645 = vrot.lane.b32.xlu0 %v3417_v7, %s2761_s28  ;;  %2649 = vmatmul.mubr.msk.bf16.gmra.mrb[4].mxu0 %vm2026_vm4, %v1981_v6 }
  0xda   : > { %v1477_v11 = vpop.permute.xlu1 %1476 }
  0xdb   : > { %v1475_v13 = vpop.permute.xlu0 %1474  ;;  %v1787_v9 = vsel %vm1775_vm13, %v1754_v21, %v1477_v11  ;;  %v1335_v11 = vrot.slane %v1333_v59, 1 }
  0xdc   : > { %1694 = vrot.lane.b32.xlu1 %v1312_v8, %s2765_s12 }
  0xdd   : > { %1692 = vrot.lane.b32.xlu0 %v1300_v42, %s2765_s12 }
  0xde   : > { %v1514_v2 = vpop.permute.xlu1 %1513 }
  0xdf   : > { %v1512_v19 = vpop.permute.xlu0 %1511  ;;  %v1820_v60 = vsel %vm1808_vm14, %v1787_v9, %v1514_v2  ;;  %v1336_v2 = vsel %vm1144_vm6, %v1331_v10, %v1335_v11  ;;  %v2747_v9 = vld [vmem:[#allocation2 + $0xd4] ss:$0 sps:$4 sm:$0x11]  }
  0xe0   : > { %1361 = vrot.lane.b32.xlu1 %v1300_v42, %s2759_s26  ;;  %v2556_v42 = vcombine.low %v1012_v57, %v973_v15  ;;  %v1668_v10 = vshll.u32 %v2747_v9, 16 }
  0xe1   : > { %1730 = vrot.lane.b32.xlu0 %v1456_v45, %s2763_s10 }
  0xe2   : > { %v1561_v23 = vpop.permute.xlu1 %1560  ;;  %v1460_v31 = vrot.slane %v2556_v42, 1 }
  0xe3   : > { %v1559_v25 = vpop.permute.xlu0 %1558  ;;  %v1853_v24 = vsel %vm1841_vm15, %v1820_v60, %v1561_v23  ;;  %v977_v23 = vld [vmem:[#allocation2 + $0xc4] sm:$0xf] }
  0xe4   : > { %1363 = vrot.lane.b32.xlu1 %v1312_v8, %s2759_s26  ;;  %v1462_v54 = vsel %vm1417_vm8, %v1460_v31, %v1461_v40  ;;  %v3525_v29 = vcombine.low %v976_v22, %v977_v23  ;;  %v978_v40 = vld [vmem:[#allocation2 + $0xcc] sm:$0xf] }
  0xe5   : > { %1732 = vrot.lane.b32.xlu0 %v1459_v52, %s2763_s10 }
  0xe6   : > { %v1599_v28 = vpop.permute.xlu1 %1598  ;;  %v1541_v1 = vshll.u32 %v3525_v29, 16  ;;  %v1539_v0 = vshrl.u32 %v3525_v29, 16 }
  0xe7   : > { %v1597_v44 = vpop.permute.xlu0 %1596  ;;  %v1886_v6 = vsel %vm1874_vm0, %v1853_v24, %v1599_v28 }
  0xe8   : > { %1492 = vrot.lane.b32.xlu1 %v1459_v52, %s2758_s25  ;;  %v1543_v33 = vrot.slane %v1541_v1, 1 }
  0xe9   : > { %1490 = vrot.lane.b32.xlu0 %v1456_v45, %s2758_s25  ;;  %v1785_v45 = vsel %vm1775_vm13, %v1752_v43, %v1475_v13 }
  0xea   : > { %v1636_v34 = vpop.permute.xlu1 %1635  ;;  %v1818_v12 = vsel %vm1808_vm14, %v1785_v45, %v1512_v19  ;;  %v2557_v19 = vcombine.low %v1013_v16, %v975_v39  ;;  %v979_v45 = vld [vmem:[#allocation2 + $0xd0] sm:$0xf]  ;;  %v1544_v48 = vor.u32 %v1543_v33, %v1539_v0 }
  0xeb   : > { %v1634_v36 = vpop.permute.xlu0 %1633  ;;  %v1851_v55 = vsel %vm1841_vm15, %v1818_v12, %v1559_v25  ;;  %v2561_v12 = vcombine.low %v978_v40, %v979_v45 }
  0xec   : > { %1529 = vrot.lane.b32.xlu1 %v3473_v47, %s2760_s27  ;;  %v1884_v51 = vsel %vm1874_vm0, %v1851_v55, %v1597_v44  ;;  %v1463_v25 = vrot.slane %v2557_v19, 1  ;;  %v2744_v44 = vld [vmem:[#allocation2 + $0xc8] ss:$0 sps:$4 sm:$0x11]  }
  0xed   : > { %1527 = vrot.lane.b32.xlu0 %v3430_v30, %s2760_s27  ;;  %v1917_v41 = vsel %vm1907_vm1, %v1884_v51, %v1634_v36  ;;  %v1014_v36 = vld [vmem:[#allocation2 + $0xc0] sm:$0xe]  ;;  %v1586_v51 = vrot.slane %v2744_v44, 1  ;;  %v1661_v24 = vshrl.u32 %v2561_v12, 16 }
  0xee   : > { %v1683_v53 = vpop.permute.xlu1 %1682  ;;  %v1465_v28 = vsel %vm1417_vm8, %v1463_v25, %v1464_v26 }
  0xef   : > { %v1681_v37 = vpop.permute.xlu0 %1680 }
  0xf0   : > { %1576 = vrot.lane.b32.xlu1 %v1324_v3, %s2764_s11  ;;  %v1950_v46 = vsel %vm1940_vm2, %v1917_v41, %v1681_v37  ;;  %v1663_v41 = vshll.u32 %v2561_v12, 16 }
  0xf1   : > { %1574 = vrot.lane.b32.xlu0 %v1312_v8, %s2764_s11  ;;  %v1919_v8 = vsel %vm1907_vm1, %v1886_v6, %v1636_v34  ;;  %v1546_v34 = vshll.u32 %v2744_v44, 16  ;;  %v1708_v44 = vrot.slane %v2747_v9, 1 }
  0xf2   : > { %v1350_v62 = vpop.permute.xlu1 %1349  ;;  %v1952_v13 = vsel %vm1940_vm2, %v1919_v8, %v1683_v53  ;;  %v1665_v8 = vrot.slane %v1663_v41, 1 }
  0xf3   : > { %v1719_v63 = vpop.permute.xlu0 %1718  ;;  %v1548_v49 = vrot.slane %v1546_v34, 1  ;;  %v1756_v55 = vsel %vm1742_vm12, %v3145_v58, %v1350_v62 }
  0xf4   : > { %v1983_v5 = vsel %vm1973_vm3, %v1950_v46, %v1719_v63  ;;  %1614 = vrot.lane.b32.xlu1 %v1462_v54, %s2762_s7 }
  0xf5   : > { %1612 = vrot.lane.b32.xlu0 %v1459_v52, %s2762_s7  ;;  %2652 = vmatprep.mubr.msk.bf16.mxu0 %vm2026_vm4, %v1983_v5 }
  0xf6   : > { %v1352_v27 = vpop.permute.xlu1 %1351 }
  0xf7   : > { %v1721_v15 = vpop.permute.xlu0 %1720  ;;  %v1758_v46 = vsel %vm1742_vm12, %v3197_v61, %v1352_v27 }
  0xf8   : > { %v1985_v17 = vsel %vm1973_vm3, %v1952_v13, %v1721_v15  ;;  %1651 = vrot.lane.b32.xlu1 %v3484_v14, %s2761_s28  ;;  %v1015_v15 = vld [vmem:[#allocation2 + $0xcc] sm:$0xe] }
  0xf9   : > { %1649 = vrot.lane.b32.xlu0 %v3473_v47, %s2761_s28  ;;  %2653 = vmatmul.mubr.msk.bf16.gmra.mrb[8].mxu0 %vm2026_vm4, %v1985_v17  ;;  %v2563_v22 = vcombine.low %v1015_v15, %v979_v45 }
  0xfa   : > { %v1481_v52 = vpop.permute.xlu1 %1480 }
  0xfb   : > { %v1479_v20 = vpop.permute.xlu0 %1478  ;;  %v1791_v5 = vsel %vm1775_vm13, %v1758_v46, %v1481_v52  ;;  %v1666_v52 = vor.u32 %v1665_v8, %v1661_v24 }
  0xfc   : > { %1698 = vrot.lane.b32.xlu1 %v1336_v2, %s2765_s12  ;;  %v1789_v35 = vsel %vm1775_vm13, %v1756_v55, %v1479_v20  ;;  %v1670_v20 = vrot.slane %v1668_v10, 1 }
  0xfd   : > { %1696 = vrot.lane.b32.xlu0 %v1324_v3, %s2765_s12 }
  0xfe   : > { %v1518_v4 = vpop.permute.xlu1 %1517 }
  0xff   : > { %v1516_v57 = vpop.permute.xlu0 %1515  ;;  %v1824_v11 = vsel %vm1808_vm14, %v1791_v5, %v1518_v4 }
 0x100   : > { %1365 = vrot.lane.b32.xlu1 %v1324_v3, %s2759_s26  ;;  %v2560_v3 = vcombine.low %v1014_v36, %v977_v23  ;;  %v1822_v50 = vsel %vm1808_vm14, %v1789_v35, %v1516_v57  ;;  %v1671_v57 = vsel %vm1144_vm6, %v1666_v52, %v1670_v20 }
 0x101   : > { %1734 = vrot.lane.b32.xlu0 %v1462_v54, %s2763_s10 }
 0x102   : > { %v1565_v39 = vpop.permute.xlu1 %1564  ;;  %v1585_v21 = vrot.slane %v2560_v3, 1 }
 0x103   : > { %v1563_v42 = vpop.permute.xlu0 %1562  ;;  %v1857_v16 = vsel %vm1841_vm15, %v1824_v11, %v1565_v39 }
 0x104   : > { %1367 = vrot.lane.b32.xlu1 %v1336_v2, %s2759_s26  ;;  %v1855_v58 = vsel %vm1841_vm15, %v1822_v50, %v1563_v42  ;;  %v1587_v63 = vsel %vm1417_vm8, %v1585_v21, %v1586_v51 }
 0x105   : > { %1736 = vrot.lane.b32.xlu0 %v1465_v28, %s2763_s10 }
 0x106   : > { %v1603_v43 = vpop.permute.xlu1 %1602 }
 0x107   : > { %v1601_v31 = vpop.permute.xlu0 %1600 }
 0x108   : > { %1496 = vrot.lane.b32.xlu1 %v1465_v28, %s2758_s25  ;;  %v1888_v62 = vsel %vm1874_vm0, %v1855_v58, %v1601_v31 }
 0x109   : > { %1494 = vrot.lane.b32.xlu0 %v1462_v54, %s2758_s25  ;;  %v1549_v54 = vsel %vm1144_vm6, %v1544_v48, %v1548_v49 }
 0x10a   : > { %v1640_v53 = vpop.permute.xlu1 %1639 }
 0x10b   : > { %v1638_v37 = vpop.permute.xlu0 %1637 }
 0x10c   : > { %1533 = vrot.lane.b32.xlu1 %v3525_v29, %s2760_s27  ;;  %v1921_v6 = vsel %vm1907_vm1, %v1888_v62, %v1638_v37 }
 0x10d   : > { %1531 = vrot.lane.b32.xlu0 %v3484_v14, %s2760_s27 }
 0x10e   : > { %v1687_v59 = vpop.permute.xlu1 %1686 }
 0x10f   : > { %v1685_v60 = vpop.permute.xlu0 %1684 }
 0x110   : > { %1580 = vrot.lane.b32.xlu1 %v1549_v54, %s2764_s11  ;;  %v1954_v13 = vsel %vm1940_vm2, %v1921_v6, %v1685_v60 }
 0x111   : > { %1578 = vrot.lane.b32.xlu0 %v1336_v2, %s2764_s11  ;;  %v1890_v2 = vsel %vm1874_vm0, %v1857_v16, %v1603_v43 }
 0x112   : > { %v1354_v61 = vpop.permute.xlu1 %1353  ;;  %v1923_v19 = vsel %vm1907_vm1, %v1890_v2, %v1640_v53 }
 0x113   : > { %v1723_v27 = vpop.permute.xlu0 %1722  ;;  %v1956_v23 = vsel %vm1940_vm2, %v1923_v19, %v1687_v59  ;;  %v1760_v45 = vsel %vm1742_vm12, %v3281_v38, %v1354_v61 }
 0x114   : > { %v1987_v17 = vsel %vm1973_vm3, %v1954_v13, %v1723_v27  ;;  %1618 = vrot.lane.b32.xlu1 %v1587_v63, %s2762_s7 }
 0x115   : > { %1616 = vrot.lane.b32.xlu0 %v1465_v28, %s2762_s7  ;;  %2656 = vmatprep.mubr.msk.bf16.mxu0 %vm2026_vm4, %v1987_v17  ;;  %v1707_v28 = vrot.slane %v2563_v22, 1 }
 0x116   : > { %v1356_v25 = vpop.permute.xlu1 %1355 }
 0x117   : > { %v1725_v26 = vpop.permute.xlu0 %1724  ;;  %v1709_v42 = vsel %vm1417_vm8, %v1707_v28, %v1708_v44  ;;  %v1762_v37 = vsel %vm1742_vm12, %v3318_v32, %v1356_v25 }
 0x118   : > { %v1989_v4 = vsel %vm1973_vm3, %v1956_v23, %v1725_v26  ;;  %1655 = vrot.lane.b32.xlu1 %v2561_v12, %s2761_s28 }
 0x119   : > { %1653 = vrot.lane.b32.xlu0 %v3525_v29, %s2761_s28  ;;  %2657 = vmatmul.mubr.msk.bf16.gmra.mrb[12].mxu0 %vm2026_vm4, %v1989_v4 }
 0x11a   : > { %v1485_v1 = vpop.permute.xlu1 %1484 }
 0x11b   : > { %v1483_v39 = vpop.permute.xlu0 %1482  ;;  %v1795_v21 = vsel %vm1775_vm13, %v1762_v37, %v1485_v1 }
 0x11c   : > { %1702 = vrot.lane.b32.xlu1 %v1671_v57, %s2765_s12  ;;  %v1793_v3 = vsel %vm1775_vm13, %v1760_v45, %v1483_v39 }
 0x11d   : > { %1700 = vrot.lane.b32.xlu0 %v1549_v54, %s2765_s12 }
 0x11e   : > { %v1522_v0 = vpop.permute.xlu1 %1521 }
 0x11f   : > { %v1520_v33 = vpop.permute.xlu0 %1519  ;;  %v1828_v35 = vsel %vm1808_vm14, %v1795_v21, %v1522_v0 }
 0x120   : > { %1740 = vrot.lane.b32.xlu1 %v1709_v42, %s2763_s10  ;;  %v1826_v48 = vsel %vm1808_vm14, %v1793_v3, %v1520_v33 }
 0x121   : > { %1738 = vrot.lane.b32.xlu0 %v1587_v63, %s2763_s10 }
 0x122   : > { %v1569_v29 = vpop.permute.xlu1 %1568 }
 0x123   : > { %v1567_v34 = vpop.permute.xlu0 %1566  ;;  %v1861_v41 = vsel %vm1841_vm15, %v1828_v35, %v1569_v29 }
 0x124   : > { %v1859_v53 = vsel %vm1841_vm15, %v1826_v48, %v1567_v34 }
 0x126   : > { %v1607_v36 = vpop.permute.xlu1 %1606 }
 0x127   : > { %v1605_v43 = vpop.permute.xlu0 %1604  ;;  %v1894_v59 = vsel %vm1874_vm0, %v1861_v41, %v1607_v36 }
 0x128   : > { %v1892_v55 = vsel %vm1874_vm0, %v1859_v53, %v1605_v43 }
 0x12a   : > { %v1644_v31 = vpop.permute.xlu1 %1643 }
 0x12b   : > { %v1642_v40 = vpop.permute.xlu0 %1641  ;;  %v1927_v32 = vsel %vm1907_vm1, %v1894_v59, %v1644_v31 }
 0x12c   : > { %v1925_v51 = vsel %vm1907_vm1, %v1892_v55, %v1642_v40 }
 0x12e   : > { %v1691_v49 = vpop.permute.xlu1 %1690 }
 0x12f   : > { %v1689_v12 = vpop.permute.xlu0 %1688  ;;  %v1960_v60 = vsel %vm1940_vm2, %v1927_v32, %v1691_v49 }
 0x130   : > { %v1958_v38 = vsel %vm1940_vm2, %v1925_v51, %v1689_v12 }
 0x132   : > { %v1358_v54 = vpop.permute.xlu1 %1357 }
 0x133   : > { %v1727_v9 = vpop.permute.xlu0 %1726  ;;  %v1764_v15 = vsel %vm1742_vm12, %v3343_v56, %v1358_v54 }
 0x134   : > { %v1991_v50 = vsel %vm1973_vm3, %v1958_v38, %v1727_v9 }
 0x135   : > { %2660 = vmatprep.mubr.msk.bf16.mxu1 %vm2026_vm4, %v1991_v50 }
 0x136   : > { %v1360_v58 = vpop.permute.xlu1 %1359 }
 0x137   : > { %v1729_v46 = vpop.permute.xlu0 %1728  ;;  %v1766_v20 = vsel %vm1742_vm12, %v3361_v18, %v1360_v58 }
 0x138   : > { %v1993_v62 = vsel %vm1973_vm3, %v1960_v60, %v1729_v46 }
 0x139   : > { %2661 = vmatmul.mubr.msk.bf16.vlgmr.msra.gmra.mrb[0].mxu1 %vm2026_vm4, %v1993_v62 }
 0x13a   : > { %v1489_v63 = vpop.permute.xlu1 %1488 }
 0x13b   : > { %v1487_v24 = vpop.permute.xlu0 %1486  ;;  %v1799_v23 = vsel %vm1775_vm13, %v1766_v20, %v1489_v63 }
 0x13c   : > { %v1797_v16 = vsel %vm1775_vm13, %v1764_v15, %v1487_v24 }
 0x13e   : > { %v1526_v5 = vpop.permute.xlu1 %1525 }
 0x13f   : > { %v1524_v6 = vpop.permute.xlu0 %1523  ;;  %v1832_v26 = vsel %vm1808_vm14, %v1799_v23, %v1526_v5 }
 0x140   : > { %v1830_v17 = vsel %vm1808_vm14, %v1797_v16, %v1524_v6 }
 0x142   : > { %v1573_v8 = vpop.permute.xlu1 %1572 }
 0x143   : > { %v1571_v10 = vpop.permute.xlu0 %1570  ;;  %v1865_v28 = vsel %vm1841_vm15, %v1832_v26, %v1573_v8 }
 0x144   : > { %v1863_v52 = vsel %vm1841_vm15, %v1830_v17, %v1571_v10 }
 0x146   : > { %v1611_v11 = vpop.permute.xlu1 %1610 }
 0x147   : > { %v1609_v13 = vpop.permute.xlu0 %1608  ;;  %v1898_v1 = vsel %vm1874_vm0, %v1865_v28, %v1611_v11 }
 0x148   : > { %v1896_v22 = vsel %vm1874_vm0, %v1863_v52, %v1609_v13 }
 0x14a   : > { %v1648_v61 = vpop.permute.xlu1 %1647 }
 0x14b   : > { %v1646_v27 = vpop.permute.xlu0 %1645  ;;  %v1931_v18 = vsel %vm1907_vm1, %v1898_v1, %v1648_v61 }
 0x14c   : > { %v1929_v25 = vsel %vm1907_vm1, %v1896_v22, %v1646_v27 }
 0x14e   : > { %v1695_v2 = vpop.permute.xlu1 %1694 }
 0x14f   : > { %v1693_v19 = vpop.permute.xlu0 %1692  ;;  %v1964_v39 = vsel %vm1940_vm2, %v1931_v18, %v1695_v2 }
 0x150   : > { %v1962_v56 = vsel %vm1940_vm2, %v1929_v25, %v1693_v19 }
 0x152   : > { %v1362_v4 = vpop.permute.xlu1 %1361 }
 0x153   : > { %v1731_v57 = vpop.permute.xlu0 %1730  ;;  %v1768_v12 = vsel %vm1742_vm12, %v3417_v7, %v1362_v4 }
 0x154   : > { %v1995_v44 = vsel %vm1973_vm3, %v1962_v56, %v1731_v57 }
 0x155   : > { %2664 = vmatprep.mubr.msk.bf16.mxu1 %vm2026_vm4, %v1995_v44 }
 0x156   : > { %v1364_v42 = vpop.permute.xlu1 %1363 }
 0x157   : > { %v1733_v0 = vpop.permute.xlu0 %1732  ;;  %v1770_v35 = vsel %vm1742_vm12, %v3430_v30, %v1364_v42 }
 0x158   : > { %v1997_v33 = vsel %vm1973_vm3, %v1964_v39, %v1733_v0 }
 0x159   : > { %2665 = vmatmul.mubr.msk.bf16.gmra.mrb[4].mxu1 %vm2026_vm4, %v1997_v33 }
 0x15a   : > { %v1493_v29 = vpop.permute.xlu1 %1492 }
 0x15b   : > { %v1491_v34 = vpop.permute.xlu0 %1490  ;;  %v1803_v54 = vsel %vm1775_vm13, %v1770_v35, %v1493_v29 }
 0x15c   : > { %v1801_v53 = vsel %vm1775_vm13, %v1768_v12, %v1491_v34 }
 0x15e   : > { %v1530_v36 = vpop.permute.xlu1 %1529 }
 0x15f   : > { %v1528_v43 = vpop.permute.xlu0 %1527  ;;  %v1836_v41 = vsel %vm1808_vm14, %v1803_v54, %v1530_v36 }
 0x160   : > { %v1834_v37 = vsel %vm1808_vm14, %v1801_v53, %v1528_v43 }
 0x162   : > { %v1577_v31 = vpop.permute.xlu1 %1576 }
 0x163   : > { %v1575_v40 = vpop.permute.xlu0 %1574  ;;  %v1869_v32 = vsel %vm1841_vm15, %v1836_v41, %v1577_v31 }
 0x164   : > { %v1867_v51 = vsel %vm1841_vm15, %v1834_v37, %v1575_v40 }
 0x166   : > { %v1615_v45 = vpop.permute.xlu1 %1614 }
 0x167   : > { %v1613_v3 = vpop.permute.xlu0 %1612  ;;  %v1902_v58 = vsel %vm1874_vm0, %v1869_v32, %v1615_v45 }
 0x168   : > { %v1900_v38 = vsel %vm1874_vm0, %v1867_v51, %v1613_v3 }
 0x16a   : > { %v1652_v48 = vpop.permute.xlu1 %1651 }
 0x16b   : > { %v1650_v49 = vpop.permute.xlu0 %1649  ;;  %v1935_v30 = vsel %vm1907_vm1, %v1902_v58, %v1652_v48 }
 0x16c   : > { %v1933_v9 = vsel %vm1907_vm1, %v1900_v38, %v1650_v49 }
 0x16e   : > { %v1699_v55 = vpop.permute.xlu1 %1698 }
 0x16f   : > { %v1697_v21 = vpop.permute.xlu0 %1696  ;;  %v1968_v46 = vsel %vm1940_vm2, %v1935_v30, %v1699_v55 }
 0x170   : > { %v1966_v7 = vsel %vm1940_vm2, %v1933_v9, %v1697_v21 }
 0x172   : > { %v1366_v50 = vpop.permute.xlu1 %1365 }
 0x173   : > { %v1735_v59 = vpop.permute.xlu0 %1734  ;;  %v1772_v17 = vsel %vm1742_vm12, %v3473_v47, %v1366_v50 }
 0x174   : > { %v1999_v60 = vsel %vm1973_vm3, %v1966_v7, %v1735_v59 }
 0x175   : > { %2668 = vmatprep.mubr.msk.bf16.mxu1 %vm2026_vm4, %v1999_v60 }
 0x176   : > { %v1368_v62 = vpop.permute.xlu1 %1367 }
 0x177   : > { %v1737_v63 = vpop.permute.xlu0 %1736  ;;  %v1774_v2 = vsel %vm1742_vm12, %v3484_v14, %v1368_v62 }
 0x178   : > { %v2001_v24 = vsel %vm1973_vm3, %v1968_v46, %v1737_v63 }
 0x179   : > { %2669 = vmatmul.mubr.msk.bf16.gmra.mrb[8].mxu1 %vm2026_vm4, %v2001_v24 }
 0x17a   : > { %v1497_v5 = vpop.permute.xlu1 %1496 }
 0x17b   : > { %v1495_v6 = vpop.permute.xlu0 %1494  ;;  %v1807_v19 = vsel %vm1775_vm13, %v1774_v2, %v1497_v5 }
 0x17c   : > { %v1805_v52 = vsel %vm1775_vm13, %v1772_v17, %v1495_v6 }
 0x17e   : > { %v1534_v8 = vpop.permute.xlu1 %1533 }
 0x17f   : > { %v1532_v10 = vpop.permute.xlu0 %1531  ;;  %v1840_v22 = vsel %vm1808_vm14, %v1807_v19, %v1534_v8 }
 0x180   : > { %v1838_v23 = vsel %vm1808_vm14, %v1805_v52, %v1532_v10 }
 0x182   : > { %v1581_v11 = vpop.permute.xlu1 %1580 }
 0x183   : > { %v1579_v13 = vpop.permute.xlu0 %1578  ;;  %v1873_v56 = vsel %vm1841_vm15, %v1840_v22, %v1581_v11 }
 0x184   : > { %v1871_v47 = vsel %vm1841_vm15, %v1838_v23, %v1579_v13 }
 0x186   : > { %v1619_v61 = vpop.permute.xlu1 %1618 }
 0x187   : > { %v1617_v27 = vpop.permute.xlu0 %1616  ;;  %v1906_v57 = vsel %vm1874_vm0, %v1873_v56, %v1619_v61 }
 0x188   : > { %v1904_v28 = vsel %vm1874_vm0, %v1871_v47, %v1617_v27 }
 0x18a   : > { %v1656_v15 = vpop.permute.xlu1 %1655 }
 0x18b   : > { %v1654_v16 = vpop.permute.xlu0 %1653  ;;  %v1939_v1 = vsel %vm1907_vm1, %v1906_v57, %v1656_v15 }
 0x18c   : > { %v1937_v0 = vsel %vm1907_vm1, %v1904_v28, %v1654_v16 }
 0x18e   : > { %v2646_v20 = vpop.f32.mrb[0].mxu0  ;;  %v1703_v25 = vpop.permute.xlu1 %1702 }
 0x18f   : > { %2226 = vst [vmem:[%s3640_s17 + $0x10] sm:$0xff] %v2646_v20  ;;  %v2097_v26 = vpop.f32.mrb[1].mxu0  ;;  %v1701_v14 = vpop.permute.xlu0 %1700  ;;  %v2296_v33 = vmul.f32 %v2646_v20, %v2646_v20  ;;  %v1972_v29 = vsel %vm1940_vm2, %v1939_v1, %v1703_v25 }
 0x190   : > { %2224 = vst [vmem:[%s3640_s17] sm:$0xff] %v2097_v26  ;;  %v2647_v4 = vpop.f32.mrb[2].mxu0  ;;  %v2294_v18 = vmul.f32 %v2097_v26, %v2097_v26  ;;  %v1970_v36 = vsel %vm1940_vm2, %v1937_v0, %v1701_v14 }
 0x191   : > { %2227 = vst [vmem:[%s3640_s17 + $0x18] sm:$0xff] %v2647_v4  ;;  %v2100_v44 = vpop.f32.mrb[3].mxu0  ;;  %v2297_v48 = vmul.f32 %v2647_v4, %v2647_v4 }
 0x192   : > { %2225 = vst [vmem:[%s3640_s17 + $0x8] sm:$0xff] %v2100_v44  ;;  %v2256_v39 = vadd.f32 %v2100_v44, %v2097_v26  ;;  %v2295_v42 = vmul.f32 %v2100_v44, %v2100_v44  ;;  %v1741_v34 = vpop.permute.xlu1 %1740 }
 0x193   : > { %v2005_v40 = vsel %vm1973_vm3, %v1972_v29, %v1741_v34  ;;  %v1739_v45 = vpop.permute.xlu0 %1738 }
 0x194   : > { %v2257_v43 = vadd.f32 %v2646_v20, %v2256_v39  ;;  %v2326_v31 = vadd.f32 %v2295_v42, %v2294_v18  ;;  %v2003_v3 = vsel %vm1973_vm3, %v1970_v36, %v1739_v45 }
 0x195   : > { %2672 = vmatprep.mubr.msk.bf16.mxu1 %vm2026_vm4, %v2003_v3 }
 0x196   : > { %v2327_v49 = vadd.f32 %v2326_v31, %v2296_v33  ;;  %v2258_v12 = vadd.f32 %v2647_v4, %v2257_v43  ;;  %2673 = vmatmul.mubr.msk.bf16.gmra.mrb[12].mxu1 %vm2026_vm4, %v2005_v40 }
 0x198   : > { %v2328_v53 = vadd.f32 %v2327_v49, %v2297_v48 }
 0x1ac   : > { %v2650_v37 = vpop.f32.mrb[4].mxu0 }
 0x1ad   : > { %2230 = vst [vmem:[%s3640_s17 + $0x30] sm:$0xff] %v2650_v37  ;;  %v2113_v55 = vpop.f32.mrb[5].mxu0  ;;  %v2300_v7 = vmul.f32 %v2650_v37, %v2650_v37 }
 0x1ae   : > { %2228 = vst [vmem:[%s3640_s17 + $0x20] sm:$0xff] %v2113_v55  ;;  %v2259_v21 = vadd.f32 %v2258_v12, %v2113_v55  ;;  %v2298_v51 = vmul.f32 %v2113_v55, %v2113_v55  ;;  %v2651_v35 = vpop.f32.mrb[6].mxu0 }
 0x1af   : > { %2231 = vst [vmem:[%s3640_s17 + $0x38] sm:$0xff] %v2651_v35  ;;  %v2116_v38 = vpop.f32.mrb[7].mxu0  ;;  %v2301_v32 = vmul.f32 %v2651_v35, %v2651_v35 }
 0x1b0   : > { %v2329_v54 = vadd.f32 %v2328_v53, %v2298_v51  ;;  %2229 = vst [vmem:[%s3640_s17 + $0x28] sm:$0xff] %v2116_v38  ;;  %v2260_v9 = vadd.f32 %v2259_v21, %v2116_v38  ;;  %v2299_v41 = vmul.f32 %v2116_v38, %v2116_v38 }
 0x1b2   : > { %v2261_v50 = vadd.f32 %v2650_v37, %v2260_v9  ;;  %v2330_v59 = vadd.f32 %v2329_v54, %v2299_v41 }
 0x1b4   : > { %v2331_v60 = vadd.f32 %v2330_v59, %v2300_v7  ;;  %v2262_v58 = vadd.f32 %v2651_v35, %v2261_v50 }
 0x1b6   : > { %v2332_v30 = vadd.f32 %v2331_v60, %v2301_v32 }
 0x1cc   : > { %v2654_v46 = vpop.f32.mrb[8].mxu0 }
 0x1cd   : > { %2234 = vst [vmem:[%s3640_s17 + $0x50] sm:$0xff] %v2654_v46  ;;  %v2129_v62 = vpop.f32.mrb[9].mxu0  ;;  %v2304_v13 = vmul.f32 %v2654_v46, %v2654_v46 }
 0x1ce   : > { %2232 = vst [vmem:[%s3640_s17 + $0x40] sm:$0xff] %v2129_v62  ;;  %v2263_v63 = vadd.f32 %v2262_v58, %v2129_v62  ;;  %v2302_v24 = vmul.f32 %v2129_v62, %v2129_v62  ;;  %v2655_v5 = vpop.f32.mrb[10].mxu0 }
 0x1cf   : > { %2235 = vst [vmem:[%s3640_s17 + $0x58] sm:$0xff] %v2655_v5  ;;  %v2132_v6 = vpop.f32.mrb[11].mxu0  ;;  %v2305_v15 = vmul.f32 %v2655_v5, %v2655_v5 }
 0x1d0   : > { %v2333_v8 = vadd.f32 %v2332_v30, %v2302_v24  ;;  %2233 = vst [vmem:[%s3640_s17 + $0x48] sm:$0xff] %v2132_v6  ;;  %v2264_v10 = vadd.f32 %v2263_v63, %v2132_v6  ;;  %v2303_v11 = vmul.f32 %v2132_v6, %v2132_v6 }
 0x1d2   : > { %v2265_v61 = vadd.f32 %v2654_v46, %v2264_v10  ;;  %v2334_v27 = vadd.f32 %v2333_v8, %v2303_v11 }
 0x1d4   : > { %v2335_v16 = vadd.f32 %v2334_v27, %v2304_v13  ;;  %v2266_v17 = vadd.f32 %v2655_v5, %v2265_v61 }
 0x1d6   : > { %v2336_v2 = vadd.f32 %v2335_v16, %v2305_v15 }
 0x1ec   : > { %v2658_v19 = vpop.f32.mrb[12].mxu0 }
 0x1ed   : > { %2238 = vst [vmem:[%s3640_s17 + $0x70] sm:$0xff] %v2658_v19  ;;  %v2145_v52 = vpop.f32.mrb[13].mxu0  ;;  %v2308_v14 = vmul.f32 %v2658_v19, %v2658_v19 }
 0x1ee   : > { %2236 = vst [vmem:[%s3640_s17 + $0x60] sm:$0xff] %v2145_v52  ;;  %v2267_v20 = vadd.f32 %v2266_v17, %v2145_v52  ;;  %v2306_v22 = vmul.f32 %v2145_v52, %v2145_v52  ;;  %v2659_v23 = vpop.f32.mrb[14].mxu0 }
 0x1ef   : > { %2239 = vst [vmem:[%s3640_s17 + $0x78] sm:$0xff] %v2659_v23  ;;  %v2148_v25 = vpop.f32.mrb[15].mxu0  ;;  %v2309_v28 = vmul.f32 %v2659_v23, %v2659_v23 }
 0x1f0   : > { %v2337_v26 = vadd.f32 %v2336_v2, %v2306_v22  ;;  %2237 = vst [vmem:[%s3640_s17 + $0x68] sm:$0xff] %v2148_v25  ;;  %v2268_v56 = vadd.f32 %v2267_v20, %v2148_v25  ;;  %v2307_v47 = vmul.f32 %v2148_v25, %v2148_v25 }
 0x1f2   : > { %v2269_v4 = vadd.f32 %v2658_v19, %v2268_v56  ;;  %v2338_v57 = vadd.f32 %v2337_v26, %v2307_v47 }
 0x1f4   : > { %v2339_v44 = vadd.f32 %v2338_v57, %v2308_v14  ;;  %v2270_v1 = vadd.f32 %v2659_v23, %v2269_v4 }
 0x1f6   : > { %v2340_v18 = vadd.f32 %v2339_v44, %v2309_v28 }
 0x20c   : > { %v2662_v39 = vpop.f32.mrb[0].mxu1 }
 0x20d   : > { %2242 = vst [vmem:[%s3640_s17 + $0x90] sm:$0xff] %v2662_v39  ;;  %v2161_v42 = vpop.f32.mrb[1].mxu1  ;;  %v2312_v40 = vmul.f32 %v2662_v39, %v2662_v39 }
 0x20e   : > { %2240 = vst [vmem:[%s3640_s17 + $0x80] sm:$0xff] %v2161_v42  ;;  %v2271_v0 = vadd.f32 %v2270_v1, %v2161_v42  ;;  %v2310_v33 = vmul.f32 %v2161_v42, %v2161_v42  ;;  %v2663_v29 = vpop.f32.mrb[2].mxu1 }
 0x20f   : > { %2243 = vst [vmem:[%s3640_s17 + $0x98] sm:$0xff] %v2663_v29  ;;  %v2164_v34 = vpop.f32.mrb[3].mxu1  ;;  %v2313_v48 = vmul.f32 %v2663_v29, %v2663_v29 }
 0x210   : > { %v2341_v36 = vadd.f32 %v2340_v18, %v2310_v33  ;;  %2241 = vst [vmem:[%s3640_s17 + $0x88] sm:$0xff] %v2164_v34  ;;  %v2272_v43 = vadd.f32 %v2271_v0, %v2164_v34  ;;  %v2311_v31 = vmul.f32 %v2164_v34, %v2164_v34 }
 0x212   : > { %v2273_v45 = vadd.f32 %v2662_v39, %v2272_v43  ;;  %v2342_v3 = vadd.f32 %v2341_v36, %v2311_v31 }
 0x214   : > { %v2343_v49 = vadd.f32 %v2342_v3, %v2312_v40  ;;  %v2274_v12 = vadd.f32 %v2663_v29, %v2273_v45 }
 0x216   : > { %v2344_v53 = vadd.f32 %v2343_v49, %v2313_v48 }
 0x22c   : > { %v2666_v37 = vpop.f32.mrb[4].mxu1 }
 0x22d   : > { %2246 = vst [vmem:[%s3640_s17 + $0xb0] sm:$0xff] %v2666_v37  ;;  %v2177_v55 = vpop.f32.mrb[5].mxu1  ;;  %v2316_v7 = vmul.f32 %v2666_v37, %v2666_v37 }
 0x22e   : > { %2244 = vst [vmem:[%s3640_s17 + $0xa0] sm:$0xff] %v2177_v55  ;;  %v2275_v21 = vadd.f32 %v2274_v12, %v2177_v55  ;;  %v2314_v51 = vmul.f32 %v2177_v55, %v2177_v55  ;;  %v2667_v35 = vpop.f32.mrb[6].mxu1 }
 0x22f   : > { %2247 = vst [vmem:[%s3640_s17 + $0xb8] sm:$0xff] %v2667_v35  ;;  %v2180_v38 = vpop.f32.mrb[7].mxu1  ;;  %v2317_v32 = vmul.f32 %v2667_v35, %v2667_v35 }
 0x230   : > { %v2345_v54 = vadd.f32 %v2344_v53, %v2314_v51  ;;  %2245 = vst [vmem:[%s3640_s17 + $0xa8] sm:$0xff] %v2180_v38  ;;  %v2276_v9 = vadd.f32 %v2275_v21, %v2180_v38  ;;  %v2315_v41 = vmul.f32 %v2180_v38, %v2180_v38 }
 0x232   : > { %v2277_v50 = vadd.f32 %v2666_v37, %v2276_v9  ;;  %v2346_v59 = vadd.f32 %v2345_v54, %v2315_v41 }
 0x234   : > { %v2347_v60 = vadd.f32 %v2346_v59, %v2316_v7  ;;  %v2278_v58 = vadd.f32 %v2667_v35, %v2277_v50 }
 0x236   : > { %v2348_v30 = vadd.f32 %v2347_v60, %v2317_v32 }
 0x24c   : > { %v2670_v46 = vpop.f32.mrb[8].mxu1 }
 0x24d   : > { %2250 = vst [vmem:[%s3640_s17 + $0xd0] sm:$0xff] %v2670_v46  ;;  %v2193_v62 = vpop.f32.mrb[9].mxu1  ;;  %v2320_v13 = vmul.f32 %v2670_v46, %v2670_v46 }
 0x24e   : > { %2248 = vst [vmem:[%s3640_s17 + $0xc0] sm:$0xff] %v2193_v62  ;;  %v2279_v63 = vadd.f32 %v2278_v58, %v2193_v62  ;;  %v2318_v24 = vmul.f32 %v2193_v62, %v2193_v62  ;;  %v2671_v5 = vpop.f32.mrb[10].mxu1 }
 0x24f   : > { %2251 = vst [vmem:[%s3640_s17 + $0xd8] sm:$0xff] %v2671_v5  ;;  %v2196_v6 = vpop.f32.mrb[11].mxu1  ;;  %v2321_v15 = vmul.f32 %v2671_v5, %v2671_v5 }
 0x250   : > { %v2349_v8 = vadd.f32 %v2348_v30, %v2318_v24  ;;  %2249 = vst [vmem:[%s3640_s17 + $0xc8] sm:$0xff] %v2196_v6  ;;  %v2280_v10 = vadd.f32 %v2279_v63, %v2196_v6  ;;  %v2319_v11 = vmul.f32 %v2196_v6, %v2196_v6 }
 0x252   : > { %v2281_v61 = vadd.f32 %v2670_v46, %v2280_v10  ;;  %v2350_v27 = vadd.f32 %v2349_v8, %v2319_v11 }
 0x254   : > { %v2351_v16 = vadd.f32 %v2350_v27, %v2320_v13  ;;  %v2282_v17 = vadd.f32 %v2671_v5, %v2281_v61 }
 0x256   : > { %v2352_v2 = vadd.f32 %v2351_v16, %v2321_v15 }
 0x269   : > { %v2674_v19 = vpop.f32.mrb[12].mxu1 }
 0x26a   : > { %2254 = vst [vmem:[%s3640_s17 + $0xf0] sm:$0xff] %v2674_v19  ;;  %v2209_v52 = vpop.f32.mrb[13].mxu1  ;;  %v2324_v14 = vmul.f32 %v2674_v19, %v2674_v19 }
 0x26b   : > { %2252 = vst [vmem:[%s3640_s17 + $0xe0] sm:$0xff] %v2209_v52  ;;  %v2283_v20 = vadd.f32 %v2282_v17, %v2209_v52  ;;  %v2322_v22 = vmul.f32 %v2209_v52, %v2209_v52  ;;  %v2675_v23 = vpop.f32.mrb[14].mxu1 }
 0x26c   : > { %2255 = vst [vmem:[%s3640_s17 + $0xf8] sm:$0xff] %v2675_v23  ;;  %v2212_v25 = vpop.f32.mrb[15].mxu1  ;;  %v2325_v28 = vmul.f32 %v2675_v23, %v2675_v23 }
 0x26d   : > { %v2353_v26 = vadd.f32 %v2352_v2, %v2322_v22  ;;  %2253 = vst [vmem:[%s3640_s17 + $0xe8] sm:$0xff] %v2212_v25  ;;  %v2284_v56 = vadd.f32 %v2283_v20, %v2212_v25  ;;  %v2323_v47 = vmul.f32 %v2212_v25, %v2212_v25 }
 0x26f   : > { %v2285_v4 = vadd.f32 %v2674_v19, %v2284_v56  ;;  %v2354_v57 = vadd.f32 %v2353_v26, %v2323_v47 }
 0x271   : > { %v2286_v44 = vadd.f32 %v2675_v23, %v2285_v4  ;;  %v2355_v1 = vadd.f32 %v2354_v57, %v2324_v14 }
 0x273   : > { %v2287_v18 = vrot.slane %v2286_v44, 4  ;;  %v2356_v39 = vadd.f32 %v2355_v1, %v2325_v28 }
 0x275   : > { %v2288_v42 = vadd.f32 %v2287_v18, %v2286_v44  ;;  %v2357_v0 = vrot.slane %v2356_v39, 4 }
 0x277   : > { %v2289_v33 = vrot.slane %v2288_v42, 2  ;;  %v2358_v29 = vadd.f32 %v2357_v0, %v2356_v39 }
 0x279   : > { %v2290_v34 = vadd.f32 %v2289_v33, %v2288_v42  ;;  %v2359_v36 = vrot.slane %v2358_v29, 2 }
 0x27b   : > { %v2291_v43 = vrot.slane %v2290_v34, 1  ;;  %v2360_v31 = vadd.f32 %v2359_v36, %v2358_v29 }
 0x27d   : > { %v2292_v40 = vadd.f32 %v2291_v43, %v2290_v34  ;;  %v2361_v45 = vrot.slane %v2360_v31, 1 }
 0x27f   : > { %2293 = vst [vmem:[%s265_s20] sm:$0x1] %v2292_v40  ;;  %v2362_v3 = vadd.f32 %v2361_v45, %v2360_v31 }
 0x281   : > { %2363 = vst [vmem:[%s268_s23] sm:$0x1] %v2362_v3 }
 0x282 PF: > { %s17_s21 = sadd.s32 1, %s2755_s21  }
 0x283   : > { %p14_p4 = scmp.ge.s32.totalorder %s17_s21, 4  }
 0x285   :  { %16 = sbr.rel (!%p14_p4) target bundleno = 1 (0x1), region = 92 }

// kernel: vgg_forward.12
= control target key start
LH: loop header
LB: loop body
LE: loop exit
PB: predicated region body
PF: predicated region fallthrough
CT: control target
= control target key end

     0   :  { %s569_s12 = smov 0   ;;  %s655_s0 = inlined_call_operand.vmem [shape: f32[1,128], index: 0, kind: input, shape index: {}]   ;;  %s656_s1 = inlined_call_operand.vmem [shape: f32[1,128], index: 1, kind: input, shape index: {}]   ;;  %s657_s2 = inlined_call_operand.vmem [shape: f32[2,8,8,128], index: 2, kind: input, shape index: {}]   ;;  %s658_s3 = inlined_call_operand.vmem [shape: f32[2,4,4,128], index: 3, kind: output, shape index: {}]  }
   0x1 LB: > { %s516_s13 = sadd.s32 4294967295, %s546_s12   ;;  %p520_p0 = scmp.ge.s32.totalorder %s546_s12, 1  ;;  %s546_s12 = sphi %s569_s12, %s13_s12  }
   0x2   : > { %p137_p1 = scmp.lt.s32.totalorder %s546_s12, 3 }
   0x4   : > { %p138_p2 = pnand %p520_p0, %p137_p1 }
   0x5   : > { %p161_p3 = scmp.lt.s32.totalorder (!%p138_p2), %s516_s13, 1  ;;  %v229_v0 = vlaneseq (!%p138_p2)  ;;  %v548_v1 = vmov (!%p138_p2), 1983009808   ;;  %v525_v3 = vld [vmem:[%s655_s0] ss:$0 sm:$0xff] (!%p138_p2)  ;;  %vm309_vm0 = vcmask (!%p138_p2), 1041408  }
   0x6   : > { %141 = sbr.rel (%p138_p2) target bundleno = 70 (0x46), region = 32  ;;  %v227_v2 = vunpack.c.l.s4 (!%p138_p2), %v548_v1  ;;  %v526_v6 = vld [vmem:[%s656_s1] ss:$0 sm:$0xff] (!%p138_p2)  ;;  %vm438_vm1 = vcmask (!%p138_p2), 1041409   ;;  %vm440_vm2 = vcmask (!%p138_p2), 1042434   ;;  %vm442_vm3 = vcmask (!%p138_p2), 1043459  }
   0x7   : > { %v230_v5 = vshrl.u32 (!%p138_p2), %v229_v0, 7 }
   0x8   : > { %v228_v4 = vunpack.c.0.s8 (!%p138_p2), %v227_v2 }
   0xa   : > { %v589_v16 = vsub.s32 (!%p138_p2), %v228_v4, %v230_v5 }
   0xd   : > { %s660_s13 = smov (!%p161_p3, %s516_s13), 1 }
   0xe   : > { %s529_s14 = sshll.u32 %s660_s13, 6  ;;  %s530_s22 = sshll.u32 %s660_s13, 4 }
   0xf   : > { %s165_s19 = scalar_lea.vmem %s657_s2, %s529_s14  ;;  %s620_s25 = scalar_lea.vmem %s658_s3, %s530_s22 }
  0x10   : > { %v171_v7 = vld [vmem:[%s165_s19] sm:$0xff]  ;;  %v172_v8 = vld [vmem:[%s165_s19 + $0x8] sm:$0xff]  ;;  %v173_v9 = vld [vmem:[%s165_s19 + $0x10] sm:$0xff] }
  0x11   : > { %v186_v10 = vmul.f32 %v525_v3, %v171_v7  ;;  %v187_v11 = vmul.f32 %v525_v3, %v172_v8  ;;  %v174_v12 = vld [vmem:[%s165_s19 + $0x18] sm:$0xff]  ;;  %v188_v13 = vmul.f32 %v525_v3, %v173_v9  ;;  %v175_v14 = vld [vmem:[%s165_s19 + $0x20] sm:$0xff]  ;;  %v176_v15 = vld [vmem:[%s165_s19 + $0x28] sm:$0xff] }
  0x12   : > { %v189_v17 = vmul.f32 %v525_v3, %v174_v12  ;;  %v190_v18 = vmul.f32 %v525_v3, %v175_v14  ;;  %v191_v19 = vmul.f32 %v525_v3, %v176_v15  ;;  %v177_v20 = vld [vmem:[%s165_s19 + $0x30] sm:$0xff]  ;;  %v178_v21 = vld [vmem:[%s165_s19 + $0x38] sm:$0xff] }
  0x13   : > { %v201_v22 = vadd.f32 %v526_v6, %v186_v10  ;;  %v202_v23 = vadd.f32 %v526_v6, %v187_v11  ;;  %v203_v24 = vadd.f32 %v526_v6, %v188_v13  ;;  %v192_v25 = vmul.f32 %v525_v3, %v177_v20 }
  0x14   : > { %v204_v26 = vadd.f32 %v526_v6, %v189_v17  ;;  %v205_v27 = vadd.f32 %v526_v6, %v190_v18  ;;  %v206_v28 = vadd.f32 %v526_v6, %v191_v19  ;;  %v193_v29 = vmul.f32 %v525_v3, %v178_v21 }
  0x15   : > { %v209_v30 = vmax.f32 %v201_v22, 0.0  ;;  %v210_v31 = vmax.f32 %v202_v23, 0.0  ;;  %v211_v32 = vmax.f32 %v203_v24, 0.0  ;;  %v207_v33 = vadd.f32 %v526_v6, %v192_v25 }
  0x16   : > { %v212_v34 = vmax.f32 %v204_v26, 0.0  ;;  %v213_v35 = vmax.f32 %v205_v27, 0.0  ;;  %v214_v36 = vmax.f32 %v206_v28, 0.0  ;;  %v208_v37 = vadd.f32 %v526_v6, %v193_v29 }
  0x17   : > { %v217_v38 = vmax.f32 %v209_v30, %v210_v31  ;;  %v215_v39 = vmax.f32 %v207_v33, 0.0 }
  0x18   : > { %v218_v40 = vmax.f32 %v211_v32, %v212_v34  ;;  %v591_v41 = vmax.f32 %v213_v35, %v214_v36  ;;  %v216_v42 = vmax.f32 %v208_v37, 0.0 }
  0x19   : > { %v225_v43 = vcombine.high %v217_v38, %v217_v38  ;;  %v232_v44 = vrot.slane %v217_v38, %v589_v16 }
  0x1a   : > { %v242_v45 = vcombine.high %v218_v40, %v218_v40  ;;  %v249_v46 = vrot.slane %v218_v40, %v589_v16  ;;  %v259_v47 = vcombine.high %v591_v41, %v591_v41  ;;  %v599_v48 = vrot.slane %v591_v41, %v589_v16 }
  0x1b   : > { %v239_v49 = vrot.slane %v225_v43, %v589_v16  ;;  %v240_v50 = vcombine.high %v232_v44, %v232_v44  ;;  %v310_v51 = vsel %vm309_vm0, %v232_v44, -inf  ;;  %v603_v52 = vmax.f32 %v215_v39, %v216_v42 }
  0x1c   : > { %v311_v53 = vrot.slane %v310_v51, 4  ;;  %v256_v54 = vrot.slane %v242_v45, %v589_v16  ;;  %v257_v55 = vcombine.high %v249_v46, %v249_v46  ;;  %v338_v56 = vsel %vm309_vm0, %v249_v46, -inf }
  0x1d   : > { %v241_v57 = vcombine.high %v239_v49, %v239_v49  ;;  %v317_v58 = vsel %vm309_vm0, %v240_v50, -inf  ;;  %v324_v59 = vsel %vm309_vm0, %v239_v49, -inf  ;;  %v339_v60 = vrot.slane %v338_v56, 4 }
  0x1e   : > { %v312_v61 = vmax.f32 %v310_v51, %v311_v53  ;;  %v318_v62 = vrot.slane %v317_v58, 4  ;;  %v325_v63 = vrot.slane %v324_v59, 4  ;;  %v258_v0 = vcombine.high %v256_v54, %v256_v54 }
  0x1f   : > { %v331_v1 = vsel %vm309_vm0, %v241_v57, -inf  ;;  %v340_v2 = vmax.f32 %v338_v56, %v339_v60  ;;  %v345_v3 = vsel %vm309_vm0, %v257_v55, -inf  ;;  %v352_v4 = vsel %vm309_vm0, %v256_v54, -inf }
  0x20   : > { %v313_v5 = vrot.slane %v312_v61, 2  ;;  %v319_v6 = vmax.f32 %v317_v58, %v318_v62  ;;  %v326_v7 = vmax.f32 %v324_v59, %v325_v63  ;;  %v332_v8 = vrot.slane %v331_v1, 4 }
  0x21   : > { %v341_v9 = vrot.slane %v340_v2, 2  ;;  %v346_v10 = vrot.slane %v345_v3, 4  ;;  %v353_v11 = vrot.slane %v352_v4, 4  ;;  %v359_v12 = vsel %vm309_vm0, %v258_v0, -inf }
  0x22   : > { %v314_v13 = vmax.f32 %v312_v61, %v313_v5  ;;  %v320_v14 = vrot.slane %v319_v6, 2  ;;  %v327_v15 = vrot.slane %v326_v7, 2  ;;  %v333_v17 = vmax.f32 %v331_v1, %v332_v8 }
  0x23   : > { %v342_v18 = vmax.f32 %v340_v2, %v341_v9  ;;  %v347_v19 = vmax.f32 %v345_v3, %v346_v10  ;;  %v354_v20 = vmax.f32 %v352_v4, %v353_v11  ;;  %v360_v21 = vrot.slane %v359_v12, 4 }
  0x24   : > { %v315_v22 = vrot.slane %v314_v13, 1  ;;  %v321_v23 = vmax.f32 %v319_v6, %v320_v14  ;;  %v328_v24 = vmax.f32 %v326_v7, %v327_v15  ;;  %v334_v25 = vrot.slane %v333_v17, 2 }
  0x25   : > { %v343_v26 = vrot.slane %v342_v18, 1  ;;  %v348_v27 = vrot.slane %v347_v19, 2  ;;  %v355_v28 = vrot.slane %v354_v20, 2  ;;  %v361_v29 = vmax.f32 %v359_v12, %v360_v21 }
  0x26   : > { %v316_v30 = vmax.f32 %v314_v13, %v315_v22  ;;  %v322_v31 = vrot.slane %v321_v23, 1  ;;  %v329_v32 = vrot.slane %v328_v24, 1  ;;  %v335_v33 = vmax.f32 %v333_v17, %v334_v25 }
  0x27   : > { %v344_v34 = vmax.f32 %v342_v18, %v343_v26  ;;  %v349_v35 = vmax.f32 %v347_v19, %v348_v27  ;;  %v356_v36 = vmax.f32 %v354_v20, %v355_v28  ;;  %v362_v37 = vrot.slane %v361_v29, 2 }
  0x28   : > { %v323_v38 = vmax.f32 %v321_v23, %v322_v31  ;;  %v330_v39 = vmax.f32 %v328_v24, %v329_v32  ;;  %v336_v40 = vrot.slane %v335_v33, 1  ;;  %v273_v41 = vrot.slane %v259_v47, %v589_v16 }
  0x29   : > { %v350_v42 = vrot.slane %v349_v35, 1  ;;  %v357_v43 = vrot.slane %v356_v36, 1  ;;  %v363_v44 = vmax.f32 %v361_v29, %v362_v37  ;;  %v274_v45 = vcombine.high %v599_v48, %v599_v48 }
  0x2a   : > { %v337_v46 = vmax.f32 %v335_v33, %v336_v40  ;;  %v439_v49 = vsel %vm438_vm1, %v323_v38, %v316_v30  ;;  %v275_v50 = vcombine.high %v273_v41, %v273_v41  ;;  %v366_v51 = vsel %vm309_vm0, %v599_v48, -inf }
  0x2b   : > { %v441_v47 = vsel %vm440_vm2, %v330_v39, %v439_v49  ;;  %v351_v53 = vmax.f32 %v349_v35, %v350_v42  ;;  %v358_v54 = vmax.f32 %v356_v36, %v357_v43  ;;  %v364_v55 = vrot.slane %v363_v44, 1 }
  0x2c   : > { %v443_v56 = vsel %vm442_vm3, %v337_v46, %v441_v47  ;;  %v367_v57 = vrot.slane %v366_v51, 4  ;;  %v373_v58 = vsel %vm309_vm0, %v274_v45, -inf  ;;  %v380_v59 = vsel %vm309_vm0, %v273_v41, -inf }
  0x2d   : > { %457 = vst [vmem:[%s620_s25] sm:$0xf] %v443_v56  ;;  %v365_v60 = vmax.f32 %v363_v44, %v364_v55  ;;  %v444_v61 = vsel %vm438_vm1, %v351_v53, %v344_v34  ;;  %v374_v62 = vrot.slane %v373_v58, 4  ;;  %v381_v63 = vrot.slane %v380_v59, 4 }
  0x2e   : > { %v445_v48 = vsel %vm440_vm2, %v358_v54, %v444_v61  ;;  %v368_v0 = vmax.f32 %v366_v51, %v367_v57  ;;  %v387_v1 = vsel %vm309_vm0, %v275_v50, -inf  ;;  %v276_v2 = vcombine.high %v603_v52, %v603_v52 }
  0x2f   : > { %v446_v3 = vsel %vm442_vm3, %v365_v60, %v445_v48  ;;  %v375_v4 = vmax.f32 %v373_v58, %v374_v62  ;;  %v382_v5 = vmax.f32 %v380_v59, %v381_v63  ;;  %v388_v6 = vrot.slane %v387_v1, 4 }
  0x30   : > { %458 = vst [vmem:[%s620_s25 + $0x4] sm:$0xf] %v446_v3  ;;  %v369_v7 = vrot.slane %v368_v0, 2  ;;  %v283_v8 = vrot.slane %v603_v52, %v589_v16  ;;  %v290_v9 = vrot.slane %v276_v2, %v589_v16 }
  0x31   : > { %v376_v10 = vrot.slane %v375_v4, 2  ;;  %v383_v11 = vrot.slane %v382_v5, 2  ;;  %v389_v12 = vmax.f32 %v387_v1, %v388_v6 }
  0x32   : > { %v370_v13 = vmax.f32 %v368_v0, %v369_v7  ;;  %v291_v14 = vcombine.high %v283_v8, %v283_v8  ;;  %v292_v15 = vcombine.high %v290_v9, %v290_v9  ;;  %v394_v17 = vsel %vm309_vm0, %v283_v8, -inf }
  0x33   : > { %v377_v18 = vmax.f32 %v375_v4, %v376_v10  ;;  %v384_v19 = vmax.f32 %v382_v5, %v383_v11  ;;  %v390_v20 = vrot.slane %v389_v12, 2  ;;  %v395_v21 = vrot.slane %v394_v17, 4 }
  0x34   : > { %v371_v22 = vrot.slane %v370_v13, 1  ;;  %v401_v23 = vsel %vm309_vm0, %v291_v14, -inf  ;;  %v408_v24 = vsel %vm309_vm0, %v290_v9, -inf  ;;  %v415_v52 = vsel %vm309_vm0, %v292_v15, -inf }
  0x35   : > { %v378_v16 = vrot.slane %v377_v18, 1  ;;  %v385_v25 = vrot.slane %v384_v19, 1  ;;  %v391_v26 = vmax.f32 %v389_v12, %v390_v20  ;;  %v396_v27 = vmax.f32 %v394_v17, %v395_v21 }
  0x36   : > { %v372_v28 = vmax.f32 %v370_v13, %v371_v22  ;;  %v402_v29 = vrot.slane %v401_v23, 4  ;;  %v409_v30 = vrot.slane %v408_v24, 4  ;;  %v416_v31 = vrot.slane %v415_v52, 4 }
  0x37   : > { %v379_v32 = vmax.f32 %v377_v18, %v378_v16  ;;  %v386_v33 = vmax.f32 %v384_v19, %v385_v25  ;;  %v392_v34 = vrot.slane %v391_v26, 1  ;;  %v397_v35 = vrot.slane %v396_v27, 2 }
  0x38   : > { %v403_v36 = vmax.f32 %v401_v23, %v402_v29  ;;  %v410_v37 = vmax.f32 %v408_v24, %v409_v30  ;;  %v417_v38 = vmax.f32 %v415_v52, %v416_v31 }
  0x39   : > { %v393_v39 = vmax.f32 %v391_v26, %v392_v34  ;;  %v447_v40 = vsel %vm438_vm1, %v379_v32, %v372_v28  ;;  %v398_v41 = vmax.f32 %v396_v27, %v397_v35 }
  0x3a   : > { %v448_v42 = vsel %vm440_vm2, %v386_v33, %v447_v40  ;;  %v404_v43 = vrot.slane %v403_v36, 2  ;;  %v411_v44 = vrot.slane %v410_v37, 2  ;;  %v418_v45 = vrot.slane %v417_v38, 2 }
  0x3b   : > { %v449_v46 = vsel %vm442_vm3, %v393_v39, %v448_v42  ;;  %v399_v49 = vrot.slane %v398_v41, 1 }
  0x3c   : > { %459 = vst [vmem:[%s620_s25 + $0x8] sm:$0xf] %v449_v46  ;;  %v405_v50 = vmax.f32 %v403_v36, %v404_v43  ;;  %v412_v51 = vmax.f32 %v410_v37, %v411_v44  ;;  %v419_v47 = vmax.f32 %v417_v38, %v418_v45 }
  0x3d   : > { %v400_v53 = vmax.f32 %v398_v41, %v399_v49 }
  0x3e   : > { %v406_v54 = vrot.slane %v405_v50, 1  ;;  %v413_v55 = vrot.slane %v412_v51, 1  ;;  %v420_v56 = vrot.slane %v419_v47, 1 }
  0x40   : > { %v407_v57 = vmax.f32 %v405_v50, %v406_v54  ;;  %v414_v58 = vmax.f32 %v412_v51, %v413_v55  ;;  %v421_v59 = vmax.f32 %v419_v47, %v420_v56 }
  0x42   : > { %v450_v60 = vsel %vm438_vm1, %v407_v57, %v400_v53 }
  0x43   : > { %v451_v61 = vsel %vm440_vm2, %v414_v58, %v450_v60 }
  0x44   : > { %v452_v62 = vsel %vm442_vm3, %v421_v59, %v451_v61 }
  0x45   : > { %460 = vst [vmem:[%s620_s25 + $0xc] sm:$0xf] %v452_v62 }
  0x46 PF: > { %s13_s12 = sadd.s32 1, %s546_s12  }
  0x47   : > { %p10_p4 = scmp.ge.s32.totalorder %s13_s12, 4  }
  0x49   :  { %12 = sbr.rel (!%p10_p4) target bundleno = 1 (0x1), region = 62 }

// kernel: vgg_forward.8
= control target key start
LH: loop header
LB: loop body
LE: loop exit
PB: predicated region body
PF: predicated region fallthrough
CT: control target
= control target key end

     0   :  { %s2945_s21 = smov 0   ;;  %s3968_s0 = inlined_call_operand.vmem [shape: f32[1,128], index: 0, kind: input, shape index: {}]   ;;  %s3969_s1 = inlined_call_operand.vmem [shape: f32[1,128], index: 1, kind: input, shape index: {}]   ;;  %s3970_s2 = inlined_call_operand.vmem [shape: f32[2,16,16,128], index: 2, kind: input, shape index: {}]   ;;  %s3971_s3 = inlined_call_operand.vmem [shape: bf16[72,128], index: 3, kind: input, shape index: {}]   ;;  %s3972_s4 = inlined_call_operand.vmem [shape: f32[2,16,16,128], index: 4, kind: output, shape index: {0}]   ;;  %s3973_s5 = inlined_call_operand.vmem [shape: f32[2,1,128], index: 5, kind: output, shape index: {1}]   ;;  %s3974_s6 = inlined_call_operand.vmem [shape: f32[2,1,128], index: 6, kind: output, shape index: {2}]  }
   0x1 LB: > { %s2595_s22 = sadd.s32 4294967295, %s2899_s21   ;;  %p2599_p0 = scmp.ge.s32.totalorder %s2899_s21, 1  ;;  %s2899_s21 = sphi %s2945_s21, %s17_s21  }
   0x2   : > { %p217_p1 = scmp.lt.s32.totalorder %s2899_s21, 3 }
   0x4   : > { %p218_p2 = pnand %p2599_p0, %p217_p1 }
   0x5   : > { %vm428_vm0 = vcmask (!%p218_p2), 60416   ;;  %v2901_v0 = vmov (!%p218_p2), 0   ;;  %p253_p3 = scmp.lt.s32.totalorder (!%p218_p2), %s2595_s22, 1  ;;  %vm437_vm1 = vcmask (!%p218_p2), 57344   ;;  %vm438_vm2 = vsmask.f32 (!%p218_p2), 256 }
   0x6   : > { %221 = sbr.rel (%p218_p2) target bundleno = 646 (0x286), region = 36  ;;  %429 = vst.msk [vmem:[#allocation2] sm:$0xf] (!%p218_p2), %vm428_vm0, %v2901_v0  ;;  %430 = vst.msk [vmem:[#allocation2 + $0x4] sm:$0xf] (!%p218_p2), %vm428_vm0, %v2901_v0  ;;  %vm1527_vm5 = vcmask (!%p218_p2), 1046528  }
   0x7   : > { %431 = vst.msk [vmem:[#allocation2 + $0x8] sm:$0xf] (!%p218_p2), %vm428_vm0, %v2901_v0  ;;  %433 = vst.msk [vmem:[#allocation2 + $0xcc] sm:$0xf] (!%p218_p2), %vm428_vm0, %v2901_v0  ;;  %v443_v1 = vld [vmem:[#allocation2 + $0x18] sm:$0x1] (!%p218_p2) }
   0x8   : > { %434 = vst.msk [vmem:[#allocation2 + $0xd0] sm:$0xf] (!%p218_p2), %vm428_vm0, %v2901_v0  ;;  %435 = vst.msk [vmem:[#allocation2 + $0xd4] sm:$0xf] (!%p218_p2), %vm428_vm0, %v2901_v0  ;;  %v2964_v2 = vld [vmem:[%s3968_s0] ss:$0 sm:$0xff] (!%p218_p2) }
   0x9   : > { %vm2968_vm3 = vmand (!%p218_p2), %vm437_vm1, %vm438_vm2  ;;  %vm488_vm4 = vsmask.f32 (!%p218_p2), 7938  ;;  %v440_v5 = vld [vmem:[#allocation2 + $0xc] sm:$0x1] (!%p218_p2)  ;;  %v446_v6 = vld [vmem:[#allocation2 + $0x24] sm:$0x1] (!%p218_p2) }
   0xa   : > { %v444_v4 = vsel (!%p218_p2), %vm2968_vm3, 0, %v443_v1  ;;  %v2978_v7 = vld [vmem:[%s3969_s1] ss:$0 sm:$0xff] (!%p218_p2)  ;;  %v441_v8 = vsel (!%p218_p2), %vm2968_vm3, 0, %v440_v5  ;;  %v447_v9 = vsel (!%p218_p2), %vm2968_vm3, 0, %v446_v6  ;;  %vm2993_vm6 = vmand (!%p218_p2), %vm437_vm1, %vm488_vm4  ;;  %s2902_s7 = smov (!%p218_p2), 16  }
   0xb   : > { %445 = vst [vmem:[#allocation2 + $0x18] sm:$0x1] (!%p218_p2), %v444_v4  ;;  %v490_v10 = vld [vmem:[#allocation2 + $0x14] sm:$0x1] (!%p218_p2)  ;;  %442 = vst [vmem:[#allocation2 + $0xc] sm:$0x1] (!%p218_p2), %v441_v8 }
   0xc   : > { %448 = vst [vmem:[#allocation2 + $0x24] sm:$0x1] (!%p218_p2), %v447_v9  ;;  %v493_v12 = vld [vmem:[#allocation2 + $0x20] sm:$0x1] (!%p218_p2)  ;;  %v496_v13 = vld [vmem:[#allocation2 + $0x2c] sm:$0x1] (!%p218_p2)  ;;  %vm3038_vm10 = vmand (!%p218_p2), %vm428_vm0, %vm488_vm4 }
   0xd   : > { %s3984_s22 = smov (!%p253_p3, %s2595_s22), 1  ;;  %vm1254_vm7 = vsmask.f32 7424  ;;  %vm618_vm8 = vsmask.f32 4368  ;;  %v491_v17 = vsel %vm2993_vm6, 0, %v490_v10 }
   0xe   : > { %s2715_s25 = sshll.u32 %s3984_s22, 8  ;;  %v494_v18 = vsel %vm2993_vm6, 0, %v493_v12  ;;  %v497_v19 = vsel %vm2993_vm6, 0, %v496_v13  ;;  %v1055_v20 = vld [vmem:[#allocation2 + $0x4] sm:$0xf]  ;;  %vm3030_vm9 = vmor %vm438_vm2, %vm618_vm8  ;;  %s2903_s8 = smov 8  }
   0xf   : > { %s2989_s30 = scalar_lea.vmem %s3970_s2, %s2715_s25  ;;  %v1108_v21 = vld [vmem:[#allocation2] sm:$0xe]  ;;  %492 = vst [vmem:[#allocation2 + $0x14] sm:$0x1] %v491_v17  ;;  %495 = vst [vmem:[#allocation2 + $0x20] sm:$0x1] %v494_v18 }
  0x10   : > { %v272_v14 = vld [vmem:[%s2989_s30 + $0x10] sm:$0xff]  ;;  %v273_v15 = vld [vmem:[%s2989_s30 + $0x18] sm:$0xff]  ;;  %v270_v16 = vld [vmem:[%s2989_s30] sm:$0xff]  ;;  %498 = vst [vmem:[#allocation2 + $0x2c] sm:$0x1] %v497_v19  ;;  %v2670_v26 = vcombine.low %v1108_v21, %v1055_v20  ;;  %s2904_s9 = smov 24  }
  0x11   : > { %v311_v22 = vmul.f32 %v2964_v2, %v272_v14  ;;  %v312_v23 = vmul.f32 %v2964_v2, %v273_v15  ;;  %v309_v24 = vmul.f32 %v2964_v2, %v270_v16  ;;  %v2841_v25 = vld [vmem:[#allocation2 + $0x8] ss:$0 sps:$4 sm:$0x11]   ;;  %v1054_v27 = vld [vmem:[#allocation2] sm:$0xf]  ;;  %v276_v43 = vld [vmem:[%s2989_s30 + $0x30] sm:$0xff] }
  0x12   : > { %v271_v28 = vld [vmem:[%s2989_s30 + $0x8] sm:$0xff]  ;;  %v3010_v29 = vcombine.low %v1054_v27, %v1055_v20  ;;  %v1528_v33 = vrot.slane %v2670_v26, 1  ;;  %v1529_v34 = vrot.slane %v2841_v25, 1  ;;  %v1263_v35 = vshll.u32 %v2841_v25, 16  ;;  %v274_v37 = vld [vmem:[%s2989_s30 + $0x20] sm:$0xff]  ;;  %v277_v25 = vld [vmem:[%s2989_s30 + $0x38] sm:$0xff] }
  0x13   : > { %v350_v30 = vadd.f32 %v2978_v7, %v311_v22  ;;  %v351_v31 = vadd.f32 %v2978_v7, %v312_v23  ;;  %v310_v32 = vmul.f32 %v2964_v2, %v271_v28  ;;  %v348_v36 = vadd.f32 %v2978_v7, %v309_v24  ;;  %v275_v42 = vld [vmem:[%s2989_s30 + $0x28] sm:$0xff]  ;;  %v949_v9 = vld [vmem:[#allocation2 + $0x18] sm:$0xf]  ;;  %s2905_s12 = smov 48   ;;  %s2906_s15 = smov 40  }
  0x14   : > { %v1256_v38 = vshrl.u32 %v3010_v29, 16  ;;  %v1258_v39 = vshll.u32 %v3010_v29, 16  ;;  %v1530_v44 = vsel %vm1527_vm5, %v1528_v33, %v1529_v34  ;;  %v1265_v45 = vrot.slane %v1263_v35, 1  ;;  %v942_v18 = vld [vmem:[#allocation2 + $0xc] sm:$0xf]  ;;  %s2907_s18 = smov 64  }
  0x15   : > { %v382_v40 = vmax.f32 %v350_v30, 0.0  ;;  %v383_v41 = vmax.f32 %v351_v31, 0.0  ;;  %v349_v46 = vadd.f32 %v2978_v7, %v310_v32  ;;  %v380_v47 = vmax.f32 %v348_v36, 0.0  ;;  %1576 = vrot.lane.b32.xlu1 %v1530_v44, %s2902_s7  ;;  %v449_v36 = vld [vmem:[#allocation2 + $0x30] sm:$0x1]  ;;  %s2908_s23 = smov 32  }
  0x16   : > { %v1260_v48 = vrot.slane %v1258_v39, 1  ;;  %v313_v51 = vmul.f32 %v2964_v2, %v274_v37  ;;  %v314_v54 = vmul.f32 %v2964_v2, %v275_v42  ;;  %v315_v55 = vmul.f32 %v2964_v2, %v276_v43  ;;  %v953_v24 = vld [vmem:[#allocation2 + $0x20] sm:$0x1]  ;;  %v946_v30 = vld [vmem:[#allocation2 + $0x14] sm:$0x1]  ;;  %s2909_s24 = smov 56  }
  0x17   : > { %v2719_v49 = vpack.c.bf16 %v382_v40, %v382_v40  ;;  %v2720_v50 = vpack.c.bf16 %v383_v41, %v383_v41  ;;  %v381_v52 = vmax.f32 %v349_v46, 0.0  ;;  %v2717_v53 = vpack.c.bf16 %v380_v47, %v380_v47  ;;  %v499_v37 = vld [vmem:[#allocation2 + $0x38] sm:$0x1]  ;;  %v956_v46 = vld [vmem:[#allocation2 + $0x24] sm:$0xf] }
  0x18   : > { %v1261_v56 = vor.u32 %v1260_v48, %v1256_v38  ;;  %v352_v6 = vadd.f32 %v2978_v7, %v313_v51  ;;  %v353_v14 = vadd.f32 %v2978_v7, %v314_v54  ;;  %v278_v38 = vld [vmem:[%s2989_s30 + $0x40] sm:$0xff]  ;;  %v316_v42 = vmul.f32 %v2964_v2, %v277_v25  ;;  %v279_v48 = vld [vmem:[%s2989_s30 + $0x48] sm:$0xff] }
  0x19   : > { %v638_v57 = vshrl.u32 %v2719_v49, 16  ;;  %v641_v58 = vshll.u32 %v2719_v49, 16  ;;  %v646_v59 = vshrl.u32 %v2720_v50, 16  ;;  %v649_v60 = vshll.u32 %v2720_v50, 16  ;;  %v960_v54 = vld [vmem:[#allocation2 + $0x2c] sm:$0x1] }
  0x1a   : > { %v2718_v61 = vpack.c.bf16 %v381_v52, %v381_v52  ;;  %v621_v62 = vshrl.u32 %v2717_v53, 16  ;;  %v624_v63 = vshll.u32 %v2717_v53, 16  ;;  %v1266_v0 = vsel %vm1254_vm7, %v1261_v56, %v1265_v45 }
  0x1b   : > { %v640_v4 = vrot.slane %v638_v57, 7  ;;  %v648_v5 = vrot.slane %v646_v59, 7  ;;  %1447 = vrot.lane.b32.xlu0 %v1266_v0, %s2903_s8  ;;  %v384_v19 = vmax.f32 %v352_v6, 0.0  ;;  %v385_v23 = vmax.f32 %v353_v14, 0.0 }
  0x1c   : > { %v623_v10 = vrot.slane %v621_v62, 7  ;;  %v629_v12 = vshrl.u32 %v2718_v61, 16  ;;  %v632_v13 = vshll.u32 %v2718_v61, 16  ;;  %v354_v50 = vadd.f32 %v2978_v7, %v315_v55  ;;  %v280_v55 = vld [vmem:[%s2989_s30 + $0x50] sm:$0xff] }
  0x1d   : > { %v643_v15 = vor.u32 %v641_v58, %v640_v4  ;;  %v644_v16 = vrot.slane %v640_v4, 4  ;;  %v651_v17 = vor.u32 %v649_v60, %v648_v5  ;;  %v2721_v28 = vpack.c.bf16 %v384_v19, %v384_v19  ;;  %v281_v4 = vld [vmem:[%s2989_s30 + $0x58] sm:$0xff] }
  0x1e   : > { %v626_v20 = vor.u32 %v624_v63, %v623_v10  ;;  %v627_v21 = vrot.slane %v623_v10, 4  ;;  %v631_v22 = vrot.slane %v629_v12, 7  ;;  %v653_v31 = vrot.slane %v648_v5, 4 }
  0x1f   : > { %v652_v26 = vsel %vm3030_vm9, %v644_v16, %v651_v17  ;;  %v950_v27 = vsel %vm3038_vm10, %v643_v15, %v949_v9  ;;  %v2722_v34 = vpack.c.bf16 %v385_v23, %v385_v23  ;;  %v655_v39 = vshrl.u32 %v2721_v28, 16 }
  0x20   : > { %951 = vst [vmem:[#allocation2 + $0x18] sm:$0xf] %v950_v27  ;;  %952 = vst.msk [vmem:[#allocation2 + $0x1c] sm:$0xf] %vm428_vm0, %v652_v26  ;;  %v634_v32 = vor.u32 %v632_v13, %v631_v22  ;;  %v943_v33 = vsel %vm3038_vm10, %v626_v20, %v942_v18  ;;  %v636_v35 = vrot.slane %v631_v22, 4  ;;  %v658_v40 = vshll.u32 %v2721_v28, 16 }
  0x21   : > { %944 = vst [vmem:[#allocation2 + $0xc] sm:$0xf] %v943_v33  ;;  %v954_v41 = vsel %vm2968_vm3, %v653_v31, %v953_v24  ;;  %v663_v44 = vshrl.u32 %v2722_v34, 16  ;;  %v666_v45 = vshll.u32 %v2722_v34, 16  ;;  %v657_v49 = vrot.slane %v655_v39, 7  ;;  %v282_v34 = vld [vmem:[%s2989_s30 + $0x60] sm:$0xff] }
  0x22   : > { %v635_v43 = vsel %vm3030_vm9, %v627_v21, %v634_v32  ;;  %v947_v47 = vsel %vm2968_vm3, %v636_v35, %v946_v30  ;;  %955 = vst [vmem:[#allocation2 + $0x20] sm:$0x1] %v954_v41  ;;  %v355_v51 = vadd.f32 %v2978_v7, %v316_v42  ;;  %v450_v52 = vsel %vm2968_vm3, 0, %v449_v36  ;;  %v283_v39 = vld [vmem:[%s2989_s30 + $0x68] sm:$0xff] }
  0x23   : > { %945 = vst.msk [vmem:[#allocation2 + $0x10] sm:$0xf] %vm428_vm0, %v635_v43  ;;  %948 = vst [vmem:[#allocation2 + $0x14] sm:$0x1] %v947_v47  ;;  %v665_v53 = vrot.slane %v663_v44, 7  ;;  %v500_v56 = vsel %vm2993_vm6, 0, %v499_v37  ;;  %v317_v57 = vmul.f32 %v2964_v2, %v278_v38  ;;  %v660_v58 = vor.u32 %v658_v40, %v657_v49 }
  0x24   : > { %451 = vst [vmem:[#allocation2 + $0x30] sm:$0x1] %v450_v52  ;;  %v661_v59 = vrot.slane %v657_v49, 4  ;;  %v386_v60 = vmax.f32 %v354_v50, 0.0  ;;  %v387_v61 = vmax.f32 %v355_v51, 0.0  ;;  %v318_v0 = vmul.f32 %v2964_v2, %v279_v48 }
  0x25   : > { %501 = vst [vmem:[#allocation2 + $0x38] sm:$0x1] %v500_v56  ;;  %v668_v62 = vor.u32 %v666_v45, %v665_v53  ;;  %v670_v63 = vrot.slane %v665_v53, 4  ;;  %v957_v9 = vsel %vm3038_vm10, %v660_v58, %v956_v46  ;;  %v3083_v22 = vadd.f32 %v2978_v7, %v317_v57  ;;  %v2865_v56 = vld [vmem:[%s3971_s3] sm:$0xff]  }
  0x26   : > { %v2723_v12 = vpack.c.bf16 %v386_v60, %v386_v60  ;;  %958 = vst [vmem:[#allocation2 + $0x24] sm:$0xf] %v957_v9  ;;  %v3080_v20 = vpack.c.bf16 %v387_v61, %v387_v61  ;;  %v3088_v25 = vadd.f32 %v2978_v7, %v318_v0  ;;  %v319_v26 = vmul.f32 %v2964_v2, %v280_v55  ;;  %v452_v55 = vld [vmem:[#allocation2 + $0x3c] sm:$0x1] }
  0x27   : > { %v1058_v5 = vld [vmem:[#allocation2 + $0x18] sm:$0xf]  ;;  %v1059_v6 = vld [vmem:[#allocation2 + $0x1c] sm:$0xf]  ;;  %v669_v15 = vsel %vm3030_vm9, %v661_v59, %v668_v62  ;;  %v961_v18 = vsel %vm2968_vm3, %v670_v63, %v960_v54  ;;  %v320_v27 = vmul.f32 %v2964_v2, %v281_v4  ;;  %v321_v48 = vmul.f32 %v2964_v2, %v282_v34  ;;  %2770 = vmatprep.subr.bf16.mxu0 %v2865_v56 }
  0x28   : > { %v1110_v10 = vld [vmem:[#allocation2 + $0x18] sm:$0xe]  ;;  %v3073_v13 = vcombine.low %v1058_v5, %v1059_v6  ;;  %v1056_v14 = vld [vmem:[#allocation2 + $0xc] sm:$0xf]  ;;  %959 = vst.msk [vmem:[#allocation2 + $0x28] sm:$0xf] %vm428_vm0, %v669_v15  ;;  %v3105_v47 = vadd.f32 %v2978_v7, %v319_v26  ;;  %v3113_v54 = vmul.f32 %v2964_v2, %v283_v39  ;;  %2771 = vmatpush3.bf16.msra.mxu0 %v2865_v56 }
  0x29   : > { %v1109_v16 = vld [vmem:[#allocation2 + $0xc] sm:$0xe]  ;;  %v2672_v17 = vcombine.low %v1110_v10, %v1059_v6  ;;  %v2848_v19 = vld [vmem:[#allocation2 + $0x20] ss:$0 sps:$4 sm:$0x11]   ;;  %v672_v21 = vshrl.u32 %v2723_v12, 16  ;;  %2812 = vmatprep.subr.bf16.mxu1 %v2865_v56 }
  0x2a   : > { %962 = vst [vmem:[#allocation2 + $0x2c] sm:$0x1] %v961_v18  ;;  %1615 = vrot.lane.b32.xlu1 %v3073_v13, %s2904_s9  ;;  %v1057_v23 = vld [vmem:[#allocation2 + $0x10] sm:$0xf]  ;;  %v1535_v32 = vrot.slane %v2848_v19, 1  ;;  %v1282_v33 = vshll.u32 %v3073_v13, 16  ;;  %v3138_v18 = vadd.f32 %v2978_v7, %v321_v48  ;;  %2817 = vmatpush3.bf16.msra.mxu1 %v2865_v56  ;;  %v361_v56 = vadd.f32 %v2978_v7, %v3113_v54 }
  0x2b   : > { %v1534_v24 = vrot.slane %v2672_v17, 1  ;;  %v3092_v28 = vcombine.low %v1056_v14, %v1057_v23  ;;  %v2847_v30 = vld [vmem:[#allocation2 + $0x14] ss:$0 sps:$4 sm:$0x11]   ;;  %v2671_v31 = vcombine.low %v1109_v16, %v1057_v23  ;;  %v1280_v35 = vshrl.u32 %v3073_v13, 16 }
  0x2c   : > { %v1287_v36 = vshll.u32 %v2848_v19, 16  ;;  %v3097_v37 = vrot.slane %v672_v21, 7  ;;  %v675_v38 = vshll.u32 %v2723_v12, 16  ;;  %v1532_v41 = vrot.slane %v2847_v30, 1  ;;  %v963_v46 = vld [vmem:[#allocation2 + $0x30] sm:$0xf] }
  0x2d   : > { %1613 = vrot.lane.b32.xlu0 %v3092_v28, %s2904_s9  ;;  %v1531_v40 = vrot.slane %v2671_v31, 1  ;;  %v1284_v42 = vrot.slane %v1282_v33, 1  ;;  %v680_v43 = vshrl.u32 %v3080_v20, 16  ;;  %v1270_v44 = vshll.u32 %v3092_v28, 16  ;;  %v1060_v49 = vld [vmem:[#allocation2 + $0x24] sm:$0xf] }
  0x2e   : > { %v1275_v45 = vshll.u32 %v2847_v30, 16  ;;  %v3109_v50 = vsel %vm1527_vm5, %v1534_v24, %v1535_v32  ;;  %v1111_v51 = vld [vmem:[#allocation2 + $0x24] sm:$0xe]  ;;  %v1289_v52 = vrot.slane %v1287_v36, 1  ;;  %v677_v53 = vor.u32 %v675_v38, %v3097_v37  ;;  %v967_v16 = vld [vmem:[#allocation2 + $0x38] sm:$0x1] }
  0x2f   : > { %v1061_v57 = vld [vmem:[#allocation2 + $0x28] sm:$0xf]  ;;  %v1533_v58 = vsel %vm1527_vm5, %v1531_v40, %v1532_v41  ;;  %v1285_v59 = vor.u32 %v1284_v42, %v1280_v35  ;;  %v1268_v60 = vshrl.u32 %v3092_v28, 16  ;;  %v1272_v61 = vrot.slane %v1270_v44, 1  ;;  %v502_v24 = vld [vmem:[#allocation2 + $0x44] sm:$0x1] }
  0x30   : > { %v3120_v62 = vcombine.low %v1060_v49, %v1061_v57  ;;  %v2673_v0 = vcombine.low %v1111_v51, %v1061_v57  ;;  %v678_v4 = vrot.slane %v3097_v37, 4  ;;  %v682_v5 = vrot.slane %v680_v43, 7  ;;  %v2867_v19 = vld [vmem:[%s3971_s3 + $0x8] sm:$0xff]   ;;  %v505_v40 = vld [vmem:[#allocation2 + $0x50] sm:$0x1] }
  0x31   : > { %1735 = vrot.lane.b32.xlu0 %v3073_v13, %s2905_s12  ;;  %v3124_v63 = vld [vmem:[#allocation2 + $0x2c] ss:$0 sps:$4 sm:$0x11]   ;;  %v3127_v6 = vrot.slane %v1275_v45, 1  ;;  %v683_v9 = vshll.u32 %v3080_v20, 16  ;;  %v964_v10 = vsel %vm3038_vm10, %v677_v53, %v963_v46  ;;  %v388_v12 = vmax.f32 %v3083_v22, 0.0  ;;  %2772 = vmatprep.subr.bf16.mxu0 %v2867_v19 }
  0x32   : > { %1737 = vrot.lane.b32.xlu1 %v3120_v62, %s2905_s12  ;;  %v1537_v14 = vrot.slane %v2673_v0, 1  ;;  %v1538_v15 = vrot.slane %v3124_v63, 1  ;;  %965 = vst [vmem:[#allocation2 + $0x30] sm:$0xf] %v964_v10  ;;  %v359_v17 = vadd.f32 %v2978_v7, %v320_v27  ;;  %v3144_v20 = vsel %vm1254_vm7, %v1285_v59, %v1289_v52  ;;  %v455_v32 = vld [vmem:[#allocation2 + $0x48] sm:$0x1]  ;;  %2773 = vmatpush3.bf16.msra.mxu0 %v2867_v19 }
  0x33   : > { %v3146_v21 = vor.u32 %v1272_v61, %v1268_v60  ;;  %v685_v22 = vor.u32 %v683_v9, %v682_v5  ;;  %v687_v23 = vrot.slane %v682_v5, 4  ;;  %v1292_v26 = vshrl.u32 %v3120_v62, 16  ;;  %2813 = vmatprep.subr.bf16.mxu1 %v2867_v19  ;;  %v2869_v41 = vld [vmem:[%s3971_s3 + $0x10] sm:$0xff]  }
  0x34   : > { %v1294_v27 = vshll.u32 %v3120_v62, 16  ;;  %v389_v30 = vmax.f32 %v3088_v25, 0.0  ;;  %v453_v31 = vsel %vm2968_vm3, 0, %v452_v55  ;;  %v1299_v33 = vshll.u32 %v3124_v63, 16  ;;  %2818 = vmatpush3.bf16.msra.mxu1 %v2867_v19  ;;  %2774 = vmatprep.subr.bf16.mxu0 %v2869_v41  ;;  %v458_v57 = vld [vmem:[#allocation2 + $0x54] sm:$0x1] }
  0x35   : > { %1698 = vrot.lane.b32.xlu0 %v1533_v58, %s2906_s15  ;;  %v686_v34 = vsel %vm3030_vm9, %v678_v4, %v685_v22  ;;  %v968_v35 = vsel %vm2968_vm3, %v687_v23, %v967_v16  ;;  %454 = vst [vmem:[#allocation2 + $0x3c] sm:$0x1] %v453_v31  ;;  %v2725_v36 = vpack.c.bf16 %v388_v12, %v388_v12  ;;  %v503_v38 = vsel %vm2993_vm6, 0, %v502_v24  ;;  %v2871_v55 = vld [vmem:[%s3971_s3 + $0x18] sm:$0xff]   ;;  %v284_v19 = vld [vmem:[%s2989_s30 + $0x70] sm:$0xff] }
  0x36   : > { %1578 = vrot.lane.b32.xlu1 %v1533_v58, %s2902_s7  ;;  %v3161_v25 = vsel %vm1527_vm5, %v1537_v14, %v1538_v15  ;;  %966 = vst.msk [vmem:[#allocation2 + $0x34] sm:$0xf] %vm428_vm0, %v686_v34  ;;  %969 = vst [vmem:[#allocation2 + $0x38] sm:$0x1] %v968_v35  ;;  %v2726_v37 = vpack.c.bf16 %v389_v30, %v389_v30  ;;  %v390_v39 = vmax.f32 %v3105_v47, 0.0  ;;  %v391_v44 = vmax.f32 %v359_v17, 0.0 }
  0x37   : > { %v689_v42 = vshrl.u32 %v2725_v36, 16  ;;  %v692_v43 = vshll.u32 %v2725_v36, 16  ;;  %504 = vst [vmem:[#allocation2 + $0x44] sm:$0x1] %v503_v38  ;;  %v456_v45 = vsel %vm2968_vm3, 0, %v455_v32  ;;  %v1296_v46 = vrot.slane %v1294_v27, 1  ;;  %2775 = vmatpush3.bf16.msra.mxu0 %v2869_v41  ;;  %2814 = vmatprep.subr.bf16.mxu1 %v2869_v41 }
  0x38   : > { %v697_v48 = vshrl.u32 %v2726_v37, 16  ;;  %v700_v47 = vshll.u32 %v2726_v37, 16  ;;  %457 = vst [vmem:[#allocation2 + $0x48] sm:$0x1] %v456_v45  ;;  %v2727_v49 = vpack.c.bf16 %v390_v39, %v390_v39  ;;  %v2728_v52 = vpack.c.bf16 %v391_v44, %v391_v44  ;;  %2819 = vmatpush3.bf16.msra.mxu1 %v2869_v41  ;;  %2776 = vmatprep.subr.bf16.mxu0 %v2871_v55  ;;  %v461_v45 = vld [vmem:[#allocation2 + $0x60] sm:$0x1] }
  0x39   : > { %1820 = vrot.lane.b32.xlu0 %v3109_v50, %s2907_s18  ;;  %v691_v51 = vrot.slane %v689_v42, 7  ;;  %v506_v53 = vsel %vm2993_vm6, 0, %v505_v40  ;;  %v392_v61 = vmax.f32 %v3138_v18, 0.0  ;;  %v1301_v5 = vrot.slane %v1299_v33, 1  ;;  %2815 = vmatprep.subr.bf16.mxu1 %v2871_v55 }
  0x3a   : > { %1700 = vrot.lane.b32.xlu1 %v3109_v50, %s2906_s15  ;;  %v699_v58 = vrot.slane %v697_v48, 7  ;;  %v706_v59 = vshrl.u32 %v2727_v49, 16  ;;  %v709_v60 = vshll.u32 %v2727_v49, 16  ;;  %507 = vst [vmem:[#allocation2 + $0x50] sm:$0x1] %v506_v53  ;;  %v714_v0 = vshrl.u32 %v2728_v52, 16 }
  0x3b   : > { %v694_v63 = vor.u32 %v692_v43, %v691_v51  ;;  %v695_v54 = vrot.slane %v691_v51, 4  ;;  %v717_v4 = vshll.u32 %v2728_v52, 16  ;;  %v393_v17 = vmax.f32 %v361_v56, 0.0  ;;  %2777 = vmatpush3.bf16.msra.mxu0 %v2871_v55  ;;  %v508_v43 = vld [vmem:[#allocation2 + $0x5c] sm:$0x1] }
  0x3c   : > { %v702_v9 = vor.u32 %v700_v47, %v699_v58  ;;  %v970_v10 = vld [vmem:[#allocation2 + $0x3c] sm:$0xf]  ;;  %v704_v12 = vrot.slane %v699_v58, 4  ;;  %v708_v14 = vrot.slane %v706_v59, 7  ;;  %v716_v16 = vrot.slane %v714_v0, 7  ;;  %2820 = vmatpush3.bf16.msra.mxu1 %v2871_v55 }
  0x3d   : > { %1822 = vrot.lane.b32.xlu0 %v3161_v25, %s2907_s18  ;;  %v971_v15 = vsel %vm3038_vm10, %v694_v63, %v970_v10  ;;  %v459_v18 = vsel %vm2968_vm3, 0, %v458_v57  ;;  %v1297_v22 = vor.u32 %v1296_v46, %v1292_v26  ;;  %v2729_v30 = vpack.c.bf16 %v392_v61, %v392_v61  ;;  %v1062_v26 = vld [vmem:[#allocation2 + $0x30] sm:$0xf]  ;;  %v3202_v36 = vld [vmem:[#allocation2 + $0x34] sm:$0xf] }
  0x3e   : > { %1582 = vrot.lane.b32.xlu1 %v3161_v25, %s2902_s7  ;;  %v703_v23 = vsel %vm3030_vm9, %v695_v54, %v702_v9  ;;  %972 = vst [vmem:[#allocation2 + $0x3c] sm:$0xf] %v971_v15  ;;  %v974_v24 = vld [vmem:[#allocation2 + $0x44] sm:$0x1]  ;;  %v711_v27 = vor.u32 %v709_v60, %v708_v14  ;;  %460 = vst [vmem:[#allocation2 + $0x54] sm:$0x1] %v459_v18  ;;  %v719_v33 = vor.u32 %v717_v4, %v716_v16 }
  0x3f   : > { %973 = vst.msk [vmem:[#allocation2 + $0x40] sm:$0xf] %vm428_vm0, %v703_v23  ;;  %v975_v31 = vsel %vm2968_vm3, %v704_v12, %v974_v24  ;;  %v712_v32 = vrot.slane %v708_v14, 4  ;;  %v977_v34 = vld [vmem:[#allocation2 + $0x48] sm:$0xf]  ;;  %v721_v35 = vrot.slane %v716_v16, 4  ;;  %v323_v37 = vmul.f32 %v2964_v2, %v284_v19 }
  0x40   : > { %976 = vst [vmem:[#allocation2 + $0x44] sm:$0x1] %v975_v31  ;;  %v1278_v38 = vsel %vm1254_vm7, %v3146_v21, %v3127_v6  ;;  %v978_v40 = vsel %vm3038_vm10, %v711_v27, %v977_v34  ;;  %v2730_v42 = vpack.c.bf16 %v393_v17, %v393_v17  ;;  %v3216_v44 = vsel %vm1254_vm7, %v1297_v22, %v1301_v5  ;;  %v511_v59 = vld [vmem:[#allocation2 + $0x68] sm:$0x1]  ;;  %v286_v16 = vld [vmem:[%s2989_s30 + $0x80] sm:$0xff] }
  0x41   : > { %1580 = vrot.lane.b32.xlu0 %v3109_v50, %s2902_s7  ;;  %v720_v39 = vsel %vm3030_vm9, %v712_v32, %v719_v33  ;;  %v981_v41 = vld [vmem:[#allocation2 + $0x50] sm:$0x1]  ;;  %v285_v50 = vld [vmem:[%s2989_s30 + $0x78] sm:$0xff]  ;;  %979 = vst [vmem:[#allocation2 + $0x48] sm:$0xf] %v978_v40  ;;  %v723_v21 = vshrl.u32 %v2729_v30, 16  ;;  %v3222_v46 = vcombine.low %v1062_v26, %v3202_v36  ;;  %v362_v57 = vadd.f32 %v2978_v7, %v323_v37 }
  0x42   : > { %1662 = vrot.lane.b32.xlu1 %v3144_v20, %s2908_s23  ;;  %980 = vst.msk [vmem:[#allocation2 + $0x4c] sm:$0xf] %vm428_vm0, %v720_v39  ;;  %v982_v6 = vsel %vm2968_vm3, %v721_v35, %v981_v41  ;;  %v726_v48 = vshll.u32 %v2729_v30, 16  ;;  %v731_v47 = vshrl.u32 %v2730_v42, 16  ;;  %v734_v49 = vshll.u32 %v2730_v42, 16  ;;  %v287_v22 = vld [vmem:[%s2989_s30 + $0x88] sm:$0xff] }
  0x43   : > { %983 = vst [vmem:[#allocation2 + $0x50] sm:$0x1] %v982_v6  ;;  %v725_v51 = vrot.slane %v723_v21, 7  ;;  %v509_v52 = vsel %vm2993_vm6, 0, %v508_v43  ;;  %v324_v53 = vmul.f32 %v2964_v2, %v285_v50  ;;  %v462_v58 = vsel %vm2968_vm3, 0, %v461_v45 }
  0x44   : > { %v733_v56 = vrot.slane %v731_v47, 7  ;;  %510 = vst [vmem:[#allocation2 + $0x5c] sm:$0x1] %v509_v52  ;;  %463 = vst [vmem:[#allocation2 + $0x60] sm:$0x1] %v462_v58  ;;  %v1306_v0 = vshll.u32 %v3222_v46, 16  ;;  %v325_v26 = vmul.f32 %v2964_v2, %v286_v16  ;;  %v326_v37 = vmul.f32 %v2964_v2, %v287_v22 }
  0x45   : > { %1449 = vrot.lane.b32.xlu0 %v1278_v38, %s2903_s8  ;;  %v728_v60 = vor.u32 %v726_v48, %v725_v51  ;;  %v729_v61 = vrot.slane %v725_v51, 4  ;;  %v984_v55 = vld [vmem:[#allocation2 + $0x54] sm:$0xf]  ;;  %v363_v63 = vadd.f32 %v2978_v7, %v324_v53  ;;  %v3234_v54 = vld [vmem:[#allocation2 + $0x38] ss:$0 sps:$4 sm:$0x11]  }
  0x46   : > { %1784 = vrot.lane.b32.xlu1 %v3216_v44, %s2909_s24  ;;  %v736_v4 = vor.u32 %v734_v49, %v733_v56  ;;  %v394_v9 = vmax.f32 %v362_v57, 0.0  ;;  %v512_v12 = vsel %vm2993_vm6, 0, %v511_v59  ;;  %v1064_v14 = vld [vmem:[#allocation2 + $0x3c] sm:$0xf]  ;;  %v3242_v15 = vld [vmem:[#allocation2 + $0x40] sm:$0xf]  ;;  %v364_v45 = vadd.f32 %v2978_v7, %v325_v26 }
  0x47   : > { %v985_v5 = vsel %vm3038_vm10, %v728_v60, %v984_v55  ;;  %v395_v10 = vmax.f32 %v363_v63, 0.0  ;;  %513 = vst [vmem:[#allocation2 + $0x68] sm:$0x1] %v512_v12  ;;  %v738_v18 = vrot.slane %v733_v56, 4  ;;  %v1304_v23 = vshrl.u32 %v3222_v46, 16  ;;  %v288_v55 = vld [vmem:[%s2989_s30 + $0x90] sm:$0xff] }
  0x48   : > { %986 = vst [vmem:[#allocation2 + $0x54] sm:$0xf] %v985_v5  ;;  %v737_v17 = vsel %vm3030_vm9, %v729_v61, %v736_v4  ;;  %v2731_v19 = vpack.c.bf16 %v394_v9, %v394_v9  ;;  %v1308_v24 = vrot.slane %v1306_v0, 1  ;;  %v1311_v27 = vshll.u32 %v3234_v54, 16  ;;  %v1112_v31 = vld [vmem:[#allocation2 + $0x30] sm:$0xe] }
  0x49   : > { %1660 = vrot.lane.b32.xlu0 %v1278_v38, %s2908_s23  ;;  %987 = vst.msk [vmem:[#allocation2 + $0x58] sm:$0xf] %vm428_vm0, %v737_v17  ;;  %v2732_v30 = vpack.c.bf16 %v395_v10, %v395_v10  ;;  %v3256_v32 = vcombine.low %v1064_v14, %v3242_v15  ;;  %v2674_v41 = vcombine.low %v1112_v31, %v3202_v36  ;;  %v464_v50 = vld [vmem:[#allocation2 + $0x6c] sm:$0x1]  ;;  %v396_v53 = vmax.f32 %v364_v45, 0.0  ;;  %v289_v17 = vld [vmem:[%s2989_s30 + $0x98] sm:$0xff] }
  0x4a   : > { %1451 = vrot.lane.b32.xlu1 %v3144_v20, %s2903_s8  ;;  %v740_v34 = vshrl.u32 %v2731_v19, 16  ;;  %v743_v35 = vshll.u32 %v2731_v19, 16  ;;  %v1309_v40 = vor.u32 %v1308_v24, %v1304_v23  ;;  %v3269_v48 = vld [vmem:[#allocation2 + $0x44] ss:$0 sps:$4 sm:$0x11]   ;;  %v365_v36 = vadd.f32 %v2978_v7, %v326_v37 }
  0x4b   : > { %v988_v33 = vld [vmem:[#allocation2 + $0x5c] sm:$0x1]  ;;  %v748_v42 = vshrl.u32 %v2732_v30, 16  ;;  %v991_v43 = vld [vmem:[#allocation2 + $0x60] sm:$0xf]  ;;  %v1318_v6 = vshll.u32 %v3256_v32, 16  ;;  %v2733_v4 = vpack.c.bf16 %v396_v53, %v396_v53 }
  0x4c   : > { %v989_v38 = vsel %vm2968_vm3, %v738_v18, %v988_v33  ;;  %v742_v39 = vrot.slane %v740_v34, 7  ;;  %v751_v51 = vshll.u32 %v2732_v30, 16  ;;  %v465_v56 = vsel %vm2968_vm3, 0, %v464_v50  ;;  %v514_v5 = vld [vmem:[#allocation2 + $0x74] sm:$0x1] }
  0x4d   : > { %1782 = vrot.lane.b32.xlu0 %v3144_v20, %s2909_s24  ;;  %v1313_v20 = vrot.slane %v1311_v27, 1  ;;  %990 = vst [vmem:[#allocation2 + $0x5c] sm:$0x1] %v989_v38  ;;  %v750_v49 = vrot.slane %v748_v42, 7  ;;  %v1540_v58 = vrot.slane %v2674_v41, 1  ;;  %v1541_v59 = vrot.slane %v3234_v54, 1 }
  0x4e   : > { %1453 = vrot.lane.b32.xlu1 %v3216_v44, %s2903_s8  ;;  %v745_v21 = vor.u32 %v743_v35, %v742_v39  ;;  %v746_v47 = vrot.slane %v742_v39, 4  ;;  %v995_v61 = vld [vmem:[#allocation2 + $0x68] sm:$0x1]  ;;  %466 = vst [vmem:[#allocation2 + $0x6c] sm:$0x1] %v465_v56  ;;  %v397_v0 = vmax.f32 %v365_v36, 0.0  ;;  %v327_v18 = vmul.f32 %v2964_v2, %v288_v55 }
  0x4f   : > { %v3279_v57 = vsel %vm1254_vm7, %v1309_v40, %v1313_v20  ;;  %v753_v60 = vor.u32 %v751_v51, %v750_v49  ;;  %v755_v63 = vrot.slane %v750_v49, 4  ;;  %v1316_v9 = vshrl.u32 %v3256_v32, 16  ;;  %v467_v30 = vld [vmem:[#allocation2 + $0x78] sm:$0x1]  ;;  %v1113_v31 = vld [vmem:[#allocation2 + $0x3c] sm:$0xe] }
  0x50   : > { %v992_v52 = vsel %vm3038_vm10, %v745_v21, %v991_v43  ;;  %v1320_v10 = vrot.slane %v1318_v6, 1  ;;  %v1323_v12 = vshll.u32 %v3269_v48, 16  ;;  %v2734_v14 = vpack.c.bf16 %v397_v0, %v397_v0  ;;  %v517_v26 = vld [vmem:[#allocation2 + $0x80] sm:$0x1]  ;;  %v1066_v55 = vld [vmem:[#allocation2 + $0x48] sm:$0xf] }
  0x51   : > { %1617 = vrot.lane.b32.xlu0 %v3120_v62, %s2904_s9  ;;  %993 = vst [vmem:[#allocation2 + $0x60] sm:$0xf] %v992_v52  ;;  %v754_v54 = vsel %vm3030_vm9, %v746_v47, %v753_v60  ;;  %v757_v16 = vshrl.u32 %v2733_v4, 16  ;;  %v3297_v19 = vsel %vm1527_vm5, %v1540_v58, %v1541_v59  ;;  %v760_v22 = vshll.u32 %v2733_v4, 16  ;;  %v290_v51 = vld [vmem:[%s2989_s30 + $0xa0] sm:$0xff]  ;;  %v291_v59 = vld [vmem:[%s2989_s30 + $0xa8] sm:$0xff] }
  0x52   : > { %1619 = vrot.lane.b32.xlu1 %v3222_v46, %s2904_s9  ;;  %994 = vst.msk [vmem:[#allocation2 + $0x64] sm:$0xf] %vm428_vm0, %v754_v54  ;;  %v515_v23 = vsel %vm2993_vm6, 0, %v514_v5  ;;  %v765_v27 = vshrl.u32 %v2734_v14, 16  ;;  %v768_v33 = vshll.u32 %v2734_v14, 16  ;;  %v328_v34 = vmul.f32 %v2964_v2, %v289_v17 }
  0x53   : > { %v759_v24 = vrot.slane %v757_v16, 7  ;;  %516 = vst [vmem:[#allocation2 + $0x74] sm:$0x1] %v515_v23  ;;  %v366_v35 = vadd.f32 %v2978_v7, %v327_v18  ;;  %v1321_v37 = vor.u32 %v1320_v10, %v1316_v9  ;;  %v1325_v38 = vrot.slane %v1323_v12, 1  ;;  %v470_v54 = vld [vmem:[#allocation2 + $0x84] sm:$0x1] }
  0x54   : > { %v767_v20 = vrot.slane %v765_v27, 7  ;;  %v367_v41 = vadd.f32 %v2978_v7, %v328_v34  ;;  %v468_v43 = vsel %vm2968_vm3, 0, %v467_v30  ;;  %v2675_v50 = vcombine.low %v1113_v31, %v3242_v15  ;;  %v2873_v18 = vld [vmem:[%s3971_s3 + $0x20] ss:$0 sps:$4 sm:$0xff]  }
  0x55   : > { %1664 = vrot.lane.b32.xlu0 %v3216_v44, %s2908_s23  ;;  %v996_v44 = vsel %vm2968_vm3, %v755_v63, %v995_v61  ;;  %v762_v39 = vor.u32 %v760_v22, %v759_v24  ;;  %v763_v40 = vrot.slane %v759_v24, 4  ;;  %v398_v42 = vmax.f32 %v366_v35, 0.0  ;;  %469 = vst [vmem:[#allocation2 + $0x78] sm:$0x1] %v468_v43  ;;  %v3329_v63 = vld [vmem:[#allocation2 + $0x4c] sm:$0xf] }
  0x56   : > { %1666 = vrot.lane.b32.xlu1 %v3279_v57, %s2908_s23  ;;  %997 = vst [vmem:[#allocation2 + $0x68] sm:$0x1] %v996_v44  ;;  %v518_v21 = vsel %vm2993_vm6, 0, %v517_v26  ;;  %v770_v45 = vor.u32 %v768_v33, %v767_v20  ;;  %v772_v7 = vrot.slane %v767_v20, 4  ;;  %v399_v47 = vmax.f32 %v367_v41, 0.0  ;;  %v292_v26 = vld [vmem:[%s2989_s30 + $0xb0] sm:$0xff] }
  0x57   : > { %v2735_v49 = vpack.c.bf16 %v398_v42, %v398_v42  ;;  %519 = vst [vmem:[#allocation2 + $0x80] sm:$0x1] %v518_v21  ;;  %v3321_v15 = vsel %vm1254_vm7, %v1321_v37, %v1325_v38  ;;  %v1543_v60 = vrot.slane %v2675_v50, 1  ;;  %v1544_v61 = vrot.slane %v3269_v48, 1  ;;  %v3340_v48 = vld [vmem:[%s3968_s0] ss:$0 sm:$0xff] }
  0x58   : > { %v771_v36 = vsel %vm3030_vm9, %v763_v40, %v770_v45  ;;  %v2736_v53 = vpack.c.bf16 %v399_v47, %v399_v47  ;;  %v329_v0 = vmul.f32 %v2964_v2, %v290_v51  ;;  %v330_v12 = vmul.f32 %v3340_v48, %v291_v59  ;;  %v3357_v24 = vld [vmem:[%s3969_s1] ss:$0 sm:$0xff]  ;;  %v293_v37 = vld [vmem:[%s2989_s30 + $0xb8] sm:$0xff]  ;;  %v3369_v38 = vld [vmem:[#allocation2 + $0x50] ss:$0 sps:$4 sm:$0x11]  }
  0x59   : > { %1702 = vrot.lane.b32.xlu0 %v3161_v25, %s2906_s15  ;;  %v998_v25 = vld [vmem:[#allocation2 + $0x6c] sm:$0xf]  ;;  %v774_v56 = vshrl.u32 %v2735_v49, 16  ;;  %v777_v58 = vshll.u32 %v2735_v49, 16  ;;  %1001 = vst.msk [vmem:[#allocation2 + $0x70] sm:$0xf] %vm428_vm0, %v771_v36  ;;  %v3344_v2 = vcombine.low %v1066_v55, %v3329_v63  ;;  %v3352_v22 = vsel %vm1527_vm5, %v1543_v60, %v1544_v61 }
  0x5a   : > { %1704 = vrot.lane.b32.xlu1 %v3297_v19, %s2906_s15  ;;  %v999_v6 = vsel %vm3038_vm10, %v762_v39, %v998_v25  ;;  %v1002_v52 = vld [vmem:[#allocation2 + $0x74] sm:$0x1]  ;;  %v782_v9 = vshrl.u32 %v2736_v53, 16  ;;  %v785_v10 = vshll.u32 %v2736_v53, 16  ;;  %v368_v27 = vadd.f32 %v3357_v24, %v329_v0  ;;  %v1114_v25 = vld [vmem:[#allocation2 + $0x48] sm:$0xe] }
  0x5b   : > { %1000 = vst [vmem:[#allocation2 + $0x6c] sm:$0xf] %v999_v6  ;;  %v1003_v4 = vsel %vm2968_vm3, %v772_v7, %v1002_v52  ;;  %v776_v5 = vrot.slane %v774_v56, 7  ;;  %v369_v30 = vadd.f32 %v3357_v24, %v330_v12  ;;  %v471_v35 = vsel %vm2968_vm3, 0, %v470_v54  ;;  %v3378_v43 = vld [vmem:[#allocation2 + $0x58] sm:$0xf] }
  0x5c   : > { %1004 = vst [vmem:[#allocation2 + $0x74] sm:$0x1] %v1003_v4  ;;  %v784_v16 = vrot.slane %v782_v9, 7  ;;  %v1005_v17 = vld [vmem:[#allocation2 + $0x78] sm:$0xf]  ;;  %v400_v39 = vmax.f32 %v368_v27, 0.0  ;;  %v331_v7 = vmul.f32 %v3340_v48, %v292_v26  ;;  %v332_v47 = vmul.f32 %v3340_v48, %v293_v37 }
  0x5d   : > { %1739 = vrot.lane.b32.xlu0 %v3222_v46, %s2905_s12  ;;  %v779_v44 = vor.u32 %v777_v58, %v776_v5  ;;  %v780_v14 = vrot.slane %v776_v5, 4  ;;  %v401_v40 = vmax.f32 %v369_v30, 0.0  ;;  %472 = vst [vmem:[#allocation2 + $0x84] sm:$0x1] %v471_v35  ;;  %vm2185_vm11 = vcmask 1043456   ;;  %v294_v9 = vld [vmem:[%s2989_s30 + $0xc0] sm:$0xff] }
  0x5e   : > { %1741 = vrot.lane.b32.xlu1 %v3256_v32, %s2905_s12  ;;  %v1009_v23 = vld [vmem:[#allocation2 + $0x80] sm:$0x1]  ;;  %v787_v31 = vor.u32 %v785_v10, %v784_v16  ;;  %v789_v34 = vrot.slane %v784_v16, 4  ;;  %v1330_v20 = vshll.u32 %v3344_v2, 16  ;;  %2822 = vmatprep.subr.msk.bf16.mxu0 %vm2185_vm11, %v2873_v18  ;;  %v2737_v50 = vpack.c.bf16 %v400_v39, %v400_v39  ;;  %v520_v45 = vld [vmem:[#allocation2 + $0x8c] sm:$0x1] }
  0x5f   : > { %v1006_v33 = vsel %vm3038_vm10, %v779_v44, %v1005_v17  ;;  %2823 = vmatprep.subr.msk.bf16.mxu1 %vm2185_vm11, %v2873_v18  ;;  %v2738_v6 = vpack.c.bf16 %v401_v40, %v401_v40  ;;  %v2187_v21 = vsel %vm2185_vm11, %v2873_v18, 0  ;;  %v1328_v49 = vshrl.u32 %v3344_v2, 16  ;;  %v473_v5 = vld [vmem:[#allocation2 + $0x90] sm:$0x1]  ;;  %v295_v10 = vld [vmem:[%s2989_s30 + $0xc8] sm:$0xff] }
  0x60   : > { %1007 = vst [vmem:[#allocation2 + $0x78] sm:$0xf] %v1006_v33  ;;  %v788_v41 = vsel %vm3030_vm9, %v780_v14, %v787_v31  ;;  %v1010_v42 = vsel %vm2968_vm3, %v789_v34, %v1009_v23  ;;  %v1335_v51 = vshll.u32 %v3369_v38, 16  ;;  %v2676_v36 = vcombine.low %v1114_v25, %v3329_v63  ;;  %2779 = vmatpush3.bf16.msra.mxu0 %v2187_v21  ;;  %v523_v31 = vld [vmem:[#allocation2 + $0x98] sm:$0x1] }
  0x61   : > { %1786 = vrot.lane.b32.xlu0 %v3279_v57, %s2909_s24  ;;  %1008 = vst.msk [vmem:[#allocation2 + $0x7c] sm:$0xf] %vm428_vm0, %v788_v41  ;;  %1011 = vst [vmem:[#allocation2 + $0x80] sm:$0x1] %v1010_v42  ;;  %v791_v52 = vshrl.u32 %v2737_v50, 16  ;;  %v1332_v53 = vrot.slane %v1330_v20, 1  ;;  %2821 = vmatpush3.bf16.msra.mxu1 %v2187_v21  ;;  %v370_v0 = vadd.f32 %v3357_v24, %v331_v7 }
  0x62   : > { %1788 = vrot.lane.b32.xlu1 %v3321_v15, %s2909_s24  ;;  %v794_v58 = vshll.u32 %v2737_v50, 16  ;;  %v799_v59 = vshrl.u32 %v2738_v6, 16  ;;  %v802_v61 = vshll.u32 %v2738_v6, 16  ;;  %v521_v55 = vsel %vm2993_vm6, 0, %v520_v45  ;;  %v476_v42 = vld [vmem:[#allocation2 + $0x9c] sm:$0x1] }
  0x63   : > { %v793_v60 = vrot.slane %v791_v52, 7  ;;  %522 = vst [vmem:[#allocation2 + $0x8c] sm:$0x1] %v521_v55  ;;  %v371_v4 = vadd.f32 %v3357_v24, %v332_v47  ;;  %v1337_v12 = vrot.slane %v1335_v51, 1  ;;  %v1333_v16 = vor.u32 %v1332_v53, %v1328_v49  ;;  %v526_v7 = vld [vmem:[#allocation2 + $0xa4] sm:$0x1] }
  0x64   : > { %v801_v63 = vrot.slane %v799_v59, 7  ;;  %v1012_v14 = vld [vmem:[#allocation2 + $0x84] sm:$0xf]  ;;  %v1546_v17 = vrot.slane %v2676_v36, 1  ;;  %v333_v33 = vmul.f32 %v3340_v48, %v294_v9  ;;  %v334_v34 = vmul.f32 %v3340_v48, %v295_v10  ;;  %v1115_v49 = vld [vmem:[#allocation2 + $0x54] sm:$0xe] }
  0x65   : > { %1824 = vrot.lane.b32.xlu0 %v3297_v19, %s2907_s18  ;;  %v796_v54 = vor.u32 %v794_v58, %v793_v60  ;;  %v797_v44 = vrot.slane %v793_v60, 4  ;;  %v402_v26 = vmax.f32 %v370_v0, 0.0  ;;  %v403_v37 = vmax.f32 %v371_v4, 0.0  ;;  %v3415_v39 = vld [vmem:[#allocation2 + $0x5c] ss:$0 sps:$4 sm:$0x11]  }
  0x66   : > { %1455 = vrot.lane.b32.xlu1 %v3279_v57, %s2903_s8  ;;  %v1068_v57 = vld [vmem:[#allocation2 + $0x54] sm:$0xf]  ;;  %v804_v23 = vor.u32 %v802_v61, %v801_v63  ;;  %v806_v30 = vrot.slane %v801_v63, 4  ;;  %v3419_v40 = vsel %vm1254_vm7, %v1333_v16, %v1337_v12  ;;  %v524_v41 = vsel %vm2993_vm6, 0, %v523_v31  ;;  %v297_v61 = vld [vmem:[%s2989_s30 + $0xd8] sm:$0xff] }
  0x67   : > { %v3389_v56 = vcombine.low %v1068_v57, %v3378_v43  ;;  %v1013_v27 = vsel %vm3038_vm10, %v796_v54, %v1012_v14  ;;  %v2739_v20 = vpack.c.bf16 %v402_v26, %v402_v26  ;;  %v2740_v25 = vpack.c.bf16 %v403_v37, %v403_v37  ;;  %525 = vst [vmem:[#allocation2 + $0x98] sm:$0x1] %v524_v41  ;;  %v296_v52 = vld [vmem:[%s2989_s30 + $0xd0] sm:$0xff]  ;;  %v1070_v26 = vld [vmem:[#allocation2 + $0x60] sm:$0xf] }
  0x68   : > { %v805_v35 = vsel %vm3030_vm9, %v797_v44, %v804_v23  ;;  %1014 = vst [vmem:[#allocation2 + $0x84] sm:$0xf] %v1013_v27  ;;  %v372_v21 = vadd.f32 %v3357_v24, %v333_v33  ;;  %v373_v45 = vadd.f32 %v3357_v24, %v334_v34  ;;  %v1347_v53 = vshll.u32 %v3415_v39, 16  ;;  %v3462_v41 = vld [vmem:[#allocation2 + $0x64] sm:$0xf] }
  0x69   : > { %1826 = vrot.lane.b32.xlu0 %v3352_v22, %s2907_s18  ;;  %v1342_v18 = vshll.u32 %v3389_v56, 16  ;;  %1015 = vst.msk [vmem:[#allocation2 + $0x88] sm:$0xf] %vm428_vm0, %v805_v35  ;;  %v1340_v50 = vshrl.u32 %v3389_v56, 16  ;;  %v808_v36 = vshrl.u32 %v2739_v20, 16  ;;  %v816_v58 = vshrl.u32 %v2740_v25, 16 }
  0x6a   : > { %1457 = vrot.lane.b32.xlu1 %v3321_v15, %s2903_s8  ;;  %v1016_v6 = vld [vmem:[#allocation2 + $0x8c] sm:$0x1]  ;;  %v819_v59 = vshll.u32 %v2740_v25, 16  ;;  %v404_v60 = vmax.f32 %v372_v21, 0.0  ;;  %v405_v63 = vmax.f32 %v373_v45, 0.0  ;;  %v477_v0 = vsel %vm2968_vm3, 0, %v476_v42 }
  0x6b   : > { %v1344_v47 = vrot.slane %v1342_v18, 1  ;;  %v1017_v51 = vsel %vm2968_vm3, %v806_v30, %v1016_v6  ;;  %v810_v55 = vrot.slane %v808_v36, 7  ;;  %v527_v4 = vsel %vm2993_vm6, 0, %v526_v7  ;;  %478 = vst [vmem:[#allocation2 + $0x9c] sm:$0x1] %v477_v0 }
  0x6c   : > { %1018 = vst [vmem:[#allocation2 + $0x8c] sm:$0x1] %v1017_v51  ;;  %v818_v9 = vrot.slane %v816_v58, 7  ;;  %v2741_v10 = vpack.c.bf16 %v404_v60, %v404_v60  ;;  %528 = vst [vmem:[#allocation2 + $0xa4] sm:$0x1] %v527_v4  ;;  %v335_v12 = vmul.f32 %v3340_v48, %v296_v52  ;;  %v2742_v14 = vpack.c.bf16 %v405_v63, %v405_v63  ;;  %v298_v58 = vld [vmem:[%s2989_s30 + $0xe0] sm:$0xff] }
  0x6d   : > { %1584 = vrot.lane.b32.xlu0 %v3297_v19, %s2902_s7  ;;  %v1547_v19 = vrot.slane %v3369_v38, 1  ;;  %v474_v38 = vsel %vm2968_vm3, 0, %v473_v5  ;;  %v2677_v5 = vcombine.low %v1115_v49, %v3378_v43  ;;  %v814_v54 = vrot.slane %v810_v55, 4  ;;  %v479_v43 = vld [vmem:[#allocation2 + $0xa8] sm:$0x1] }
  0x6e   : > { %1586 = vrot.lane.b32.xlu1 %v3352_v22, %s2902_s7  ;;  %475 = vst [vmem:[#allocation2 + $0x90] sm:$0x1] %v474_v38  ;;  %v336_v16 = vmul.f32 %v3340_v48, %v297_v61  ;;  %v1349_v18 = vrot.slane %v1347_v53, 1  ;;  %v823_v23 = vrot.slane %v818_v9, 4  ;;  %v1023_v30 = vld [vmem:[#allocation2 + $0x98] sm:$0x1]  ;;  %v3475_v61 = vcombine.low %v1070_v26, %v3462_v41 }
  0x6f   : > { %v3426_v57 = vsel %vm1527_vm5, %v1546_v17, %v1547_v19  ;;  %v1345_v17 = vor.u32 %v1344_v47, %v1340_v50  ;;  %v825_v31 = vshrl.u32 %v2741_v10, 16  ;;  %v828_v33 = vshll.u32 %v2741_v10, 16  ;;  %v529_v51 = vld [vmem:[#allocation2 + $0xb0] sm:$0x1]  ;;  %v482_v0 = vld [vmem:[#allocation2 + $0xb4] sm:$0x1] }
  0x70   : > { %v833_v34 = vshrl.u32 %v2742_v14, 16  ;;  %v1024_v37 = vsel %vm2968_vm3, %v823_v23, %v1023_v30  ;;  %v375_v25 = vadd.f32 %v3357_v24, %v336_v16  ;;  %v836_v50 = vshll.u32 %v2742_v14, 16  ;;  %v532_v4 = vld [vmem:[#allocation2 + $0xbc] sm:$0x1]  ;;  %v1074_v3 = vld [vmem:[#allocation2 + $0x78] sm:$0xf] }
  0x71   : > { %1621 = vrot.lane.b32.xlu0 %v3256_v32, %s2904_s9  ;;  %v827_v38 = vrot.slane %v825_v31, 7  ;;  %1025 = vst [vmem:[#allocation2 + $0x98] sm:$0x1] %v1024_v37  ;;  %v480_v6 = vsel %vm2968_vm3, 0, %v479_v43  ;;  %v3467_v21 = vsel %vm1254_vm7, %v1345_v17, %v1349_v18  ;;  %v1549_v45 = vrot.slane %v2677_v5, 1  ;;  %v300_v43 = vld [vmem:[%s2989_s30 + $0xf0] sm:$0xff] }
  0x72   : > { %1623 = vrot.lane.b32.xlu1 %v3344_v2, %s2904_s9  ;;  %v835_v42 = vrot.slane %v833_v34, 7  ;;  %v1026_v49 = vld [vmem:[#allocation2 + $0x9c] sm:$0xf]  ;;  %481 = vst [vmem:[#allocation2 + $0xa8] sm:$0x1] %v480_v6  ;;  %v1550_v60 = vrot.slane %v3415_v39, 1 }
  0x73   : > { %v830_v7 = vor.u32 %v828_v33, %v827_v38  ;;  %v831_v47 = vrot.slane %v827_v38, 4  ;;  %v1030_v52 = vld [vmem:[#allocation2 + $0xa4] sm:$0x1]  ;;  %v407_v63 = vmax.f32 %v375_v25, 0.0  ;;  %v530_v10 = vsel %vm2993_vm6, 0, %v529_v51  ;;  %v301_v33 = vld [vmem:[%s2989_s30 + $0xf8] sm:$0xff] }
  0x74   : > { %v838_v36 = vor.u32 %v836_v50, %v835_v42  ;;  %531 = vst [vmem:[#allocation2 + $0xb0] sm:$0x1] %v530_v10  ;;  %v483_v17 = vsel %vm2968_vm3, 0, %v482_v0  ;;  %v533_v18 = vsel %vm2993_vm6, 0, %v532_v4  ;;  %v1116_v37 = vld [vmem:[#allocation2 + $0x60] sm:$0xe]  ;;  %v340_v6 = vmul.f32 %v3340_v48, %v301_v33 }
  0x75   : > { %1668 = vrot.lane.b32.xlu0 %v3321_v15, %s2908_s23  ;;  %v811_v15 = vshll.u32 %v2739_v20, 16  ;;  %v1019_v44 = vld [vmem:[#allocation2 + $0x90] sm:$0xf]  ;;  %v374_v20 = vadd.f32 %v3357_v24, %v335_v12  ;;  %v3487_v12 = vld [vmem:[#allocation2 + $0x68] ss:$0 sps:$4 sm:$0x11]   ;;  %v2678_v51 = vcombine.low %v1116_v37, %v3462_v41 }
  0x76   : > { %1670 = vrot.lane.b32.xlu1 %v3419_v40, %s2908_s23  ;;  %v839_v5 = vsel %vm3030_vm9, %v831_v47, %v838_v36  ;;  %484 = vst [vmem:[#allocation2 + $0xb4] sm:$0x1] %v483_v17  ;;  %534 = vst [vmem:[#allocation2 + $0xbc] sm:$0x1] %v533_v18  ;;  %v1359_v50 = vshll.u32 %v3487_v12, 16  ;;  %v379_v41 = vadd.f32 %v3357_v24, %v340_v6  ;;  %vm1852_vm12 = vcmask 64512  }
  0x77   : > { %v813_v19 = vor.u32 %v811_v15, %v810_v55  ;;  %v840_v15 = vrot.slane %v835_v42, 4  ;;  %v406_v53 = vmax.f32 %v374_v20, 0.0  ;;  %v1027_v55 = vsel %vm3038_vm10, %v830_v7, %v1026_v49  ;;  %1029 = vst.msk [vmem:[#allocation2 + $0xa0] sm:$0xf] %vm428_vm0, %v839_v5  ;;  %v485_v5 = vld [vmem:[#allocation2 + $0xc0] sm:$0x1] }
  0x78   : > { %1028 = vst [vmem:[#allocation2 + $0x9c] sm:$0xf] %v1027_v55  ;;  %v339_v42 = vmul.f32 %v3340_v48, %v300_v43  ;;  %v1361_v55 = vrot.slane %v1359_v50, 1  ;;  %v3543_v18 = vld [vmem:[#allocation2 + $0x74] ss:$0 sps:$4 sm:$0x11]  }
  0x79   : > { %1706 = vrot.lane.b32.xlu0 %v3352_v22, %s2906_s15  ;;  %v821_v22 = vor.u32 %v819_v59, %v818_v9  ;;  %v1020_v27 = vsel %vm3038_vm10, %v813_v19, %v1019_v44  ;;  %v299_v59 = vld [vmem:[%s2989_s30 + $0xe8] sm:$0xff]  ;;  %v1031_v9 = vsel %vm2968_vm3, %v840_v15, %v1030_v52  ;;  %v2743_v39 = vpack.c.bf16 %v406_v53, %v406_v53  ;;  %v3521_v53 = vld [vmem:[#allocation2 + $0x70] sm:$0xf] }
  0x7a   : > { %1708 = vrot.lane.b32.xlu1 %v3426_v57, %s2906_s15  ;;  %1021 = vst [vmem:[#allocation2 + $0x90] sm:$0xf] %v1020_v27  ;;  %1032 = vst [vmem:[#allocation2 + $0xa4] sm:$0x1] %v1031_v9  ;;  %v2744_v19 = vpack.c.bf16 %v407_v63, %v407_v63  ;;  %v338_v44 = vmul.f32 %v3340_v48, %v299_v59  ;;  %v1354_v27 = vshll.u32 %v3475_v61, 16  ;;  %v1552_v9 = vrot.slane %v2678_v51, 1 }
  0x7b   : > { %v822_v35 = vsel %vm3030_vm9, %v814_v54, %v821_v22  ;;  %v337_v54 = vmul.f32 %v3340_v48, %v298_v58  ;;  %v842_v14 = vshrl.u32 %v2743_v39, 16  ;;  %v845_v16 = vshll.u32 %v2743_v39, 16  ;;  %v1033_v34 = vld [vmem:[#allocation2 + $0xa8] sm:$0xf]  ;;  %v1037_v36 = vld [vmem:[#allocation2 + $0xb0] sm:$0x1] }
  0x7c   : > { %1022 = vst.msk [vmem:[#allocation2 + $0x94] sm:$0xf] %vm428_vm0, %v822_v35  ;;  %v3499_v22 = vsel %vm1527_vm5, %v1549_v45, %v1550_v60  ;;  %v850_v23 = vshrl.u32 %v2744_v19, 16  ;;  %v853_v31 = vshll.u32 %v2744_v19, 16  ;;  %v377_v26 = vadd.f32 %v3357_v24, %v338_v44  ;;  %v1072_v52 = vld [vmem:[#allocation2 + $0x6c] sm:$0xf] }
  0x7d   : > { %1743 = vrot.lane.b32.xlu0 %v3344_v2, %s2905_s12  ;;  %v844_v30 = vrot.slane %v842_v14, 7  ;;  %v376_v35 = vadd.f32 %v3357_v24, %v337_v54  ;;  %v1356_v45 = vrot.slane %v1354_v27, 1  ;;  %v378_v60 = vadd.f32 %v3357_v24, %v339_v42  ;;  %v535_v54 = vld [vmem:[#allocation2 + $0xc8] sm:$0x1] }
  0x7e   : > { %1745 = vrot.lane.b32.xlu1 %v3389_v56, %s2905_s12  ;;  %v852_v25 = vrot.slane %v850_v23, 7  ;;  %v409_v59 = vmax.f32 %v377_v26, 0.0  ;;  %v3533_v0 = vcombine.low %v1072_v52, %v3521_v53  ;;  %v1553_v24 = vrot.slane %v3487_v12, 1  ;;  %v1040_v12 = vld [vmem:[#allocation2 + $0xb4] sm:$0xf] }
  0x7f   : > { %v847_v38 = vor.u32 %v845_v16, %v844_v30  ;;  %v848_v20 = vrot.slane %v844_v30, 4  ;;  %v408_v15 = vmax.f32 %v376_v35, 0.0  ;;  %v410_v19 = vmax.f32 %v378_v60, 0.0 }
  0x80   : > { %v855_v7 = vor.u32 %v853_v31, %v852_v25  ;;  %v857_v49 = vrot.slane %v852_v25, 4  ;;  %v2746_v4 = vpack.c.bf16 %v409_v59, %v409_v59  ;;  %v411_v16 = vmax.f32 %v379_v41, 0.0  ;;  %v1044_v25 = vld [vmem:[#allocation2 + $0xbc] sm:$0x1] }
  0x81   : > { %1790 = vrot.lane.b32.xlu0 %v3419_v40, %s2909_s24  ;;  %v1034_v47 = vsel %vm3038_vm10, %v847_v38, %v1033_v34  ;;  %v2745_v63 = vpack.c.bf16 %v408_v15, %v408_v15  ;;  %v486_v43 = vsel %vm2968_vm3, 0, %v485_v5  ;;  %v2747_v27 = vpack.c.bf16 %v410_v19, %v410_v19 }
  0x82   : > { %1792 = vrot.lane.b32.xlu1 %v3467_v21, %s2909_s24  ;;  %1035 = vst [vmem:[#allocation2 + $0xa8] sm:$0xf] %v1034_v47  ;;  %v856_v48 = vsel %vm3030_vm9, %v848_v20, %v855_v7  ;;  %v1038_v58 = vsel %vm2968_vm3, %v857_v49, %v1037_v36  ;;  %v867_v44 = vshrl.u32 %v2746_v4, 16  ;;  %v870_v14 = vshll.u32 %v2746_v4, 16  ;;  %487 = vst [vmem:[#allocation2 + $0xc0] sm:$0x1] %v486_v43 }
  0x83   : > { %1036 = vst.msk [vmem:[#allocation2 + $0xac] sm:$0xf] %vm428_vm0, %v856_v48  ;;  %1039 = vst [vmem:[#allocation2 + $0xb0] sm:$0x1] %v1038_v58  ;;  %v859_v39 = vshrl.u32 %v2745_v63, 16  ;;  %v862_v10 = vshll.u32 %v2745_v63, 16  ;;  %v2748_v33 = vpack.c.bf16 %v411_v16, %v411_v16  ;;  %v1554_v6 = vsel %vm1527_vm5, %v1552_v9, %v1553_v24 }
  0x84   : > { %v1366_v30 = vshll.u32 %v3533_v0, 16  ;;  %v869_v31 = vrot.slane %v867_v44, 7  ;;  %v536_v34 = vsel %vm2993_vm6, 0, %v535_v54  ;;  %v876_v37 = vshrl.u32 %v2747_v27, 16  ;;  %v1117_v48 = vld [vmem:[#allocation2 + $0x6c] sm:$0xe] }
  0x85   : > { %1828 = vrot.lane.b32.xlu0 %v3426_v57, %s2907_s18  ;;  %v861_v23 = vrot.slane %v859_v39, 7  ;;  %537 = vst [vmem:[#allocation2 + $0xc8] sm:$0x1] %v536_v34  ;;  %v879_v50 = vshll.u32 %v2747_v27, 16  ;;  %v884_v11 = vshrl.u32 %v2748_v33, 16  ;;  %v1371_v7 = vshll.u32 %v3543_v18, 16 }
  0x86   : > { %1459 = vrot.lane.b32.xlu1 %v3419_v40, %s2903_s8  ;;  %v1352_v40 = vshrl.u32 %v3475_v61, 16  ;;  %v872_v38 = vor.u32 %v870_v14, %v869_v31  ;;  %v874_v20 = vrot.slane %v869_v31, 4  ;;  %v2679_v5 = vcombine.low %v1117_v48, %v3521_v53  ;;  %v1075_v53 = vld [vmem:[#allocation2 + $0x7c] sm:$0xf]  ;;  %v1118_v34 = vld [vmem:[#allocation2 + $0x78] sm:$0xe] }
  0x87   : > { %v864_v35 = vor.u32 %v862_v10, %v861_v23  ;;  %v865_v26 = vrot.slane %v861_v23, 4  ;;  %v3561_v47 = vpop.permute.xlu1 %1576  ;;  %v886_v52 = vrot.slane %v884_v11, 7  ;;  %v1373_v41 = vrot.slane %v1371_v7, 1  ;;  %v2868_v43 = vld [vmem:[#allocation2 + $0x80] ss:$0 sps:$4 sm:$0x11]  }
  0x88   : > { %v1045_v36 = vsel %vm2968_vm3, %v874_v20, %v1044_v25  ;;  %v1555_v54 = vrot.slane %v2679_v5, 1  ;;  %v1556_v24 = vrot.slane %v3543_v18, 1  ;;  %v3594_v14 = vcombine.low %v1074_v3, %v1075_v53 }
  0x89   : > { %1830 = vrot.lane.b32.xlu0 %v3499_v22, %s2907_s18  ;;  %v1041_v42 = vsel %vm3038_vm10, %v864_v35, %v1040_v12  ;;  %v873_v51 = vsel %vm3030_vm9, %v865_v26, %v872_v38  ;;  %1046 = vst [vmem:[#allocation2 + $0xbc] sm:$0x1] %v1045_v36  ;;  %v1047_v59 = vld [vmem:[#allocation2 + $0xc0] sm:$0xf]  ;;  %v3611_v26 = vld [vmem:[#allocation2 + $0x88] sm:$0xf]  ;;  %v2680_v38 = vcombine.low %v1118_v34, %v1075_v53 }
  0x8a   : > { %1461 = vrot.lane.b32.xlu1 %v3467_v21, %s2903_s8  ;;  %1042 = vst [vmem:[#allocation2 + $0xb4] sm:$0xf] %v1041_v42  ;;  %1043 = vst.msk [vmem:[#allocation2 + $0xb8] sm:$0xf] %vm428_vm0, %v873_v51  ;;  %v1557_v16 = vsel %vm1527_vm5, %v1555_v54, %v1556_v24  ;;  %v1378_v18 = vshll.u32 %v3594_v14, 16  ;;  %v1376_v31 = vshrl.u32 %v3594_v14, 16 }
  0x8b   : > { %v1558_v11 = vrot.slane %v2680_v38, 1  ;;  %vm1885_vm13 = vcmask 130048   ;;  %vm1918_vm14 = vcmask 195584   ;;  %vm1951_vm15 = vcmask 261120  }
  0x8c   : > { %v1051_v63 = vld [vmem:[#allocation2 + $0xc8] sm:$0x1]  ;;  %v1380_v12 = vrot.slane %v1378_v18, 1  ;;  %vm2017_vm1 = vcmask 392192   ;;  %vm2050_vm2 = vcmask 457728   ;;  %vm2152_vm4 = vcmask 588800  }
  0x8d   : > { %1588 = vrot.lane.b32.xlu0 %v3426_v57, %s2902_s7  ;;  %v1357_v57 = vor.u32 %v1356_v45, %v1352_v40  ;;  %v878_v40 = vrot.slane %v876_v37, 7  ;;  %v1368_v45 = vrot.slane %v1366_v30, 1  ;;  %v3563_v49 = vpop.permute.xlu0 %1447 }
  0x8e   : > { %1590 = vrot.lane.b32.xlu1 %v3499_v22, %s2902_s7  ;;  %v1381_v20 = vor.u32 %v1380_v12, %v1376_v31  ;;  %v1854_v36 = vsel %vm1852_vm12, %v3010_v29, %v3563_v49 }
  0x8f   : > { %v3541_v17 = vsel %vm1254_vm7, %v1357_v57, %v1361_v55  ;;  %v881_v15 = vor.u32 %v879_v50, %v878_v40  ;;  %v882_v58 = vrot.slane %v878_v40, 4  ;;  %v891_v57 = vrot.slane %v886_v52, 4 }
  0x90   : > { %v1887_v29 = vsel %vm1885_vm13, %v1854_v36, %v3561_v47 }
  0x91   : > { %1625 = vrot.lane.b32.xlu0 %v3389_v56, %s2904_s9  ;;  %v1048_v55 = vsel %vm3038_vm10, %v881_v15, %v1047_v59  ;;  %v1052_v9 = vsel %vm2968_vm3, %v891_v57, %v1051_v63  ;;  %v1119_v63 = vld [vmem:[#allocation2 + $0x84] sm:$0xe]  ;;  %vm2083_vm3 = vcmask 523264  }
  0x92   : > { %1627 = vrot.lane.b32.xlu1 %v3475_v61, %s2904_s9  ;;  %1049 = vst [vmem:[#allocation2 + $0xc0] sm:$0xf] %v1048_v55  ;;  %1053 = vst [vmem:[#allocation2 + $0xc8] sm:$0x1] %v1052_v9  ;;  %v2681_v3 = vcombine.low %v1119_v63, %v3611_v26 }
  0x95   : > { %1672 = vrot.lane.b32.xlu0 %v3467_v21, %s2908_s23  ;;  %v1364_v21 = vshrl.u32 %v3533_v0, 16 }
  0x96   : > { %1674 = vrot.lane.b32.xlu1 %v3541_v17, %s2908_s23 }
  0x97   : > { %v1369_v60 = vor.u32 %v1368_v45, %v1364_v21  ;;  %v2874_v45 = vld [vmem:[#allocation2 + $0x8c] ss:$0 sps:$4 sm:$0x11]  }
  0x98   : > { %v1395_v59 = vshll.u32 %v2874_v45, 16  ;;  %v1562_v31 = vrot.slane %v2874_v45, 1 }
  0x99   : > { %1710 = vrot.lane.b32.xlu0 %v3499_v22, %s2906_s15  ;;  %v887_v22 = vshll.u32 %v2748_v33, 16  ;;  %v1374_v19 = vsel %vm1254_vm7, %v1369_v60, %v1373_v41  ;;  %v1383_v33 = vshll.u32 %v2868_v43, 16 }
  0x9a   : > { %1712 = vrot.lane.b32.xlu1 %v1554_v6, %s2906_s15  ;;  %v1397_v9 = vrot.slane %v1395_v59, 1 }
  0x9b   : > { %v889_v4 = vor.u32 %v887_v22, %v886_v52  ;;  %v1385_v25 = vrot.slane %v1383_v33, 1 }
  0x9c   : > { %v3580_v39 = vpop.permute.xlu1 %1615 }
  0x9d   : > { %1747 = vrot.lane.b32.xlu0 %v3475_v61, %s2905_s12  ;;  %v890_v8 = vsel %vm3030_vm9, %v882_v58, %v889_v4  ;;  %v3628_v21 = vsel %vm1254_vm7, %v1381_v20, %v1385_v25 }
  0x9e   : > { %1749 = vrot.lane.b32.xlu1 %v3533_v0, %s2905_s12  ;;  %1050 = vst.msk [vmem:[#allocation2 + $0xc4] sm:$0xf] %vm428_vm0, %v890_v8  ;;  %vm1984_vm0 = vcmask 326656  }
  0x9f   : > { %v3582_v10 = vpop.permute.xlu0 %1613 }
  0xa1   : > { %1794 = vrot.lane.b32.xlu0 %v3541_v17, %s2909_s24 }
  0xa2   : > { %1796 = vrot.lane.b32.xlu1 %v1374_v19, %s2909_s24 }
  0xa3   : > { %v3592_v44 = vpop.permute.xlu0 %1735 }
  0xa4   : > { %v3596_v1 = vpop.permute.xlu1 %1737 }
  0xa5   : > { %1832 = vrot.lane.b32.xlu0 %v1554_v6, %s2907_s18 }
  0xa6   : > { %1463 = vrot.lane.b32.xlu1 %v3541_v17, %s2903_s8  ;;  %v1076_v17 = vld [vmem:[#allocation2 + $0x84] sm:$0xf] }
  0xa7   : > { %v3602_v23 = vpop.permute.xlu0 %1698  ;;  %v3617_v42 = vcombine.low %v1076_v17, %v3611_v26  ;;  %v2876_v17 = vld [vmem:[#allocation2 + $0x98] ss:$0 sps:$4 sm:$0x11]  }
  0xa8   : > { %v1579_v27 = vpop.permute.xlu1 %1578 }
  0xa9   : > { %1834 = vrot.lane.b32.xlu0 %v1557_v16, %s2907_s18  ;;  %v1390_v7 = vshll.u32 %v3617_v42, 16  ;;  %v1388_v58 = vshrl.u32 %v3617_v42, 16 }
  0xaa   : > { %1465 = vrot.lane.b32.xlu1 %v1374_v19, %s2903_s8 }
  0xab   : > { %v3607_v30 = vpop.permute.xlu0 %1820  ;;  %v1392_v22 = vrot.slane %v1390_v7, 1  ;;  %v1081_v7 = vld [vmem:[#allocation2 + $0xa0] sm:$0xf] }
  0xac   : > { %v1701_v35 = vpop.permute.xlu1 %1700 }
  0xad   : > { %1592 = vrot.lane.b32.xlu0 %v1554_v6, %s2902_s7  ;;  %v1559_v6 = vrot.slane %v2868_v43, 1  ;;  %v1393_v5 = vor.u32 %v1392_v22, %v1388_v58  ;;  %v1079_v43 = vld [vmem:[#allocation2 + $0x94] sm:$0xf] }
  0xae   : > { %1594 = vrot.lane.b32.xlu1 %v1557_v16, %s2902_s7 }
  0xaf   : > { %v3614_v37 = vpop.permute.xlu0 %1822  ;;  %v3638_v52 = vsel %vm1527_vm5, %v1558_v11, %v1559_v6  ;;  %v1407_v11 = vshll.u32 %v2876_v17, 16  ;;  %v1120_v6 = vld [vmem:[#allocation2 + $0x90] sm:$0xe] }
  0xb0   : > { %v3619_v40 = vpop.permute.xlu1 %1582 }
  0xb1   : > { %1629 = vrot.lane.b32.xlu0 %v3533_v0, %s2904_s9  ;;  %v1409_v58 = vrot.slane %v1407_v11, 1 }
  0xb2   : > { %1631 = vrot.lane.b32.xlu1 %v3594_v14, %s2904_s9 }
  0xb3   : > { %v3625_v50 = vpop.permute.xlu0 %1580 }
  0xb4   : > { %v1663_v51 = vpop.permute.xlu1 %1662 }
  0xb5   : > { %1676 = vrot.lane.b32.xlu0 %v1374_v19, %s2908_s23 }
  0xb6   : > { %1678 = vrot.lane.b32.xlu1 %v3628_v21, %s2908_s23 }
  0xb7   : > { %v1450_v15 = vpop.permute.xlu0 %1449 }
  0xb8   : > { %v1856_v48 = vsel %vm1852_vm12, %v3092_v28, %v1450_v15  ;;  %v1785_v60 = vpop.permute.xlu1 %1784  ;;  %v1920_v28 = vsel %vm1918_vm14, %v1887_v29, %v3582_v10  ;;  %v2682_v15 = vcombine.low %v1120_v6, %v1079_v43 }
  0xb9   : > { %v1889_v41 = vsel %vm1885_vm13, %v1856_v48, %v1579_v27  ;;  %1714 = vrot.lane.b32.xlu0 %v1557_v16, %s2906_s15  ;;  %v1398_v16 = vsel %vm1254_vm7, %v1393_v5, %v1397_v9  ;;  %v1561_v27 = vrot.slane %v2681_v3, 1 }
  0xba   : > { %v1922_v49 = vsel %vm1918_vm14, %v1889_v41, %v3580_v39  ;;  %1716 = vrot.lane.b32.xlu1 %v3638_v52, %s2906_s15  ;;  %v1564_v29 = vrot.slane %v2682_v15, 1 }
  0xbb   : > { %v1955_v57 = vsel %vm1951_vm15, %v1922_v49, %v1663_v51  ;;  %v1661_v55 = vpop.permute.xlu0 %1660  ;;  %v1565_v49 = vrot.slane %v2876_v17, 1  ;;  %v1082_v17 = vld [vmem:[#allocation2 + $0xa8] sm:$0xf] }
  0xbc   : > { %v1953_v4 = vsel %vm1951_vm15, %v1920_v28, %v1661_v55  ;;  %v1988_v47 = vsel %vm1984_vm0, %v1955_v57, %v1701_v35  ;;  %v1452_v8 = vpop.permute.xlu1 %1451  ;;  %v2879_v55 = vld [vmem:[#allocation2 + $0xa4] ss:$0 sps:$4 sm:$0x11]  }
  0xbd   : > { %v1986_v39 = vsel %vm1984_vm0, %v1953_v4, %v3602_v23  ;;  %1751 = vrot.lane.b32.xlu0 %v3594_v14, %s2905_s12  ;;  %v2021_v10 = vsel %vm2017_vm1, %v1988_v47, %v3596_v1  ;;  %v1078_v1 = vld [vmem:[#allocation2 + $0x90] sm:$0xf]  ;;  %v1858_v51 = vsel %vm1852_vm12, %v3073_v13, %v1452_v8 }
  0xbe   : > { %v2019_v19 = vsel %vm2017_vm1, %v1986_v39, %v3592_v44  ;;  %1753 = vrot.lane.b32.xlu1 %v3617_v42, %s2905_s12  ;;  %v2054_v54 = vsel %vm2050_vm2, %v2021_v10, %v1785_v60  ;;  %v3679_v33 = vcombine.low %v1078_v1, %v1079_v43  ;;  %v1566_v39 = vsel %vm1527_vm5, %v1564_v29, %v1565_v49  ;;  %v1121_v1 = vld [vmem:[#allocation2 + $0x9c] sm:$0xe] }
  0xbf   : > { %v1783_v53 = vpop.permute.xlu0 %1782  ;;  %v2087_v18 = vsel %vm2083_vm3, %v2054_v54, %v3614_v37  ;;  %v1419_v54 = vshll.u32 %v2879_v55, 16 }
  0xc0   : > { %v2052_v24 = vsel %vm2050_vm2, %v2019_v19, %v1783_v53  ;;  %v1454_v23 = vpop.permute.xlu1 %1453  ;;  %v1402_v26 = vshll.u32 %v3679_v33, 16  ;;  %v1400_v20 = vshrl.u32 %v3679_v33, 16 }
  0xc1   : > { %1798 = vrot.lane.b32.xlu0 %v3628_v21, %s2909_s24  ;;  %v2085_v44 = vsel %vm2083_vm3, %v2052_v24, %v3607_v30  ;;  %v1563_v30 = vsel %vm1527_vm5, %v1561_v27, %v1562_v31  ;;  %v1860_v60 = vsel %vm1852_vm12, %v3120_v62, %v1454_v23  ;;  %v1421_v27 = vrot.slane %v1419_v54, 1 }
  0xc2   : > { %2780 = vmatprep.mubr.msk.bf16.mxu0 %vm2152_vm4, %v2085_v44  ;;  %1800 = vrot.lane.b32.xlu1 %v1398_v16, %s2909_s24  ;;  %v1404_v25 = vrot.slane %v1402_v26, 1  ;;  %v1893_v62 = vsel %vm1885_vm13, %v1860_v60, %v3619_v40  ;;  %v1083_v26 = vld [vmem:[#allocation2 + $0xac] sm:$0xf]  ;;  %v1084_v60 = vld [vmem:[#allocation2 + $0xb4] sm:$0xf] }
  0xc3   : > { %2781 = vmatmul.mubr.msk.bf16.vlgmr.msra.gmra.mrb[0].mxu0 %vm2152_vm4, %v2087_v18  ;;  %v1618_v12 = vpop.permute.xlu0 %1617 }
  0xc4   : > { %v1620_v34 = vpop.permute.xlu1 %1619  ;;  %v1405_v48 = vor.u32 %v1404_v25, %v1400_v20  ;;  %v3736_v25 = vcombine.low %v1082_v17, %v1083_v26 }
  0xc5   : > { %1836 = vrot.lane.b32.xlu0 %v3638_v52, %s2907_s18  ;;  %v1926_v9 = vsel %vm1918_vm14, %v1893_v62, %v1620_v34 }
  0xc6   : > { %1467 = vrot.lane.b32.xlu1 %v3628_v21, %s2903_s8  ;;  %v1080_v21 = vld [vmem:[#allocation2 + $0x9c] sm:$0xf]  ;;  %v1410_v57 = vsel %vm1254_vm7, %v1405_v48, %v1409_v58  ;;  %v1424_v15 = vshrl.u32 %v3736_v25, 16 }
  0xc7   : > { %v1665_v35 = vpop.permute.xlu0 %1664  ;;  %v3695_v22 = vcombine.low %v1080_v21, %v1081_v7  ;;  %v2881_v21 = vld [vmem:[#allocation2 + $0xb0] ss:$0 sps:$4 sm:$0x11]  }
  0xc8   : > { %v1667_v37 = vpop.permute.xlu1 %1666  ;;  %v1431_v58 = vshll.u32 %v2881_v21, 16 }
  0xc9   : > { %1838 = vrot.lane.b32.xlu0 %v1563_v30, %s2907_s18  ;;  %v1414_v63 = vshll.u32 %v3695_v22, 16  ;;  %v1412_v10 = vshrl.u32 %v3695_v22, 16  ;;  %v1959_v19 = vsel %vm1951_vm15, %v1926_v9, %v1667_v37  ;;  %v1571_v9 = vrot.slane %v2881_v21, 1  ;;  %v1086_v21 = vld [vmem:[#allocation2 + $0xc0] sm:$0xf] }
  0xca   : > { %1469 = vrot.lane.b32.xlu1 %v1398_v16, %s2903_s8 }
  0xcb   : > { %v1703_v38 = vpop.permute.xlu0 %1702  ;;  %v1416_v53 = vrot.slane %v1414_v63, 1 }
  0xcc   : > { %v1705_v45 = vpop.permute.xlu1 %1704 }
  0xcd   : > { %1596 = vrot.lane.b32.xlu0 %v3638_v52, %s2902_s7  ;;  %v1891_v52 = vsel %vm1885_vm13, %v1858_v51, %v3625_v50  ;;  %v1992_v40 = vsel %vm1984_vm0, %v1959_v19, %v1705_v45  ;;  %v1417_v18 = vor.u32 %v1416_v53, %v1412_v10 }
  0xce   : > { %1598 = vrot.lane.b32.xlu1 %v1563_v30, %s2902_s7  ;;  %v1924_v13 = vsel %vm1918_vm14, %v1891_v52, %v1618_v12  ;;  %v2683_v12 = vcombine.low %v1121_v1, %v1081_v7  ;;  %v1426_v7 = vshll.u32 %v3736_v25, 16 }
  0xcf   : > { %v1740_v36 = vpop.permute.xlu0 %1739  ;;  %v1957_v28 = vsel %vm1951_vm15, %v1924_v13, %v1665_v35  ;;  %v1085_v13 = vld [vmem:[#allocation2 + $0xb8] sm:$0xf] }
  0xd0   : > { %v1742_v59 = vpop.permute.xlu1 %1741  ;;  %v1990_v50 = vsel %vm1984_vm0, %v1957_v28, %v1703_v38  ;;  %v1567_v37 = vrot.slane %v2683_v12, 1  ;;  %v1568_v38 = vrot.slane %v2879_v55, 1  ;;  %v1428_v48 = vrot.slane %v1426_v7, 1  ;;  %v1087_v7 = vld [vmem:[#allocation2 + $0xc4] sm:$0xf] }
  0xd1   : > { %1633 = vrot.lane.b32.xlu0 %v3617_v42, %s2904_s9  ;;  %v2023_v5 = vsel %vm2017_vm1, %v1990_v50, %v1740_v36  ;;  %v1433_v28 = vrot.slane %v1431_v58, 1 }
  0xd2   : > { %1635 = vrot.lane.b32.xlu1 %v3679_v33, %s2904_s9  ;;  %v1569_v6 = vsel %vm1527_vm5, %v1567_v37, %v1568_v38  ;;  %v1429_v49 = vor.u32 %v1428_v48, %v1424_v15  ;;  %v3788_v48 = vcombine.low %v1086_v21, %v1087_v7 }
  0xd3   : > { %v1787_v41 = vpop.permute.xlu0 %1786 }
  0xd4   : > { %v1789_v4 = vpop.permute.xlu1 %1788  ;;  %v2056_v47 = vsel %vm2050_vm2, %v2023_v5, %v1787_v41 }
  0xd5   : > { %1680 = vrot.lane.b32.xlu0 %v1398_v16, %s2908_s23  ;;  %v2025_v16 = vsel %vm2017_vm1, %v1992_v40, %v1742_v59  ;;  %v1122_v59 = vld [vmem:[#allocation2 + $0xa8] sm:$0xe] }
  0xd6   : > { %1682 = vrot.lane.b32.xlu1 %v1410_v57, %s2908_s23  ;;  %v2058_v23 = vsel %vm2050_vm2, %v2025_v16, %v1789_v4  ;;  %v2684_v29 = vcombine.low %v1122_v59, %v1083_v26 }
  0xd7   : > { %v1825_v8 = vpop.permute.xlu0 %1824 }
  0xd8   : > { %v2089_v3 = vsel %vm2083_vm3, %v2056_v47, %v1825_v8  ;;  %v1456_v24 = vpop.permute.xlu1 %1455  ;;  %v1570_v5 = vrot.slane %v2684_v29, 1  ;;  %v1434_v8 = vsel %vm1254_vm7, %v1429_v49, %v1433_v28  ;;  %v1088_v49 = vld [vmem:[#allocation2 + $0xcc] sm:$0xf]  ;;  %v1649_v28 = vshrl.u32 %v3788_v48, 16 }
  0xd9   : > { %1718 = vrot.lane.b32.xlu0 %v1563_v30, %s2906_s15  ;;  %2784 = vmatprep.mubr.msk.bf16.mxu0 %vm2152_vm4, %v2089_v3  ;;  %v1422_v30 = vsel %vm1254_vm7, %v1417_v18, %v1421_v27  ;;  %v1862_v55 = vsel %vm1852_vm12, %v3222_v46, %v1456_v24 }
  0xda   : > { %1720 = vrot.lane.b32.xlu1 %v1566_v39, %s2906_s15 }
  0xdb   : > { %v1827_v44 = vpop.permute.xlu0 %1826 }
  0xdc   : > { %v2091_v43 = vsel %vm2083_vm3, %v2058_v23, %v1827_v44  ;;  %v1458_v31 = vpop.permute.xlu1 %1457  ;;  %v1572_v23 = vsel %vm1527_vm5, %v1570_v5, %v1571_v9 }
  0xdd   : > { %1755 = vrot.lane.b32.xlu0 %v3679_v33, %s2905_s12  ;;  %2785 = vmatmul.mubr.msk.bf16.gmra.mrb[4].mxu0 %vm2152_vm4, %v2091_v43  ;;  %v1864_v10 = vsel %vm1852_vm12, %v3256_v32, %v1458_v31 }
  0xde   : > { %1757 = vrot.lane.b32.xlu1 %v3695_v22, %s2905_s12 }
  0xdf   : > { %v1585_v34 = vpop.permute.xlu0 %1584 }
  0xe0   : > { %v1587_v35 = vpop.permute.xlu1 %1586  ;;  %v1895_v50 = vsel %vm1885_vm13, %v1862_v55, %v1585_v34 }
  0xe1   : > { %1802 = vrot.lane.b32.xlu0 %v1410_v57, %s2909_s24  ;;  %v1897_v53 = vsel %vm1885_vm13, %v1864_v10, %v1587_v35  ;;  %v1123_v35 = vld [vmem:[#allocation2 + $0xb4] sm:$0xe] }
  0xe2   : > { %1804 = vrot.lane.b32.xlu1 %v1422_v30, %s2909_s24 }
  0xe3   : > { %v1622_v20 = vpop.permute.xlu0 %1621 }
  0xe4   : > { %v1624_v11 = vpop.permute.xlu1 %1623  ;;  %v1928_v4 = vsel %vm1918_vm14, %v1895_v50, %v1622_v20  ;;  %v2685_v20 = vcombine.low %v1123_v35, %v1085_v13  ;;  %v1089_v50 = vld [vmem:[#allocation2 + $0xd0] sm:$0xf] }
  0xe5   : > { %1840 = vrot.lane.b32.xlu0 %v1566_v39, %s2907_s18  ;;  %v1930_v40 = vsel %vm1918_vm14, %v1897_v53, %v1624_v11  ;;  %v2689_v9 = vcombine.low %v1088_v49, %v1089_v50 }
  0xe6   : > { %1471 = vrot.lane.b32.xlu1 %v1410_v57, %s2903_s8  ;;  %v3747_v57 = vcombine.low %v1084_v60, %v1085_v13  ;;  %v2886_v60 = vld [vmem:[#allocation2 + $0xc8] ss:$0 sps:$4 sm:$0x11]   ;;  %v1651_v13 = vshll.u32 %v3788_v48, 16 }
  0xe7   : > { %v1669_v45 = vpop.permute.xlu0 %1668 }
  0xe8   : > { %v1671_v51 = vpop.permute.xlu1 %1670  ;;  %v1961_v47 = vsel %vm1951_vm15, %v1928_v4, %v1669_v45  ;;  %v1438_v46 = vshll.u32 %v3747_v57, 16  ;;  %v1436_v32 = vshrl.u32 %v3747_v57, 16  ;;  %v1653_v55 = vrot.slane %v1651_v13, 1 }
  0xe9   : > { %1842 = vrot.lane.b32.xlu0 %v1569_v6, %s2907_s18  ;;  %v1963_v44 = vsel %vm1951_vm15, %v1930_v40, %v1671_v51  ;;  %v1573_v51 = vrot.slane %v2685_v20, 1  ;;  %v1773_v40 = vshll.u32 %v2689_v9, 16  ;;  %v1125_v20 = vld [vmem:[#allocation2 + $0xcc] sm:$0xe] }
  0xea   : > { %1473 = vrot.lane.b32.xlu1 %v1422_v30, %s2903_s8  ;;  %v1440_v43 = vrot.slane %v1438_v46, 1 }
  0xeb   : > { %v1707_v36 = vpop.permute.xlu0 %1706 }
  0xec   : > { %v1709_v52 = vpop.permute.xlu1 %1708  ;;  %v1994_v19 = vsel %vm1984_vm0, %v1961_v47, %v1707_v36  ;;  %v1441_v26 = vor.u32 %v1440_v43, %v1436_v32  ;;  %v1654_v47 = vor.u32 %v1653_v55, %v1649_v28 }
  0xed   : > { %1600 = vrot.lane.b32.xlu0 %v1566_v39, %s2902_s7  ;;  %v2884_v39 = vld [vmem:[#allocation2 + $0xbc] ss:$0 sps:$4 sm:$0x11]   ;;  %v1996_v27 = vsel %vm1984_vm0, %v1963_v44, %v1709_v52 }
  0xee   : > { %1602 = vrot.lane.b32.xlu1 %v1569_v6, %s2902_s7  ;;  %v1443_v18 = vshll.u32 %v2884_v39, 16  ;;  %v1574_v36 = vrot.slane %v2884_v39, 1 }
  0xef   : > { %v1744_v41 = vpop.permute.xlu0 %1743 }
  0xf0   : > { %v1746_v63 = vpop.permute.xlu1 %1745  ;;  %v2027_v54 = vsel %vm2017_vm1, %v1994_v19, %v1744_v41  ;;  %v1445_v37 = vrot.slane %v1443_v18, 1  ;;  %v1575_v59 = vsel %vm1527_vm5, %v1573_v51, %v1574_v36  ;;  %v2691_v36 = vcombine.low %v1125_v20, %v1089_v50 }
  0xf1   : > { %1637 = vrot.lane.b32.xlu0 %v3695_v22, %s2904_s9  ;;  %v2029_v12 = vsel %vm2017_vm1, %v1996_v27, %v1746_v63  ;;  %v1656_v63 = vshll.u32 %v2886_v60, 16 }
  0xf2   : > { %1639 = vrot.lane.b32.xlu1 %v3736_v25, %s2904_s9 }
  0xf3   : > { %v1791_v62 = vpop.permute.xlu0 %1790 }
  0xf4   : > { %v1793_v3 = vpop.permute.xlu1 %1792  ;;  %v2060_v24 = vsel %vm2050_vm2, %v2027_v54, %v1791_v62  ;;  %v1124_v62 = vld [vmem:[#allocation2 + $0xc0] sm:$0xe]  ;;  %v2889_v54 = vld [vmem:[#allocation2 + $0xd4] ss:$0 sps:$4 sm:$0x11]  }
  0xf5   : > { %1684 = vrot.lane.b32.xlu0 %v1422_v30, %s2908_s23  ;;  %v2062_v34 = vsel %vm2050_vm2, %v2029_v12, %v1793_v3  ;;  %v2688_v39 = vcombine.low %v1124_v62, %v1087_v7 }
  0xf6   : > { %1686 = vrot.lane.b32.xlu1 %v1434_v8, %s2908_s23 }
  0xf7   : > { %v1829_v16 = vpop.permute.xlu0 %1828 }
  0xf8   : > { %v2093_v1 = vsel %vm2083_vm3, %v2060_v24, %v1829_v16  ;;  %v1460_v31 = vpop.permute.xlu1 %1459 }
  0xf9   : > { %1722 = vrot.lane.b32.xlu0 %v1569_v6, %s2906_s15  ;;  %2788 = vmatprep.mubr.msk.bf16.mxu0 %vm2152_vm4, %v2093_v1  ;;  %v1446_v6 = vsel %vm1254_vm7, %v1441_v26, %v1445_v37  ;;  %v1866_v46 = vsel %vm1852_vm12, %v3344_v2, %v1460_v31  ;;  %v1696_v2 = vrot.slane %v2886_v60, 1  ;;  %v1775_v26 = vrot.slane %v1773_v40, 1 }
  0xfa   : > { %1724 = vrot.lane.b32.xlu1 %v1572_v23, %s2906_s15  ;;  %v1818_v60 = vrot.slane %v2889_v54, 1 }
  0xfb   : > { %v1831_v30 = vpop.permute.xlu0 %1830 }
  0xfc   : > { %v2095_v17 = vsel %vm2083_vm3, %v2062_v34, %v1831_v30  ;;  %v1462_v38 = vpop.permute.xlu1 %1461  ;;  %v1771_v34 = vshrl.u32 %v2689_v9, 16  ;;  %v1778_v30 = vshll.u32 %v2889_v54, 16 }
  0xfd   : > { %1759 = vrot.lane.b32.xlu0 %v3736_v25, %s2905_s12  ;;  %2789 = vmatmul.mubr.msk.bf16.gmra.mrb[8].mxu0 %vm2152_vm4, %v2095_v17  ;;  %v1868_v32 = vsel %vm1852_vm12, %v3389_v56, %v1462_v38 }
  0xfe   : > { %1761 = vrot.lane.b32.xlu1 %v3747_v57, %s2905_s12  ;;  %v1776_v7 = vor.u32 %v1775_v26, %v1771_v34  ;;  %v1780_v51 = vrot.slane %v1778_v30, 1 }
  0xff   : > { %v1589_v11 = vpop.permute.xlu0 %1588 }
 0x100   : > { %v1591_v45 = vpop.permute.xlu1 %1590  ;;  %v1899_v19 = vsel %vm1885_vm13, %v1866_v46, %v1589_v11 }
 0x101   : > { %1806 = vrot.lane.b32.xlu0 %v1434_v8, %s2909_s24  ;;  %v1901_v43 = vsel %vm1885_vm13, %v1868_v32, %v1591_v45 }
 0x102   : > { %1808 = vrot.lane.b32.xlu1 %v1446_v6, %s2909_s24 }
 0x103   : > { %v1626_v15 = vpop.permute.xlu0 %1625 }
 0x104   : > { %v1628_v58 = vpop.permute.xlu1 %1627  ;;  %v1932_v3 = vsel %vm1918_vm14, %v1899_v19, %v1626_v15 }
 0x105   : > { %1844 = vrot.lane.b32.xlu0 %v1572_v23, %s2907_s18  ;;  %v1934_v27 = vsel %vm1918_vm14, %v1901_v43, %v1628_v58 }
 0x106   : > { %1475 = vrot.lane.b32.xlu1 %v1434_v8, %s2903_s8  ;;  %v1658_v8 = vrot.slane %v1656_v63, 1 }
 0x107   : > { %v1673_v52 = vpop.permute.xlu0 %1672 }
 0x108   : > { %v1675_v41 = vpop.permute.xlu1 %1674  ;;  %v1965_v24 = vsel %vm1951_vm15, %v1932_v3, %v1673_v52  ;;  %v1659_v16 = vsel %vm1254_vm7, %v1654_v47, %v1658_v8  ;;  %v1817_v52 = vrot.slane %v2691_v36, 1 }
 0x109   : > { %1846 = vrot.lane.b32.xlu0 %v1575_v59, %s2907_s18  ;;  %v1967_v56 = vsel %vm1951_vm15, %v1934_v27, %v1675_v41 }
 0x10a   : > { %1477 = vrot.lane.b32.xlu1 %v1446_v6, %s2903_s8  ;;  %s3911_s8 = scalar_lea.vmem %s3972_s4, %s2715_s25 }
 0x10b   : > { %v1711_v29 = vpop.permute.xlu0 %1710 }
 0x10c   : > { %v1713_v4 = vpop.permute.xlu1 %1712  ;;  %v1998_v44 = vsel %vm1984_vm0, %v1965_v24, %v1711_v29  ;;  %v1819_v29 = vsel %vm1527_vm5, %v1817_v52, %v1818_v60 }
 0x10d   : > { %1604 = vrot.lane.b32.xlu0 %v1572_v23, %s2902_s7  ;;  %v1695_v23 = vrot.slane %v2688_v39, 1  ;;  %v2000_v37 = vsel %vm1984_vm0, %v1967_v56, %v1713_v4 }
 0x10e   : > { %1606 = vrot.lane.b32.xlu1 %v1575_v59, %s2902_s7 }
 0x10f   : > { %v1748_v5 = vpop.permute.xlu0 %1747  ;;  %v1697_v17 = vsel %vm1527_vm5, %v1695_v23, %v1696_v2 }
 0x110   : > { %v1750_v10 = vpop.permute.xlu1 %1749  ;;  %v2031_v18 = vsel %vm2017_vm1, %v1998_v44, %v1748_v5 }
 0x111   : > { %1641 = vrot.lane.b32.xlu0 %v3747_v57, %s2904_s9  ;;  %v2033_v11 = vsel %vm2017_vm1, %v2000_v37, %v1750_v10 }
 0x112   : > { %1643 = vrot.lane.b32.xlu1 %v3788_v48, %s2904_s9 }
 0x113   : > { %v1795_v53 = vpop.permute.xlu0 %1794 }
 0x114   : > { %v1797_v1 = vpop.permute.xlu1 %1796  ;;  %v2064_v31 = vsel %vm2050_vm2, %v2031_v18, %v1795_v53 }
 0x115   : > { %1688 = vrot.lane.b32.xlu0 %v1446_v6, %s2908_s23  ;;  %v2066_v6 = vsel %vm2050_vm2, %v2033_v11, %v1797_v1 }
 0x116   : > { %1690 = vrot.lane.b32.xlu1 %v1659_v16, %s2908_s23 }
 0x117   : > { %v1833_v12 = vpop.permute.xlu0 %1832 }
 0x118   : > { %v2097_v35 = vsel %vm2083_vm3, %v2064_v31, %v1833_v12  ;;  %v1464_v38 = vpop.permute.xlu1 %1463 }
 0x119   : > { %1726 = vrot.lane.b32.xlu0 %v1575_v59, %s2906_s15  ;;  %2792 = vmatprep.mubr.msk.bf16.mxu0 %vm2152_vm4, %v2097_v35  ;;  %v1781_v59 = vsel %vm1254_vm7, %v1776_v7, %v1780_v51  ;;  %v1870_v4 = vsel %vm1852_vm12, %v3475_v61, %v1464_v38 }
 0x11a   : > { %1728 = vrot.lane.b32.xlu1 %v1697_v17, %s2906_s15  ;;  %s268_s15 = scalar_lea.vmem %s3974_s6, %s3984_s22 }
 0x11b   : > { %v1835_v45 = vpop.permute.xlu0 %1834 }
 0x11c   : > { %v2099_v21 = vsel %vm2083_vm3, %v2066_v6, %v1835_v45  ;;  %v1466_v15 = vpop.permute.xlu1 %1465 }
 0x11d   : > { %1763 = vrot.lane.b32.xlu0 %v3788_v48, %s2905_s12  ;;  %2793 = vmatmul.mubr.msk.bf16.gmra.mrb[12].mxu0 %vm2152_vm4, %v2099_v21  ;;  %v1872_v39 = vsel %vm1852_vm12, %v3533_v0, %v1466_v15 }
 0x11e   : > { %1765 = vrot.lane.b32.xlu1 %v2689_v9, %s2905_s12  ;;  %s265_s12 = scalar_lea.vmem %s3973_s5, %s3984_s22 }
 0x11f   : > { %v1593_v58 = vpop.permute.xlu0 %1592 }
 0x120   : > { %v1595_v13 = vpop.permute.xlu1 %1594  ;;  %v1903_v5 = vsel %vm1885_vm13, %v1870_v4, %v1593_v58 }
 0x121   : > { %1810 = vrot.lane.b32.xlu0 %v1659_v16, %s2909_s24  ;;  %v1905_v19 = vsel %vm1885_vm13, %v1872_v39, %v1595_v13 }
 0x122   : > { %1812 = vrot.lane.b32.xlu1 %v1781_v59, %s2909_s24 }
 0x123   : > { %v1630_v41 = vpop.permute.xlu0 %1629 }
 0x124   : > { %v1632_v49 = vpop.permute.xlu1 %1631  ;;  %v1936_v9 = vsel %vm1918_vm14, %v1903_v5, %v1630_v41 }
 0x125   : > { %1848 = vrot.lane.b32.xlu0 %v1697_v17, %s2907_s18  ;;  %v1938_v61 = vsel %vm1918_vm14, %v1905_v19, %v1632_v49 }
 0x126   : > { %1850 = vrot.lane.b32.xlu1 %v1819_v29, %s2907_s18 }
 0x127   : > { %v1677_v48 = vpop.permute.xlu0 %1676 }
 0x128   : > { %v1679_v28 = vpop.permute.xlu1 %1678  ;;  %v1969_v8 = vsel %vm1951_vm15, %v1936_v9, %v1677_v48 }
 0x129   : > { %v1971_v40 = vsel %vm1951_vm15, %v1938_v61, %v1679_v28 }
 0x12b   : > { %v1715_v55 = vpop.permute.xlu0 %1714 }
 0x12c   : > { %v1717_v63 = vpop.permute.xlu1 %1716  ;;  %v2002_v46 = vsel %vm1984_vm0, %v1969_v8, %v1715_v55 }
 0x12d   : > { %v2004_v16 = vsel %vm1984_vm0, %v1971_v40, %v1717_v63 }
 0x12f   : > { %v1752_v50 = vpop.permute.xlu0 %1751 }
 0x130   : > { %v1754_v62 = vpop.permute.xlu1 %1753  ;;  %v2035_v3 = vsel %vm2017_vm1, %v2002_v46, %v1752_v50 }
 0x131   : > { %v2037_v0 = vsel %vm2017_vm1, %v2004_v16, %v1754_v62 }
 0x133   : > { %v1799_v47 = vpop.permute.xlu0 %1798 }
 0x134   : > { %v1801_v10 = vpop.permute.xlu1 %1800  ;;  %v2068_v53 = vsel %vm2050_vm2, %v2035_v3, %v1799_v47 }
 0x135   : > { %v2070_v2 = vsel %vm2050_vm2, %v2037_v0, %v1801_v10 }
 0x137   : > { %v1837_v54 = vpop.permute.xlu0 %1836 }
 0x138   : > { %v2101_v24 = vsel %vm2083_vm3, %v2068_v53, %v1837_v54  ;;  %v1468_v23 = vpop.permute.xlu1 %1467 }
 0x139   : > { %2796 = vmatprep.mubr.msk.bf16.mxu1 %vm2152_vm4, %v2101_v24  ;;  %v1874_v17 = vsel %vm1852_vm12, %v3594_v14, %v1468_v23 }
 0x13b   : > { %v1839_v32 = vpop.permute.xlu0 %1838 }
 0x13c   : > { %v2103_v44 = vsel %vm2083_vm3, %v2070_v2, %v1839_v32  ;;  %v1470_v1 = vpop.permute.xlu1 %1469 }
 0x13d   : > { %2797 = vmatmul.mubr.msk.bf16.vlgmr.msra.gmra.mrb[0].mxu1 %vm2152_vm4, %v2103_v44  ;;  %v1876_v6 = vsel %vm1852_vm12, %v3617_v42, %v1470_v1 }
 0x13f   : > { %v1597_v43 = vpop.permute.xlu0 %1596 }
 0x140   : > { %v1599_v18 = vpop.permute.xlu1 %1598  ;;  %v1907_v37 = vsel %vm1885_vm13, %v1874_v17, %v1597_v43 }
 0x141   : > { %v1909_v7 = vsel %vm1885_vm13, %v1876_v6, %v1599_v18 }
 0x143   : > { %v1634_v27 = vpop.permute.xlu0 %1633 }
 0x144   : > { %v1636_v31 = vpop.permute.xlu1 %1635  ;;  %v1940_v38 = vsel %vm1918_vm14, %v1907_v37, %v1634_v27 }
 0x145   : > { %v1942_v14 = vsel %vm1918_vm14, %v1909_v7, %v1636_v31 }
 0x147   : > { %v1681_v12 = vpop.permute.xlu0 %1680 }
 0x148   : > { %v1683_v34 = vpop.permute.xlu1 %1682  ;;  %v1973_v11 = vsel %vm1951_vm15, %v1940_v38, %v1681_v12 }
 0x149   : > { %v1975_v58 = vsel %vm1951_vm15, %v1942_v14, %v1683_v34 }
 0x14b   : > { %v1719_v30 = vpop.permute.xlu0 %1718 }
 0x14c   : > { %v1721_v56 = vpop.permute.xlu1 %1720  ;;  %v2006_v45 = vsel %vm1984_vm0, %v1973_v11, %v1719_v30 }
 0x14d   : > { %v2008_v52 = vsel %vm1984_vm0, %v1975_v58, %v1721_v56 }
 0x14f   : > { %v1756_v35 = vpop.permute.xlu0 %1755 }
 0x150   : > { %v1758_v26 = vpop.permute.xlu1 %1757  ;;  %v2039_v51 = vsel %vm2017_vm1, %v2006_v45, %v1756_v35 }
 0x151   : > { %v2041_v42 = vsel %vm2017_vm1, %v2008_v52, %v1758_v26 }
 0x153   : > { %v1803_v20 = vpop.permute.xlu0 %1802 }
 0x154   : > { %v1805_v21 = vpop.permute.xlu1 %1804  ;;  %v2072_v36 = vsel %vm2050_vm2, %v2039_v51, %v1803_v20 }
 0x155   : > { %v2074_v13 = vsel %vm2050_vm2, %v2041_v42, %v1805_v21 }
 0x157   : > { %v1841_v15 = vpop.permute.xlu0 %1840 }
 0x158   : > { %v2105_v59 = vsel %vm2083_vm3, %v2072_v36, %v1841_v15  ;;  %v1472_v60 = vpop.permute.xlu1 %1471 }
 0x159   : > { %2800 = vmatprep.mubr.msk.bf16.mxu1 %vm2152_vm4, %v2105_v59  ;;  %v1878_v47 = vsel %vm1852_vm12, %v3679_v33, %v1472_v60 }
 0x15b   : > { %v1843_v41 = vpop.permute.xlu0 %1842 }
 0x15c   : > { %v2107_v29 = vsel %vm2083_vm3, %v2074_v13, %v1843_v41  ;;  %v1474_v49 = vpop.permute.xlu1 %1473 }
 0x15d   : > { %2801 = vmatmul.mubr.msk.bf16.gmra.mrb[4].mxu1 %vm2152_vm4, %v2107_v29  ;;  %v1880_v3 = vsel %vm1852_vm12, %v3695_v22, %v1474_v49 }
 0x15f   : > { %v1601_v48 = vpop.permute.xlu0 %1600 }
 0x160   : > { %v1603_v28 = vpop.permute.xlu1 %1602  ;;  %v1911_v39 = vsel %vm1885_vm13, %v1878_v47, %v1601_v48 }
 0x161   : > { %v1913_v54 = vsel %vm1885_vm13, %v1880_v3, %v1603_v28 }
 0x163   : > { %v1638_v55 = vpop.permute.xlu0 %1637 }
 0x164   : > { %v1640_v63 = vpop.permute.xlu1 %1639  ;;  %v1944_v46 = vsel %vm1918_vm14, %v1911_v39, %v1638_v55 }
 0x165   : > { %v1946_v33 = vsel %vm1918_vm14, %v1913_v54, %v1640_v63 }
 0x167   : > { %v1685_v50 = vpop.permute.xlu0 %1684 }
 0x168   : > { %v1687_v4 = vpop.permute.xlu1 %1686  ;;  %v1977_v19 = vsel %vm1951_vm15, %v1944_v46, %v1685_v50 }
 0x169   : > { %v1979_v23 = vsel %vm1951_vm15, %v1946_v33, %v1687_v4 }
 0x16b   : > { %v1723_v62 = vpop.permute.xlu0 %1722 }
 0x16c   : > { %v1725_v5 = vpop.permute.xlu1 %1724  ;;  %v2010_v61 = vsel %vm1984_vm0, %v1977_v19, %v1723_v62 }
 0x16d   : > { %v2012_v2 = vsel %vm1984_vm0, %v1979_v23, %v1725_v5 }
 0x16f   : > { %v1760_v9 = vpop.permute.xlu0 %1759 }
 0x170   : > { %v1762_v8 = vpop.permute.xlu1 %1761  ;;  %v2043_v40 = vsel %vm2017_vm1, %v2010_v61, %v1760_v9 }
 0x171   : > { %v2045_v22 = vsel %vm2017_vm1, %v2012_v2, %v1762_v8 }
 0x173   : > { %v1807_v10 = vpop.permute.xlu0 %1806 }
 0x174   : > { %v1809_v53 = vpop.permute.xlu1 %1808  ;;  %v2076_v24 = vsel %vm2050_vm2, %v2043_v40, %v1807_v10 }
 0x175   : > { %v2078_v44 = vsel %vm2050_vm2, %v2045_v22, %v1809_v53 }
 0x177   : > { %v1845_v16 = vpop.permute.xlu0 %1844 }
 0x178   : > { %v2109_v0 = vsel %vm2083_vm3, %v2076_v24, %v1845_v16  ;;  %v1476_v32 = vpop.permute.xlu1 %1475 }
 0x179   : > { %2804 = vmatprep.mubr.msk.bf16.mxu1 %vm2152_vm4, %v2109_v0  ;;  %v1882_v37 = vsel %vm1852_vm12, %v3736_v25, %v1476_v32 }
 0x17b   : > { %v1847_v1 = vpop.permute.xlu0 %1846 }
 0x17c   : > { %v2111_v43 = vsel %vm2083_vm3, %v2078_v44, %v1847_v1  ;;  %v1478_v18 = vpop.permute.xlu1 %1477 }
 0x17d   : > { %2805 = vmatmul.mubr.msk.bf16.gmra.mrb[8].mxu1 %vm2152_vm4, %v2111_v43  ;;  %v1884_v11 = vsel %vm1852_vm12, %v3747_v57, %v1478_v18 }
 0x17f   : > { %v1605_v27 = vpop.permute.xlu0 %1604 }
 0x180   : > { %v1607_v31 = vpop.permute.xlu1 %1606  ;;  %v1915_v20 = vsel %vm1885_vm13, %v1882_v37, %v1605_v27 }
 0x181   : > { %v1917_v21 = vsel %vm1885_vm13, %v1884_v11, %v1607_v31 }
 0x183   : > { %v1642_v12 = vpop.permute.xlu0 %1641 }
 0x184   : > { %v1644_v34 = vpop.permute.xlu1 %1643  ;;  %v1948_v6 = vsel %vm1918_vm14, %v1915_v20, %v1642_v12 }
 0x185   : > { %v1950_v25 = vsel %vm1918_vm14, %v1917_v21, %v1644_v34 }
 0x187   : > { %v1689_v30 = vpop.permute.xlu0 %1688 }
 0x188   : > { %v1691_v56 = vpop.permute.xlu1 %1690  ;;  %v1981_v7 = vsel %vm1951_vm15, %v1948_v6, %v1689_v30 }
 0x189   : > { %v1983_v14 = vsel %vm1951_vm15, %v1950_v25, %v1691_v56 }
 0x18b   : > { %v1727_v35 = vpop.permute.xlu0 %1726 }
 0x18c   : > { %v1729_v17 = vpop.permute.xlu1 %1728  ;;  %v2014_v51 = vsel %vm1984_vm0, %v1981_v7, %v1727_v35 }
 0x18d   : > { %v2016_v58 = vsel %vm1984_vm0, %v1983_v14, %v1729_v17 }
 0x18f   : > { %v1764_v26 = vpop.permute.xlu0 %1763 }
 0x190   : > { %v1766_v38 = vpop.permute.xlu1 %1765  ;;  %v2047_v36 = vsel %vm2017_vm1, %v2014_v51, %v1764_v26 }
 0x191   : > { %v2049_v42 = vsel %vm2017_vm1, %v2016_v58, %v1766_v38 }
 0x193   : > { %v1811_v45 = vpop.permute.xlu0 %1810 }
 0x194   : > { %v1813_v57 = vpop.permute.xlu1 %1812  ;;  %v2080_v59 = vsel %vm2050_vm2, %v2047_v36, %v1811_v45 }
 0x195   : > { %v2082_v29 = vsel %vm2050_vm2, %v2049_v42, %v1813_v57 }
 0x196   : > { %v2782_v15 = vpop.f32.mrb[0].mxu0 }
 0x197   : > { %2352 = vst [vmem:[%s3911_s8 + $0x10] sm:$0xff] %v2782_v15  ;;  %v2223_v52 = vpop.f32.mrb[1].mxu0  ;;  %v1849_v60 = vpop.permute.xlu0 %1848  ;;  %v2422_v4 = vmul.f32 %v2782_v15, %v2782_v15 }
 0x198   : > { %2350 = vst [vmem:[%s3911_s8] sm:$0xff] %v2223_v52  ;;  %v2113_v13 = vsel %vm2083_vm3, %v2080_v59, %v1849_v60  ;;  %v2783_v41 = vpop.f32.mrb[2].mxu0  ;;  %v1851_v49 = vpop.permute.xlu1 %1850  ;;  %v2420_v55 = vmul.f32 %v2223_v52, %v2223_v52 }
 0x199   : > { %2353 = vst [vmem:[%s3911_s8 + $0x18] sm:$0xff] %v2783_v41  ;;  %v2226_v48 = vpop.f32.mrb[3].mxu0  ;;  %2808 = vmatprep.mubr.msk.bf16.mxu1 %vm2152_vm4, %v2113_v13  ;;  %v2115_v28 = vsel %vm2083_vm3, %v2082_v29, %v1851_v49  ;;  %v2423_v9 = vmul.f32 %v2783_v41, %v2783_v41 }
 0x19a   : > { %2351 = vst [vmem:[%s3911_s8 + $0x8] sm:$0xff] %v2226_v48  ;;  %v2382_v63 = vadd.f32 %v2226_v48, %v2223_v52  ;;  %v2421_v50 = vmul.f32 %v2226_v48, %v2226_v48  ;;  %2809 = vmatmul.mubr.msk.bf16.gmra.mrb[12].mxu1 %vm2152_vm4, %v2115_v28 }
 0x19c   : > { %v2383_v62 = vadd.f32 %v2782_v15, %v2382_v63  ;;  %v2452_v5 = vadd.f32 %v2421_v50, %v2420_v55 }
 0x19e   : > { %v2453_v47 = vadd.f32 %v2452_v5, %v2422_v4  ;;  %v2384_v8 = vadd.f32 %v2783_v41, %v2383_v62 }
 0x1a0   : > { %v2454_v39 = vadd.f32 %v2453_v47, %v2423_v9 }
 0x1b0   : > { %v2786_v46 = vpop.f32.mrb[4].mxu0 }
 0x1b1   : > { %2356 = vst [vmem:[%s3911_s8 + $0x30] sm:$0xff] %v2786_v46  ;;  %v2239_v10 = vpop.f32.mrb[5].mxu0  ;;  %v2426_v24 = vmul.f32 %v2786_v46, %v2786_v46 }
 0x1b2   : > { %2354 = vst [vmem:[%s3911_s8 + $0x20] sm:$0xff] %v2239_v10  ;;  %v2385_v19 = vadd.f32 %v2384_v8, %v2239_v10  ;;  %v2424_v3 = vmul.f32 %v2239_v10, %v2239_v10  ;;  %v2787_v61 = vpop.f32.mrb[6].mxu0 }
 0x1b3   : > { %2357 = vst [vmem:[%s3911_s8 + $0x38] sm:$0xff] %v2787_v61  ;;  %v2242_v53 = vpop.f32.mrb[7].mxu0  ;;  %v2427_v0 = vmul.f32 %v2787_v61, %v2787_v61 }
 0x1b4   : > { %v2455_v54 = vadd.f32 %v2454_v39, %v2424_v3  ;;  %2355 = vst [vmem:[%s3911_s8 + $0x28] sm:$0xff] %v2242_v53  ;;  %v2386_v40 = vadd.f32 %v2385_v19, %v2242_v53  ;;  %v2425_v33 = vmul.f32 %v2242_v53, %v2242_v53 }
 0x1b6   : > { %v2387_v16 = vadd.f32 %v2786_v46, %v2386_v40  ;;  %v2456_v23 = vadd.f32 %v2455_v54, %v2425_v33 }
 0x1b8   : > { %v2457_v2 = vadd.f32 %v2456_v23, %v2426_v24  ;;  %v2388_v32 = vadd.f32 %v2787_v61, %v2387_v16 }
 0x1ba   : > { %v2458_v22 = vadd.f32 %v2457_v2, %v2427_v0 }
 0x1d0   : > { %v2790_v44 = vpop.f32.mrb[8].mxu0 }
 0x1d1   : > { %2360 = vst [vmem:[%s3911_s8 + $0x50] sm:$0xff] %v2790_v44  ;;  %v2255_v1 = vpop.f32.mrb[9].mxu0  ;;  %v2430_v56 = vmul.f32 %v2790_v44, %v2790_v44 }
 0x1d2   : > { %2358 = vst [vmem:[%s3911_s8 + $0x40] sm:$0xff] %v2255_v1  ;;  %v2389_v43 = vadd.f32 %v2388_v32, %v2255_v1  ;;  %v2428_v18 = vmul.f32 %v2255_v1, %v2255_v1  ;;  %v2791_v27 = vpop.f32.mrb[10].mxu0 }
 0x1d3   : > { %2361 = vst [vmem:[%s3911_s8 + $0x58] sm:$0xff] %v2791_v27  ;;  %v2258_v31 = vpop.f32.mrb[11].mxu0  ;;  %v2431_v26 = vmul.f32 %v2791_v27, %v2791_v27 }
 0x1d4   : > { %v2459_v12 = vadd.f32 %v2458_v22, %v2428_v18  ;;  %2359 = vst [vmem:[%s3911_s8 + $0x48] sm:$0xff] %v2258_v31  ;;  %v2390_v34 = vadd.f32 %v2389_v43, %v2258_v31  ;;  %v2429_v30 = vmul.f32 %v2258_v31, %v2258_v31 }
 0x1d6   : > { %v2391_v35 = vadd.f32 %v2790_v44, %v2390_v34  ;;  %v2460_v17 = vadd.f32 %v2459_v12, %v2429_v30 }
 0x1d8   : > { %v2461_v37 = vadd.f32 %v2460_v17, %v2430_v56  ;;  %v2392_v38 = vadd.f32 %v2791_v27, %v2391_v35 }
 0x1da   : > { %v2462_v20 = vadd.f32 %v2461_v37, %v2431_v26 }
 0x1f0   : > { %v2794_v11 = vpop.f32.mrb[12].mxu0 }
 0x1f1   : > { %2364 = vst [vmem:[%s3911_s8 + $0x70] sm:$0xff] %v2794_v11  ;;  %v2271_v6 = vpop.f32.mrb[13].mxu0  ;;  %v2434_v36 = vmul.f32 %v2794_v11, %v2794_v11 }
 0x1f2   : > { %2362 = vst [vmem:[%s3911_s8 + $0x60] sm:$0xff] %v2271_v6  ;;  %v2393_v45 = vadd.f32 %v2392_v38, %v2271_v6  ;;  %v2432_v21 = vmul.f32 %v2271_v6, %v2271_v6  ;;  %v2795_v7 = vpop.f32.mrb[14].mxu0 }
 0x1f3   : > { %2365 = vst [vmem:[%s3911_s8 + $0x78] sm:$0xff] %v2795_v7  ;;  %v2274_v25 = vpop.f32.mrb[15].mxu0  ;;  %v2435_v59 = vmul.f32 %v2795_v7, %v2795_v7 }
 0x1f4   : > { %v2463_v51 = vadd.f32 %v2462_v20, %v2432_v21  ;;  %2363 = vst [vmem:[%s3911_s8 + $0x68] sm:$0xff] %v2274_v25  ;;  %v2394_v57 = vadd.f32 %v2393_v45, %v2274_v25  ;;  %v2433_v14 = vmul.f32 %v2274_v25, %v2274_v25 }
 0x1f6   : > { %v2395_v15 = vadd.f32 %v2794_v11, %v2394_v57  ;;  %v2464_v58 = vadd.f32 %v2463_v51, %v2433_v14 }
 0x1f8   : > { %v2465_v52 = vadd.f32 %v2464_v58, %v2434_v36  ;;  %v2396_v60 = vadd.f32 %v2795_v7, %v2395_v15 }
 0x1fa   : > { %v2466_v42 = vadd.f32 %v2465_v52, %v2435_v59 }
 0x210   : > { %v2798_v13 = vpop.f32.mrb[0].mxu1 }
 0x211   : > { %2368 = vst [vmem:[%s3911_s8 + $0x90] sm:$0xff] %v2798_v13  ;;  %v2287_v41 = vpop.f32.mrb[1].mxu1  ;;  %v2438_v4 = vmul.f32 %v2798_v13, %v2798_v13 }
 0x212   : > { %2366 = vst [vmem:[%s3911_s8 + $0x80] sm:$0xff] %v2287_v41  ;;  %v2397_v29 = vadd.f32 %v2396_v60, %v2287_v41  ;;  %v2436_v49 = vmul.f32 %v2287_v41, %v2287_v41  ;;  %v2799_v48 = vpop.f32.mrb[2].mxu1 }
 0x213   : > { %2369 = vst [vmem:[%s3911_s8 + $0x98] sm:$0xff] %v2799_v48  ;;  %v2290_v28 = vpop.f32.mrb[3].mxu1  ;;  %v2439_v9 = vmul.f32 %v2799_v48, %v2799_v48 }
 0x214   : > { %v2467_v55 = vadd.f32 %v2466_v42, %v2436_v49  ;;  %2367 = vst [vmem:[%s3911_s8 + $0x88] sm:$0xff] %v2290_v28  ;;  %v2398_v63 = vadd.f32 %v2397_v29, %v2290_v28  ;;  %v2437_v50 = vmul.f32 %v2290_v28, %v2290_v28 }
 0x216   : > { %v2399_v62 = vadd.f32 %v2798_v13, %v2398_v63  ;;  %v2468_v5 = vadd.f32 %v2467_v55, %v2437_v50 }
 0x218   : > { %v2469_v47 = vadd.f32 %v2468_v5, %v2438_v4  ;;  %v2400_v8 = vadd.f32 %v2799_v48, %v2399_v62 }
 0x21a   : > { %v2470_v39 = vadd.f32 %v2469_v47, %v2439_v9 }
 0x230   : > { %v2802_v46 = vpop.f32.mrb[4].mxu1 }
 0x231   : > { %2372 = vst [vmem:[%s3911_s8 + $0xb0] sm:$0xff] %v2802_v46  ;;  %v2303_v10 = vpop.f32.mrb[5].mxu1  ;;  %v2442_v24 = vmul.f32 %v2802_v46, %v2802_v46 }
 0x232   : > { %2370 = vst [vmem:[%s3911_s8 + $0xa0] sm:$0xff] %v2303_v10  ;;  %v2401_v19 = vadd.f32 %v2400_v8, %v2303_v10  ;;  %v2440_v3 = vmul.f32 %v2303_v10, %v2303_v10  ;;  %v2803_v61 = vpop.f32.mrb[6].mxu1 }
 0x233   : > { %2373 = vst [vmem:[%s3911_s8 + $0xb8] sm:$0xff] %v2803_v61  ;;  %v2306_v53 = vpop.f32.mrb[7].mxu1  ;;  %v2443_v0 = vmul.f32 %v2803_v61, %v2803_v61 }
 0x234   : > { %v2471_v54 = vadd.f32 %v2470_v39, %v2440_v3  ;;  %2371 = vst [vmem:[%s3911_s8 + $0xa8] sm:$0xff] %v2306_v53  ;;  %v2402_v40 = vadd.f32 %v2401_v19, %v2306_v53  ;;  %v2441_v33 = vmul.f32 %v2306_v53, %v2306_v53 }
 0x236   : > { %v2403_v16 = vadd.f32 %v2802_v46, %v2402_v40  ;;  %v2472_v23 = vadd.f32 %v2471_v54, %v2441_v33 }
 0x238   : > { %v2473_v2 = vadd.f32 %v2472_v23, %v2442_v24  ;;  %v2404_v32 = vadd.f32 %v2803_v61, %v2403_v16 }
 0x23a   : > { %v2474_v22 = vadd.f32 %v2473_v2, %v2443_v0 }
 0x250   : > { %v2806_v44 = vpop.f32.mrb[8].mxu1 }
 0x251   : > { %2376 = vst [vmem:[%s3911_s8 + $0xd0] sm:$0xff] %v2806_v44  ;;  %v2319_v1 = vpop.f32.mrb[9].mxu1  ;;  %v2446_v56 = vmul.f32 %v2806_v44, %v2806_v44 }
 0x252   : > { %2374 = vst [vmem:[%s3911_s8 + $0xc0] sm:$0xff] %v2319_v1  ;;  %v2405_v43 = vadd.f32 %v2404_v32, %v2319_v1  ;;  %v2444_v18 = vmul.f32 %v2319_v1, %v2319_v1  ;;  %v2807_v27 = vpop.f32.mrb[10].mxu1 }
 0x253   : > { %2377 = vst [vmem:[%s3911_s8 + $0xd8] sm:$0xff] %v2807_v27  ;;  %v2322_v31 = vpop.f32.mrb[11].mxu1  ;;  %v2447_v26 = vmul.f32 %v2807_v27, %v2807_v27 }
 0x254   : > { %v2475_v12 = vadd.f32 %v2474_v22, %v2444_v18  ;;  %2375 = vst [vmem:[%s3911_s8 + $0xc8] sm:$0xff] %v2322_v31  ;;  %v2406_v34 = vadd.f32 %v2405_v43, %v2322_v31  ;;  %v2445_v30 = vmul.f32 %v2322_v31, %v2322_v31 }
 0x256   : > { %v2407_v35 = vadd.f32 %v2806_v44, %v2406_v34  ;;  %v2476_v17 = vadd.f32 %v2475_v12, %v2445_v30 }
 0x258   : > { %v2477_v37 = vadd.f32 %v2476_v17, %v2446_v56  ;;  %v2408_v38 = vadd.f32 %v2807_v27, %v2407_v35 }
 0x25a   : > { %v2478_v20 = vadd.f32 %v2477_v37, %v2447_v26 }
 0x26d   : > { %v2810_v11 = vpop.f32.mrb[12].mxu1 }
 0x26e   : > { %2380 = vst [vmem:[%s3911_s8 + $0xf0] sm:$0xff] %v2810_v11  ;;  %v2335_v6 = vpop.f32.mrb[13].mxu1  ;;  %v2450_v36 = vmul.f32 %v2810_v11, %v2810_v11 }
 0x26f   : > { %2378 = vst [vmem:[%s3911_s8 + $0xe0] sm:$0xff] %v2335_v6  ;;  %v2409_v45 = vadd.f32 %v2408_v38, %v2335_v6  ;;  %v2448_v21 = vmul.f32 %v2335_v6, %v2335_v6  ;;  %v2811_v7 = vpop.f32.mrb[14].mxu1 }
 0x270   : > { %2381 = vst [vmem:[%s3911_s8 + $0xf8] sm:$0xff] %v2811_v7  ;;  %v2338_v25 = vpop.f32.mrb[15].mxu1  ;;  %v2451_v59 = vmul.f32 %v2811_v7, %v2811_v7 }
 0x271   : > { %v2479_v51 = vadd.f32 %v2478_v20, %v2448_v21  ;;  %2379 = vst [vmem:[%s3911_s8 + $0xe8] sm:$0xff] %v2338_v25  ;;  %v2410_v57 = vadd.f32 %v2409_v45, %v2338_v25  ;;  %v2449_v14 = vmul.f32 %v2338_v25, %v2338_v25 }
 0x273   : > { %v2411_v15 = vadd.f32 %v2810_v11, %v2410_v57  ;;  %v2480_v58 = vadd.f32 %v2479_v51, %v2449_v14 }
 0x275   : > { %v2412_v52 = vadd.f32 %v2811_v7, %v2411_v15  ;;  %v2481_v60 = vadd.f32 %v2480_v58, %v2450_v36 }
 0x277   : > { %v2413_v42 = vrot.slane %v2412_v52, 4  ;;  %v2482_v13 = vadd.f32 %v2481_v60, %v2451_v59 }
 0x279   : > { %v2414_v41 = vadd.f32 %v2413_v42, %v2412_v52  ;;  %v2483_v29 = vrot.slane %v2482_v13, 4 }
 0x27b   : > { %v2415_v49 = vrot.slane %v2414_v41, 2  ;;  %v2484_v48 = vadd.f32 %v2483_v29, %v2482_v13 }
 0x27d   : > { %v2416_v28 = vadd.f32 %v2415_v49, %v2414_v41  ;;  %v2485_v55 = vrot.slane %v2484_v48, 2 }
 0x27f   : > { %v2417_v63 = vrot.slane %v2416_v28, 1  ;;  %v2486_v50 = vadd.f32 %v2485_v55, %v2484_v48 }
 0x281   : > { %v2418_v4 = vadd.f32 %v2417_v63, %v2416_v28  ;;  %v2487_v62 = vrot.slane %v2486_v50, 1 }
 0x283   : > { %2419 = vst [vmem:[%s265_s12] sm:$0x1] %v2418_v4  ;;  %v2488_v5 = vadd.f32 %v2487_v62, %v2486_v50 }
 0x285   : > { %2489 = vst [vmem:[%s268_s15] sm:$0x1] %v2488_v5 }
 0x286 PF: > { %s17_s21 = sadd.s32 1, %s2899_s21  }
 0x287   : > { %p14_p4 = scmp.ge.s32.totalorder %s17_s21, 4  }
 0x289   :  { %16 = sbr.rel (!%p14_p4) target bundleno = 1 (0x1), region = 92 }

// kernel: vgg_forward.11
= control target key start
LH: loop header
LB: loop body
LE: loop exit
PB: predicated region body
PF: predicated region fallthrough
CT: control target
= control target key end

     0   :  { %s1305_s21 = smov 0   ;;  %s1669_s0 = inlined_call_operand.vmem [shape: f32[1,128], index: 0, kind: input, shape index: {}]   ;;  %s1670_s1 = inlined_call_operand.vmem [shape: f32[1,128], index: 1, kind: input, shape index: {}]   ;;  %s1671_s2 = inlined_call_operand.vmem [shape: f32[2,8,8,128], index: 2, kind: input, shape index: {}]   ;;  %s1672_s3 = inlined_call_operand.vmem [shape: bf16[144,128], index: 3, kind: input, shape index: {}]   ;;  %s1673_s4 = inlined_call_operand.vmem [shape: f32[2,8,8,128], index: 4, kind: output, shape index: {0}]   ;;  %s1674_s5 = inlined_call_operand.vmem [shape: f32[2,1,128], index: 5, kind: output, shape index: {1}]   ;;  %s1675_s6 = inlined_call_operand.vmem [shape: f32[2,1,128], index: 6, kind: output, shape index: {2}]  }
   0x1 LB: > { %s1175_s22 = sadd.s32 4294967295, %s1260_s21   ;;  %p1179_p0 = scmp.ge.s32.totalorder %s1260_s21, 1  ;;  %s1260_s21 = sphi %s1305_s21, %s17_s21  }
   0x2   : > { %p217_p1 = scmp.lt.s32.totalorder %s1260_s21, 3 }
   0x4   : > { %p218_p2 = pnand %p1179_p0, %p217_p1 }
   0x5   : > { %vm324_vm0 = vcmask (!%p218_p2), 130048   ;;  %v1262_v0 = vmov (!%p218_p2), 0   ;;  %p253_p3 = scmp.lt.s32.totalorder (!%p218_p2), %s1175_s22, 1  ;;  %vm329_vm1 = vcmask (!%p218_p2), 122880   ;;  %vm330_vm2 = vsmask.f32 (!%p218_p2), 256 }
   0x6   : > { %221 = sbr.rel (%p218_p2) target bundleno = 493 (0x1ed), region = 36  ;;  %325 = vst.msk [vmem:[#allocation2] sm:$0xff] (!%p218_p2), %vm324_vm0, %v1262_v0  ;;  %327 = vst.msk [vmem:[#allocation2 + $0x48] sm:$0xff] (!%p218_p2), %vm324_vm0, %v1262_v0  ;;  %961 = vmatprep.subr.bf16.mxu0 (!%p218_p2), %v1262_v0  ;;  %1211 = vmatprep.subr.bf16.mxu1 (!%p218_p2), %v1262_v0  ;;  %v335_v2 = vld [vmem:[#allocation2 + $0x10] sm:$0x1] (!%p218_p2)  ;;  %vm356_vm4 = vcmask (!%p218_p2), 126980  }
   0x7   : > { %vm1319_vm3 = vmand (!%p218_p2), %vm329_vm1, %vm330_vm2  ;;  %vm357_vm5 = vsmask.f32 (!%p218_p2), 7954  ;;  %v1328_v3 = vld [vmem:[%s1669_s0] ss:$0 sm:$0xff] (!%p218_p2)  ;;  %v362_v6 = vld [vmem:[#allocation2 + $0x10] sm:$0x10] (!%p218_p2) }
   0x8   : > { %v336_v4 = vsel (!%p218_p2), %vm1319_vm3, 0, %v335_v2  ;;  %vm1332_vm6 = vmand (!%p218_p2), %vm356_vm4, %vm357_vm5  ;;  %v332_v8 = vld [vmem:[#allocation2 + $0x8] sm:$0x1] (!%p218_p2)  ;;  %v359_v9 = vld [vmem:[#allocation2 + $0x8] sm:$0x10] (!%p218_p2)  ;;  %vm447_vm7 = vcmask (!%p218_p2), 126976  }
   0x9   : > { %337 = vst [vmem:[#allocation2 + $0x10] sm:$0x1] (!%p218_p2), %v336_v4  ;;  %v363_v7 = vsel (!%p218_p2), %vm1332_vm6, 0, %v362_v6  ;;  %v1342_v10 = vld [vmem:[%s1670_s1] ss:$0 sm:$0xff] (!%p218_p2)  ;;  %v333_v11 = vsel (!%p218_p2), %vm1319_vm3, 0, %v332_v8 }
   0xa   : > { %364 = vst [vmem:[#allocation2 + $0x10] sm:$0x10] (!%p218_p2), %v363_v7  ;;  %v360_v12 = vsel (!%p218_p2), %vm1332_vm6, 0, %v359_v9  ;;  %v338_v13 = vld [vmem:[#allocation2 + $0x18] sm:$0x1] (!%p218_p2)  ;;  %s1263_s7 = smov (!%p218_p2), 32  }
   0xb   : > { %334 = vst [vmem:[#allocation2 + $0x8] sm:$0x1] (!%p218_p2), %v333_v11  ;;  %361 = vst [vmem:[#allocation2 + $0x8] sm:$0x10] (!%p218_p2), %v360_v12  ;;  %v339_v14 = vsel (!%p218_p2), %vm1319_vm3, 0, %v338_v13  ;;  %s1264_s8 = smov (!%p218_p2), 16  }
   0xc   : > { %v365_v15 = vld [vmem:[#allocation2 + $0x18] sm:$0x10] (!%p218_p2)  ;;  %v344_v16 = vld [vmem:[#allocation2 + $0x28] sm:$0x1] (!%p218_p2)  ;;  %340 = vst [vmem:[#allocation2 + $0x18] sm:$0x1] (!%p218_p2), %v339_v14 }
   0xd   : > { %s1683_s22 = smov (!%p253_p3, %s1175_s22), 1  ;;  %v366_v20 = vsel %vm1332_vm6, 0, %v365_v15  ;;  %v484_v21 = vld [vmem:[#allocation2] sm:$0x1f]  ;;  %vm448_vm8 = vsmask.f32 4354 }
   0xe   : > { %s1209_s25 = sshll.u32 %s1683_s22, 6  ;;  %v494_v22 = vld [vmem:[#allocation2] sm:$0x1e]  ;;  %367 = vst [vmem:[#allocation2 + $0x18] sm:$0x10] %v366_v20  ;;  %v345_v27 = vsel %vm1319_vm3, 0, %v344_v16  ;;  %vm1397_vm9 = vmand %vm447_vm7, %vm448_vm8  ;;  %s265_s15 = scalar_lea.vmem %s1674_s5, %s1683_s22 }
   0xf   : > { %s1353_s30 = scalar_lea.vmem %s1671_s2, %s1209_s25  ;;  %v505_v28 = vshrl.u32 %v484_v21, 16  ;;  %v507_v29 = vshll.u32 %v484_v21, 16  ;;  %v584_v30 = vrot.slane %v494_v22, 1  ;;  %346 = vst [vmem:[#allocation2 + $0x28] sm:$0x1] %v345_v27  ;;  %v1245_v22 = vld [vmem:[%s1672_s3] sm:$0xff]   ;;  %s1648_s13 = scalar_lea.vmem %s1673_s4, %s1209_s25 }
  0x10   : > { %v271_v17 = vld [vmem:[%s1353_s30 + $0x8] sm:$0xff]  ;;  %v270_v18 = vld [vmem:[%s1353_s30] sm:$0xff]  ;;  %v272_v19 = vld [vmem:[%s1353_s30 + $0x10] sm:$0xff]  ;;  %962 = vmatpush1.bf16.msra.mxu0 %v1245_v22  ;;  %1220 = vmatpush1.bf16.msra.mxu1 %v1245_v22  ;;  %s1265_s17 = smov 48   ;;  %s1266_s20 = smov 96   ;;  %vm739_vm10 = vcmask 261120  }
  0x11   : > { %v286_v23 = vmul.f32 %v1328_v3, %v271_v17  ;;  %v285_v24 = vmul.f32 %v1328_v3, %v270_v18  ;;  %v287_v25 = vmul.f32 %v1328_v3, %v272_v19  ;;  %v274_v26 = vld [vmem:[%s1353_s30 + $0x20] sm:$0xff]  ;;  %v371_v32 = vld [vmem:[#allocation2 + $0x28] sm:$0x10]  ;;  %v273_v33 = vld [vmem:[%s1353_s30 + $0x18] sm:$0xff]  ;;  %v509_v41 = vrot.slane %v507_v29, 1  ;;  %592 = vrot.lane.b32.xlu1 %v584_v30, %s1263_s7  ;;  %963 = vmatprep.subr.bf16.mxu0 %v1262_v0  ;;  %s1267_s26 = smov 80   ;;  %s268_s18 = scalar_lea.vmem %s1675_s6, %s1683_s22 }
  0x12   : > { %v289_v31 = vmul.f32 %v1328_v3, %v274_v26  ;;  %v372_v37 = vsel %vm1332_vm6, 0, %v371_v32  ;;  %v341_v38 = vld [vmem:[#allocation2 + $0x20] sm:$0x1]  ;;  %v368_v39 = vld [vmem:[#allocation2 + $0x20] sm:$0x10]  ;;  %v275_v40 = vld [vmem:[%s1353_s30 + $0x28] sm:$0xff]  ;;  %v288_v43 = vmul.f32 %v1328_v3, %v273_v33  ;;  %1212 = vmatprep.subr.bf16.mxu1 %v1262_v0 }
  0x13   : > { %v301_v34 = vadd.f32 %v1342_v10, %v286_v23  ;;  %v300_v35 = vadd.f32 %v1342_v10, %v285_v24  ;;  %v302_v36 = vadd.f32 %v1342_v10, %v287_v25  ;;  %373 = vst [vmem:[#allocation2 + $0x28] sm:$0x10] %v372_v37  ;;  %v342_v44 = vsel %vm1319_vm3, 0, %v341_v38  ;;  %v347_v45 = vld [vmem:[#allocation2 + $0x30] sm:$0x1]  ;;  %v1248_v5 = vld [vmem:[%s1672_s3 + $0x18] sm:$0xff]  }
  0x14   : > { %v304_v42 = vadd.f32 %v1342_v10, %v289_v31  ;;  %343 = vst [vmem:[#allocation2 + $0x20] sm:$0x1] %v342_v44  ;;  %v369_v49 = vsel %vm1332_vm6, 0, %v368_v39  ;;  %v374_v50 = vld [vmem:[#allocation2 + $0x30] sm:$0x10]  ;;  %v510_v51 = vor.u32 %v509_v41, %v505_v28  ;;  %v303_v53 = vadd.f32 %v1342_v10, %v288_v43  ;;  %v1253_v23 = vld [vmem:[%s1672_s3 + $0x40] sm:$0xff]  }
  0x15   : > { %v309_v46 = vmax.f32 %v301_v34, 0.0  ;;  %v308_v47 = vmax.f32 %v300_v35, 0.0  ;;  %v310_v48 = vmax.f32 %v302_v36, 0.0  ;;  %370 = vst [vmem:[#allocation2 + $0x20] sm:$0x10] %v369_v49  ;;  %v290_v54 = vmul.f32 %v1328_v3, %v275_v40  ;;  %v276_v63 = vld [vmem:[%s1353_s30 + $0x30] sm:$0xff] }
  0x16   : > { %v312_v52 = vmax.f32 %v304_v42, 0.0  ;;  %v348_v58 = vsel %vm1319_vm3, 0, %v347_v45  ;;  %560 = vrot.lane.b32.xlu0 %v510_v51, %s1264_s8  ;;  %v311_v60 = vmax.f32 %v303_v53, 0.0  ;;  %v375_v62 = vsel %vm1332_vm6, 0, %v374_v50  ;;  %v350_v8 = vld [vmem:[#allocation2 + $0x38] sm:$0x1] }
  0x17   : > { %v317_v55 = vpack.c.bf16 %v309_v46, %v309_v46  ;;  %v316_v56 = vpack.c.bf16 %v308_v47, %v308_v47  ;;  %v318_v57 = vpack.c.bf16 %v310_v48, %v310_v48  ;;  %v305_v61 = vadd.f32 %v1342_v10, %v290_v54  ;;  %349 = vst [vmem:[#allocation2 + $0x30] sm:$0x1] %v348_v58  ;;  %v453_v9 = vld [vmem:[#allocation2 + $0x10] sm:$0x1f]  ;;  %v450_v11 = vld [vmem:[#allocation2 + $0x8] sm:$0x1f] }
  0x18   : > { %v320_v59 = vpack.c.bf16 %v312_v52, %v312_v52  ;;  %376 = vst [vmem:[#allocation2 + $0x30] sm:$0x10] %v375_v62  ;;  %v377_v16 = vld [vmem:[#allocation2 + $0x38] sm:$0x10]  ;;  %v319_v20 = vpack.c.bf16 %v311_v60, %v311_v60  ;;  %v291_v27 = vmul.f32 %v1328_v3, %v276_v63  ;;  %v351_v28 = vsel %vm1319_vm3, 0, %v350_v8  ;;  %v1246_v35 = vld [vmem:[%s1672_s3 + $0x8] sm:$0xff]  }
  0x19   : > { %v391_v2 = vshrl.u32 %v317_v55, 16  ;;  %v394_v4 = vshll.u32 %v317_v55, 16  ;;  %v384_v6 = vshrl.u32 %v316_v56, 16  ;;  %v387_v7 = vshll.u32 %v316_v56, 16  ;;  %v456_v19 = vld [vmem:[#allocation2 + $0x18] sm:$0x1f]  ;;  %964 = vmatpush1.bf16.msra.mxu0 %v1246_v35  ;;  %1221 = vmatpush1.bf16.msra.mxu1 %v1246_v35 }
  0x1a   : > { %v398_v12 = vshrl.u32 %v318_v57, 16  ;;  %v401_v13 = vshll.u32 %v318_v57, 16  ;;  %v412_v14 = vshrl.u32 %v320_v59, 16  ;;  %v415_v15 = vshll.u32 %v320_v59, 16  ;;  %v462_v26 = vld [vmem:[#allocation2 + $0x28] sm:$0x1f]  ;;  %965 = vmatprep.subr.bf16.mxu0 %v1262_v0  ;;  %1213 = vmatprep.subr.bf16.mxu1 %v1262_v0 }
  0x1b   : > { %v393_v17 = vrot.slane %v391_v2, 7  ;;  %v386_v18 = vrot.slane %v384_v6, 7  ;;  %v313_v21 = vmax.f32 %v305_v61, 0.0  ;;  %v353_v29 = vld [vmem:[#allocation2 + $0x40] sm:$0x1]  ;;  %v405_v32 = vshrl.u32 %v319_v20, 16 }
  0x1c   : > { %v400_v24 = vrot.slane %v398_v12, 7  ;;  %v414_v25 = vrot.slane %v412_v14, 7  ;;  %v408_v33 = vshll.u32 %v319_v20, 16  ;;  %352 = vst [vmem:[#allocation2 + $0x38] sm:$0x1] %v351_v28  ;;  %v277_v34 = vld [vmem:[%s1353_s30 + $0x38] sm:$0xff]  ;;  %v306_v39 = vadd.f32 %v1342_v10, %v291_v27 }
  0x1d   : > { %v396_v30 = vor.u32 %v394_v4, %v393_v17  ;;  %v389_v31 = vor.u32 %v387_v7, %v386_v18  ;;  %v321_v38 = vpack.c.bf16 %v313_v21, %v313_v21  ;;  %v380_v40 = vld [vmem:[#allocation2 + $0x40] sm:$0x10]  ;;  %v407_v43 = vrot.slane %v405_v32, 7  ;;  %v1247_v54 = vld [vmem:[%s1672_s3 + $0x10] sm:$0xff]   ;;  %s1268_s11 = smov 64   ;;  %s1269_s12 = smov 112  }
  0x1e   : > { %v403_v36 = vor.u32 %v401_v13, %v400_v24  ;;  %v417_v37 = vor.u32 %v415_v15, %v414_v25  ;;  %v378_v44 = vsel %vm1332_vm6, 0, %v377_v16  ;;  %v459_v47 = vld [vmem:[#allocation2 + $0x20] sm:$0x1f]  ;;  %v314_v51 = vmax.f32 %v306_v39, 0.0  ;;  %966 = vmatpush1.bf16.msra.mxu0 %v1247_v54  ;;  %1222 = vmatpush1.bf16.msra.mxu1 %v1247_v54  ;;  %v1250_v16 = vld [vmem:[%s1672_s3 + $0x28] sm:$0xff]   ;;  %v1251_v27 = vld [vmem:[%s1672_s3 + $0x30] sm:$0xff]  }
  0x1f   : > { %v454_v41 = vsel %vm1397_vm9, %v396_v30, %v453_v9  ;;  %v451_v42 = vsel %vm1397_vm9, %v389_v31, %v450_v11  ;;  %v419_v48 = vshrl.u32 %v321_v38, 16  ;;  %v422_v49 = vshll.u32 %v321_v38, 16  ;;  %379 = vst [vmem:[#allocation2 + $0x38] sm:$0x10] %v378_v44  ;;  %v465_v1 = vld [vmem:[#allocation2 + $0x30] sm:$0x1f]  ;;  %967 = vmatprep.subr.bf16.mxu0 %v1262_v0  ;;  %1214 = vmatprep.subr.bf16.mxu1 %v1262_v0 }
  0x20   : > { %455 = vst [vmem:[#allocation2 + $0x10] sm:$0x1f] %v454_v41  ;;  %452 = vst [vmem:[#allocation2 + $0x8] sm:$0x1f] %v451_v42  ;;  %v457_v45 = vsel %vm1397_vm9, %v403_v36, %v456_v19  ;;  %v463_v46 = vsel %vm1397_vm9, %v417_v37, %v462_v26  ;;  %v410_v50 = vor.u32 %v408_v33, %v407_v43  ;;  %v354_v53 = vsel %vm1319_vm3, 0, %v353_v29  ;;  %v1249_v2 = vld [vmem:[%s1672_s3 + $0x20] sm:$0xff]  }
  0x21   : > { %458 = vst [vmem:[#allocation2 + $0x18] sm:$0x1f] %v457_v45  ;;  %464 = vst [vmem:[#allocation2 + $0x28] sm:$0x1f] %v463_v46  ;;  %v292_v52 = vmul.f32 %v1328_v3, %v277_v34  ;;  %v421_v55 = vrot.slane %v419_v48, 7  ;;  %v381_v56 = vsel %vm1332_vm6, 0, %v380_v40  ;;  %v322_v57 = vpack.c.bf16 %v314_v51, %v314_v51 }
  0x22   : > { %355 = vst [vmem:[#allocation2 + $0x40] sm:$0x1] %v354_v53  ;;  %v460_v3 = vsel %vm1397_vm9, %v410_v50, %v459_v47  ;;  %382 = vst [vmem:[#allocation2 + $0x40] sm:$0x10] %v381_v56  ;;  %968 = vmatpush1.bf16.msra.mxu0 %v1248_v5  ;;  %1223 = vmatpush1.bf16.msra.mxu1 %v1248_v5  ;;  %v1252_v39 = vld [vmem:[%s1672_s3 + $0x38] sm:$0xff]   ;;  %vm756_vm11 = vcmask 392192  }
  0x23   : > { %v307_v58 = vadd.f32 %v1342_v10, %v292_v52  ;;  %461 = vst [vmem:[#allocation2 + $0x20] sm:$0x1f] %v460_v3  ;;  %v424_v59 = vor.u32 %v422_v49, %v421_v55  ;;  %v426_v60 = vshrl.u32 %v322_v57, 16  ;;  %v429_v9 = vshll.u32 %v322_v57, 16  ;;  %969 = vmatprep.subr.bf16.mxu0 %v1262_v0  ;;  %1215 = vmatprep.subr.bf16.mxu1 %v1262_v0 }
  0x24   : > { %vm773_vm12 = vcmask 523264   ;;  %vm790_vm13 = vcmask 654336   ;;  %vm807_vm14 = vcmask 785408   ;;  %vm824_vm15 = vcmask 916480  }
  0x25   : > { %v315_v61 = vmax.f32 %v307_v58, 0.0  ;;  %v466_v62 = vsel %vm1397_vm9, %v424_v59, %v465_v1  ;;  %v428_v8 = vrot.slane %v426_v60, 7 }
  0x26   : > { %467 = vst [vmem:[#allocation2 + $0x30] sm:$0x1f] %v466_v62  ;;  %970 = vmatpush1.bf16.msra.mxu0 %v1249_v2  ;;  %1224 = vmatpush1.bf16.msra.mxu1 %v1249_v2  ;;  %v468_v26 = vld [vmem:[#allocation2 + $0x38] sm:$0x1f] }
  0x27   : > { %v1441_v63 = vld [vmem:[#allocation2 + $0x10] sm:$0xf]  ;;  %v1443_v10 = vld [vmem:[#allocation2 + $0x8] sm:$0xf]  ;;  %v323_v11 = vpack.c.bf16 %v315_v61, %v315_v61  ;;  %v431_v17 = vor.u32 %v429_v9, %v428_v8  ;;  %971 = vmatprep.subr.bf16.mxu0 %v1262_v0  ;;  %1216 = vmatprep.subr.bf16.mxu1 %v1262_v0 }
  0x28   : > { %618 = vrot.lane.b32.xlu1 %v1441_v63, %s1265_s17  ;;  %616 = vrot.lane.b32.xlu0 %v1443_v10, %s1265_s17  ;;  %v1452_v4 = vld [vmem:[#allocation2 + $0x18] sm:$0xf]  ;;  %v495_v6 = vld [vmem:[#allocation2 + $0x8] sm:$0x1e]  ;;  %v496_v14 = vld [vmem:[#allocation2 + $0x10] sm:$0x1e] }
  0x29   : > { %v485_v7 = vld [vmem:[#allocation2 + $0x8] sm:$0x1f]  ;;  %v585_v12 = vrot.slane %v495_v6, 1  ;;  %v486_v15 = vld [vmem:[#allocation2 + $0x10] sm:$0x1f]  ;;  %v433_v18 = vshrl.u32 %v323_v11, 16  ;;  %v469_v29 = vsel %vm1397_vm9, %v431_v17, %v468_v26 }
  0x2a   : > { %v514_v13 = vshll.u32 %v485_v7, 16  ;;  %v497_v19 = vld [vmem:[#allocation2 + $0x18] sm:$0x1e]  ;;  %v586_v20 = vrot.slane %v496_v14, 1  ;;  %v512_v21 = vshrl.u32 %v485_v7, 16  ;;  %v521_v24 = vshll.u32 %v486_v15, 16  ;;  %972 = vmatpush1.bf16.msra.mxu0 %v1250_v16  ;;  %1225 = vmatpush1.bf16.msra.mxu1 %v1250_v16 }
  0x2b   : > { %v487_v25 = vld [vmem:[#allocation2 + $0x18] sm:$0x1f]  ;;  %v1470_v28 = vrot.slane %v497_v19, 1  ;;  %v435_v30 = vrot.slane %v433_v18, 7  ;;  %v436_v31 = vshll.u32 %v323_v11, 16  ;;  %973 = vmatprep.subr.bf16.mxu0 %v1262_v0  ;;  %1217 = vmatprep.subr.bf16.mxu1 %v1262_v0  ;;  %v519_v32 = vshrl.u32 %v486_v15, 16 }
  0x2c   : > { %676 = vrot.lane.b32.xlu1 %v1452_v4, %s1266_s20  ;;  %674 = vrot.lane.b32.xlu0 %v1441_v63, %s1266_s20  ;;  %v516_v22 = vrot.slane %v514_v13, 1  ;;  %v528_v33 = vshll.u32 %v487_v25, 16  ;;  %470 = vst [vmem:[#allocation2 + $0x38] sm:$0x1f] %v469_v29  ;;  %v471_v34 = vld [vmem:[#allocation2 + $0x40] sm:$0x1f] }
  0x2d   : > { %v523_v36 = vrot.slane %v521_v24, 1  ;;  %v438_v37 = vor.u32 %v436_v31, %v435_v30  ;;  %v1187_v38 = vcombine.low %v586_v20, %v1470_v28  ;;  %v526_v42 = vshrl.u32 %v487_v25, 16  ;;  %v489_v44 = vld [vmem:[#allocation2 + $0x28] sm:$0x1f]  ;;  %v488_v45 = vld [vmem:[#allocation2 + $0x20] sm:$0x1f] }
  0x2e   : > { %v517_v35 = vor.u32 %v516_v22, %v512_v21  ;;  %974 = vmatpush1.bf16.msra.mxu0 %v1251_v27  ;;  %1226 = vmatpush1.bf16.msra.mxu1 %v1251_v27  ;;  %v530_v43 = vrot.slane %v528_v33, 1  ;;  %v542_v47 = vshll.u32 %v489_v44, 16  ;;  %v535_v48 = vshll.u32 %v488_v45, 16  ;;  %v499_v54 = vld [vmem:[#allocation2 + $0x28] sm:$0x1e] }
  0x2f   : > { %v472_v40 = vsel %vm1397_vm9, %v438_v37, %v471_v34  ;;  %975 = vmatprep.subr.bf16.mxu0 %v1262_v0  ;;  %1203 = vmatprep.mubr.msk.bf16.mxu0 %vm324_vm0, %v1187_v38  ;;  %v524_v41 = vor.u32 %v523_v36, %v519_v32  ;;  %v540_v49 = vshrl.u32 %v489_v44, 16  ;;  %v533_v51 = vshrl.u32 %v488_v45, 16  ;;  %v498_v55 = vld [vmem:[#allocation2 + $0x20] sm:$0x1e]  ;;  %v490_v57 = vld [vmem:[#allocation2 + $0x30] sm:$0x1f] }
  0x30   : > { %594 = vrot.lane.b32.xlu1 %v585_v12, %s1263_s7  ;;  %657 = vrot.lane.b32.xlu0 %v585_v12, %s1267_s26  ;;  %473 = vst [vmem:[#allocation2 + $0x40] sm:$0x1f] %v472_v40  ;;  %v531_v46 = vor.u32 %v530_v43, %v526_v42  ;;  %v544_v50 = vrot.slane %v542_v47, 1  ;;  %v537_v52 = vrot.slane %v535_v48, 1  ;;  %v1503_v56 = vrot.slane %v499_v54, 1 }
  0x31   : > { %1218 = vmatprep.subr.bf16.mxu1 %v1262_v0  ;;  %v1505_v3 = vrot.slane %v498_v55, 1  ;;  %v1511_v1 = vld [vmem:[#allocation2 + $0x20] sm:$0xf]  ;;  %v549_v58 = vshll.u32 %v490_v57, 16  ;;  %v1517_v59 = vld [vmem:[#allocation2 + $0x30] sm:$0xf] }
  0x32   : > { %976 = vmatpush1.bf16.msra.mxu0 %v1252_v39  ;;  %1227 = vmatpush1.bf16.msra.mxu1 %v1252_v39  ;;  %v538_v53 = vor.u32 %v537_v52, %v533_v51  ;;  %v1519_v60 = vld [vmem:[#allocation2 + $0x28] sm:$0xf]  ;;  %v547_v61 = vshrl.u32 %v490_v57, 16  ;;  %v500_v2 = vld [vmem:[#allocation2 + $0x30] sm:$0x1e] }
  0x33   : > { %977 = vmatprep.subr.bf16.mxu0 %v1262_v0  ;;  %1219 = vmatprep.subr.bf16.mxu1 %v1262_v0  ;;  %v545_v0 = vor.u32 %v544_v50, %v540_v49  ;;  %v551_v5 = vrot.slane %v549_v58, 1  ;;  %v590_v6 = vrot.slane %v500_v2, 1  ;;  %v501_v7 = vld [vmem:[#allocation2 + $0x38] sm:$0x1e]  ;;  %v1189_v8 = vcombine.low %v1505_v3, %v1503_v56  ;;  %v493_v26 = vld [vmem:[#allocation2 + $0x48] sm:$0x1f] }
  0x34   : > { %659 = vrot.lane.b32.xlu1 %v586_v20, %s1267_s26  ;;  %596 = vrot.lane.b32.xlu0 %v586_v20, %s1263_s7  ;;  %v491_v9 = vld [vmem:[#allocation2 + $0x38] sm:$0x1f]  ;;  %v591_v11 = vrot.slane %v501_v7, 1  ;;  %v691_v29 = vshrl.u32 %v493_v26, 16  ;;  %v483_v31 = vld [vmem:[#allocation2 + $0x48] sm:$0xf] }
  0x35   : > { %v552_v62 = vor.u32 %v551_v5, %v547_v61  ;;  %v556_v13 = vshll.u32 %v491_v9, 16  ;;  %v1542_v14 = vld [vmem:[#allocation2 + $0x38] sm:$0xf]  ;;  %v554_v15 = vshrl.u32 %v491_v9, 16  ;;  %v474_v43 = vld [vmem:[#allocation2] sm:$0xf] }
  0x36   : > { %978 = vmatpush1.bf16.msra.mxu0 %v1253_v23  ;;  %1228 = vmatpush1.bf16.msra.mxu1 %v1253_v23  ;;  %v1191_v12 = vcombine.low %v590_v6, %v591_v11 }
  0x37   : > { %v558_v16 = vrot.slane %v556_v13, 1  ;;  %v492_v18 = vld [vmem:[#allocation2 + $0x40] sm:$0x1f] }
  0x38   : > { %598 = vrot.lane.b32.xlu1 %v1470_v28, %s1263_s7  ;;  %562 = vrot.lane.b32.xlu0 %v517_v35, %s1264_s8  ;;  %v635_v19 = vshll.u32 %v492_v18, 16  ;;  %v633_v20 = vshrl.u32 %v492_v18, 16  ;;  %v482_v22 = vld [vmem:[#allocation2 + $0x40] sm:$0xf] }
  0x39   : > { %1205 = vmatprep.mubr.msk.bf16.mxu1 %vm324_vm0, %v1191_v12  ;;  %v559_v17 = vor.u32 %v558_v16, %v554_v15  ;;  %v1560_v25 = vld [vmem:[#allocation2 + $0x40] sm:$0x1e] }
  0x3a   : > { %v637_v21 = vrot.slane %v635_v19, 1  ;;  %v656_v27 = vrot.slane %v1560_v25, 1 }
  0x3c   : > { %641 = vrot.lane.b32.xlu1 %v524_v41, %s1268_s11  ;;  %639 = vrot.lane.b32.xlu0 %v517_v35, %s1268_s11  ;;  %v638_v24 = vor.u32 %v637_v21, %v633_v20 }
  0x40   : > { %699 = vrot.lane.b32.xlu1 %v531_v46, %s1269_s12  ;;  %697 = vrot.lane.b32.xlu0 %v524_v41, %s1269_s12 }
  0x44   : > { %566 = vrot.lane.b32.xlu1 %v531_v46, %s1264_s8  ;;  %564 = vrot.lane.b32.xlu0 %v524_v41, %s1264_s8 }
  0x48   : > { %570 = vrot.lane.b32.xlu1 %v545_v0, %s1264_s8  ;;  %568 = vrot.lane.b32.xlu0 %v538_v53, %s1264_s8 }
  0x4c   : > { %602 = vrot.lane.b32.xlu1 %v1503_v56, %s1263_s7  ;;  %600 = vrot.lane.b32.xlu0 %v1505_v3, %s1263_s7 }
  0x50   : > { %622 = vrot.lane.b32.xlu1 %v1511_v1, %s1265_s17  ;;  %620 = vrot.lane.b32.xlu0 %v1452_v4, %s1265_s17 }
  0x54   : > { %626 = vrot.lane.b32.xlu1 %v1517_v59, %s1265_s17  ;;  %624 = vrot.lane.b32.xlu0 %v1519_v60, %s1265_s17 }
  0x58   : > { %645 = vrot.lane.b32.xlu1 %v538_v53, %s1268_s11  ;;  %643 = vrot.lane.b32.xlu0 %v531_v46, %s1268_s11 }
  0x5c   : > { %649 = vrot.lane.b32.xlu1 %v552_v62, %s1268_s11  ;;  %647 = vrot.lane.b32.xlu0 %v545_v0, %s1268_s11 }
  0x60   : > { %663 = vrot.lane.b32.xlu1 %v1505_v3, %s1267_s26  ;;  %661 = vrot.lane.b32.xlu0 %v1470_v28, %s1267_s26  ;;  %v693_v28 = vshll.u32 %v493_v26, 16 }
  0x62   : > { %v695_v30 = vrot.slane %v693_v28, 1 }
  0x64   : > { %667 = vrot.lane.b32.xlu1 %v590_v6, %s1267_s26  ;;  %665 = vrot.lane.b32.xlu0 %v1503_v56, %s1267_s26  ;;  %v696_v32 = vor.u32 %v695_v30, %v691_v29 }
  0x68   : > { %680 = vrot.lane.b32.xlu1 %v1519_v60, %s1266_s20  ;;  %678 = vrot.lane.b32.xlu0 %v1511_v1, %s1266_s20 }
  0x6c   : > { %684 = vrot.lane.b32.xlu1 %v1542_v14, %s1266_s20  ;;  %682 = vrot.lane.b32.xlu0 %v1517_v59, %s1266_s20 }
  0x70   : > { %703 = vrot.lane.b32.xlu1 %v545_v0, %s1269_s12  ;;  %701 = vrot.lane.b32.xlu0 %v538_v53, %s1269_s12 }
  0x74   : > { %707 = vrot.lane.b32.xlu1 %v559_v17, %s1269_s12  ;;  %705 = vrot.lane.b32.xlu0 %v552_v62, %s1269_s12 }
  0x78   : > { %574 = vrot.lane.b32.xlu1 %v559_v17, %s1264_s8  ;;  %572 = vrot.lane.b32.xlu0 %v552_v62, %s1264_s8 }
  0x7c   : > { %606 = vrot.lane.b32.xlu1 %v591_v11, %s1263_s7  ;;  %604 = vrot.lane.b32.xlu0 %v590_v6, %s1263_s7 }
  0x80   : > { %630 = vrot.lane.b32.xlu1 %v482_v22, %s1265_s17  ;;  %628 = vrot.lane.b32.xlu0 %v1542_v14, %s1265_s17 }
  0x83   : > { %v593_v34 = vpop.permute.xlu1 %592 }
  0x84   : > { %653 = vrot.lane.b32.xlu1 %v638_v24, %s1268_s11  ;;  %651 = vrot.lane.b32.xlu0 %v559_v17, %s1268_s11 }
  0x88   : > { %671 = vrot.lane.b32.xlu1 %v656_v27, %s1267_s26  ;;  %669 = vrot.lane.b32.xlu0 %v591_v11, %s1267_s26  ;;  %v561_v33 = vpop.permute.xlu0 %560 }
  0x89   : > { %v717_v44 = vsel %vm324_vm0, %v474_v43, %v561_v33 }
  0x8a   : > { %v741_v48 = vsel %vm739_vm10, %v717_v44, %v593_v34 }
  0x8c   : > { %688 = vrot.lane.b32.xlu1 %v483_v31, %s1266_s20  ;;  %686 = vrot.lane.b32.xlu0 %v482_v22, %s1266_s20  ;;  %v503_v31 = vld [vmem:[#allocation2 + $0x48] sm:$0x1e] }
  0x90   : > { %711 = vrot.lane.b32.xlu1 %v696_v32, %s1269_s12  ;;  %709 = vrot.lane.b32.xlu0 %v638_v24, %s1269_s12 }
  0x9a   : > { %v619_v35 = vpop.permute.xlu1 %618  ;;  %v617_v36 = vpop.permute.xlu0 %616 }
  0x9b   : > { %v758_v50 = vsel %vm756_vm11, %v741_v48, %v617_v36 }
  0x9e   : > { %v677_v37 = vpop.permute.xlu1 %676  ;;  %v675_v38 = vpop.permute.xlu0 %674 }
  0xa2   : > { %v595_v39 = vpop.permute.xlu1 %594  ;;  %v658_v40 = vpop.permute.xlu0 %657 }
  0xa6   : > { %v660_v41 = vpop.permute.xlu1 %659  ;;  %v597_v42 = vpop.permute.xlu0 %596 }
  0xaa   : > { %v599_v45 = vpop.permute.xlu1 %598  ;;  %v563_v23 = vpop.permute.xlu0 %562 }
  0xab   : > { %v720_v46 = vsel %vm324_vm0, %v1443_v10, %v563_v23 }
  0xac   : > { %v743_v47 = vsel %vm739_vm10, %v720_v46, %v595_v39 }
  0xad   : > { %v760_v49 = vsel %vm756_vm11, %v743_v47, %v619_v35 }
  0xae   : > { %v642_v51 = vpop.permute.xlu1 %641  ;;  %v640_v52 = vpop.permute.xlu0 %639 }
  0xaf   : > { %v777_v0 = vsel %vm773_vm12, %v760_v49, %v642_v51  ;;  %v775_v53 = vsel %vm773_vm12, %v758_v50, %v640_v52 }
  0xb0   : > { %v794_v54 = vsel %vm790_vm13, %v777_v0, %v660_v41  ;;  %v792_v10 = vsel %vm790_vm13, %v775_v53, %v658_v40 }
  0xb1   : > { %v811_v55 = vsel %vm807_vm14, %v794_v54, %v677_v37  ;;  %v809_v57 = vsel %vm807_vm14, %v792_v10, %v675_v38  ;;  %v714_v38 = vrot.slane %v503_v31, 1 }
  0xb2   : > { %v700_v58 = vpop.permute.xlu1 %699  ;;  %v698_v61 = vpop.permute.xlu0 %697 }
  0xb3   : > { %v828_v5 = vsel %vm824_vm15, %v811_v55, %v700_v58  ;;  %v826_v62 = vsel %vm824_vm15, %v809_v57, %v698_v61  ;;  %v1193_v58 = vcombine.low %v656_v27, %v714_v38 }
  0xb4   : > { %v1186_v2 = vcombine.low %v826_v62, %v828_v5 }
  0xb6   : > { %v567_v6 = vpop.permute.xlu1 %566  ;;  %994 = vmatmul.mubr.bf16.vlgmr.msra.gmra.mrb[0].mxu0 %v1186_v2  ;;  %v565_v7 = vpop.permute.xlu0 %564 }
  0xb7   : > { %1204 = vmatprep.mubr.msk.bf16.mxu0 %vm324_vm0, %v1189_v8  ;;  %v726_v3 = vsel %vm324_vm0, %v1452_v4, %v567_v6  ;;  %v723_v8 = vsel %vm324_vm0, %v1441_v63, %v565_v7 }
  0xb8   : > { %v747_v32 = vsel %vm739_vm10, %v726_v3, %v599_v45  ;;  %v745_v33 = vsel %vm739_vm10, %v723_v8, %v597_v42 }
  0xba   : > { %v571_v9 = vpop.permute.xlu1 %570  ;;  %v569_v11 = vpop.permute.xlu0 %568 }
  0xbb   : > { %v732_v4 = vsel %vm324_vm0, %v1519_v60, %v571_v9  ;;  %v729_v63 = vsel %vm324_vm0, %v1511_v1, %v569_v11 }
  0xbe   : > { %v603_v12 = vpop.permute.xlu1 %602  ;;  %v601_v13 = vpop.permute.xlu0 %600 }
  0xbf   : > { %v751_v43 = vsel %vm739_vm10, %v732_v4, %v603_v12  ;;  %v749_v44 = vsel %vm739_vm10, %v729_v63, %v601_v13 }
  0xc2   : > { %v623_v15 = vpop.permute.xlu1 %622  ;;  %v621_v16 = vpop.permute.xlu0 %620 }
  0xc3   : > { %v764_v36 = vsel %vm756_vm11, %v747_v32, %v623_v15  ;;  %v762_v37 = vsel %vm756_vm11, %v745_v33, %v621_v16 }
  0xc6   : > { %v627_v17 = vpop.permute.xlu1 %626  ;;  %v625_v18 = vpop.permute.xlu0 %624 }
  0xc7   : > { %v768_v48 = vsel %vm756_vm11, %v751_v43, %v627_v17  ;;  %v766_v60 = vsel %vm756_vm11, %v749_v44, %v625_v18 }
  0xca   : > { %v646_v19 = vpop.permute.xlu1 %645  ;;  %v644_v20 = vpop.permute.xlu0 %643 }
  0xcb   : > { %v781_v39 = vsel %vm773_vm12, %v764_v36, %v646_v19  ;;  %v779_v40 = vsel %vm773_vm12, %v762_v37, %v644_v20 }
  0xce   : > { %v650_v21 = vpop.permute.xlu1 %649  ;;  %v648_v22 = vpop.permute.xlu0 %647 }
  0xcf   : > { %v785_v50 = vsel %vm773_vm12, %v768_v48, %v650_v21  ;;  %v783_v51 = vsel %vm773_vm12, %v766_v60, %v648_v22 }
  0xd2   : > { %v664_v24 = vpop.permute.xlu1 %663  ;;  %v662_v26 = vpop.permute.xlu0 %661 }
  0xd3   : > { %v798_v41 = vsel %vm790_vm13, %v781_v39, %v664_v24  ;;  %v796_v42 = vsel %vm790_vm13, %v779_v40, %v662_v26 }
  0xd6   : > { %v668_v28 = vpop.permute.xlu1 %667  ;;  %v666_v29 = vpop.permute.xlu0 %665 }
  0xd7   : > { %v802_v0 = vsel %vm790_vm13, %v785_v50, %v668_v28  ;;  %v800_v53 = vsel %vm790_vm13, %v783_v51, %v666_v29 }
  0xda   : > { %v681_v30 = vpop.permute.xlu1 %680  ;;  %v679_v56 = vpop.permute.xlu0 %678 }
  0xdb   : > { %v815_v45 = vsel %vm807_vm14, %v798_v41, %v681_v30  ;;  %v813_v23 = vsel %vm807_vm14, %v796_v42, %v679_v56 }
  0xde   : > { %v685_v34 = vpop.permute.xlu1 %684  ;;  %v683_v35 = vpop.permute.xlu0 %682 }
  0xdf   : > { %v819_v54 = vsel %vm807_vm14, %v802_v0, %v685_v34  ;;  %v817_v10 = vsel %vm807_vm14, %v800_v53, %v683_v35 }
  0xe2   : > { %v704_v46 = vpop.permute.xlu1 %703  ;;  %v702_v47 = vpop.permute.xlu0 %701 }
  0xe3   : > { %v832_v1 = vsel %vm824_vm15, %v815_v45, %v704_v46  ;;  %v830_v49 = vsel %vm824_vm15, %v813_v23, %v702_v47 }
  0xe4   : > { %v1188_v52 = vcombine.low %v830_v49, %v832_v1 }
  0xe6   : > { %v708_v55 = vpop.permute.xlu1 %707  ;;  %1002 = vmatmul.mubr.bf16.gmra.mrb[4].mxu0 %v1188_v52  ;;  %v706_v57 = vpop.permute.xlu0 %705 }
  0xe7   : > { %v836_v61 = vsel %vm824_vm15, %v819_v54, %v708_v55  ;;  %v834_v5 = vsel %vm824_vm15, %v817_v10, %v706_v57 }
  0xe8   : > { %v1190_v62 = vcombine.low %v834_v5, %v836_v61 }
  0xea   : > { %v575_v2 = vpop.permute.xlu1 %574  ;;  %1010 = vmatmul.mubr.bf16.vlgmr.msra.gmra.mrb[0].mxu1 %v1190_v62  ;;  %v573_v6 = vpop.permute.xlu0 %572 }
  0xeb   : > { %1206 = vmatprep.mubr.msk.bf16.mxu1 %vm324_vm0, %v1193_v58  ;;  %v738_v25 = vsel %vm324_vm0, %v1542_v14, %v575_v2  ;;  %v735_v27 = vsel %vm324_vm0, %v1517_v59, %v573_v6 }
  0xee   : > { %v607_v7 = vpop.permute.xlu1 %606  ;;  %v605_v9 = vpop.permute.xlu0 %604 }
  0xef   : > { %v755_v18 = vsel %vm739_vm10, %v738_v25, %v607_v7  ;;  %v753_v19 = vsel %vm739_vm10, %v735_v27, %v605_v9 }
  0xf2   : > { %v631_v11 = vpop.permute.xlu1 %630  ;;  %v629_v12 = vpop.permute.xlu0 %628 }
  0xf3   : > { %v772_v22 = vsel %vm756_vm11, %v755_v18, %v631_v11  ;;  %v770_v24 = vsel %vm756_vm11, %v753_v19, %v629_v12 }
  0xf6   : > { %v654_v13 = vpop.permute.xlu1 %653  ;;  %v652_v15 = vpop.permute.xlu0 %651 }
  0xf7   : > { %v789_v26 = vsel %vm773_vm12, %v772_v22, %v654_v13  ;;  %v787_v28 = vsel %vm773_vm12, %v770_v24, %v652_v15 }
  0xfa   : > { %v672_v16 = vpop.permute.xlu1 %671  ;;  %v670_v17 = vpop.permute.xlu0 %669 }
  0xfb   : > { %v806_v14 = vsel %vm790_vm13, %v789_v26, %v672_v16  ;;  %v804_v29 = vsel %vm790_vm13, %v787_v28, %v670_v17 }
  0xfe   : > { %v689_v20 = vpop.permute.xlu1 %688  ;;  %v687_v21 = vpop.permute.xlu0 %686 }
  0xff   : > { %v823_v59 = vsel %vm807_vm14, %v806_v14, %v689_v20  ;;  %v821_v30 = vsel %vm807_vm14, %v804_v29, %v687_v21 }
 0x102   : > { %v712_v56 = vpop.permute.xlu1 %711  ;;  %v710_v3 = vpop.permute.xlu0 %709 }
 0x103   : > { %v840_v8 = vsel %vm824_vm15, %v823_v59, %v712_v56  ;;  %v838_v31 = vsel %vm824_vm15, %v821_v30, %v710_v3 }
 0x104   : > { %v1192_v32 = vcombine.low %v838_v31, %v840_v8 }
 0x106   : > { %1018 = vmatmul.mubr.bf16.gmra.mrb[4].mxu1 %v1192_v32 }
 0x189   : > { %v995_v33 = vpop.f32.mrb[0].mxu0 }
 0x18a   : > { %1026 = vst [vmem:[%s1648_s13] sm:$0xff] %v995_v33  ;;  %v997_v34 = vpop.f32.mrb[1].mxu0  ;;  %v1048_v36 = vmul.f32 %v995_v33, %v995_v33 }
 0x18b   : > { %v998_v35 = vpop.f32.mrb[2].mxu0 }
 0x18c   : > { %1027 = vst [vmem:[%s1648_s13 + $0x8] sm:$0xff] %v998_v35  ;;  %v1034_v37 = vadd.f32 %v998_v35, %v995_v33  ;;  %v1049_v38 = vmul.f32 %v998_v35, %v998_v35  ;;  %v1000_v39 = vpop.f32.mrb[3].mxu0 }
 0x18e   : > { %v1056_v40 = vadd.f32 %v1049_v38, %v1048_v36 }
 0x1b9   : > { %v1003_v4 = vpop.f32.mrb[4].mxu0 }
 0x1ba   : > { %1028 = vst [vmem:[%s1648_s13 + $0x10] sm:$0xff] %v1003_v4  ;;  %v1035_v63 = vadd.f32 %v1034_v37, %v1003_v4  ;;  %v1050_v41 = vmul.f32 %v1003_v4, %v1003_v4  ;;  %v1005_v42 = vpop.f32.mrb[5].mxu0 }
 0x1bb   : > { %v1006_v43 = vpop.f32.mrb[6].mxu0 }
 0x1bc   : > { %v1057_v44 = vadd.f32 %v1056_v40, %v1050_v41  ;;  %1029 = vst [vmem:[%s1648_s13 + $0x18] sm:$0xff] %v1006_v43  ;;  %v1036_v45 = vadd.f32 %v1035_v63, %v1006_v43  ;;  %v1051_v23 = vmul.f32 %v1006_v43, %v1006_v43  ;;  %v1008_v46 = vpop.f32.mrb[7].mxu0 }
 0x1bd   : > { %v1011_v47 = vpop.f32.mrb[0].mxu1 }
 0x1be   : > { %v1058_v48 = vadd.f32 %v1057_v44, %v1051_v23  ;;  %1030 = vst [vmem:[%s1648_s13 + $0x20] sm:$0xff] %v1011_v47  ;;  %v1037_v60 = vadd.f32 %v1036_v45, %v1011_v47  ;;  %v1052_v1 = vmul.f32 %v1011_v47, %v1011_v47  ;;  %v1013_v49 = vpop.f32.mrb[1].mxu1 }
 0x1bf   : > { %v1014_v50 = vpop.f32.mrb[2].mxu1 }
 0x1c0   : > { %v1059_v51 = vadd.f32 %v1058_v48, %v1052_v1  ;;  %1031 = vst [vmem:[%s1648_s13 + $0x28] sm:$0xff] %v1014_v50  ;;  %v1038_v52 = vadd.f32 %v1037_v60, %v1014_v50  ;;  %v1053_v0 = vmul.f32 %v1014_v50, %v1014_v50  ;;  %v1016_v53 = vpop.f32.mrb[3].mxu1 }
 0x1c2   : > { %v1060_v54 = vadd.f32 %v1059_v51, %v1053_v0 }
 0x1d9   : > { %v1019_v10 = vpop.f32.mrb[4].mxu1 }
 0x1da   : > { %1032 = vst [vmem:[%s1648_s13 + $0x30] sm:$0xff] %v1019_v10  ;;  %v1039_v55 = vadd.f32 %v1038_v52, %v1019_v10  ;;  %v1054_v57 = vmul.f32 %v1019_v10, %v1019_v10  ;;  %v1021_v58 = vpop.f32.mrb[5].mxu1 }
 0x1db   : > { %v1022_v61 = vpop.f32.mrb[6].mxu1 }
 0x1dc   : > { %v1061_v5 = vadd.f32 %v1060_v54, %v1054_v57  ;;  %1033 = vst [vmem:[%s1648_s13 + $0x38] sm:$0xff] %v1022_v61  ;;  %v1040_v62 = vadd.f32 %v1039_v55, %v1022_v61  ;;  %v1055_v2 = vmul.f32 %v1022_v61, %v1022_v61  ;;  %v1024_v6 = vpop.f32.mrb[7].mxu1 }
 0x1de   : > { %v1041_v7 = vrot.slane %v1040_v62, 4  ;;  %v1062_v9 = vadd.f32 %v1061_v5, %v1055_v2 }
 0x1e0   : > { %v1042_v11 = vadd.f32 %v1041_v7, %v1040_v62  ;;  %v1063_v12 = vrot.slane %v1062_v9, 4 }
 0x1e2   : > { %v1043_v13 = vrot.slane %v1042_v11, 2  ;;  %v1064_v15 = vadd.f32 %v1063_v12, %v1062_v9 }
 0x1e4   : > { %v1044_v16 = vadd.f32 %v1043_v13, %v1042_v11  ;;  %v1065_v17 = vrot.slane %v1064_v15, 2 }
 0x1e6   : > { %v1045_v25 = vrot.slane %v1044_v16, 1  ;;  %v1066_v27 = vadd.f32 %v1065_v17, %v1064_v15 }
 0x1e8   : > { %v1046_v18 = vadd.f32 %v1045_v25, %v1044_v16  ;;  %v1067_v19 = vrot.slane %v1066_v27, 1 }
 0x1ea   : > { %1047 = vst [vmem:[%s265_s15] sm:$0x1] %v1046_v18  ;;  %v1068_v20 = vadd.f32 %v1067_v19, %v1066_v27 }
 0x1ec   : > { %1069 = vst [vmem:[%s268_s18] sm:$0x1] %v1068_v20 }
 0x1ed PF: > { %s17_s21 = sadd.s32 1, %s1260_s21  }
 0x1ee   : > { %p14_p4 = scmp.ge.s32.totalorder %s17_s21, 4  }
 0x1f0   :  { %16 = sbr.rel (!%p14_p4) target bundleno = 1 (0x1), region = 92 }

// kernel: vgg_forward.13
= control target key start
LH: loop header
LB: loop body
LE: loop exit
PB: predicated region body
PF: predicated region fallthrough
CT: control target
= control target key end

     0   :  { %12 = vsyncpa [#allocation4], 0  ;;  %s1277_s24 = smov 0   ;;  %s1417_s0 = inlined_call_operand.vmem [shape: f32[2,2048], index: 0, kind: input, shape index: {}]   ;;  %s1418_s1 = inlined_call_operand.vmem [shape: bf16[2048,128], index: 1, kind: input, shape index: {}]   ;;  %s1419_s2 = inlined_call_operand.vmem [shape: f32[1,128], index: 2, kind: input, shape index: {}]   ;;  %s1420_s3 = inlined_call_operand.vmem [shape: bf16[128,128], index: 3, kind: input, shape index: {}]   ;;  %s1421_s4 = inlined_call_operand.vmem [shape: f32[1,128], index: 4, kind: input, shape index: {}]   ;;  %s1422_s5 = inlined_call_operand.vmem [shape: bf16[128,128], index: 5, kind: input, shape index: {}]   ;;  %s1423_s6 = inlined_call_operand.vmem [shape: f32[1,128], index: 6, kind: input, shape index: {}]   ;;  %s1424_s7 = inlined_call_operand.hbm [shape: f32[2,128], index: 7, kind: output, shape index: {}]  }
   0x1 LB: > { %s1283_s25 = sadd.s32 4294967295, %s1230_s24   ;;  %p962_p0 = scmp.ge.s32.totalorder %s1230_s24, 1  ;;  %s1230_s24 = sphi %s1277_s24, %s18_s24  }
   0x2   : > { %p245_p1 = scmp.lt.s32.totalorder %s1230_s24, 5 }
   0x4   : > { %p246_p2 = pnand %p962_p0, %p245_p1 }
   0x5   : > { %s963_s26 = sshll.u32 (!%p246_p2), %s1283_s25, 2  ;;  %s965_s27 = sshll.u32 (!%p246_p2), %s1283_s25, 6 }
   0x6   : > { %249 = sbr.rel (%p246_p2) target bundleno = 749 (0x2ed), region = 48  ;;  %p278_p3 = scmp.lt.s32.totalorder (!%p246_p2), %s963_s26, 15 }
   0x7   : > { %p284_p4 = scmp.lt.s32.totalorder (!%p246_p2), %s965_s27, 255  ;;  %p967_p5 = scmp.ne.s32.totalorder (!%p246_p2), %s1283_s25, 0 }
   0xd   : > { %s1426_s26 = smov (!%p278_p3, %s963_s26), 15  ;;  %s1428_s27 = smov (!%p284_p4, %s965_s27), 255 }
   0xe   : > { %s964_s28 = sshll.u32 %s1426_s26, 1  ;;  %s966_s9 = sshll.u32 %s1428_s27, 2  ;;  %v1232_v0 = vmov (!%p967_p5), 0.0  }
   0xf   : > { %s1292_s8 = scalar_lea.vmem %s1417_s0, %s964_s28  ;;  %s1297_s12 = scalar_lea.vmem %s1418_s1, %s966_s9  ;;  %294 = vst [vmem:[#allocation2] sm:$0x3] (!%p967_p5), %v1232_v0 }
  0x10   : > { %293 = sbr.rel (%p967_p5) target bundleno = 23 (0x17), region = 52 }
  0x17 PF: > { %v1145_v1 = vld [vmem:[%s1297_s12 + $0x40] sm:$0xff]   ;;  %v1149_v5 = vld [vmem:[%s1297_s12 + $0x48] sm:$0xff]   ;;  %v1153_v9 = vld [vmem:[%s1297_s12 + $0x50] sm:$0xff]   ;;  %v302_v31 = vlaneseq  ;;  %v1233_v35 = vmov 1983009808   ;;  %p1000_p6 = scmp.ne.s32.totalorder %s1283_s25, 3 }
  0x18   : > { %v1146_v2 = vld [vmem:[%s1297_s12 + $0xc0] sm:$0xff]   ;;  %1024 = vmatprep.subr.bf16.mxu0 %v1145_v1  ;;  %v1150_v6 = vld [vmem:[%s1297_s12 + $0xc8] sm:$0xff]   ;;  %v1154_v10 = vld [vmem:[%s1297_s12 + $0xd0] sm:$0xff]   ;;  %v300_v36 = vunpack.c.l.s4 %v1233_v35  ;;  %v1234_v63 = vmov (!%p1000_p6), 0.0   ;;  %vm1235_vm0 = vmmov (!%p1000_p6), 0  }
  0x19   : > { %v1147_v3 = vld [vmem:[%s1297_s12] sm:$0xff]   ;;  %1046 = vmatprep.subr.bf16.mxu1 %v1146_v2  ;;  %v1151_v7 = vld [vmem:[%s1297_s12 + $0x8] sm:$0xff]   ;;  %v1155_v11 = vld [vmem:[%s1297_s12 + $0x10] sm:$0xff]   ;;  %v303_v37 = vshrl.u32 %v302_v31, 7 }
  0x1a   : > { %v1148_v4 = vld [vmem:[%s1297_s12 + $0x80] sm:$0xff]   ;;  %1025 = vmatpush3.bf16.msra.mxu0 %v1147_v3  ;;  %v1152_v8 = vld [vmem:[%s1297_s12 + $0x88] sm:$0xff]   ;;  %v1156_v12 = vld [vmem:[%s1297_s12 + $0x90] sm:$0xff]   ;;  %v301_v38 = vunpack.c.0.s8 %v300_v36 }
  0x1b   : > { %1047 = vmatpush3.bf16.msra.mxu1 %v1148_v4  ;;  %1026 = vmatprep.subr.bf16.mxu0 %v1149_v5  ;;  %v1157_v13 = vld [vmem:[%s1297_s12 + $0x58] sm:$0xff]   ;;  %v1161_v17 = vld [vmem:[%s1297_s12 + $0x60] sm:$0xff]   ;;  %v1165_v21 = vld [vmem:[%s1297_s12 + $0x68] sm:$0xff]  }
  0x1c   : > { %1048 = vmatprep.subr.bf16.mxu1 %v1150_v6  ;;  %v1158_v14 = vld [vmem:[%s1297_s12 + $0xd8] sm:$0xff]   ;;  %v1162_v18 = vld [vmem:[%s1297_s12 + $0xe0] sm:$0xff]   ;;  %v1166_v22 = vld [vmem:[%s1297_s12 + $0xe8] sm:$0xff]   ;;  %v304_v40 = vsub.s32 %v301_v38, %v303_v37 }
  0x1d   : > { %v1159_v15 = vld [vmem:[%s1297_s12 + $0x18] sm:$0xff]   ;;  %v1163_v19 = vld [vmem:[%s1297_s12 + $0x20] sm:$0xff]   ;;  %v1167_v23 = vld [vmem:[%s1297_s12 + $0x28] sm:$0xff]  }
  0x1e   : > { %1027 = vmatpush3.bf16.msra.mxu0 %v1151_v7  ;;  %v1160_v16 = vld [vmem:[%s1297_s12 + $0x98] sm:$0xff]   ;;  %v1164_v20 = vld [vmem:[%s1297_s12 + $0xa0] sm:$0xff]   ;;  %v1168_v24 = vld [vmem:[%s1297_s12 + $0xa8] sm:$0xff]  }
  0x1f   : > { %1049 = vmatpush3.bf16.msra.mxu1 %v1152_v8  ;;  %1028 = vmatprep.subr.bf16.mxu0 %v1153_v9  ;;  %v1169_v25 = vld [vmem:[%s1297_s12 + $0x70] sm:$0xff]   ;;  %v1173_v29 = vld [vmem:[%s1297_s12 + $0x78] sm:$0xff]   ;;  %v296_v34 = vld [vmem:[%s1292_s8] sm:$0xff] }
  0x20   : > { %1050 = vmatprep.subr.bf16.mxu1 %v1154_v10  ;;  %v1170_v26 = vld [vmem:[%s1297_s12 + $0xf0] sm:$0xff]   ;;  %v1174_v30 = vld [vmem:[%s1297_s12 + $0xf8] sm:$0xff]   ;;  %v298_v39 = vcombine.high %v296_v34, %v296_v34  ;;  %v305_v41 = vrot.slane %v296_v34, %v304_v40  ;;  %v295_v57 = vld [vmem:[#allocation2] sm:$0x3] }
  0x21   : > { %v1171_v27 = vld [vmem:[%s1297_s12 + $0x30] sm:$0xff]   ;;  %v1175_v32 = vld [vmem:[%s1297_s12 + $0x38] sm:$0xff]   ;;  %v1178_v62 = vld [vmem:[%s1420_s3] sm:$0xff] (!%p1000_p6)  }
  0x22   : > { %1029 = vmatpush3.bf16.msra.mxu0 %v1155_v11  ;;  %v1172_v28 = vld [vmem:[%s1297_s12 + $0xb0] sm:$0xff]   ;;  %v1176_v33 = vld [vmem:[%s1297_s12 + $0xb8] sm:$0xff]   ;;  %v312_v42 = vrot.slane %v298_v39, %v304_v40  ;;  %v313_v43 = vcombine.high %v305_v41, %v305_v41  ;;  %v319_v45 = vpack.c.bf16 %v305_v41, %v305_v41  ;;  %v1179_v0 = vld [vmem:[%s1420_s3 + $0x8] sm:$0xff] (!%p1000_p6)  }
  0x23   : > { %1051 = vmatpush3.bf16.msra.mxu1 %v1156_v12  ;;  %1030 = vmatprep.subr.bf16.mxu0 %v1157_v13  ;;  %v1180_v1 = vld [vmem:[%s1420_s3 + $0x10] sm:$0xff] (!%p1000_p6)   ;;  %v1186_v2 = vld [vmem:[%s1422_s5] sm:$0xff] (!%p1000_p6)   ;;  %v1181_v3 = vld [vmem:[%s1420_s3 + $0x18] sm:$0xff] (!%p1000_p6)  }
  0x24   : > { %1052 = vmatprep.subr.bf16.mxu1 %v1158_v14  ;;  %v314_v44 = vcombine.high %v312_v42, %v312_v42  ;;  %v321_v46 = vpack.c.bf16 %v312_v42, %v312_v42  ;;  %v320_v47 = vpack.c.bf16 %v313_v43, %v313_v43  ;;  %v1187_v4 = vld [vmem:[%s1422_s5 + $0x8] sm:$0xff] (!%p1000_p6)   ;;  %v1182_v5 = vld [vmem:[%s1420_s3 + $0x20] sm:$0xff] (!%p1000_p6)   ;;  %v1188_v6 = vld [vmem:[%s1422_s5 + $0x10] sm:$0xff] (!%p1000_p6)  }
  0x25   : > { %v1183_v7 = vld [vmem:[%s1420_s3 + $0x28] sm:$0xff] (!%p1000_p6)   ;;  %v1001_v9 = vld [vmem:[%s1419_s2] ss:$0 sm:$0xff] (!%p1000_p6)  ;;  %v1189_v10 = vld [vmem:[%s1422_s5 + $0x18] sm:$0xff] (!%p1000_p6)  }
  0x26   : > { %1031 = vmatpush3.bf16.msra.mxu0 %v1159_v15  ;;  %v322_v48 = vpack.c.bf16 %v314_v44, %v314_v44  ;;  %611 = vmatprep.mubr.bf16.mxu0 %v320_v47  ;;  %v1184_v12 = vld [vmem:[%s1420_s3 + $0x30] sm:$0xff] (!%p1000_p6)   ;;  %v1190_v13 = vld [vmem:[%s1422_s5 + $0x20] sm:$0xff] (!%p1000_p6)   ;;  %v1185_v15 = vld [vmem:[%s1420_s3 + $0x38] sm:$0xff] (!%p1000_p6)  }
  0x27   : > { %1053 = vmatpush3.bf16.msra.mxu1 %v1160_v16  ;;  %1032 = vmatprep.subr.bf16.mxu0 %v1161_v17  ;;  %v1191_v16 = vld [vmem:[%s1422_s5 + $0x28] sm:$0xff] (!%p1000_p6)  }
  0x28   : > { %1054 = vmatprep.subr.bf16.mxu1 %v1162_v18  ;;  %651 = vmatprep.mubr.bf16.mxu1 %v322_v48  ;;  %v1192_v18 = vld [vmem:[%s1422_s5 + $0x30] sm:$0xff] (!%p1000_p6)  }
  0x2a   : > { %1033 = vmatpush3.bf16.msra.mxu0 %v1163_v19  ;;  %v1193_v19 = vld [vmem:[%s1422_s5 + $0x38] sm:$0xff] (!%p1000_p6)  }
  0x2b   : > { %1055 = vmatpush3.bf16.msra.mxu1 %v1164_v20  ;;  %1034 = vmatprep.subr.bf16.mxu0 %v1165_v21  ;;  %v1002_v20 = vld [vmem:[%s1421_s4] ss:$0 sm:$0xff] (!%p1000_p6) }
  0x2c   : > { %1056 = vmatprep.subr.bf16.mxu1 %v1166_v22 }
  0x2e   : > { %1035 = vmatpush3.bf16.msra.mxu0 %v1167_v23 }
  0x2f   : > { %1057 = vmatpush3.bf16.msra.mxu1 %v1168_v24  ;;  %1036 = vmatprep.subr.bf16.mxu0 %v1169_v25 }
  0x30   : > { %1058 = vmatprep.subr.bf16.mxu1 %v1170_v26 }
  0x32   : > { %1037 = vmatpush3.bf16.msra.mxu0 %v1171_v27 }
  0x33   : > { %1059 = vmatpush3.bf16.msra.mxu1 %v1172_v28  ;;  %1038 = vmatprep.subr.bf16.mxu0 %v1173_v29  ;;  %v1011_v28 = vld [vmem:[%s1423_s6] ss:$0 sm:$0xff] (!%p1000_p6) }
  0x34   : > { %1060 = vmatprep.subr.bf16.mxu1 %v1174_v30 }
  0x36   : > { %1039 = vmatpush3.bf16.msra.mxu0 %v1175_v32 }
  0x37   : > { %1061 = vmatpush3.bf16.msra.mxu1 %v1176_v33  ;;  %1086 = vmatprep.subr.bf16.mxu0 (!%p1000_p6), %v1234_v63 }
  0x38   : > { %1106 = vmatprep.subr.bf16.mxu1 (!%p1000_p6), %v1234_v63 }
  0x39   : > { %612 = vmatmul.mubr.bf16.vlgmr.msra.gmra.mrb[0].mxu0 %v319_v45 }
  0x3a   : > { %652 = vmatmul.mubr.bf16.vlgmr.msra.gmra.mrb[0].mxu1 %v321_v46  ;;  %1087 = vmatpush3.bf16.msra.mxu0 (!%p1000_p6), %v1178_v62 }
  0x3b   : > { %1102 = vmatprep.mubr.msk.bf16.mxu0 (!%p1000_p6), %vm1235_vm0, %v1234_v63  ;;  %1088 = vmatprep.subr.bf16.mxu0 (!%p1000_p6), %v1234_v63 }
  0x3c   : > { %1122 = vmatprep.mubr.msk.bf16.mxu1 (!%p1000_p6), %vm1235_vm0, %v1234_v63  ;;  %1107 = vmatpush3.bf16.msra.mxu1 (!%p1000_p6), %v1186_v2 }
  0x3d   : > { %1108 = vmatprep.subr.bf16.mxu1 (!%p1000_p6), %v1234_v63 }
  0x3e   : > { %1089 = vmatpush3.bf16.msra.mxu0 (!%p1000_p6), %v1179_v0 }
  0x3f   : > { %1090 = vmatprep.subr.bf16.mxu0 (!%p1000_p6), %v1234_v63 }
  0x40   : > { %1109 = vmatpush3.bf16.msra.mxu1 (!%p1000_p6), %v1187_v4 }
  0x41   : > { %1110 = vmatprep.subr.bf16.mxu1 (!%p1000_p6), %v1234_v63 }
  0x42   : > { %1091 = vmatpush3.bf16.msra.mxu0 (!%p1000_p6), %v1180_v1 }
  0x43   : > { %1092 = vmatprep.subr.bf16.mxu0 (!%p1000_p6), %v1234_v63 }
  0x44   : > { %1111 = vmatpush3.bf16.msra.mxu1 (!%p1000_p6), %v1188_v6 }
  0x45   : > { %1112 = vmatprep.subr.bf16.mxu1 (!%p1000_p6), %v1234_v63 }
  0x46   : > { %1093 = vmatpush3.bf16.msra.mxu0 (!%p1000_p6), %v1181_v3 }
  0x47   : > { %1094 = vmatprep.subr.bf16.mxu0 (!%p1000_p6), %v1234_v63 }
  0x48   : > { %1113 = vmatpush3.bf16.msra.mxu1 (!%p1000_p6), %v1189_v10 }
  0x49   : > { %1114 = vmatprep.subr.bf16.mxu1 (!%p1000_p6), %v1234_v63 }
  0x4a   : > { %1095 = vmatpush3.bf16.msra.mxu0 (!%p1000_p6), %v1182_v5 }
  0x4b   : > { %1096 = vmatprep.subr.bf16.mxu0 (!%p1000_p6), %v1234_v63 }
  0x4c   : > { %1115 = vmatpush3.bf16.msra.mxu1 (!%p1000_p6), %v1190_v13 }
  0x4d   : > { %1116 = vmatprep.subr.bf16.mxu1 (!%p1000_p6), %v1234_v63 }
  0x4e   : > { %1097 = vmatpush3.bf16.msra.mxu0 (!%p1000_p6), %v1183_v7 }
  0x4f   : > { %1098 = vmatprep.subr.bf16.mxu0 (!%p1000_p6), %v1234_v63 }
  0x50   : > { %1117 = vmatpush3.bf16.msra.mxu1 (!%p1000_p6), %v1191_v16 }
  0x51   : > { %1118 = vmatprep.subr.bf16.mxu1 (!%p1000_p6), %v1234_v63 }
  0x52   : > { %1099 = vmatpush3.bf16.msra.mxu0 (!%p1000_p6), %v1184_v12 }
  0x53   : > { %1100 = vmatprep.subr.bf16.mxu0 (!%p1000_p6), %v1234_v63 }
  0x54   : > { %1119 = vmatpush3.bf16.msra.mxu1 (!%p1000_p6), %v1192_v18 }
  0x55   : > { %1120 = vmatprep.subr.bf16.mxu1 (!%p1000_p6), %v1234_v63 }
  0x56   : > { %1101 = vmatpush3.bf16.msra.mxu0 (!%p1000_p6), %v1185_v15 }
  0x58   : > { %1121 = vmatpush3.bf16.msra.mxu1 (!%p1000_p6), %v1193_v19 }
 0x10c   : > { %v1040_v49 = vpop.f32.mrb[0].mxu0 }
 0x10d   : > { %v1062_v50 = vpop.f32.mrb[0].mxu1  ;;  %v1041_v51 = vpop.f32.mrb[1].mxu0 }
 0x10e   : > { %v1063_v52 = vpop.f32.mrb[1].mxu1  ;;  %v1042_v53 = vadd.f32 %v1041_v51, %v1040_v49  ;;  %v1043_v55 = vpop.f32.mrb[2].mxu0 }
 0x10f   : > { %v1064_v54 = vadd.f32 %v1063_v52, %v1062_v50  ;;  %v1065_v56 = vpop.f32.mrb[2].mxu1  ;;  %v1044_v58 = vpop.f32.mrb[3].mxu0  ;;  %664 = sbr.rel (%p1000_p6) target bundleno = 724 (0x2d4), region = 56 }
 0x110   : > { %v1066_v59 = vpop.f32.mrb[3].mxu1 }
 0x111   : > { %v654_v60 = vadd.f32 %v1064_v54, %v1042_v53 }
 0x113   : > { %v659_v61 = vadd.f32 %v654_v60, %v295_v57 }
 0x115   : > { %660 = vst [vmem:[#allocation2] sm:$0x3] %v659_v61 }
 0x11c   : > { %v665_v8 = vld [vmem:[#allocation2] sm:$0x3] }
 0x11d   : > { %v673_v11 = vadd.f32 %v1001_v9, %v665_v8 }
 0x11f   : > { %v674_v14 = vmax.f32 %v673_v11, 0.0 }
 0x121   : > { %v675_v17 = vpack.c.bf16 %v674_v14, %v674_v14 }
 0x123   : > { %1103 = vmatmul.mubr.bf16.vlgmr.msra.gmra.mrb[0].mxu0 %v675_v17 }
 0x1f6   : > { %v781_v21 = vpop.f32.mrb[0].mxu0 }
 0x1f7   : > { %v782_v22 = vadd.f32 %v1002_v20, %v781_v21  ;;  %v1104_v23 = vpop.f32.mrb[1].mxu0 }
 0x1f8   : > { %v784_v24 = vpop.f32.mrb[2].mxu0 }
 0x1f9   : > { %v787_v25 = vmax.f32 %v782_v22, 0.0  ;;  %v1105_v26 = vpop.f32.mrb[3].mxu0 }
 0x1fb   : > { %v788_v27 = vpack.c.bf16 %v787_v25, %v787_v25 }
 0x1fd   : > { %1123 = vmatmul.mubr.bf16.vlgmr.msra.gmra.mrb[0].mxu1 %v788_v27 }
 0x2d0   : > { %v894_v29 = vpop.f32.mrb[0].mxu1 }
 0x2d1   : > { %v895_v30 = vadd.f32 %v1011_v28, %v894_v29  ;;  %v1124_v31 = vpop.f32.mrb[1].mxu1 }
 0x2d2   : > { %v897_v32 = vpop.f32.mrb[2].mxu1 }
 0x2d3   : > { %900 = vst [vmem:[#allocation3] sm:$0x3] %v895_v30  ;;  %v1125_v33 = vpop.f32.mrb[3].mxu1 }
 0x2d4 PF: > { %p1130_p7 = scmp.eq.s32.totalorder %s1283_s25, 3  ;;  %s1236_s9 = smov [#allocation3]  }
 0x2d5   : > { %s908_s10 = sshll.u32 %s1236_s9, 4  ;;  %s909_s10 = int_to_ptr.vmem [resolvable:$true] %s908_s10 }
 0x2d6   : > { %s1194_s11 = scalar_lea.vmem %s909_s10, 32  ;;  %p1201_p11 = scmp.lt.s32.totalorder %s909_s10, %s909_s10 }
 0x2d7   : > { %p1195_p8 = scmp.ne.s32.totalorder %s909_s10, %s1194_s11  ;;  %p1202_p12 = scmp.lt.s32.totalorder %s1194_s11, %s1194_s11 }
 0x2d9   : > { %p1196_p9 = pnand %p1195_p8, %p1130_p7  ;;  %p1203_p13 = por %p1202_p12, %p1201_p11 }
 0x2db   : > { %p1197_p10 = pneg %p1196_p9 }
 0x2dd   : > { %p1204_p0 = pnand %p1203_p13, %p1197_p10 }
 0x2df   : > { %1207 = shalt.err (!%p1204_p0)
}
 0x2e0   : > { %s1208_s14 = scalar_lea.hbm %s1424_s7, 32 }
 0x2e1   : > { %p1209_p1 = scmp.ne.s32.totalorder %s1424_s7, %s1208_s14  ;;  %p1214_p4 = scmp.lt.u32.totalorder %s1208_s14, %s1424_s7 }
 0x2e3   : > { %p1210_p2 = pnand %p1209_p1, %p1130_p7 }
 0x2e5   : > { %p1211_p3 = pneg %p1210_p2 }
 0x2e7   : > { %p1216_p5 = pnand %p1214_p4, %p1211_p3 }
 0x2e9   : > { %1219 = shalt.err (!%p1216_p5)
}
 0x2ea   : > { %1127 = dma.vmem_to_hbm [thread:$0]  (%p1130_p7), %s909_s10, 32, %s1424_s7, [#allocation4]  }
 0x2eb   : > { %1225 = dma.done.wait (%p1130_p7), [#allocation4], 32  }
 0x2ec   : > { %1227 = vsyncadd (%p1130_p7), [#allocation4], 4294967264 }
 0x2ed PF: > { %s18_s24 = sadd.s32 1, %s1230_s24  }
 0x2ee   : > { %p15_p6 = scmp.ge.s32.totalorder %s18_s24, 6  }
 0x2f0   :  { %17 = sbr.rel (!%p15_p6) target bundleno = 1 (0x1), region = 86 }
 0x2f7   :  { %921 = vsyncpa [#allocation4], 1 }
 0x2f8   :  { %923 = vsyncpa [#allocation4 + $0x1], 1 }

</bundles_post_ra>
